<compile_context>
chip_gen: v7x
topology: tpu7x:2x2x1
jax: 0.10.0
libtpu: 0.0.40
codegen_flags: <defaults>
</compile_context>

<pallas_src>
import jax
import jax.numpy as jnp
from jax import lax
from jax.experimental import pallas as pl
from jax.experimental.pallas import tpu as pltpu


def _round_up(v, m):
    return (v + m - 1) // m * m


def residual_block_kernel(x_ref, s1_ref, b1_ref, w1_ref, s2_ref, b2_ref, w2_ref,
                          o_ref, pad_ref, col_ref, y_ref):
    # x_ref block: (NB, H, W, C) with C == CO, already padded to a lane multiple.
    NB, H, W, C = x_ref.shape
    M = NB * H * W

    # ---- zero only the 1-element halo border (interior is overwritten below) ----
    zrow = jnp.zeros((NB, 1, W + 2, C), dtype=pad_ref.dtype)
    zcol = jnp.zeros((NB, H + 2, 1, C), dtype=pad_ref.dtype)
    pad_ref[:, 0:1, :, :] = zrow
    pad_ref[:, H + 1:H + 2, :, :] = zrow
    pad_ref[:, :, 0:1, :] = zcol
    pad_ref[:, :, W + 1:W + 2, :] = zcol

    # ---- BN1 (folded affine) + ReLU (f32), cast bf16, write padded interior ----
    pad_ref[:, 1:H + 1, 1:W + 1, :] = jnp.maximum(
        x_ref[...] * s1_ref[...] + b1_ref[...], 0.0).astype(pad_ref.dtype)

    # ---- conv1: im2col slab + single MXU matmul (M, 9C) x (9C, C), f32 acc ----
    for t in range(9):
        dh, dw = divmod(t, 3)
        col_ref[:, t * C:(t + 1) * C] = (
            pad_ref[:, dh:dh + H, dw:dw + W, :].reshape(M, C))
    y_ref[...] = jnp.dot(col_ref[...], w1_ref[...],
                         preferred_element_type=jnp.float32)

    # ---- BN2 (folded affine) + ReLU (f32), cast bf16, re-pad interior ----
    pad_ref[:, 1:H + 1, 1:W + 1, :] = jnp.maximum(
        y_ref[...] * s2_ref[...] + b2_ref[...], 0.0
    ).reshape(NB, H, W, C).astype(pad_ref.dtype)

    # ---- conv2: im2col slab + single MXU matmul ----
    for t in range(9):
        dh, dw = divmod(t, 3)
        col_ref[:, t * C:(t + 1) * C] = (
            pad_ref[:, dh:dh + H, dw:dw + W, :].reshape(M, C))
    y_ref[...] = jnp.dot(col_ref[...], w2_ref[...],
                         preferred_element_type=jnp.float32)

    # ---- residual add (f32), lane-dense store ----
    o_ref[...] = y_ref[...].reshape(NB, H, W, C) + x_ref[...]


def residual_block(x, s1, b1, w1, s2, b2, w2, *, batch_block=None,
                   vmem_limit_bytes=48 * 1024 * 1024):
    """x: (N, H, W, C) NHWC f32. w1: (3,3,C,CO) HWIO, w2: (3,3,CO,CO).
    s1/b1: (C,), s2/b2: (CO,) folded (eval-mode) BatchNorm scale/shift."""
    N, H, W, C = x.shape
    KH, KW, Cin, CO = w1.shape
    assert (KH, KW) == (3, 3) and Cin == C
    assert w2.shape == (3, 3, CO, CO)
    # downsample=None in the PyTorch module => residual is x itself.
    assert C == CO, "ResidualBlock with downsample=None requires in_channels == out_channels"

    Cp = _round_up(C, 128)  # lane-dense channel padding
    pad_c = Cp - C

    # Skip the HBM pad/slice copies when channels are already lane-aligned.
    xp = jnp.pad(x, ((0, 0), (0, 0), (0, 0), (0, pad_c))) if pad_c else x

    def _pad1(v):
        return (jnp.pad(v, (0, pad_c)) if pad_c else v).reshape(1, Cp)

    s1p, b1p, s2p, b2p = _pad1(s1), _pad1(b1), _pad1(s2), _pad1(b2)

    # Weights: zero-pad channels, fold the 9 taps into the contraction dim, bf16.
    if pad_c:
        w1q = jnp.pad(w1, ((0, 0), (0, 0), (0, pad_c), (0, pad_c)))
        w2q = jnp.pad(w2, ((0, 0), (0, 0), (0, pad_c), (0, pad_c)))
    else:
        w1q, w2q = w1, w2
    w1p = w1q.reshape(9 * Cp, Cp).astype(jnp.bfloat16)
    w2p = w2q.reshape(9 * Cp, Cp).astype(jnp.bfloat16)

    if batch_block is None:
        # Per-image VMEM footprint: double-buffered x/out blocks + scratches.
        per_img = (H * W * Cp * 4 * 2 * 2          # x + out blocks, f32, 2 buffers
                   + (H + 2) * (W + 2) * Cp * 2    # halo scratch (bf16)
                   + H * W * 9 * Cp * 2            # im2col slab (bf16)
                   + H * W * Cp * 4)               # f32 matmul staging
        batch_block = max(1, min(N, (vmem_limit_bytes // 2) // max(per_img, 1)))
        # Give megacore (v7x: 2 TensorCores) at least 2 grid steps to shard.
        if N >= 2:
            batch_block = min(batch_block, max(1, N // 2))
        while N % batch_block:
            batch_block -= 1
    NB = batch_block
    assert N % NB == 0

    out = pl.pallas_call(
        residual_block_kernel,
        out_shape=jax.ShapeDtypeStruct((N, H, W, Cp), jnp.float32),
        grid_spec=pltpu.PrefetchScalarGridSpec(
            num_scalar_prefetch=0,
            grid=(N // NB,),
            in_specs=[
                pl.BlockSpec((NB, H, W, Cp), lambda n: (n, 0, 0, 0)),
                pl.BlockSpec((1, Cp), lambda n: (0, 0)),
                pl.BlockSpec((1, Cp), lambda n: (0, 0)),
                pl.BlockSpec((9 * Cp, Cp), lambda n: (0, 0)),
                pl.BlockSpec((1, Cp), lambda n: (0, 0)),
                pl.BlockSpec((1, Cp), lambda n: (0, 0)),
                pl.BlockSpec((9 * Cp, Cp), lambda n: (0, 0)),
            ],
            out_specs=pl.BlockSpec((NB, H, W, Cp), lambda n: (n, 0, 0, 0)),
            scratch_shapes=[
                pltpu.VMEM((NB, H + 2, W + 2, Cp), jnp.bfloat16),  # padded activation
                pltpu.VMEM((NB * H * W, 9 * Cp), jnp.bfloat16),    # im2col slab
                pltpu.VMEM((NB * H * W, Cp), jnp.float32),         # conv output staging
            ],
        ),
        compiler_params=pltpu.CompilerParams(
            dimension_semantics=("parallel",),
            vmem_limit_bytes=vmem_limit_bytes,
        ),
    )(xp, s1p, b1p, w1p, s2p, b2p, w2p)
    return out[..., :CO] if pad_c else out


def fold_bn(gamma, beta, mean, var, eps=1e-5):
    scale = gamma * lax.rsqrt(var + eps)
    shift = beta - mean * scale
    return scale, shift  # (C,) each


def reference_forward(x, s1, b1, w1, s2, b2, w2):
    """Pure-JAX reference with the same bf16 matmul quantization as the kernel."""
    dn = ('NHWC', 'HWIO', 'NHWC')
    h = jnp.maximum(x * s1 + b1, 0.0).astype(jnp.bfloat16)
    y = lax.conv_general_dilated(h, w1.astype(jnp.bfloat16), (1, 1), 'SAME',
                                 dimension_numbers=dn,
                                 preferred_element_type=jnp.float32)
    h = jnp.maximum(y * s2 + b2, 0.0).astype(jnp.bfloat16)
    y = lax.conv_general_dilated(h, w2.astype(jnp.bfloat16), (1, 1), 'SAME',
                                 dimension_numbers=dn,
                                 preferred_element_type=jnp.float32)
    return y + x


if __name__ == "__main__":
    # small shapes consistent with the module: in_channels == out_channels
    # (downsample=None), stride=1
    N, H, W, C = 2, 16, 16, 8
    CO = C

    key = jax.random.PRNGKey(0)
    keys = jax.random.split(key, 11)

    x = jax.random.normal(keys[0], (N, H, W, C), dtype=jnp.float32)

    # deterministic BN1 / BN2 parameters and running stats
    g1 = 1.0 + 0.1 * jax.random.normal(keys[1], (C,), dtype=jnp.float32)
    be1 = 0.1 * jax.random.normal(keys[2], (C,), dtype=jnp.float32)
    m1 = 0.1 * jax.random.normal(keys[3], (C,), dtype=jnp.float32)
    v1 = jax.random.uniform(keys[4], (C,), minval=0.5, maxval=1.5, dtype=jnp.float32)

    g2 = 1.0 + 0.1 * jax.random.normal(keys[5], (CO,), dtype=jnp.float32)
    be2 = 0.1 * jax.random.normal(keys[6], (CO,), dtype=jnp.float32)
    m2 = 0.1 * jax.random.normal(keys[7], (CO,), dtype=jnp.float32)
    v2 = jax.random.uniform(keys[8], (CO,), minval=0.5, maxval=1.5, dtype=jnp.float32)

    # conv weights, HWIO layout (3, 3, Cin, Cout), bias=False
    w1 = 0.1 * jax.random.normal(keys[9], (3, 3, C, CO), dtype=jnp.float32)
    w2 = 0.1 * jax.random.normal(keys[10], (3, 3, CO, CO), dtype=jnp.float32)

    s1, b1 = fold_bn(g1, be1, m1, v1)
    s2, b2 = fold_bn(g2, be2, m2, v2)

    out = residual_block(x, s1, b1, w1, s2, b2, w2)
    out = jax.block_until_ready(out)

    ref = reference_forward(x, s1, b1, w1, s2, b2, w2)
    assert out.shape == (N, H, W, CO)
    assert jnp.allclose(out, ref, atol=2e-2, rtol=2e-2), \
        f"max abs err = {jnp.max(jnp.abs(out - ref))}"

    print("KERNEL_OK")
</pallas_src>

<mosaic_0001>
module attributes {stable_mosaic.version = 11 : i64} {
  func.func @residual_block_kernel(%arg0: i32, %arg1: memref<1x16x16x128xf32, #tpu.memory_space<vmem>>, %arg2: memref<1x128xf32, #tpu.memory_space<vmem>>, %arg3: memref<1x128xf32, #tpu.memory_space<vmem>>, %arg4: memref<1152x128xbf16, #tpu.memory_space<vmem>>, %arg5: memref<1x128xf32, #tpu.memory_space<vmem>>, %arg6: memref<1x128xf32, #tpu.memory_space<vmem>>, %arg7: memref<1152x128xbf16, #tpu.memory_space<vmem>>, %arg8: memref<1x16x16x128xf32, #tpu.memory_space<vmem>>, %arg9: memref<1x18x18x128xbf16, #tpu.memory_space<vmem>>, %arg10: memref<256x1152xbf16, #tpu.memory_space<vmem>>, %arg11: memref<256x128xf32, #tpu.memory_space<vmem>>) attributes {dimension_semantics = [#tpu.dimension_semantics<parallel>], iteration_bounds = array<i64: 2>, scalar_prefetch = 0 : i64, scratch_operands = 3 : i64, tpu.core_type = #tpu.core_type<tc>, window_params = [{transform_indices = @transform_0, window_bounds = array<i64: 1, 16, 16, 128>}, {pipeline_mode = #tpu.pipeline_mode<synchronous>, transform_indices = @transform_1, window_bounds = array<i64: 1, 128>}, {pipeline_mode = #tpu.pipeline_mode<synchronous>, transform_indices = @transform_2, window_bounds = array<i64: 1, 128>}, {pipeline_mode = #tpu.pipeline_mode<synchronous>, transform_indices = @transform_3, window_bounds = array<i64: 1152, 128>}, {pipeline_mode = #tpu.pipeline_mode<synchronous>, transform_indices = @transform_4, window_bounds = array<i64: 1, 128>}, {pipeline_mode = #tpu.pipeline_mode<synchronous>, transform_indices = @transform_5, window_bounds = array<i64: 1, 128>}, {pipeline_mode = #tpu.pipeline_mode<synchronous>, transform_indices = @transform_6, window_bounds = array<i64: 1152, 128>}, {transform_indices = @transform_7, window_bounds = array<i64: 1, 16, 16, 128>}]} {
    %cst = arith.constant 0.000000e+00 : bf16
    %0 = vector.broadcast %cst : bf16 to vector<1x1x18x128xbf16>
    %cst_0 = arith.constant 0.000000e+00 : bf16
    %1 = vector.broadcast %cst_0 : bf16 to vector<1x18x1x128xbf16>
    %c0 = arith.constant 0 : index
    %c0_1 = arith.constant 0 : index
    %c0_2 = arith.constant 0 : index
    %c0_3 = arith.constant 0 : index
    %2 = vector.load %arg9[%c0, %c0_1, %c0_2, %c0_3] : memref<1x18x18x128xbf16, #tpu.memory_space<vmem>>, vector<1x1x18x128xbf16>
    tpu.vector_store %arg9[%c0, %c0_1, %c0_2, %c0_3], %0 {strides = array<i32>} : memref<1x18x18x128xbf16, #tpu.memory_space<vmem>>, vector<1x1x18x128xbf16>,
    %c0_4 = arith.constant 0 : index
    %c17 = arith.constant 17 : index
    %c0_5 = arith.constant 0 : index
    %c0_6 = arith.constant 0 : index
    %3 = vector.load %arg9[%c0_4, %c17, %c0_5, %c0_6] : memref<1x18x18x128xbf16, #tpu.memory_space<vmem>>, vector<1x1x18x128xbf16>
    tpu.vector_store %arg9[%c0_4, %c17, %c0_5, %c0_6], %0 {strides = array<i32>} : memref<1x18x18x128xbf16, #tpu.memory_space<vmem>>, vector<1x1x18x128xbf16>,
    %c0_7 = arith.constant 0 : index
    %c0_8 = arith.constant 0 : index
    %c0_9 = arith.constant 0 : index
    %c0_10 = arith.constant 0 : index
    %4 = vector.load %arg9[%c0_7, %c0_8, %c0_9, %c0_10] : memref<1x18x18x128xbf16, #tpu.memory_space<vmem>>, vector<1x18x1x128xbf16>
    tpu.vector_store %arg9[%c0_7, %c0_8, %c0_9, %c0_10], %1 {strides = array<i32>} : memref<1x18x18x128xbf16, #tpu.memory_space<vmem>>, vector<1x18x1x128xbf16>,
    %c0_11 = arith.constant 0 : index
    %c0_12 = arith.constant 0 : index
    %c17_13 = arith.constant 17 : index
    %c0_14 = arith.constant 0 : index
    %5 = vector.load %arg9[%c0_11, %c0_12, %c17_13, %c0_14] : memref<1x18x18x128xbf16, #tpu.memory_space<vmem>>, vector<1x18x1x128xbf16>
    tpu.vector_store %arg9[%c0_11, %c0_12, %c17_13, %c0_14], %1 {strides = array<i32>} : memref<1x18x18x128xbf16, #tpu.memory_space<vmem>>, vector<1x18x1x128xbf16>,
    %c0_15 = arith.constant 0 : index
    %c0_16 = arith.constant 0 : index
    %c0_17 = arith.constant 0 : index
    %c0_18 = arith.constant 0 : index
    %6 = vector.load %arg1[%c0_15, %c0_16, %c0_17, %c0_18] : memref<1x16x16x128xf32, #tpu.memory_space<vmem>>, vector<1x16x16x128xf32>
    %c0_19 = arith.constant 0 : index
    %c0_20 = arith.constant 0 : index
    %7 = vector.load %arg2[%c0_19, %c0_20] : memref<1x128xf32, #tpu.memory_space<vmem>>, vector<1x128xf32>
    %8 = vector.shape_cast %7 : vector<1x128xf32> to vector<1x1x1x128xf32>
    %9 = vector.broadcast %8 : vector<1x1x1x128xf32> to vector<1x16x16x128xf32>
    %10 = arith.mulf %6, %9 : vector<1x16x16x128xf32>
    %c0_21 = arith.constant 0 : index
    %c0_22 = arith.constant 0 : index
    %11 = vector.load %arg3[%c0_21, %c0_22] : memref<1x128xf32, #tpu.memory_space<vmem>>, vector<1x128xf32>
    %12 = vector.shape_cast %11 : vector<1x128xf32> to vector<1x1x1x128xf32>
    %13 = vector.broadcast %12 : vector<1x1x1x128xf32> to vector<1x16x16x128xf32>
    %14 = arith.addf %10, %13 : vector<1x16x16x128xf32>
    %cst_23 = arith.constant 0.000000e+00 : f32
    %15 = vector.broadcast %cst_23 : f32 to vector<1x16x16x128xf32>
    %16 = arith.maximumf %14, %15 : vector<1x16x16x128xf32>
    %17 = arith.truncf %16 : vector<1x16x16x128xf32> to vector<1x16x16x128xbf16>
    %c0_24 = arith.constant 0 : index
    %c1 = arith.constant 1 : index
    %c1_25 = arith.constant 1 : index
    %c0_26 = arith.constant 0 : index
    %18 = vector.load %arg9[%c0_24, %c1, %c1_25, %c0_26] : memref<1x18x18x128xbf16, #tpu.memory_space<vmem>>, vector<1x16x16x128xbf16>
    tpu.vector_store %arg9[%c0_24, %c1, %c1_25, %c0_26], %17 {strides = array<i32>} : memref<1x18x18x128xbf16, #tpu.memory_space<vmem>>, vector<1x16x16x128xbf16>,
    %c0_27 = arith.constant 0 : index
    %c0_28 = arith.constant 0 : index
    %c0_29 = arith.constant 0 : index
    %c0_30 = arith.constant 0 : index
    %19 = vector.load %arg9[%c0_27, %c0_28, %c0_29, %c0_30] : memref<1x18x18x128xbf16, #tpu.memory_space<vmem>>, vector<1x16x16x128xbf16>
    %20 = vector.shape_cast %19 : vector<1x16x16x128xbf16> to vector<256x128xbf16>
    %c0_31 = arith.constant 0 : index
    %c0_32 = arith.constant 0 : index
    %21 = vector.load %arg10[%c0_31, %c0_32] : memref<256x1152xbf16, #tpu.memory_space<vmem>>, vector<256x128xbf16>
    tpu.vector_store %arg10[%c0_31, %c0_32], %20 {strides = array<i32>} : memref<256x1152xbf16, #tpu.memory_space<vmem>>, vector<256x128xbf16>,
    %c0_33 = arith.constant 0 : index
    %c0_34 = arith.constant 0 : index
    %c1_35 = arith.constant 1 : index
    %c0_36 = arith.constant 0 : index
    %22 = vector.load %arg9[%c0_33, %c0_34, %c1_35, %c0_36] : memref<1x18x18x128xbf16, #tpu.memory_space<vmem>>, vector<1x16x16x128xbf16>
    %23 = vector.shape_cast %22 : vector<1x16x16x128xbf16> to vector<256x128xbf16>
    %c0_37 = arith.constant 0 : index
    %c128 = arith.constant 128 : index
    %24 = vector.load %arg10[%c0_37, %c128] : memref<256x1152xbf16, #tpu.memory_space<vmem>>, vector<256x128xbf16>
    tpu.vector_store %arg10[%c0_37, %c128], %23 {strides = array<i32>} : memref<256x1152xbf16, #tpu.memory_space<vmem>>, vector<256x128xbf16>,
    %c0_38 = arith.constant 0 : index
    %c0_39 = arith.constant 0 : index
    %c2 = arith.constant 2 : index
    %c0_40 = arith.constant 0 : index
    %25 = vector.load %arg9[%c0_38, %c0_39, %c2, %c0_40] : memref<1x18x18x128xbf16, #tpu.memory_space<vmem>>, vector<1x16x16x128xbf16>
    %26 = vector.shape_cast %25 : vector<1x16x16x128xbf16> to vector<256x128xbf16>
    %c0_41 = arith.constant 0 : index
    %c256 = arith.constant 256 : index
    %27 = vector.load %arg10[%c0_41, %c256] : memref<256x1152xbf16, #tpu.memory_space<vmem>>, vector<256x128xbf16>
    tpu.vector_store %arg10[%c0_41, %c256], %26 {strides = array<i32>} : memref<256x1152xbf16, #tpu.memory_space<vmem>>, vector<256x128xbf16>,
    %c0_42 = arith.constant 0 : index
    %c1_43 = arith.constant 1 : index
    %c0_44 = arith.constant 0 : index
    %c0_45 = arith.constant 0 : index
    %28 = vector.load %arg9[%c0_42, %c1_43, %c0_44, %c0_45] : memref<1x18x18x128xbf16, #tpu.memory_space<vmem>>, vector<1x16x16x128xbf16>
    %29 = vector.shape_cast %28 : vector<1x16x16x128xbf16> to vector<256x128xbf16>
    %c0_46 = arith.constant 0 : index
    %c384 = arith.constant 384 : index
    %30 = vector.load %arg10[%c0_46, %c384] : memref<256x1152xbf16, #tpu.memory_space<vmem>>, vector<256x128xbf16>
    tpu.vector_store %arg10[%c0_46, %c384], %29 {strides = array<i32>} : memref<256x1152xbf16, #tpu.memory_space<vmem>>, vector<256x128xbf16>,
    %c0_47 = arith.constant 0 : index
    %c1_48 = arith.constant 1 : index
    %c1_49 = arith.constant 1 : index
    %c0_50 = arith.constant 0 : index
    %31 = vector.load %arg9[%c0_47, %c1_48, %c1_49, %c0_50] : memref<1x18x18x128xbf16, #tpu.memory_space<vmem>>, vector<1x16x16x128xbf16>
    %32 = vector.shape_cast %31 : vector<1x16x16x128xbf16> to vector<256x128xbf16>
    %c0_51 = arith.constant 0 : index
    %c512 = arith.constant 512 : index
    %33 = vector.load %arg10[%c0_51, %c512] : memref<256x1152xbf16, #tpu.memory_space<vmem>>, vector<256x128xbf16>
    tpu.vector_store %arg10[%c0_51, %c512], %32 {strides = array<i32>} : memref<256x1152xbf16, #tpu.memory_space<vmem>>, vector<256x128xbf16>,
    %c0_52 = arith.constant 0 : index
    %c1_53 = arith.constant 1 : index
    %c2_54 = arith.constant 2 : index
    %c0_55 = arith.constant 0 : index
    %34 = vector.load %arg9[%c0_52, %c1_53, %c2_54, %c0_55] : memref<1x18x18x128xbf16, #tpu.memory_space<vmem>>, vector<1x16x16x128xbf16>
    %35 = vector.shape_cast %34 : vector<1x16x16x128xbf16> to vector<256x128xbf16>
    %c0_56 = arith.constant 0 : index
    %c640 = arith.constant 640 : index
    %36 = vector.load %arg10[%c0_56, %c640] : memref<256x1152xbf16, #tpu.memory_space<vmem>>, vector<256x128xbf16>
    tpu.vector_store %arg10[%c0_56, %c640], %35 {strides = array<i32>} : memref<256x1152xbf16, #tpu.memory_space<vmem>>, vector<256x128xbf16>,
    %c0_57 = arith.constant 0 : index
    %c2_58 = arith.constant 2 : index
    %c0_59 = arith.constant 0 : index
    %c0_60 = arith.constant 0 : index
    %37 = vector.load %arg9[%c0_57, %c2_58, %c0_59, %c0_60] : memref<1x18x18x128xbf16, #tpu.memory_space<vmem>>, vector<1x16x16x128xbf16>
    %38 = vector.shape_cast %37 : vector<1x16x16x128xbf16> to vector<256x128xbf16>
    %c0_61 = arith.constant 0 : index
    %c768 = arith.constant 768 : index
    %39 = vector.load %arg10[%c0_61, %c768] : memref<256x1152xbf16, #tpu.memory_space<vmem>>, vector<256x128xbf16>
    tpu.vector_store %arg10[%c0_61, %c768], %38 {strides = array<i32>} : memref<256x1152xbf16, #tpu.memory_space<vmem>>, vector<256x128xbf16>,
    %c0_62 = arith.constant 0 : index
    %c2_63 = arith.constant 2 : index
    %c1_64 = arith.constant 1 : index
    %c0_65 = arith.constant 0 : index
    %40 = vector.load %arg9[%c0_62, %c2_63, %c1_64, %c0_65] : memref<1x18x18x128xbf16, #tpu.memory_space<vmem>>, vector<1x16x16x128xbf16>
    %41 = vector.shape_cast %40 : vector<1x16x16x128xbf16> to vector<256x128xbf16>
    %c0_66 = arith.constant 0 : index
    %c896 = arith.constant 896 : index
    %42 = vector.load %arg10[%c0_66, %c896] : memref<256x1152xbf16, #tpu.memory_space<vmem>>, vector<256x128xbf16>
    tpu.vector_store %arg10[%c0_66, %c896], %41 {strides = array<i32>} : memref<256x1152xbf16, #tpu.memory_space<vmem>>, vector<256x128xbf16>,
    %c0_67 = arith.constant 0 : index
    %c2_68 = arith.constant 2 : index
    %c2_69 = arith.constant 2 : index
    %c0_70 = arith.constant 0 : index
    %43 = vector.load %arg9[%c0_67, %c2_68, %c2_69, %c0_70] : memref<1x18x18x128xbf16, #tpu.memory_space<vmem>>, vector<1x16x16x128xbf16>
    %44 = vector.shape_cast %43 : vector<1x16x16x128xbf16> to vector<256x128xbf16>
    %c0_71 = arith.constant 0 : index
    %c1024 = arith.constant 1024 : index
    %45 = vector.load %arg10[%c0_71, %c1024] : memref<256x1152xbf16, #tpu.memory_space<vmem>>, vector<256x128xbf16>
    tpu.vector_store %arg10[%c0_71, %c1024], %44 {strides = array<i32>} : memref<256x1152xbf16, #tpu.memory_space<vmem>>, vector<256x128xbf16>,
    %c0_72 = arith.constant 0 : index
    %c0_73 = arith.constant 0 : index
    %46 = vector.load %arg10[%c0_72, %c0_73] : memref<256x1152xbf16, #tpu.memory_space<vmem>>, vector<256x1152xbf16>
    %c0_74 = arith.constant 0 : index
    %c0_75 = arith.constant 0 : index
    %47 = vector.load %arg4[%c0_74, %c0_75] : memref<1152x128xbf16, #tpu.memory_space<vmem>>, vector<1152x128xbf16>
    %cst_76 = arith.constant dense<0.000000e+00> : vector<256x128xf32>
    %48 = tpu.matmul %46, %47, %cst_76 {dimension_numbers = #tpu.dot_dimension_numbers<[1], [0], [0], [1], [0, 0, 1, 1], [], []>} : vector<256x1152xbf16>, vector<1152x128xbf16>, vector<256x128xf32> -> vector<256x128xf32>
    %c0_77 = arith.constant 0 : index
    %c0_78 = arith.constant 0 : index
    %49 = vector.load %arg11[%c0_77, %c0_78] : memref<256x128xf32, #tpu.memory_space<vmem>>, vector<256x128xf32>
    tpu.vector_store %arg11[%c0_77, %c0_78], %48 {strides = array<i32>} : memref<256x128xf32, #tpu.memory_space<vmem>>, vector<256x128xf32>,
    %c0_79 = arith.constant 0 : index
    %c0_80 = arith.constant 0 : index
    %50 = vector.load %arg11[%c0_79, %c0_80] : memref<256x128xf32, #tpu.memory_space<vmem>>, vector<256x128xf32>
    %c0_81 = arith.constant 0 : index
    %c0_82 = arith.constant 0 : index
    %51 = vector.load %arg5[%c0_81, %c0_82] : memref<1x128xf32, #tpu.memory_space<vmem>>, vector<1x128xf32>
    %52 = vector.broadcast %51 : vector<1x128xf32> to vector<256x128xf32>
    %53 = arith.mulf %50, %52 : vector<256x128xf32>
    %c0_83 = arith.constant 0 : index
    %c0_84 = arith.constant 0 : index
    %54 = vector.load %arg6[%c0_83, %c0_84] : memref<1x128xf32, #tpu.memory_space<vmem>>, vector<1x128xf32>
    %55 = vector.broadcast %54 : vector<1x128xf32> to vector<256x128xf32>
    %56 = arith.addf %53, %55 : vector<256x128xf32>
    %cst_85 = arith.constant 0.000000e+00 : f32
    %57 = vector.broadcast %cst_85 : f32 to vector<256x128xf32>
    %58 = arith.maximumf %56, %57 : vector<256x128xf32>
    %59 = vector.shape_cast %58 : vector<256x128xf32> to vector<1x16x16x128xf32>
    %60 = arith.truncf %59 : vector<1x16x16x128xf32> to vector<1x16x16x128xbf16>
    %c0_86 = arith.constant 0 : index
    %c1_87 = arith.constant 1 : index
    %c1_88 = arith.constant 1 : index
    %c0_89 = arith.constant 0 : index
    %61 = vector.load %arg9[%c0_86, %c1_87, %c1_88, %c0_89] : memref<1x18x18x128xbf16, #tpu.memory_space<vmem>>, vector<1x16x16x128xbf16>
    tpu.vector_store %arg9[%c0_86, %c1_87, %c1_88, %c0_89], %60 {strides = array<i32>} : memref<1x18x18x128xbf16, #tpu.memory_space<vmem>>, vector<1x16x16x128xbf16>,
    %c0_90 = arith.constant 0 : index
    %c0_91 = arith.constant 0 : index
    %c0_92 = arith.constant 0 : index
    %c0_93 = arith.constant 0 : index
    %62 = vector.load %arg9[%c0_90, %c0_91, %c0_92, %c0_93] : memref<1x18x18x128xbf16, #tpu.memory_space<vmem>>, vector<1x16x16x128xbf16>
    %63 = vector.shape_cast %62 : vector<1x16x16x128xbf16> to vector<256x128xbf16>
    %c0_94 = arith.constant 0 : index
    %c0_95 = arith.constant 0 : index
    %64 = vector.load %arg10[%c0_94, %c0_95] : memref<256x1152xbf16, #tpu.memory_space<vmem>>, vector<256x128xbf16>
    tpu.vector_store %arg10[%c0_94, %c0_95], %63 {strides = array<i32>} : memref<256x1152xbf16, #tpu.memory_space<vmem>>, vector<256x128xbf16>,
    %c0_96 = arith.constant 0 : index
    %c0_97 = arith.constant 0 : index
    %c1_98 = arith.constant 1 : index
    %c0_99 = arith.constant 0 : index
    %65 = vector.load %arg9[%c0_96, %c0_97, %c1_98, %c0_99] : memref<1x18x18x128xbf16, #tpu.memory_space<vmem>>, vector<1x16x16x128xbf16>
    %66 = vector.shape_cast %65 : vector<1x16x16x128xbf16> to vector<256x128xbf16>
    %c0_100 = arith.constant 0 : index
    %c128_101 = arith.constant 128 : index
    %67 = vector.load %arg10[%c0_100, %c128_101] : memref<256x1152xbf16, #tpu.memory_space<vmem>>, vector<256x128xbf16>
    tpu.vector_store %arg10[%c0_100, %c128_101], %66 {strides = array<i32>} : memref<256x1152xbf16, #tpu.memory_space<vmem>>, vector<256x128xbf16>,
    %c0_102 = arith.constant 0 : index
    %c0_103 = arith.constant 0 : index
    %c2_104 = arith.constant 2 : index
    %c0_105 = arith.constant 0 : index
    %68 = vector.load %arg9[%c0_102, %c0_103, %c2_104, %c0_105] : memref<1x18x18x128xbf16, #tpu.memory_space<vmem>>, vector<1x16x16x128xbf16>
    %69 = vector.shape_cast %68 : vector<1x16x16x128xbf16> to vector<256x128xbf16>
    %c0_106 = arith.constant 0 : index
    %c256_107 = arith.constant 256 : index
    %70 = vector.load %arg10[%c0_106, %c256_107] : memref<256x1152xbf16, #tpu.memory_space<vmem>>, vector<256x128xbf16>
    tpu.vector_store %arg10[%c0_106, %c256_107], %69 {strides = array<i32>} : memref<256x1152xbf16, #tpu.memory_space<vmem>>, vector<256x128xbf16>,
    %c0_108 = arith.constant 0 : index
    %c1_109 = arith.constant 1 : index
    %c0_110 = arith.constant 0 : index
    %c0_111 = arith.constant 0 : index
    %71 = vector.load %arg9[%c0_108, %c1_109, %c0_110, %c0_111] : memref<1x18x18x128xbf16, #tpu.memory_space<vmem>>, vector<1x16x16x128xbf16>
    %72 = vector.shape_cast %71 : vector<1x16x16x128xbf16> to vector<256x128xbf16>
    %c0_112 = arith.constant 0 : index
    %c384_113 = arith.constant 384 : index
    %73 = vector.load %arg10[%c0_112, %c384_113] : memref<256x1152xbf16, #tpu.memory_space<vmem>>, vector<256x128xbf16>
    tpu.vector_store %arg10[%c0_112, %c384_113], %72 {strides = array<i32>} : memref<256x1152xbf16, #tpu.memory_space<vmem>>, vector<256x128xbf16>,
    %c0_114 = arith.constant 0 : index
    %c1_115 = arith.constant 1 : index
    %c1_116 = arith.constant 1 : index
    %c0_117 = arith.constant 0 : index
    %74 = vector.load %arg9[%c0_114, %c1_115, %c1_116, %c0_117] : memref<1x18x18x128xbf16, #tpu.memory_space<vmem>>, vector<1x16x16x128xbf16>
    %75 = vector.shape_cast %74 : vector<1x16x16x128xbf16> to vector<256x128xbf16>
    %c0_118 = arith.constant 0 : index
    %c512_119 = arith.constant 512 : index
    %76 = vector.load %arg10[%c0_118, %c512_119] : memref<256x1152xbf16, #tpu.memory_space<vmem>>, vector<256x128xbf16>
    tpu.vector_store %arg10[%c0_118, %c512_119], %75 {strides = array<i32>} : memref<256x1152xbf16, #tpu.memory_space<vmem>>, vector<256x128xbf16>,
    %c0_120 = arith.constant 0 : index
    %c1_121 = arith.constant 1 : index
    %c2_122 = arith.constant 2 : index
    %c0_123 = arith.constant 0 : index
    %77 = vector.load %arg9[%c0_120, %c1_121, %c2_122, %c0_123] : memref<1x18x18x128xbf16, #tpu.memory_space<vmem>>, vector<1x16x16x128xbf16>
    %78 = vector.shape_cast %77 : vector<1x16x16x128xbf16> to vector<256x128xbf16>
    %c0_124 = arith.constant 0 : index
    %c640_125 = arith.constant 640 : index
    %79 = vector.load %arg10[%c0_124, %c640_125] : memref<256x1152xbf16, #tpu.memory_space<vmem>>, vector<256x128xbf16>
    tpu.vector_store %arg10[%c0_124, %c640_125], %78 {strides = array<i32>} : memref<256x1152xbf16, #tpu.memory_space<vmem>>, vector<256x128xbf16>,
    %c0_126 = arith.constant 0 : index
    %c2_127 = arith.constant 2 : index
    %c0_128 = arith.constant 0 : index
    %c0_129 = arith.constant 0 : index
    %80 = vector.load %arg9[%c0_126, %c2_127, %c0_128, %c0_129] : memref<1x18x18x128xbf16, #tpu.memory_space<vmem>>, vector<1x16x16x128xbf16>
    %81 = vector.shape_cast %80 : vector<1x16x16x128xbf16> to vector<256x128xbf16>
    %c0_130 = arith.constant 0 : index
    %c768_131 = arith.constant 768 : index
    %82 = vector.load %arg10[%c0_130, %c768_131] : memref<256x1152xbf16, #tpu.memory_space<vmem>>, vector<256x128xbf16>
    tpu.vector_store %arg10[%c0_130, %c768_131], %81 {strides = array<i32>} : memref<256x1152xbf16, #tpu.memory_space<vmem>>, vector<256x128xbf16>,
    %c0_132 = arith.constant 0 : index
    %c2_133 = arith.constant 2 : index
    %c1_134 = arith.constant 1 : index
    %c0_135 = arith.constant 0 : index
    %83 = vector.load %arg9[%c0_132, %c2_133, %c1_134, %c0_135] : memref<1x18x18x128xbf16, #tpu.memory_space<vmem>>, vector<1x16x16x128xbf16>
    %84 = vector.shape_cast %83 : vector<1x16x16x128xbf16> to vector<256x128xbf16>
    %c0_136 = arith.constant 0 : index
    %c896_137 = arith.constant 896 : index
    %85 = vector.load %arg10[%c0_136, %c896_137] : memref<256x1152xbf16, #tpu.memory_space<vmem>>, vector<256x128xbf16>
    tpu.vector_store %arg10[%c0_136, %c896_137], %84 {strides = array<i32>} : memref<256x1152xbf16, #tpu.memory_space<vmem>>, vector<256x128xbf16>,
    %c0_138 = arith.constant 0 : index
    %c2_139 = arith.constant 2 : index
    %c2_140 = arith.constant 2 : index
    %c0_141 = arith.constant 0 : index
    %86 = vector.load %arg9[%c0_138, %c2_139, %c2_140, %c0_141] : memref<1x18x18x128xbf16, #tpu.memory_space<vmem>>, vector<1x16x16x128xbf16>
    %87 = vector.shape_cast %86 : vector<1x16x16x128xbf16> to vector<256x128xbf16>
    %c0_142 = arith.constant 0 : index
    %c1024_143 = arith.constant 1024 : index
    %88 = vector.load %arg10[%c0_142, %c1024_143] : memref<256x1152xbf16, #tpu.memory_space<vmem>>, vector<256x128xbf16>
    tpu.vector_store %arg10[%c0_142, %c1024_143], %87 {strides = array<i32>} : memref<256x1152xbf16, #tpu.memory_space<vmem>>, vector<256x128xbf16>,
    %c0_144 = arith.constant 0 : index
    %c0_145 = arith.constant 0 : index
    %89 = vector.load %arg10[%c0_144, %c0_145] : memref<256x1152xbf16, #tpu.memory_space<vmem>>, vector<256x1152xbf16>
    %c0_146 = arith.constant 0 : index
    %c0_147 = arith.constant 0 : index
    %90 = vector.load %arg7[%c0_146, %c0_147] : memref<1152x128xbf16, #tpu.memory_space<vmem>>, vector<1152x128xbf16>
    %cst_148 = arith.constant dense<0.000000e+00> : vector<256x128xf32>
    %91 = tpu.matmul %89, %90, %cst_148 {dimension_numbers = #tpu.dot_dimension_numbers<[1], [0], [0], [1], [0, 0, 1, 1], [], []>} : vector<256x1152xbf16>, vector<1152x128xbf16>, vector<256x128xf32> -> vector<256x128xf32>
    %c0_149 = arith.constant 0 : index
    %c0_150 = arith.constant 0 : index
    %92 = vector.load %arg11[%c0_149, %c0_150] : memref<256x128xf32, #tpu.memory_space<vmem>>, vector<256x128xf32>
    tpu.vector_store %arg11[%c0_149, %c0_150], %91 {strides = array<i32>} : memref<256x128xf32, #tpu.memory_space<vmem>>, vector<256x128xf32>,
    %c0_151 = arith.constant 0 : index
    %c0_152 = arith.constant 0 : index
    %93 = vector.load %arg11[%c0_151, %c0_152] : memref<256x128xf32, #tpu.memory_space<vmem>>, vector<256x128xf32>
    %94 = vector.shape_cast %93 : vector<256x128xf32> to vector<1x16x16x128xf32>
    %c0_153 = arith.constant 0 : index
    %c0_154 = arith.constant 0 : index
    %c0_155 = arith.constant 0 : index
    %c0_156 = arith.constant 0 : index
    %95 = vector.load %arg1[%c0_153, %c0_154, %c0_155, %c0_156] : memref<1x16x16x128xf32, #tpu.memory_space<vmem>>, vector<1x16x16x128xf32>
    %96 = arith.addf %94, %95 : vector<1x16x16x128xf32>
    %c0_157 = arith.constant 0 : index
    %c0_158 = arith.constant 0 : index
    %c0_159 = arith.constant 0 : index
    %c0_160 = arith.constant 0 : index
    %97 = vector.load %arg8[%c0_157, %c0_158, %c0_159, %c0_160] : memref<1x16x16x128xf32, #tpu.memory_space<vmem>>, vector<1x16x16x128xf32>
    tpu.vector_store %arg8[%c0_157, %c0_158, %c0_159, %c0_160], %96 {strides = array<i32>} : memref<1x16x16x128xf32, #tpu.memory_space<vmem>>, vector<1x16x16x128xf32>,
    return
  }
  func.func @transform_0(%arg0: i32) -> (i32, i32, i32, i32) {
    %c0_i32 = arith.constant 0 : i32
    %c0_i32_0 = arith.constant 0 : i32
    %c0_i32_1 = arith.constant 0 : i32
    %c0_i32_2 = arith.constant 0 : i32
    return %arg0, %c0_i32, %c0_i32_0, %c0_i32_1 : i32, i32, i32, i32
  }
  func.func @transform_1(%arg0: i32) -> (i32, i32) {
    %c0_i32 = arith.constant 0 : i32
    %c0_i32_0 = arith.constant 0 : i32
    %c0_i32_1 = arith.constant 0 : i32
    return %c0_i32, %c0_i32_0 : i32, i32
  }
  func.func @transform_2(%arg0: i32) -> (i32, i32) {
    %c0_i32 = arith.constant 0 : i32
    %c0_i32_0 = arith.constant 0 : i32
    %c0_i32_1 = arith.constant 0 : i32
    return %c0_i32, %c0_i32_0 : i32, i32
  }
  func.func @transform_3(%arg0: i32) -> (i32, i32) {
    %c0_i32 = arith.constant 0 : i32
    %c0_i32_0 = arith.constant 0 : i32
    %c0_i32_1 = arith.constant 0 : i32
    return %c0_i32, %c0_i32_0 : i32, i32
  }
  func.func @transform_4(%arg0: i32) -> (i32, i32) {
    %c0_i32 = arith.constant 0 : i32
    %c0_i32_0 = arith.constant 0 : i32
    %c0_i32_1 = arith.constant 0 : i32
    return %c0_i32, %c0_i32_0 : i32, i32
  }
  func.func @transform_5(%arg0: i32) -> (i32, i32) {
    %c0_i32 = arith.constant 0 : i32
    %c0_i32_0 = arith.constant 0 : i32
    %c0_i32_1 = arith.constant 0 : i32
    return %c0_i32, %c0_i32_0 : i32, i32
  }
  func.func @transform_6(%arg0: i32) -> (i32, i32) {
    %c0_i32 = arith.constant 0 : i32
    %c0_i32_0 = arith.constant 0 : i32
    %c0_i32_1 = arith.constant 0 : i32
    return %c0_i32, %c0_i32_0 : i32, i32
  }
  func.func @transform_7(%arg0: i32) -> (i32, i32, i32, i32) {
    %c0_i32 = arith.constant 0 : i32
    %c0_i32_0 = arith.constant 0 : i32
    %c0_i32_1 = arith.constant 0 : i32
    %c0_i32_2 = arith.constant 0 : i32
    return %arg0, %c0_i32, %c0_i32_0, %c0_i32_1 : i32, i32, i32, i32
  }
}

</mosaic_0001>

<bundles_post_ra>
// kernel: tpu_custom_call.1
= control target key start
LH: loop header
LB: loop body
LE: loop exit
PB: predicated region body
PF: predicated region fallthrough
CT: control target
= control target key end

     0   :  { %12 = vsyncpa [#allocation6], 0  ;;  %s16188_s0 = inlined_call_operand.hbm [shape: f32[2,16,16,128], index: 0, kind: input, shape index: {}]   ;;  %s16189_s1 = inlined_call_operand.vmem [shape: f32[1,128], index: 1, kind: input, shape index: {}]   ;;  %s16190_s2 = inlined_call_operand.vmem [shape: f32[1,128], index: 2, kind: input, shape index: {}]   ;;  %s16191_s3 = inlined_call_operand.hbm [shape: bf16[1152,128], index: 3, kind: input, shape index: {}]   ;;  %s16192_s4 = inlined_call_operand.vmem [shape: f32[1,128], index: 4, kind: input, shape index: {}]   ;;  %s16193_s5 = inlined_call_operand.vmem [shape: f32[1,128], index: 5, kind: input, shape index: {}]   ;;  %s16194_s6 = inlined_call_operand.hbm [shape: bf16[1152,128], index: 6, kind: input, shape index: {}]   ;;  %s16195_s7 = inlined_call_operand.hbm [shape: f32[2,16,16,128], index: 7, kind: output, shape index: {}]  }
   0x1   :  { %14 = vsyncpa [#allocation6 + $0x1], 0 }
   0x2   :  { %15 = vsyncpa [#allocation9], 0 }
   0x3   :  { %16 = vsyncpa [#allocation7], 0 }
   0x4   :  { %18 = vsyncpa [#allocation7 + $0x1], 0  ;;  %s13061_s24 = smov 0   ;;  %s13063_s25 = smov 0  }
   0x5   :  { %s13065_s26 = smov 0   ;;  %s13067_s27 = smov 0  }
   0x6 LB: > { %s13082_s28 = sadd.s32 4294967295, %s13008_s27   ;;  %s10811_s29 = sadd.s32 4294967294, %s13008_s27   ;;  %s13008_s27 = sphi %s13067_s27, %s16343_s27   ;;  %s13004_s26 = sphi %s13065_s26, %s16342_s26   ;;  %s13000_s25 = sphi %s13063_s25, %s16341_s25   ;;  %s12996_s24 = sphi %s13061_s24, %s16340_s24  }
   0x7   : > { %p44_p0 = scmp.ne.s32.totalorder %s13000_s25, %s12996_s24  ;;  %p16196_p1 = scmp.eq.s32.totalorder %s13082_s28, 0 }
   0x8   : > { %p200_p3 = scmp.eq.s32.totalorder %s10811_s29, 1  ;;  %p10812_p5 = scmp.ge.s32.totalorder %s13008_s27, 1 }
   0x9   : > { %p13091_p4 = por %p16196_p1, %p44_p0  ;;  %p207_p7 = scmp.lt.s32.totalorder %s13008_s27, 3 }
   0xa   : > { %p13096_p6 = por %p200_p3, %p44_p0  ;;  %s13010_s10 = smov [#allocation8]  }
   0xb   : > { %s16210_s30 = scalar_select %p13091_p4, 1, 0 }
   0xc   : > { %s16211_s8 = scalar_select %p13096_p6, 1, 0 }
   0xd   : > { %p13101_p8 = pnand %p10812_p5, %p207_p7  ;;  %s225_s11 = sshll.u32 %s13010_s10, 4  ;;  %s13105_s11 = int_to_ptr.vmem [resolvable:$true] %s225_s11 }
   0xe   : > { %s13011_s13 = smov [#allocation10]   ;;  %s12852_s17 = scalar_lea.hbm %s16191_s3, 9216 }
   0xf   : > { %p12543_p9 = pneg %p13101_p8  ;;  %s244_s14 = sshll.u32 %s13011_s13, 4  ;;  %s13116_s14 = int_to_ptr.vmem [resolvable:$true] %s244_s14 }
  0x10   : > { %p12853_p12 = scmp.ne.s32.totalorder %s16191_s3, %s12852_s17  ;;  %p12859_p5 = scmp.lt.u32.totalorder %s12852_s17, %s16191_s3 }
  0x11   : > { %p13112_p11 = pnand %p12543_p9, %p16196_p1 }
  0x13   : > { %p12854_p13 = pneg %p13112_p11 }
  0x15   : > { %p12855_p0 = pnand %p12854_p13, %p12853_p12 }
  0x17   : > { %p12856_p3 = pneg %p12855_p0 }
  0x19   : > { %p12861_p7 = pnand %p12859_p5, %p12856_p3 }
  0x1b   : > { %12864 = shalt.err (!%p12861_p7)
}
  0x1c   : > { %s12865_s22 = scalar_lea.vmem %s13105_s11, 9216  ;;  %p12873_p2 = scmp.lt.s32.totalorder %s13105_s11, %s13105_s11 }
  0x1d   : > { %p12866_p9 = scmp.ne.s32.totalorder %s13105_s11, %s12865_s22  ;;  %p12874_p12 = scmp.lt.s32.totalorder %s12865_s22, %s12865_s22 }
  0x1f   : > { %p12868_p10 = pnand %p12866_p9, %p12854_p13  ;;  %p12875_p0 = por %p12874_p12, %p12873_p2 }
  0x21   : > { %p12869_p1 = pneg %p12868_p10 }
  0x23   : > { %p12876_p6 = pnand %p12875_p0, %p12869_p1 }
  0x25   : > { %12879 = shalt.err (!%p12876_p6)
}
  0x26   : > { %s13012_s23 = smov 64   ;;  %s13013_s29 = smov 4  }
  0x27   : > { %12546 = dma.hbm_to_vmem [thread:$0]  (!%p13112_p11), %s16191_s3, 9216, %s13105_s11, [#allocation9], %s13012_s23, %s13012_s23, %s13013_s29  }
  0x28   : > { %s12880_s17 = scalar_lea.hbm %s16194_s6, 9216 }
  0x29   : > { %p12881_p2 = scmp.ne.s32.totalorder %s16194_s6, %s12880_s17  ;;  %p12887_p10 = scmp.lt.u32.totalorder %s12880_s17, %s16194_s6 }
  0x2b   : > { %p12883_p1 = pnand %p12881_p2, %p12854_p13 }
  0x2d   : > { %p12884_p6 = pneg %p12883_p1 }
  0x2f   : > { %p12889_p3 = pnand %p12887_p10, %p12884_p6 }
  0x31   : > { %12892 = shalt.err (!%p12889_p3)
}
  0x32   : > { %s12893_s11 = scalar_lea.vmem %s13116_s14, 9216  ;;  %p12901_p12 = scmp.lt.s32.totalorder %s13116_s14, %s13116_s14 }
  0x33   : > { %p12894_p5 = scmp.ne.s32.totalorder %s13116_s14, %s12893_s11  ;;  %p12902_p0 = scmp.lt.s32.totalorder %s12893_s11, %s12893_s11 }
  0x35   : > { %p12896_p7 = pnand %p12894_p5, %p12854_p13  ;;  %p12903_p2 = por %p12902_p0, %p12901_p12 }
  0x37   : > { %p12897_p9 = pneg %p12896_p7 }
  0x39   : > { %p12904_p1 = pnand %p12903_p2, %p12897_p9 }
  0x3b   : > { %12907 = shalt.err (!%p12904_p1)
}
  0x3c   : > { %12549 = dma.hbm_to_vmem [thread:$0]  (!%p13112_p11), %s16194_s6, 9216, %s13116_s14, [#allocation9], %s13012_s23, %s13012_s23, %s13013_s29  }
  0x3d   : > { %s13171_s13 = sadd.s32 1, %s13008_s27   ;;  %s31_s12 = sadd.s32 1, %s13004_s26 }
  0x3e   : > { %s28_s15 = ssub.s32 %s13008_s27, %s13171_s13  ;;  %p38_p13 = scmp.ne.s32.totalorder %s13004_s26, %s13000_s25 }
  0x3f   : > { %p29_p6 = scmp.eq.s32.totalorder %s28_s15, 0  ;;  %p39_p10 = scmp.eq.s32.totalorder %s13008_s27, 0 }
  0x40   : > { %p16214_p3 = scmp.eq.s32.totalorder %s13082_s28, 1  ;;  %p12560_p7 = scmp.lt.s32.totalorder %s13008_s27, 2 }
  0x41   : > { %s13187_s17 = scalar_select %p29_p6, %s13004_s26, %s31_s12  }
  0x42   : > { %p13181_p5 = por %p16214_p3, %p38_p13  ;;  %p40_p9 = por %p39_p10, %p38_p13 }
  0x43   : > { %s258_s18 = sand.u32 1, %s13004_s26   ;;  %s11425_s14 = sshll.u32 %s13008_s27, 12 }
  0x44   : > { %s16215_s16 = scalar_select %p13181_p5, 1, 0 }
  0x45   : > { %s10816_s19 = sshll.u32 %s258_s18, 8  ;;  %s13194_s20 = scalar_lea.hbm %s16188_s0, %s11425_s14 }
  0x46   : > { %s262_s21 = scalar_lea.vmem [#allocation5], %s10816_s19  ;;  %p13198_p11 = pnand %p12560_p7, %p40_p9 }
  0x47   : > { %s269_s11 = sshll.u32 %s262_s21, 4  ;;  %s13202_s10 = scalar_lea.sflag [#allocation6], %s258_s18  ;;  %s13196_s11 = int_to_ptr.vmem [resolvable:$true] %s269_s11 }
  0x48   : > { %s12908_s12 = scalar_lea.hbm %s13194_s20, 4096  ;;  %p12910_p0 = pneg %p13198_p11 }
  0x49   : > { %p12909_p12 = scmp.ne.s32.totalorder %s13194_s20, %s12908_s12  ;;  %s12913_s14 = scalar_lea.hbm %s16188_s0, 8192 }
  0x4a   : > { %p12914_p13 = scmp.lt.u32.totalorder %s13194_s20, %s16188_s0  ;;  %p12915_p6 = scmp.lt.u32.totalorder %s12913_s14, %s12908_s12 }
  0x4b   : > { %p12911_p2 = pnand %p12910_p0, %p12909_p12  ;;  %p12917_p3 = scmp.lt.u32.totalorder %s12908_s12, %s13194_s20 }
  0x4c   : > { %p12916_p10 = por %p12915_p6, %p12914_p13 }
  0x4d   : > { %p12912_p1 = pneg %p12911_p2 }
  0x4e   : > { %p12918_p7 = por %p12917_p3, %p12916_p10 }
  0x50   : > { %p12919_p9 = pnand %p12918_p7, %p12912_p1 }
  0x52   : > { %12922 = shalt.err (!%p12919_p9)
}
  0x53   : > { %s12923_s18 = scalar_lea.vmem %s13196_s11, 4096  ;;  %s13014_s21 = smov [#allocation5]  }
  0x54   : > { %p12924_p12 = scmp.ne.s32.totalorder %s13196_s11, %s12923_s18  ;;  %s12928_s15 = sshll.u32 %s13014_s21, 4  ;;  %s12929_s15 = int_to_ptr.vmem [resolvable:$false] %s12928_s15 }
  0x55   : > { %s12930_s19 = scalar_lea.vmem %s12929_s15, 8192  ;;  %p12931_p4 = scmp.lt.s32.totalorder %s13196_s11, %s12929_s15 }
  0x56   : > { %p12926_p2 = pnand %p12924_p12, %p12910_p0  ;;  %p12932_p13 = scmp.lt.s32.totalorder %s12930_s19, %s12923_s18 }
  0x58   : > { %p12927_p5 = pneg %p12926_p2  ;;  %p12933_p6 = por %p12932_p13, %p12931_p4 }
  0x5a   : > { %p12934_p10 = pnand %p12933_p6, %p12927_p5 }
  0x5c   : > { %12937 = shalt.err (!%p12934_p10)
}
  0x5d   : > { %s13015_s12 = smov 128   ;;  %s13016_s14 = smov 8  }
  0x5e   : > { %12553 = dma.hbm_to_vmem [thread:$0]  (!%p13198_p11), %s13194_s20, 4096, %s13196_s11, %s13202_s10, %s13015_s12, %s13015_s12, %s13016_s14  }
  0x5f   : > { %281 = sbr.rel (%p13101_p8) target bundleno = 1376 (0x560), region = 48 }
  0x66   : > { %s13233_s23 = sand.u32 1, %s13000_s25   ;;  %p16217_p4 = scmp.ne.s32.totalorder %s16210_s30, 0 }
  0x67   : > { %s10820_s29 = sshll.u32 %s13233_s23, 8  ;;  %s284_s18 = scalar_lea.sflag [#allocation6], %s13233_s23 }
  0x68   : > { %s13239_s21 = scalar_lea.vmem [#allocation5], %s10820_s29 }
  0x69   : > { %12983 = dma.done.wait (%p16217_p4), %s284_s18, 4096  }
  0x6a   : > { %12985 = vsyncadd (%p16217_p4), %s284_s18, 4294963200  ;;  %p16218_p5 = scmp.eq.s32.totalorder %s13082_s28, 0 }
  0x6c   : > { %12987 = dma.done.wait (%p16218_p5), [#allocation9], 18432   ;;  %p16219_p8 = pmov %p16218_p5 }
  0x6d   : > { %v13017_v0 = vmov 0   ;;  %v12605_v1 = vld [vmem:[#allocation8 + $0x40] sm:$0xff]   ;;  %v12609_v5 = vld [vmem:[#allocation8 + $0x48] sm:$0xff]   ;;  %v12613_v9 = vld [vmem:[#allocation8 + $0x50] sm:$0xff]   ;;  %vm335_vm0 = vsmask.f32 256 }
  0x6e   : > { %12989 = vsyncadd (%p16219_p8), [#allocation9], 4294948864  ;;  %327 = vst [vmem:[#allocation2] sm:$0xf] %v13017_v0  ;;  %v12606_v2 = vld [vmem:[#allocation8 + $0xc0] sm:$0xff]   ;;  %11491 = vmatprep.subr.bf16.mxu0 %v12605_v1  ;;  %v12610_v6 = vld [vmem:[#allocation8 + $0xc8] sm:$0xff]  }
  0x6f   : > { %328 = vst [vmem:[#allocation2 + $0x4] sm:$0xf] %v13017_v0  ;;  %329 = vst [vmem:[#allocation2 + $0x8] sm:$0x1] %v13017_v0  ;;  %v12607_v3 = vld [vmem:[#allocation8] sm:$0xff]   ;;  %11603 = vmatprep.subr.bf16.mxu1 %v12606_v2  ;;  %v12611_v7 = vld [vmem:[#allocation8 + $0x8] sm:$0xff]  }
  0x70   : > { %331 = vst [vmem:[#allocation2 + $0xcc] sm:$0xf] %v13017_v0  ;;  %332 = vst [vmem:[#allocation2 + $0xd0] sm:$0xf] %v13017_v0  ;;  %v12608_v4 = vld [vmem:[#allocation8 + $0x80] sm:$0xff]   ;;  %11492 = vmatpush3.bf16.msra.mxu0 %v12607_v3  ;;  %v12612_v8 = vld [vmem:[#allocation8 + $0x88] sm:$0xff]  }
  0x71   : > { %333 = vst [vmem:[#allocation2 + $0xd4] sm:$0x1] %v13017_v0  ;;  %11604 = vmatpush3.bf16.msra.mxu1 %v12608_v4  ;;  %11493 = vmatprep.subr.bf16.mxu0 %v12609_v5  ;;  %v12614_v10 = vld [vmem:[#allocation8 + $0xd0] sm:$0xff]   ;;  %vm391_vm1 = vsmask.f32 7938  ;;  %v12617_v13 = vld [vmem:[#allocation8 + $0x58] sm:$0xff]  }
  0x72   : > { %11605 = vmatprep.subr.bf16.mxu1 %v12610_v6  ;;  %v12615_v11 = vld [vmem:[#allocation8 + $0x10] sm:$0xff]   ;;  %v12618_v14 = vld [vmem:[#allocation8 + $0xd8] sm:$0xff]   ;;  %v12621_v17 = vld [vmem:[#allocation8 + $0x60] sm:$0xff]   ;;  %vm334_vm2 = vcmask 1040384   ;;  %v16220_v24 = vmov 0  ;;  %v16223_v25 = vmov 0 }
  0x73   : > { %v12616_v12 = vld [vmem:[#allocation8 + $0x90] sm:$0xff]   ;;  %v12619_v15 = vld [vmem:[#allocation8 + $0x18] sm:$0xff]   ;;  %v12622_v18 = vld [vmem:[#allocation8 + $0xe0] sm:$0xff]   ;;  %vm1314_vm5 = vsmask.f32 3328  ;;  %vm1008_vm7 = vcmask 1043456  }
  0x74   : > { %11494 = vmatpush3.bf16.msra.mxu0 %v12611_v7  ;;  %v12620_v16 = vld [vmem:[#allocation8 + $0x98] sm:$0xff]   ;;  %v12623_v19 = vld [vmem:[#allocation8 + $0x20] sm:$0xff]   ;;  %v12625_v21 = vld [vmem:[#allocation8 + $0x68] sm:$0xff]   ;;  %vm1315_vm6 = vsmask.f32 7440  ;;  %vm1877_vm9 = vcmask 1042432  }
  0x75   : > { %11606 = vmatpush3.bf16.msra.mxu1 %v12612_v8  ;;  %11495 = vmatprep.subr.bf16.mxu0 %v12613_v9  ;;  %v12624_v20 = vld [vmem:[#allocation8 + $0xa0] sm:$0xff]   ;;  %v12626_v22 = vld [vmem:[#allocation8 + $0xe8] sm:$0xff]   ;;  %vm13250_vm3 = vmand %vm334_vm2, %vm335_vm0  ;;  %vm685_vm8 = vsmask.f32 4368  ;;  %vm1878_vm10 = vcmask 1046532   ;;  %s16047_s14 = scalar_lea.vmem [#allocation11], %s10820_s29 }
  0x76   : > { %11607 = vmatprep.subr.bf16.mxu1 %v12614_v10  ;;  %v12627_v23 = vld [vmem:[#allocation8 + $0x28] sm:$0xff]   ;;  %v16221_v24 = vsel %vm13250_vm3, 4294967295, %v16220_v24  ;;  %vm13255_vm4 = vmand %vm334_vm2, %vm391_vm1  ;;  %v12629_v27 = vld [vmem:[#allocation8 + $0x70] sm:$0xff]   ;;  %s11490_s29 = sshll.u32 %s13082_s28, 12  ;;  %s10719_s18 = sshll.u32 %s16047_s14, 4  ;;  %s16141_s18 = int_to_ptr.vmem [resolvable:$true] %s10719_s18 }
  0x77   : > { %16222 = vst [vmem:[#allocation15_spill] sm:$0xff] %v16221_v24  ;;  %v16224_v25 = vsel %vm13255_vm4, 4294967295, %v16223_v25  ;;  %v12628_v26 = vld [vmem:[#allocation8 + $0xa8] sm:$0xff]   ;;  %v12630_v28 = vld [vmem:[#allocation8 + $0xf0] sm:$0xff]   ;;  %v12633_v31 = vld [vmem:[#allocation8 + $0x78] sm:$0xff]   ;;  %s16139_s20 = scalar_lea.hbm %s16195_s7, %s11490_s29  ;;  %s10706_s28 = scalar_lea.sflag [#allocation7], %s13233_s23 }
  0x78   : > { %11496 = vmatpush3.bf16.msra.mxu0 %v12615_v11  ;;  %16225 = vst [vmem:[#allocation16_spill] sm:$0xff] %v16224_v25  ;;  %v12631_v29 = vld [vmem:[#allocation8 + $0x30] sm:$0xff]   ;;  %v12634_v32 = vld [vmem:[#allocation8 + $0xf8] sm:$0xff]   ;;  %v337_v35 = vld [vmem:[#allocation2] sm:$0x1]  ;;  %p16337_p0 = scmp.ne.s32.totalorder %s16215_s16, 0 }
  0x79   : > { %11608 = vmatpush3.bf16.msra.mxu1 %v12616_v12  ;;  %11497 = vmatprep.subr.bf16.mxu0 %v12617_v13  ;;  %v12632_v30 = vld [vmem:[#allocation8 + $0xb0] sm:$0xff]   ;;  %v12635_v33 = vld [vmem:[#allocation8 + $0x38] sm:$0xff]   ;;  %v1267_v37 = vld [vmem:[#allocation2 + $0x4] sm:$0xf]  ;;  %v338_v38 = vsel %vm13250_vm3, 0, %v337_v35  ;;  %s13018_s11 = smov [#allocation11]  }
  0x7a   : > { %11609 = vmatprep.subr.bf16.mxu1 %v12618_v14  ;;  %v12636_v34 = vld [vmem:[#allocation8 + $0xb8] sm:$0xff]   ;;  %v393_v36 = vld [vmem:[#allocation2 + $0x8] sm:$0x1]  ;;  %v1327_v40 = vshll.u32 %v1267_v37, 16  ;;  %v1331_v41 = vshrl.u32 %v1267_v37, 16  ;;  %v447_v45 = vld [vmem:[%s13239_s21] sm:$0xff] }
  0x7b   : > { %v394_v39 = vsel %vm13255_vm4, 0, %v393_v36  ;;  %v340_v42 = vld [vmem:[#allocation2 + $0xc] sm:$0x1]  ;;  %339 = vst [vmem:[#allocation2] sm:$0x1] %v338_v38  ;;  %v448_v46 = vld [vmem:[%s13239_s21 + $0x8] sm:$0xff]  ;;  %vm13311_vm11 = vmor %vm1314_vm5, %vm1315_vm6 }
  0x7c   : > { %11498 = vmatpush3.bf16.msra.mxu0 %v12619_v15  ;;  %395 = vst [vmem:[#allocation2 + $0x8] sm:$0x1] %v394_v39  ;;  %v341_v43 = vsel %vm13250_vm3, 0, %v340_v42  ;;  %v396_v44 = vld [vmem:[#allocation2 + $0x14] sm:$0x1]  ;;  %v13267_v47 = vrot.slane %v1327_v40, 5  ;;  %vm13318_vm12 = vmand %vm1008_vm7, %vm391_vm1 }
  0x7d   : > { %11610 = vmatpush3.bf16.msra.mxu1 %v12620_v16  ;;  %11499 = vmatprep.subr.bf16.mxu0 %v12621_v17  ;;  %v1333_v48 = vrot.slane %v1331_v41, 4  ;;  %342 = vst [vmem:[#allocation2 + $0xc] sm:$0x1] %v341_v43  ;;  %v397_v49 = vsel %vm13255_vm4, 0, %v396_v44  ;;  %v13274_v50 = vld [vmem:[%s16189_s1] ss:$0 sm:$0xff]  ;;  %vm13330_vm13 = vmor %vm335_vm0, %vm685_vm8 }
  0x7e   : > { %11611 = vmatprep.subr.bf16.mxu1 %v12622_v18  ;;  %v12639_v51 = vld [vmem:[#allocation8 + $0x140] sm:$0xff]   ;;  %398 = vst [vmem:[#allocation2 + $0x14] sm:$0x1] %v397_v49  ;;  %v486_v52 = vmul.f32 %v13274_v50, %v447_v45  ;;  %v487_v53 = vmul.f32 %v13274_v50, %v448_v46  ;;  %v13281_v54 = vld [vmem:[%s16190_s2] ss:$0 sm:$0xff]  ;;  %v449_v61 = vld [vmem:[%s13239_s21 + $0x10] sm:$0xff] }
  0x7f   : > { %v13283_v55 = vld [vmem:[#allocation2] sm:$0xe]  ;;  %v1334_v56 = vor.u32 %v1333_v48, %v13267_v47  ;;  %v13286_v57 = vld [vmem:[#allocation2 + $0x4] sm:$0xf]  ;;  %v450_v63 = vld [vmem:[%s13239_s21 + $0x18] sm:$0xff]  ;;  %v488_v0 = vmul.f32 %v13274_v50, %v449_v61  ;;  %v16228_v37 = vmov 0 }
  0x80   : > { %11500 = vmatpush3.bf16.msra.mxu0 %v12623_v19  ;;  %v525_v58 = vadd.f32 %v13281_v54, %v486_v52  ;;  %v526_v59 = vadd.f32 %v13281_v54, %v487_v53  ;;  %v1882_v60 = vrot.slane %v13286_v57, 5  ;;  %v10890_v62 = vrot.slane %v13283_v55, 9  ;;  %v343_v5 = vld [vmem:[#allocation2 + $0x18] sm:$0x1]  ;;  %v399_v19 = vld [vmem:[#allocation2 + $0x20] sm:$0x1]  ;;  %vm13342_vm14 = vmor %vm1877_vm9, %vm1878_vm10 }
  0x81   : > { %11612 = vmatpush3.bf16.msra.mxu1 %v12624_v20  ;;  %11501 = vmatprep.subr.bf16.mxu0 %v12625_v21  ;;  %v13295_v1 = vrot.slane %v1334_v56, 4  ;;  %v489_v8 = vmul.f32 %v13274_v50, %v450_v63  ;;  %v527_v9 = vadd.f32 %v13281_v54, %v488_v0  ;;  %v344_v16 = vsel %vm13250_vm3, 0, %v343_v5  ;;  %v12640_v53 = vld [vmem:[#allocation8 + $0x100] sm:$0xff]   ;;  %v402_v61 = vld [vmem:[#allocation2 + $0x2c] sm:$0x1]  ;;  %s12942_s22 = sshll.u32 %s13018_s11, 4  ;;  %s12943_s22 = int_to_ptr.vmem [resolvable:$false] %s12942_s22 }
  0x82   : > { %11613 = vmatprep.subr.bf16.mxu1 %v12626_v22  ;;  %v557_v2 = vmax.f32 %v525_v58, 0.0  ;;  %v558_v3 = vmax.f32 %v526_v59, 0.0  ;;  %v13299_v4 = vrot.slane %v1882_v60, 4  ;;  %v1266_v6 = vld [vmem:[#allocation2] sm:$0xf]  ;;  %v16229_v37 = vsel %vm13318_vm12, 4294967295, %v16228_v37  ;;  %p12945_p7 = scmp.lt.s32.totalorder %s16141_s18, %s12943_s22 }
  0x83   : > { %v1268_v7 = vld [vmem:[#allocation2 + $0x8] sm:$0x1]  ;;  %v1318_v10 = vshrl.u32 %v1266_v6, 16  ;;  %v1321_v11 = vshll.u32 %v1266_v6, 16  ;;  %v528_v17 = vadd.f32 %v13281_v54, %v489_v8  ;;  %v559_v18 = vmax.f32 %v527_v9, 0.0  ;;  %16230 = vst [vmem:[#allocation17_spill] sm:$0xff] %v16229_v37 }
  0x84   : > { %11502 = vmatpush3.bf16.msra.mxu0 %v12627_v23  ;;  %v1337_v12 = vshll.u32 %v1268_v7, 16  ;;  %v11426_v13 = vpack.c.bf16 %v557_v2, %v557_v2  ;;  %v11427_v14 = vpack.c.bf16 %v558_v3, %v558_v3  ;;  %v13303_v15 = vld [vmem:[#allocation2 + $0x8] sm:$0x1]  ;;  %345 = vst [vmem:[#allocation2 + $0x18] sm:$0x1] %v344_v16  ;;  %v400_v40 = vsel %vm13255_vm4, 0, %v399_v19 }
  0x85   : > { %11614 = vmatpush3.bf16.msra.mxu1 %v12628_v26  ;;  %11503 = vmatprep.subr.bf16.mxu0 %v12629_v27  ;;  %v1320_v20 = vrot.slane %v1318_v10, 4  ;;  %v1323_v21 = vrot.slane %v1321_v11, 5  ;;  %v451_v26 = vld [vmem:[%s13239_s21 + $0x20] sm:$0xff]  ;;  %v560_v36 = vmax.f32 %v528_v17, 0.0  ;;  %v11428_v39 = vpack.c.bf16 %v559_v18, %v559_v18  ;;  %v1014_v48 = vld [vmem:[#allocation2 + $0x14] sm:$0x1] }
  0x86   : > { %11615 = vmatprep.subr.bf16.mxu1 %v12630_v28  ;;  %v1339_v22 = vrot.slane %v1337_v12, 5  ;;  %v688_v23 = vshrl.u32 %v11426_v13, 16  ;;  %v691_v28 = vshll.u32 %v11426_v13, 16  ;;  %v490_v41 = vmul.f32 %v13274_v50, %v451_v26  ;;  %401 = vst [vmem:[#allocation2 + $0x20] sm:$0x1] %v400_v40  ;;  %v12638_v52 = vld [vmem:[#allocation2] sm:$0xff]  }
  0x87   : > { %v16231_v44 = vmov 0  ;;  %v11429_v56 = vpack.c.bf16 %v560_v36, %v560_v36  ;;  %v705_v58 = vshrl.u32 %v11428_v39, 16  ;;  %v452_v59 = vld [vmem:[%s13239_s21 + $0x28] sm:$0xff]  ;;  %v708_v2 = vshll.u32 %v11428_v39, 16  ;;  %v349_v5 = vld [vmem:[#allocation2 + $0x30] sm:$0x1] }
  0x88   : > { %11504 = vmatpush3.bf16.msra.mxu0 %v12631_v29  ;;  %v696_v29 = vshrl.u32 %v11427_v14, 16  ;;  %v690_v35 = vrot.slane %v688_v23, 7  ;;  %v1340_v43 = vsel %vm13311_vm11, %v13295_v1, %v1339_v22  ;;  %v16232_v44 = vsel %vm13330_vm13, 4294967295, %v16231_v44  ;;  %v405_v6 = vld [vmem:[#allocation2 + $0x38] sm:$0x1]  ;;  %v12645_v10 = vld [vmem:[#allocation8 + $0x148] sm:$0xff]  }
  0x89   : > { %11616 = vmatpush3.bf16.msra.mxu1 %v12632_v30  ;;  %11505 = vmatprep.subr.bf16.mxu0 %v12633_v31  ;;  %v699_v30 = vshll.u32 %v11427_v14, 16  ;;  %v1010_v31 = vld [vmem:[#allocation2 + $0xc] sm:$0xf]  ;;  %16233 = vst [vmem:[#allocation18_spill] sm:$0xff] %v16232_v44  ;;  %v707_v9 = vrot.slane %v705_v58, 7  ;;  %v713_v12 = vshrl.u32 %v11429_v56, 16  ;;  %v529_v16 = vadd.f32 %v13281_v54, %v490_v41 }
  0x8a   : > { %11617 = vmatprep.subr.bf16.mxu1 %v12634_v32  ;;  %v1885_v32 = vrot.slane %v13303_v15, 5  ;;  %v698_v38 = vrot.slane %v696_v29, 7  ;;  %v693_v45 = vor.u32 %v691_v28, %v690_v35  ;;  %v694_v46 = vrot.slane %v690_v35, 4  ;;  %v352_v11 = vld [vmem:[#allocation2 + $0x3c] sm:$0x1]  ;;  %v12646_v29 = vld [vmem:[#allocation8 + $0x108] sm:$0xff]  }
  0x8b   : > { %v716_v13 = vshll.u32 %v11429_v56, 16  ;;  %v1017_v14 = vld [vmem:[#allocation2 + $0x18] sm:$0xf]  ;;  %v491_v15 = vmul.f32 %v13274_v50, %v452_v59  ;;  %v1883_v17 = vsel %vm13342_vm14, %v10890_v62, %v1882_v60  ;;  %v710_v18 = vor.u32 %v708_v2, %v707_v9  ;;  %v454_v60 = vld [vmem:[%s13239_s21 + $0x38] sm:$0xff]  ;;  %v12652_v39 = vld [vmem:[#allocation8 + $0x110] sm:$0xff]   ;;  %s12944_s10 = scalar_lea.vmem %s12943_s22, 8192 }
  0x8c   : > { %11506 = vmatpush3.bf16.msra.mxu0 %v12635_v33  ;;  %v346_v33 = vld [vmem:[#allocation2 + $0x24] sm:$0x1]  ;;  %v701_v49 = vor.u32 %v699_v30, %v698_v38  ;;  %v1011_v0 = vsel %vm13318_vm12, %v693_v45, %v1010_v31  ;;  %v403_v19 = vsel %vm13255_vm4, 0, %v402_v61  ;;  %v1886_v22 = vsel %vm13342_vm14, %v13299_v4, %v1885_v32 }
  0x8d   : > { %11618 = vmatpush3.bf16.msra.mxu1 %v12636_v34  ;;  %11715 = vmatprep.subr.bf16.mxu0 %v12639_v51  ;;  %v1324_v34 = vor.u32 %v1323_v21, %v1320_v20  ;;  %v703_v51 = vrot.slane %v698_v38, 4  ;;  %v347_v3 = vsel %vm13250_vm3, 0, %v346_v33  ;;  %1012 = vst [vmem:[#allocation2 + $0xc] sm:$0xf] %v1011_v0  ;;  %v350_v20 = vsel %vm13250_vm3, 0, %v349_v5  ;;  %v453_v21 = vld [vmem:[%s13239_s21 + $0x30] sm:$0xff] }
  0x8e   : > { %v702_v8 = vsel %vm13330_vm13, %v694_v46, %v701_v49  ;;  %348 = vst [vmem:[#allocation2 + $0x24] sm:$0x1] %v347_v3  ;;  %v711_v23 = vrot.slane %v707_v9, 4  ;;  %v715_v57 = vrot.slane %v713_v12, 7  ;;  %v530_v55 = vadd.f32 %v13281_v54, %v491_v15  ;;  %404 = vst [vmem:[#allocation2 + $0x2c] sm:$0x1] %v403_v19 }
  0x8f   : > { %v1325_v42 = vrot.slane %v1324_v34, 4  ;;  %1013 = vst [vmem:[#allocation2 + $0x10] sm:$0xf] %v702_v8  ;;  %351 = vst [vmem:[#allocation2 + $0x30] sm:$0x1] %v350_v20  ;;  %v1018_v62 = vsel %vm13318_vm12, %v710_v18, %v1017_v14  ;;  %v561_v28 = vmax.f32 %v529_v16, 0.0  ;;  %v492_v33 = vmul.f32 %v13274_v50, %v453_v21 }
  0x90   : > { %v1021_v26 = vld [vmem:[#allocation2 + $0x20] sm:$0x1]  ;;  %v406_v30 = vsel %vm13255_vm4, 0, %v405_v6  ;;  %v353_v4 = vsel %vm13250_vm3, 0, %v352_v11  ;;  %v718_v31 = vor.u32 %v716_v13, %v715_v57  ;;  %v720_v32 = vrot.slane %v715_v57, 4  ;;  %v12651_v34 = vld [vmem:[#allocation8 + $0x150] sm:$0xff]  }
  0x91   : > { %v1330_v63 = vsel %vm13311_vm11, %v1325_v42, %v13267_v47  ;;  %v1015_v47 = vsel %vm13250_vm3, %v703_v51, %v1014_v48  ;;  %1019 = vst [vmem:[#allocation2 + $0x18] sm:$0xf] %v1018_v62  ;;  %407 = vst [vmem:[#allocation2 + $0x38] sm:$0x1] %v406_v30  ;;  %v562_v35 = vmax.f32 %v530_v55, 0.0  ;;  %v493_v36 = vmul.f32 %v13274_v50, %v454_v60  ;;  %v455_v38 = vld [vmem:[%s13239_s21 + $0x40] sm:$0xff] }
  0x92   : > { %v10874_v7 = vcombine.low %v1330_v63, %v1340_v43  ;;  %1016 = vst [vmem:[#allocation2 + $0x14] sm:$0x1] %v1015_v47  ;;  %354 = vst [vmem:[#allocation2 + $0x3c] sm:$0x1] %v353_v4  ;;  %v10906_v40 = vcombine.low %v1883_v17, %v1886_v22  ;;  %v719_v42 = vsel %vm13330_vm13, %v711_v23, %v718_v31  ;;  %v456_v59 = vld [vmem:[%s13239_s21 + $0x48] sm:$0xff]  ;;  %v457_v5 = vld [vmem:[%s13239_s21 + $0x50] sm:$0xff] }
  0x93   : > { %v1022_v43 = vsel %vm13250_vm3, %v720_v32, %v1021_v26  ;;  %1020 = vst [vmem:[#allocation2 + $0x1c] sm:$0xf] %v719_v42  ;;  %v13383_v49 = vpack.c.bf16 %v561_v28, %v561_v28  ;;  %v13386_v58 = vadd.f32 %v13281_v54, %v492_v33  ;;  %v13390_v2 = vadd.f32 %v13281_v54, %v493_v36  ;;  %v12657_v57 = vld [vmem:[#allocation8 + $0x158] sm:$0xff]  }
  0x94   : > { %4713 = vmatprep.mubr.bf16.mxu0 %v10874_v7  ;;  %v1269_v41 = vld [vmem:[#allocation2 + $0xc] sm:$0xf]  ;;  %1023 = vst [vmem:[#allocation2 + $0x20] sm:$0x1] %v1022_v43  ;;  %v494_v3 = vmul.f32 %v13274_v50, %v455_v38  ;;  %v11431_v13 = vpack.c.bf16 %v562_v35, %v562_v35  ;;  %v495_v14 = vmul.f32 %v13274_v50, %v456_v59 }
  0x95   : > { %4714 = vmatmul.mubr.bf16.vlgmr.msra.gmra.mrb[0].mxu0 %v12638_v52  ;;  %v1342_v48 = vshrl.u32 %v1269_v41, 16  ;;  %v1345_v52 = vshll.u32 %v1269_v41, 16  ;;  %v1784_v0 = vld [vmem:[#allocation2 + $0xc] sm:$0xe]  ;;  %v722_v19 = vshrl.u32 %v13383_v49, 16  ;;  %v13399_v28 = vmul.f32 %v13274_v50, %v457_v5 }
  0x96   : > { %11716 = vmatpush3.bf16.msra.mxu0 %v12640_v53  ;;  %v12637_v45 = vld [vmem:[#allocation2 + $0xc] sm:$0xff]   ;;  %v10891_v9 = vrot.slane %v1784_v0, 9  ;;  %v13404_v33 = vadd.f32 %v13281_v54, %v494_v3  ;;  %v733_v0 = vshll.u32 %v11431_v13, 16 }
  0x97   : > { %11717 = vmatprep.subr.bf16.mxu0 %v12645_v10  ;;  %v1270_v46 = vld [vmem:[#allocation2 + $0x10] sm:$0xf]  ;;  %4874 = vmatprep.mubr.bf16.mxu1 %v12637_v45  ;;  %v1344_v61 = vrot.slane %v1342_v48, 4  ;;  %v1347_v6 = vrot.slane %v1345_v52, 5  ;;  %v724_v26 = vrot.slane %v722_v19, 7  ;;  %v730_v52 = vshrl.u32 %v11431_v13, 16 }
  0x98   : > { %v1351_v53 = vshll.u32 %v1270_v46, 16  ;;  %v1355_v56 = vshrl.u32 %v1270_v46, 16  ;;  %4875 = vmatmul.mubr.bf16.vlgmr.msra.gmra.mrb[0].mxu1 %v10906_v40  ;;  %v1785_v47 = vld [vmem:[#allocation2 + $0x10] sm:$0xf]  ;;  %v1272_v18 = vld [vmem:[#allocation2 + $0x18] sm:$0xf] }
  0x99   : > { %v1271_v51 = vld [vmem:[#allocation2 + $0x14] sm:$0x1]  ;;  %v1889_v12 = vrot.slane %v1785_v47, 5  ;;  %v1348_v15 = vor.u32 %v1347_v6, %v1344_v61  ;;  %v1366_v22 = vshrl.u32 %v1272_v18, 16  ;;  %v1369_v23 = vshll.u32 %v1272_v18, 16  ;;  %v12642_v36 = vld [vmem:[#allocation2 + $0xc] sm:$0xff]  }
  0x9a   : > { %11718 = vmatpush3.bf16.msra.mxu0 %v12646_v29  ;;  %v1361_v63 = vshll.u32 %v1271_v51, 16  ;;  %v1353_v7 = vrot.slane %v1351_v53, 5  ;;  %v1357_v8 = vrot.slane %v1355_v56, 4  ;;  %v1786_v11 = vld [vmem:[#allocation2 + $0x14] sm:$0x1]  ;;  %v12641_v62 = vld [vmem:[#allocation2 + $0x18] sm:$0xff]   ;;  %v534_v56 = vadd.f32 %v13281_v54, %v495_v14 }
  0x9b   : > { %11719 = vmatprep.subr.bf16.mxu0 %v12651_v34  ;;  %v1892_v17 = vrot.slane %v1786_v11, 5  ;;  %v1890_v20 = vsel %vm13342_vm14, %v10891_v9, %v1889_v12  ;;  %v1891_v21 = vrot.slane %v1889_v12, 4  ;;  %v1349_v55 = vrot.slane %v1348_v15, 4  ;;  %v1273_v30 = vld [vmem:[#allocation2 + $0x1c] sm:$0xf]  ;;  %4882 = vmatprep.mubr.bf16.mxu1 %v12641_v62  ;;  %v12658_v47 = vld [vmem:[#allocation8 + $0x118] sm:$0xff]  }
  0x9c   : > { %v1363_v10 = vrot.slane %v1361_v63, 5  ;;  %v1358_v16 = vor.u32 %v1357_v8, %v1353_v7  ;;  %v1274_v4 = vld [vmem:[#allocation2 + $0x20] sm:$0x1]  ;;  %v1368_v31 = vrot.slane %v1366_v22, 4  ;;  %v1371_v32 = vrot.slane %v1369_v23, 5 }
  0x9d   : > { %v1893_v29 = vsel %vm13342_vm14, %v1891_v21, %v1892_v17  ;;  %v1354_v34 = vsel %vm13311_vm11, %v1349_v55, %v1353_v7  ;;  %v1379_v42 = vshrl.u32 %v1273_v30, 16  ;;  %v1385_v43 = vshll.u32 %v1274_v4, 16  ;;  %v1024_v45 = vld [vmem:[#allocation2 + $0x24] sm:$0xf]  ;;  %v1788_v46 = vld [vmem:[#allocation2 + $0x1c] sm:$0xf] }
  0x9e   : > { %11720 = vmatpush3.bf16.msra.mxu0 %v12652_v39  ;;  %v1359_v60 = vrot.slane %v1358_v16, 4  ;;  %v10907_v38 = vcombine.low %v1890_v20, %v1893_v29  ;;  %v1375_v39 = vshll.u32 %v1273_v30, 16  ;;  %v1372_v41 = vor.u32 %v1371_v32, %v1368_v31  ;;  %v1787_v53 = vld [vmem:[#allocation2 + $0x18] sm:$0xe]  ;;  %v1789_v3 = vld [vmem:[#allocation2 + $0x20] sm:$0x1] }
  0x9f   : > { %11721 = vmatprep.subr.bf16.mxu0 %v12657_v57  ;;  %v725_v51 = vshll.u32 %v13383_v49, 16  ;;  %v1381_v61 = vrot.slane %v1379_v42, 4  ;;  %v728_v63 = vrot.slane %v724_v26, 4  ;;  %v1387_v5 = vrot.slane %v1385_v43, 5  ;;  %v1028_v11 = vld [vmem:[#allocation2 + $0x2c] sm:$0x1] }
  0xa0   : > { %v1364_v35 = vsel %vm13311_vm11, %v1359_v60, %v1363_v10  ;;  %4883 = vmatmul.mubr.bf16.gmra.mrb[4].mxu1 %v10907_v38  ;;  %v1377_v48 = vrot.slane %v1375_v39, 5  ;;  %v1373_v59 = vrot.slane %v1372_v41, 4  ;;  %v732_v7 = vrot.slane %v730_v52, 7  ;;  %v408_v57 = vld [vmem:[#allocation2 + $0x44] sm:$0x1]  ;;  %v12644_v60 = vld [vmem:[#allocation2 + $0x18] sm:$0xff]  }
  0xa1   : > { %v10875_v40 = vcombine.low %v1354_v34, %v1364_v35  ;;  %v727_v6 = vor.u32 %v725_v51, %v724_v26  ;;  %v1896_v8 = vrot.slane %v1788_v46, 5  ;;  %v10892_v10 = vrot.slane %v1787_v53, 9  ;;  %v355_v29 = vld [vmem:[#allocation2 + $0x48] sm:$0x1]  ;;  %v458_v30 = vld [vmem:[%s13239_s21 + $0x58] sm:$0xff]  ;;  %v12663_v34 = vld [vmem:[#allocation8 + $0x160] sm:$0xff]  }
  0xa2   : > { %v1378_v9 = vsel %vm13311_vm11, %v1373_v59, %v1377_v48  ;;  %v1382_v49 = vor.u32 %v1381_v61, %v1377_v48  ;;  %v563_v12 = vmax.f32 %v13386_v58, 0.0  ;;  %v735_v14 = vor.u32 %v733_v0, %v732_v7  ;;  %11722 = vmatpush3.bf16.msra.mxu0 %v12658_v47  ;;  %v1031_v39 = vld [vmem:[#allocation2 + $0x30] sm:$0xf]  ;;  %v12664_v41 = vld [vmem:[#allocation8 + $0x120] sm:$0xff]  }
  0xa3   : > { %4721 = vmatprep.mubr.bf16.mxu0 %v10875_v40  ;;  %v737_v15 = vrot.slane %v732_v7, 4  ;;  %v1025_v13 = vsel %vm13318_vm12, %v727_v6, %v1024_v45  ;;  %v1899_v16 = vrot.slane %v1789_v3, 5  ;;  %v1898_v18 = vrot.slane %v1896_v8, 4  ;;  %11723 = vmatprep.subr.bf16.mxu0 %v12663_v34  ;;  %v1035_v53 = vld [vmem:[#allocation2 + $0x38] sm:$0x1] }
  0xa4   : > { %4722 = vmatmul.mubr.bf16.gmra.mrb[4].mxu0 %v12642_v36  ;;  %v1383_v17 = vrot.slane %v1382_v49, 4  ;;  %1026 = vst [vmem:[#allocation2 + $0x24] sm:$0xf] %v1025_v13  ;;  %v564_v19 = vmax.f32 %v13390_v2, 0.0  ;;  %v11432_v20 = vpack.c.bf16 %v563_v12, %v563_v12  ;;  %v736_v21 = vsel %vm13330_vm13, %v728_v63, %v735_v14  ;;  %v459_v59 = vld [vmem:[%s13239_s21 + $0x60] sm:$0xff] }
  0xa5   : > { %v1029_v58 = vsel %vm13250_vm3, %v737_v15, %v1028_v11  ;;  %v565_v22 = vmax.f32 %v13404_v33, 0.0  ;;  %v566_v23 = vmax.f32 %v534_v56, 0.0  ;;  %1027 = vst [vmem:[#allocation2 + $0x28] sm:$0xf] %v736_v21  ;;  %v1897_v62 = vsel %vm13342_vm14, %v10892_v10, %v1896_v8 }
  0xa6   : > { %v1388_v55 = vsel %vm13311_vm11, %v1383_v17, %v1387_v5  ;;  %1030 = vst [vmem:[#allocation2 + $0x2c] sm:$0x1] %v1029_v58  ;;  %v11433_v2 = vpack.c.bf16 %v564_v19, %v564_v19  ;;  %v739_v26 = vshrl.u32 %v11432_v20, 16  ;;  %v1900_v31 = vsel %vm13342_vm14, %v1898_v18, %v1899_v16  ;;  %11724 = vmatpush3.bf16.msra.mxu0 %v12664_v41 }
  0xa7   : > { %v10876_v4 = vcombine.low %v1378_v9, %v1388_v55  ;;  %v742_v32 = vshll.u32 %v11432_v20, 16  ;;  %v13430_v33 = vpack.c.bf16 %v565_v22, %v565_v22  ;;  %v13432_v40 = vpack.c.bf16 %v566_v23, %v566_v23 }
  0xa8   : > { %v741_v35 = vrot.slane %v739_v26, 7  ;;  %v747_v36 = vshrl.u32 %v11433_v2, 16  ;;  %v750_v38 = vshll.u32 %v11433_v2, 16  ;;  %v409_v43 = vsel %vm13255_vm4, 0, %v408_v57 }
  0xa9   : > { %4729 = vmatprep.mubr.bf16.mxu0 %v10876_v4  ;;  %v756_v42 = vshrl.u32 %v13430_v33, 16  ;;  %v356_v45 = vsel %vm13250_vm3, 0, %v355_v29  ;;  %v497_v46 = vmul.f32 %v13274_v50, %v458_v30  ;;  %v764_v56 = vshrl.u32 %v13432_v40, 16  ;;  %410 = vst [vmem:[#allocation2 + $0x44] sm:$0x1] %v409_v43  ;;  %v460_v29 = vld [vmem:[%s13239_s21 + $0x68] sm:$0xff] }
  0xaa   : > { %v744_v48 = vor.u32 %v742_v32, %v741_v35  ;;  %v745_v51 = vrot.slane %v741_v35, 4  ;;  %v749_v52 = vrot.slane %v747_v36, 7  ;;  %357 = vst [vmem:[#allocation2 + $0x48] sm:$0x1] %v356_v45  ;;  %v10908_v61 = vcombine.low %v1897_v62, %v1900_v31 }
  0xab   : > { %v1275_v63 = vld [vmem:[#allocation2 + $0x24] sm:$0xf]  ;;  %v13444_v0 = vadd.f32 %v13281_v54, %v13399_v28  ;;  %v13449_v11 = vadd.f32 %v13281_v54, %v497_v46  ;;  %v498_v12 = vmul.f32 %v13274_v50, %v459_v59  ;;  %v759_v21 = vshll.u32 %v13430_v33, 16  ;;  %v1038_v33 = vld [vmem:[#allocation2 + $0x3c] sm:$0xf] }
  0xac   : > { %4730 = vmatmul.mubr.bf16.gmra.mrb[8].mxu0 %v12644_v60  ;;  %v1390_v3 = vshrl.u32 %v1275_v63, 16  ;;  %v1393_v5 = vshll.u32 %v1275_v63, 16  ;;  %v752_v6 = vor.u32 %v750_v38, %v749_v52  ;;  %v754_v7 = vrot.slane %v749_v52, 4  ;;  %v1790_v8 = vld [vmem:[#allocation2 + $0x24] sm:$0xe] }
  0xad   : > { %v12643_v47 = vld [vmem:[#allocation2 + $0x24] sm:$0xff]   ;;  %v1032_v49 = vsel %vm13318_vm12, %v744_v48, %v1031_v39  ;;  %v10893_v10 = vrot.slane %v1790_v8, 9  ;;  %v1277_v14 = vld [vmem:[#allocation2 + $0x2c] sm:$0x1]  ;;  %v758_v2 = vrot.slane %v756_v42, 7  ;;  %v766_v26 = vrot.slane %v764_v56, 7 }
  0xae   : > { %v1276_v9 = vld [vmem:[#allocation2 + $0x28] sm:$0xf]  ;;  %v1392_v28 = vrot.slane %v1390_v3, 4  ;;  %v1395_v15 = vrot.slane %v1393_v5, 5  ;;  %1033 = vst [vmem:[#allocation2 + $0x30] sm:$0xf] %v1032_v49  ;;  %4890 = vmatprep.mubr.bf16.mxu1 %v12643_v47  ;;  %v753_v18 = vsel %vm13330_vm13, %v745_v51, %v752_v6  ;;  %v1036_v20 = vsel %vm13250_vm3, %v754_v7, %v1035_v53 }
  0xaf   : > { %v1399_v13 = vshll.u32 %v1276_v9, 16  ;;  %v1403_v16 = vshrl.u32 %v1276_v9, 16  ;;  %v1409_v17 = vshll.u32 %v1277_v14, 16  ;;  %v1791_v19 = vld [vmem:[#allocation2 + $0x28] sm:$0xf]  ;;  %4891 = vmatmul.mubr.bf16.gmra.mrb[8].mxu1 %v10908_v61  ;;  %v761_v35 = vor.u32 %v759_v21, %v758_v2  ;;  %v462_v5 = vld [vmem:[%s13239_s21 + $0x78] sm:$0xff] }
  0xb0   : > { %v1396_v58 = vor.u32 %v1395_v15, %v1392_v28  ;;  %1034 = vst [vmem:[#allocation2 + $0x34] sm:$0xf] %v753_v18  ;;  %v1792_v57 = vld [vmem:[#allocation2 + $0x2c] sm:$0x1]  ;;  %v1903_v55 = vrot.slane %v1791_v19, 5  ;;  %v762_v36 = vrot.slane %v758_v2, 4  ;;  %v499_v52 = vmul.f32 %v13274_v50, %v460_v29 }
  0xb1   : > { %v1401_v22 = vrot.slane %v1399_v13, 5  ;;  %v1405_v23 = vrot.slane %v1403_v16, 4  ;;  %1037 = vst [vmem:[#allocation2 + $0x38] sm:$0x1] %v1036_v20  ;;  %v1411_v60 = vrot.slane %v1409_v17, 5  ;;  %v1906_v62 = vrot.slane %v1792_v57, 5 }
  0xb2   : > { %v1397_v30 = vrot.slane %v1396_v58, 4  ;;  %v1904_v31 = vsel %vm13342_vm14, %v10893_v10, %v1903_v55  ;;  %v1905_v32 = vrot.slane %v1903_v55, 4  ;;  %v1042_v34 = vld [vmem:[#allocation2 + $0x44] sm:$0x1]  ;;  %v767_v38 = vshll.u32 %v13432_v40, 16  ;;  %v463_v17 = vld [vmem:[%s13239_s21 + $0x80] sm:$0xff] }
  0xb3   : > { %v1406_v4 = vor.u32 %v1405_v23, %v1401_v22  ;;  %v771_v39 = vrot.slane %v766_v26, 4  ;;  %v567_v45 = vmax.f32 %v13444_v0, 0.0  ;;  %v1039_v51 = vsel %vm13318_vm12, %v761_v35, %v1038_v33  ;;  %v12648_v56 = vld [vmem:[#allocation2 + $0x24] sm:$0xff]  }
  0xb4   : > { %v1402_v41 = vsel %vm13311_vm11, %v1397_v30, %v1401_v22  ;;  %v1907_v42 = vsel %vm13342_vm14, %v1905_v32, %v1906_v62  ;;  %v769_v48 = vor.u32 %v767_v38, %v766_v26  ;;  %1040 = vst [vmem:[#allocation2 + $0x3c] sm:$0xf] %v1039_v51  ;;  %v461_v0 = vld [vmem:[%s13239_s21 + $0x70] sm:$0xff]  ;;  %v12669_v6 = vld [vmem:[#allocation8 + $0x168] sm:$0xff]   ;;  %v13478_v10 = vadd.f32 %v13281_v54, %v498_v12 }
  0xb5   : > { %v1407_v43 = vrot.slane %v1406_v4, 4  ;;  %v1278_v46 = vld [vmem:[#allocation2 + $0x30] sm:$0xf]  ;;  %v1043_v40 = vsel %vm13250_vm3, %v771_v39, %v1042_v34  ;;  %v10909_v59 = vcombine.low %v1904_v31, %v1907_v42  ;;  %11725 = vmatprep.subr.bf16.mxu0 %v12669_v6  ;;  %v568_v20 = vmax.f32 %v13449_v11, 0.0  ;;  %v464_v30 = vld [vmem:[%s13239_s21 + $0x88] sm:$0xff] }
  0xb6   : > { %v1414_v61 = vshrl.u32 %v1278_v46, 16  ;;  %v1417_v63 = vshll.u32 %v1278_v46, 16  ;;  %v1793_v3 = vld [vmem:[#allocation2 + $0x30] sm:$0xe]  ;;  %1044 = vst [vmem:[#allocation2 + $0x44] sm:$0x1] %v1043_v40  ;;  %v770_v9 = vsel %vm13330_vm13, %v762_v36, %v769_v48  ;;  %v11436_v21 = vpack.c.bf16 %v567_v45, %v567_v45 }
  0xb7   : > { %v1412_v53 = vsel %vm13311_vm11, %v1407_v43, %v1411_v60  ;;  %v12647_v8 = vld [vmem:[#allocation2 + $0x30] sm:$0xff]   ;;  %v10894_v49 = vrot.slane %v1793_v3, 9  ;;  %1041 = vst [vmem:[#allocation2 + $0x40] sm:$0xf] %v770_v9  ;;  %v13483_v58 = vadd.f32 %v13281_v54, %v499_v52  ;;  %v12670_v60 = vld [vmem:[#allocation8 + $0x128] sm:$0xff]   ;;  %v500_v26 = vmul.f32 %v13274_v50, %v461_v0 }
  0xb8   : > { %v10877_v7 = vcombine.low %v1402_v41, %v1412_v53  ;;  %v1279_v47 = vld [vmem:[#allocation2 + $0x34] sm:$0xf]  ;;  %v1280_v14 = vld [vmem:[#allocation2 + $0x38] sm:$0x1]  ;;  %v1416_v28 = vrot.slane %v1414_v61, 4  ;;  %v1419_v15 = vrot.slane %v1417_v63, 5  ;;  %4898 = vmatprep.mubr.bf16.mxu1 %v12647_v8  ;;  %v501_v29 = vmul.f32 %v13274_v50, %v462_v5  ;;  %11726 = vmatpush3.bf16.msra.mxu0 %v12670_v60 }
  0xb9   : > { %v1423_v13 = vshll.u32 %v1279_v47, 16  ;;  %v1427_v16 = vshrl.u32 %v1279_v47, 16  ;;  %v1433_v18 = vshll.u32 %v1280_v14, 16  ;;  %v1794_v19 = vld [vmem:[#allocation2 + $0x34] sm:$0xf]  ;;  %4899 = vmatmul.mubr.bf16.gmra.mrb[12].mxu1 %v10909_v59  ;;  %v11437_v34 = vpack.c.bf16 %v568_v20, %v568_v20 }
  0xba   : > { %4737 = vmatprep.mubr.bf16.mxu0 %v10877_v7  ;;  %v1420_v12 = vor.u32 %v1419_v15, %v1416_v28  ;;  %v1795_v57 = vld [vmem:[#allocation2 + $0x38] sm:$0x1]  ;;  %v1910_v55 = vrot.slane %v1794_v19, 5  ;;  %v773_v35 = vshrl.u32 %v11436_v21, 16  ;;  %v776_v36 = vshll.u32 %v11436_v21, 16  ;;  %v12650_v59 = vld [vmem:[#allocation2 + $0x30] sm:$0xff]  }
  0xbb   : > { %4738 = vmatmul.mubr.bf16.gmra.mrb[12].mxu0 %v12648_v56  ;;  %v1425_v22 = vrot.slane %v1423_v13, 5  ;;  %v1429_v23 = vrot.slane %v1427_v16, 4  ;;  %v1435_v62 = vrot.slane %v1433_v18, 5  ;;  %v1913_v2 = vrot.slane %v1795_v57, 5  ;;  %v1281_v33 = vld [vmem:[#allocation2 + $0x3c] sm:$0xf] }
  0xbc   : > { %v1421_v11 = vrot.slane %v1420_v12, 4  ;;  %v1911_v31 = vsel %vm13342_vm14, %v10894_v49, %v1910_v55  ;;  %v1912_v32 = vrot.slane %v1910_v55, 4  ;;  %v13491_v38 = vmul.f32 %v13274_v50, %v463_v17  ;;  %v1045_v0 = vld [vmem:[#allocation2 + $0x48] sm:$0xf]  ;;  %v411_v5 = vld [vmem:[#allocation2 + $0x50] sm:$0x1] }
  0xbd   : > { %v1430_v4 = vor.u32 %v1429_v23, %v1425_v22  ;;  %v1283_v42 = vld [vmem:[#allocation2 + $0x44] sm:$0x1]  ;;  %v1438_v45 = vshrl.u32 %v1281_v33, 16  ;;  %v1441_v40 = vshll.u32 %v1281_v33, 16  ;;  %v13498_v52 = vadd.f32 %v13281_v54, %v500_v26  ;;  %v1796_v15 = vld [vmem:[#allocation2 + $0x3c] sm:$0xe] }
  0xbe   : > { %v1426_v39 = vsel %vm13311_vm11, %v1421_v11, %v1425_v22  ;;  %v1914_v43 = vsel %vm13342_vm14, %v1912_v32, %v1913_v2  ;;  %v12649_v46 = vld [vmem:[#allocation2 + $0x3c] sm:$0xff]   ;;  %v13501_v53 = vmul.f32 %v13274_v50, %v464_v30  ;;  %v1457_v8 = vshll.u32 %v1283_v42, 16  ;;  %v1798_v18 = vld [vmem:[#allocation2 + $0x44] sm:$0x1]  ;;  %v358_v19 = vld [vmem:[#allocation2 + $0x54] sm:$0x1] }
  0xbf   : > { %v1431_v41 = vrot.slane %v1430_v4, 4  ;;  %v10910_v48 = vcombine.low %v1911_v31, %v1914_v43  ;;  %v1282_v51 = vld [vmem:[#allocation2 + $0x40] sm:$0xf]  ;;  %v1440_v61 = vrot.slane %v1438_v45, 4  ;;  %4906 = vmatprep.mubr.bf16.mxu1 %v12649_v46  ;;  %v1443_v7 = vrot.slane %v1441_v40, 5  ;;  %v465_v30 = vld [vmem:[%s13239_s21 + $0x90] sm:$0xff] }
  0xc0   : > { %v1447_v63 = vshll.u32 %v1282_v51, 16  ;;  %v1451_v3 = vshrl.u32 %v1282_v51, 16  ;;  %v775_v47 = vrot.slane %v773_v35, 7  ;;  %v1797_v9 = vld [vmem:[#allocation2 + $0x40] sm:$0xf]  ;;  %v781_v50 = vshrl.u32 %v11437_v34, 16 }
  0xc1   : > { %v1436_v56 = vsel %vm13311_vm11, %v1431_v41, %v1435_v62  ;;  %4907 = vmatmul.mubr.bf16.gmra.mrb[16].mxu1 %v10910_v48  ;;  %v784_v28 = vshll.u32 %v11437_v34, 16  ;;  %v1444_v13 = vor.u32 %v1443_v7, %v1440_v61  ;;  %v1459_v16 = vrot.slane %v1457_v8, 5  ;;  %v414_v57 = vld [vmem:[#allocation2 + $0x5c] sm:$0x1]  ;;  %v361_v26 = vld [vmem:[#allocation2 + $0x60] sm:$0x1] }
  0xc2   : > { %v10878_v6 = vcombine.low %v1426_v39, %v1436_v56  ;;  %v1449_v49 = vrot.slane %v1447_v63, 5  ;;  %v1453_v14 = vrot.slane %v1451_v3, 4  ;;  %v778_v17 = vor.u32 %v776_v36, %v775_v47  ;;  %v12654_v4 = vld [vmem:[#allocation2 + $0x3c] sm:$0xff]   ;;  %v417_v32 = vld [vmem:[#allocation2 + $0x68] sm:$0x1] }
  0xc3   : > { %v13506_v20 = vadd.f32 %v13281_v54, %v501_v29  ;;  %v779_v12 = vrot.slane %v775_v47, 4  ;;  %v13508_v22 = vrot.slane %v781_v50, 7  ;;  %v1917_v23 = vrot.slane %v1797_v9, 5  ;;  %v364_v33 = vld [vmem:[#allocation2 + $0x6c] sm:$0x1]  ;;  %v12678_v9 = vld [vmem:[#allocation8 + $0x180] sm:$0xff]  }
  0xc4   : > { %4745 = vmatprep.mubr.bf16.mxu0 %v10878_v6  ;;  %v1454_v21 = vor.u32 %v1453_v14, %v1449_v49  ;;  %v1445_v55 = vrot.slane %v1444_v13, 4  ;;  %v1046_v60 = vsel %vm13318_vm12, %v778_v17, %v1045_v0  ;;  %v10895_v62 = vrot.slane %v1796_v15, 9  ;;  %v12675_v34 = vld [vmem:[#allocation8 + $0x170] sm:$0xff]   ;;  %v13534_v56 = vld [vmem:[%s16189_s1] ss:$0 sm:$0xff] }
  0xc5   : > { %4746 = vmatmul.mubr.bf16.gmra.mrb[16].mxu0 %v12650_v59  ;;  %v412_v2 = vsel %vm13255_vm4, 0, %v411_v5  ;;  %v786_v54 = vor.u32 %v784_v28, %v13508_v22  ;;  %v788_v29 = vrot.slane %v13508_v22, 4  ;;  %1047 = vst [vmem:[#allocation2 + $0x48] sm:$0xf] %v1046_v60  ;;  %v1920_v31 = vrot.slane %v1798_v18, 5  ;;  %v12676_v43 = vld [vmem:[#allocation8 + $0x130] sm:$0xff]   ;;  %11727 = vmatprep.subr.bf16.mxu0 %v12675_v34 }
  0xc6   : > { %v1455_v11 = vrot.slane %v1454_v21, 4  ;;  %413 = vst [vmem:[#allocation2 + $0x50] sm:$0x1] %v412_v2  ;;  %v1450_v35 = vsel %vm13311_vm11, %v1445_v55, %v1449_v49  ;;  %v1919_v36 = vrot.slane %v1917_v23, 4  ;;  %v359_v39 = vsel %vm13250_vm3, 0, %v358_v19  ;;  %11728 = vmatpush3.bf16.msra.mxu0 %v12676_v43  ;;  %v466_v5 = vld [vmem:[%s13239_s21 + $0x98] sm:$0xff] }
  0xc7   : > { %v569_v41 = vmax.f32 %v13478_v10, 0.0  ;;  %v787_v45 = vsel %vm13330_vm13, %v779_v12, %v786_v54  ;;  %360 = vst [vmem:[#allocation2 + $0x54] sm:$0x1] %v359_v39  ;;  %v570_v46 = vmax.f32 %v13483_v58, 0.0  ;;  %v415_v48 = vsel %vm13255_vm4, 0, %v414_v57  ;;  %v12677_v58 = vld [vmem:[#allocation8 + $0x1c0] sm:$0xff]  }
  0xc8   : > { %v1460_v42 = vsel %vm13311_vm11, %v1455_v11, %v1459_v16  ;;  %1048 = vst [vmem:[#allocation2 + $0x4c] sm:$0xf] %v787_v45  ;;  %416 = vst [vmem:[#allocation2 + $0x5c] sm:$0x1] %v415_v48  ;;  %v362_v10 = vsel %vm13250_vm3, 0, %v361_v26  ;;  %v504_v59 = vmul.f32 %v13534_v56, %v465_v30  ;;  %v1918_v61 = vsel %vm13342_vm14, %v10895_v62, %v1917_v23  ;;  %v12679_v49 = vld [vmem:[#allocation8 + $0x1c8] sm:$0xff]  }
  0xc9   : > { %v10879_v51 = vcombine.low %v1450_v35, %v1460_v42  ;;  %v11438_v40 = vpack.c.bf16 %v569_v41, %v569_v41  ;;  %v11439_v63 = vpack.c.bf16 %v570_v46, %v570_v46  ;;  %363 = vst [vmem:[#allocation2 + $0x60] sm:$0x1] %v362_v10  ;;  %v571_v3 = vmax.f32 %v13498_v52, 0.0  ;;  %11827 = vmatprep.subr.bf16.mxu1 %v12677_v58  ;;  %v13553_v16 = vld [vmem:[%s16190_s2] ss:$0 sm:$0xff]  ;;  %v467_v39 = vld [vmem:[%s13239_s21 + $0xa0] sm:$0xff] }
  0xca   : > { %v572_v0 = vmax.f32 %v13506_v20, 0.0  ;;  %v418_v8 = vsel %vm13255_vm4, 0, %v417_v32  ;;  %v365_v47 = vsel %vm13250_vm3, 0, %v364_v33  ;;  %v1921_v14 = vsel %vm13342_vm14, %v1919_v36, %v1920_v31  ;;  %11828 = vmatpush3.bf16.msra.mxu1 %v12678_v9  ;;  %v468_v41 = vld [vmem:[%s13239_s21 + $0xa8] sm:$0xff] }
  0xcb   : > { %4753 = vmatprep.mubr.bf16.mxu0 %v10879_v51  ;;  %v790_v6 = vshrl.u32 %v11438_v40, 16  ;;  %v793_v7 = vshll.u32 %v11438_v40, 16  ;;  %v798_v52 = vshrl.u32 %v11439_v63, 16  ;;  %v801_v50 = vshll.u32 %v11439_v63, 16  ;;  %419 = vst [vmem:[#allocation2 + $0x68] sm:$0x1] %v418_v8  ;;  %11829 = vmatprep.subr.bf16.mxu1 %v12679_v49 }
  0xcc   : > { %v13548_v28 = vpack.c.bf16 %v571_v3, %v571_v3  ;;  %366 = vst [vmem:[#allocation2 + $0x6c] sm:$0x1] %v365_v47  ;;  %v1284_v13 = vld [vmem:[#allocation2 + $0x48] sm:$0xf]  ;;  %v13557_v17 = vadd.f32 %v13553_v16, %v13491_v38  ;;  %v13561_v18 = vadd.f32 %v13553_v16, %v13501_v53  ;;  %v10911_v22 = vcombine.low %v1918_v61, %v1921_v14  ;;  %v12681_v51 = vld [vmem:[#allocation8 + $0x188] sm:$0xff]  }
  0xcd   : > { %4754 = vmatmul.mubr.bf16.gmra.mrb[20].mxu0 %v12654_v4  ;;  %v1049_v15 = vld [vmem:[#allocation2 + $0x50] sm:$0x1]  ;;  %v1462_v20 = vshrl.u32 %v1284_v13, 16  ;;  %v1465_v21 = vshll.u32 %v1284_v13, 16  ;;  %v792_v12 = vrot.slane %v790_v6, 7  ;;  %v800_v23 = vrot.slane %v798_v52, 7 }
  0xce   : > { %v1050_v19 = vsel %vm13250_vm3, %v788_v29, %v1049_v15  ;;  %v1052_v57 = vld [vmem:[#allocation2 + $0x54] sm:$0xf]  ;;  %v1799_v55 = vld [vmem:[#allocation2 + $0x48] sm:$0xe]  ;;  %v807_v38 = vshrl.u32 %v13548_v28, 16  ;;  %v13567_v60 = vmul.f32 %v13534_v56, %v466_v5  ;;  %v11441_v30 = vpack.c.bf16 %v572_v0, %v572_v0  ;;  %11830 = vmatpush3.bf16.msra.mxu1 %v12681_v51 }
  0xcf   : > { %1051 = vst [vmem:[#allocation2 + $0x50] sm:$0x1] %v1050_v19  ;;  %v12653_v53 = vld [vmem:[#allocation2 + $0x48] sm:$0xff]   ;;  %v1464_v2 = vrot.slane %v1462_v20, 4  ;;  %v795_v26 = vor.u32 %v793_v7, %v792_v12  ;;  %v13570_v11 = vadd.f32 %v13553_v16, %v504_v59  ;;  %v1467_v54 = vrot.slane %v1465_v21, 5 }
  0xd0   : > { %v1285_v62 = vld [vmem:[#allocation2 + $0x4c] sm:$0xf]  ;;  %v796_v31 = vrot.slane %v792_v12, 4  ;;  %4914 = vmatprep.mubr.bf16.mxu1 %v12653_v53  ;;  %v803_v32 = vor.u32 %v801_v50, %v800_v23  ;;  %v805_v33 = vrot.slane %v800_v23, 4  ;;  %v10896_v36 = vrot.slane %v1799_v55, 9 }
  0xd1   : > { %v1471_v29 = vshll.u32 %v1285_v62, 16  ;;  %v1475_v4 = vshrl.u32 %v1285_v62, 16  ;;  %v1053_v34 = vsel %vm13318_vm12, %v795_v26, %v1052_v57  ;;  %v1800_v35 = vld [vmem:[#allocation2 + $0x4c] sm:$0xf]  ;;  %4915 = vmatmul.mubr.bf16.gmra.mrb[20].mxu1 %v10911_v22  ;;  %v1468_v43 = vor.u32 %v1467_v54, %v1464_v2  ;;  %v1056_v48 = vld [vmem:[#allocation2 + $0x5c] sm:$0x1] }
  0xd2   : > { %1054 = vst [vmem:[#allocation2 + $0x54] sm:$0xf] %v1053_v34  ;;  %v1924_v46 = vrot.slane %v1800_v35, 5  ;;  %v804_v40 = vsel %vm13330_vm13, %v796_v31, %v803_v32  ;;  %v1057_v10 = vsel %vm13250_vm3, %v805_v33, %v1056_v48  ;;  %v809_v59 = vrot.slane %v807_v38, 7  ;;  %v1059_v0 = vld [vmem:[#allocation2 + $0x60] sm:$0xf] }
  0xd3   : > { %v1473_v42 = vrot.slane %v1471_v29, 5  ;;  %v1477_v45 = vrot.slane %v1475_v4, 4  ;;  %v810_v58 = vshll.u32 %v13548_v28, 16  ;;  %v1469_v61 = vrot.slane %v1468_v43, 4  ;;  %1055 = vst [vmem:[#allocation2 + $0x58] sm:$0xf] %v804_v40 }
  0xd4   : > { %v1926_v3 = vrot.slane %v1924_v46, 4  ;;  %1058 = vst [vmem:[#allocation2 + $0x5c] sm:$0x1] %v1057_v10  ;;  %v420_v5 = vld [vmem:[#allocation2 + $0x74] sm:$0x1]  ;;  %v506_v6 = vmul.f32 %v13534_v56, %v467_v39  ;;  %v1925_v47 = vsel %vm13342_vm14, %v10896_v36, %v1924_v46  ;;  %v815_v49 = vshrl.u32 %v11441_v30, 16 }
  0xd5   : > { %v1478_v63 = vor.u32 %v1477_v45, %v1473_v42  ;;  %v812_v9 = vor.u32 %v810_v58, %v809_v59  ;;  %v13585_v14 = vmul.f32 %v13534_v56, %v468_v41  ;;  %v813_v15 = vrot.slane %v809_v59, 4  ;;  %v1063_v13 = vld [vmem:[#allocation2 + $0x68] sm:$0x1]  ;;  %v12685_v2 = vld [vmem:[#allocation8 + $0x1d8] sm:$0xff]  }
  0xd6   : > { %v1286_v7 = vld [vmem:[#allocation2 + $0x50] sm:$0x1]  ;;  %v12683_v19 = vld [vmem:[#allocation8 + $0x1d0] sm:$0xff]   ;;  %v1474_v20 = vsel %vm13311_vm11, %v1469_v61, %v1473_v42  ;;  %v817_v21 = vrot.slane %v815_v49, 7  ;;  %v818_v12 = vshll.u32 %v11441_v30, 16  ;;  %v573_v53 = vmax.f32 %v13557_v17, 0.0 }
  0xd7   : > { %v1801_v8 = vld [vmem:[#allocation2 + $0x50] sm:$0x1]  ;;  %v1479_v52 = vrot.slane %v1478_v63, 4  ;;  %v1481_v50 = vshll.u32 %v1286_v7, 16  ;;  %v1060_v22 = vsel %vm13318_vm12, %v812_v9, %v1059_v0  ;;  %v12684_v23 = vld [vmem:[#allocation8 + $0x190] sm:$0xff]   ;;  %v421_v62 = vsel %vm13255_vm4, 0, %v420_v5  ;;  %11831 = vmatprep.subr.bf16.mxu1 %v12683_v19 }
  0xd8   : > { %v1927_v28 = vrot.slane %v1801_v8, 5  ;;  %v12656_v55 = vld [vmem:[#allocation2 + $0x48] sm:$0xff]   ;;  %1061 = vst [vmem:[#allocation2 + $0x60] sm:$0xf] %v1060_v22  ;;  %v820_v30 = vor.u32 %v818_v12, %v817_v21  ;;  %v822_v54 = vrot.slane %v817_v21, 4  ;;  %v574_v29 = vmax.f32 %v13561_v18, 0.0  ;;  %11832 = vmatpush3.bf16.msra.mxu1 %v12684_v23 }
  0xd9   : > { %v1483_v57 = vrot.slane %v1481_v50, 5  ;;  %v1287_v26 = vld [vmem:[#allocation2 + $0x54] sm:$0xf]  ;;  %422 = vst [vmem:[#allocation2 + $0x74] sm:$0x1] %v421_v62  ;;  %v13599_v4 = vadd.f32 %v13553_v16, %v13567_v60  ;;  %v469_v35 = vld [vmem:[%s13239_s21 + $0xb0] sm:$0xff]  ;;  %11833 = vmatprep.subr.bf16.mxu1 %v12685_v2  ;;  %v11442_v59 = vpack.c.bf16 %v573_v53, %v573_v53  ;;  %v13611_v61 = vadd.f32 %v13553_v16, %v506_v6 }
  0xda   : > { %v1928_v38 = vsel %vm13342_vm14, %v1926_v3, %v1927_v28  ;;  %v1486_v32 = vshrl.u32 %v1287_v26, 16  ;;  %v1489_v33 = vshll.u32 %v1287_v26, 16  ;;  %v1802_v34 = vld [vmem:[#allocation2 + $0x54] sm:$0xe]  ;;  %v1288_v41 = vld [vmem:[#allocation2 + $0x58] sm:$0xf]  ;;  %v821_v18 = vsel %vm13330_vm13, %v813_v15, %v820_v30 }
  0xdb   : > { %v1484_v17 = vsel %vm13311_vm11, %v1479_v52, %v1483_v57  ;;  %v10912_v31 = vcombine.low %v1925_v47, %v1928_v38  ;;  %v12655_v39 = vld [vmem:[#allocation2 + $0x54] sm:$0xff]   ;;  %v10897_v43 = vrot.slane %v1802_v34, 9  ;;  %v1064_v60 = vsel %vm13250_vm3, %v822_v54, %v1063_v13  ;;  %v1289_v42 = vld [vmem:[#allocation2 + $0x5c] sm:$0x1]  ;;  %1062 = vst [vmem:[#allocation2 + $0x64] sm:$0xf] %v821_v18 }
  0xdc   : > { %v10880_v36 = vcombine.low %v1474_v20, %v1484_v17  ;;  %v1488_v45 = vrot.slane %v1486_v32, 4  ;;  %v1491_v46 = vrot.slane %v1489_v33, 5  ;;  %v1495_v48 = vshll.u32 %v1288_v41, 16  ;;  %1065 = vst [vmem:[#allocation2 + $0x68] sm:$0x1] %v1064_v60  ;;  %4922 = vmatprep.mubr.bf16.mxu1 %v12655_v39  ;;  %v470_v13 = vld [vmem:[%s13239_s21 + $0xb8] sm:$0xff] }
  0xdd   : > { %v1499_v51 = vshrl.u32 %v1288_v41, 16  ;;  %v1505_v40 = vshll.u32 %v1289_v42, 16  ;;  %v1803_v10 = vld [vmem:[#allocation2 + $0x58] sm:$0xf]  ;;  %v13608_v58 = vpack.c.bf16 %v574_v29, %v574_v29  ;;  %4923 = vmatmul.mubr.bf16.gmra.mrb[24].mxu1 %v10912_v31  ;;  %v1804_v5 = vld [vmem:[#allocation2 + $0x5c] sm:$0x1]  ;;  %v13615_v49 = vadd.f32 %v13553_v16, %v13585_v14 }
  0xde   : > { %4761 = vmatprep.mubr.bf16.mxu0 %v10880_v36  ;;  %v1492_v63 = vor.u32 %v1491_v46, %v1488_v45  ;;  %v1497_v3 = vrot.slane %v1495_v48, 5  ;;  %v1931_v7 = vrot.slane %v1803_v10, 5  ;;  %v1934_v47 = vrot.slane %v1804_v5, 5  ;;  %v471_v19 = vld [vmem:[%s13239_s21 + $0xc0] sm:$0xff]  ;;  %v12687_v42 = vld [vmem:[#allocation8 + $0x198] sm:$0xff]   ;;  %v472_v10 = vld [vmem:[%s13239_s21 + $0xc8] sm:$0xff] }
  0xdf   : > { %4762 = vmatmul.mubr.bf16.gmra.mrb[24].mxu0 %v12656_v55  ;;  %v1501_v0 = vrot.slane %v1499_v51, 4  ;;  %v1507_v8 = vrot.slane %v1505_v40, 5  ;;  %v1290_v9 = vld [vmem:[#allocation2 + $0x60] sm:$0xf]  ;;  %v13618_v52 = vmul.f32 %v13534_v56, %v469_v35  ;;  %v824_v12 = vshrl.u32 %v11442_v59, 16  ;;  %v12660_v17 = vld [vmem:[#allocation2 + $0x54] sm:$0xff]   ;;  %11834 = vmatpush3.bf16.msra.mxu1 %v12687_v42 }
  0xe0   : > { %v1493_v6 = vrot.slane %v1492_v63, 4  ;;  %v1932_v28 = vsel %vm13342_vm14, %v10897_v43, %v1931_v7  ;;  %v1933_v15 = vrot.slane %v1931_v7, 4  ;;  %v1510_v20 = vshrl.u32 %v1290_v9, 16  ;;  %v13629_v26 = vld [vmem:[#allocation2 + $0x60] sm:$0xe] }
  0xe1   : > { %v1502_v50 = vor.u32 %v1501_v0, %v1497_v3  ;;  %v1513_v21 = vshll.u32 %v1290_v9, 16  ;;  %v827_v22 = vshll.u32 %v11442_v59, 16  ;;  %v832_v55 = vshrl.u32 %v13608_v58, 16  ;;  %v1066_v35 = vld [vmem:[#allocation2 + $0x6c] sm:$0xf]  ;;  %v12689_v59 = vld [vmem:[#allocation8 + $0x178] sm:$0xff]  }
  0xe2   : > { %v1498_v23 = vsel %vm13311_vm11, %v1493_v6, %v1497_v3  ;;  %v1935_v57 = vsel %vm13342_vm14, %v1933_v15, %v1934_v47  ;;  %v12659_v38 = vld [vmem:[#allocation2 + $0x60] sm:$0xff]   ;;  %v1512_v2 = vrot.slane %v1510_v20, 4  ;;  %v13632_v30 = vmul.f32 %v13534_v56, %v470_v13  ;;  %v1070_v36 = vld [vmem:[#allocation2 + $0x74] sm:$0x1]  ;;  %v367_v60 = vld [vmem:[#allocation2 + $0x78] sm:$0x1]  ;;  %11729 = vmatprep.subr.bf16.mxu0 %v12689_v59 }
  0xe3   : > { %v1503_v14 = vrot.slane %v1502_v50, 4  ;;  %v10913_v53 = vcombine.low %v1932_v28, %v1935_v57  ;;  %v1291_v62 = vld [vmem:[#allocation2 + $0x64] sm:$0xf]  ;;  %v13635_v54 = vmul.f32 %v13534_v56, %v471_v19  ;;  %v1292_v31 = vld [vmem:[#allocation2 + $0x68] sm:$0x1]  ;;  %v1515_v32 = vrot.slane %v1513_v21, 5  ;;  %4930 = vmatprep.mubr.bf16.mxu1 %v12659_v38 }
  0xe4   : > { %v1519_v33 = vshll.u32 %v1291_v62, 16  ;;  %v1523_v34 = vshrl.u32 %v1291_v62, 16  ;;  %v1529_v41 = vshll.u32 %v1292_v31, 16  ;;  %v826_v18 = vrot.slane %v824_v12, 7  ;;  %v1806_v40 = vld [vmem:[#allocation2 + $0x64] sm:$0xf] }
  0xe5   : > { %v1508_v29 = vsel %vm13311_vm11, %v1503_v14, %v1507_v8  ;;  %v834_v43 = vrot.slane %v832_v55, 7  ;;  %4931 = vmatmul.mubr.bf16.gmra.mrb[28].mxu1 %v10913_v53  ;;  %v1516_v45 = vor.u32 %v1515_v32, %v1512_v2  ;;  %v835_v51 = vshll.u32 %v13608_v58, 16  ;;  %v1807_v7 = vld [vmem:[#allocation2 + $0x68] sm:$0x1]  ;;  %v423_v8 = vld [vmem:[#allocation2 + $0x80] sm:$0x1] }
  0xe6   : > { %v10881_v39 = vcombine.low %v1498_v23, %v1508_v29  ;;  %v1521_v46 = vrot.slane %v1519_v33, 5  ;;  %v1525_v48 = vrot.slane %v1523_v34, 4  ;;  %v1531_v63 = vrot.slane %v1529_v41, 5  ;;  %v370_v47 = vld [vmem:[#allocation2 + $0x84] sm:$0x1]  ;;  %v12690_v9 = vld [vmem:[#allocation8 + $0x138] sm:$0xff]  }
  0xe7   : > { %v829_v3 = vor.u32 %v827_v22, %v826_v18  ;;  %v830_v0 = vrot.slane %v826_v18, 4  ;;  %v839_v5 = vrot.slane %v834_v43, 4  ;;  %v1517_v6 = vrot.slane %v1516_v45, 4  ;;  %11730 = vmatpush3.bf16.msra.mxu0 %v12690_v9  ;;  %v12662_v23 = vld [vmem:[#allocation2 + $0x60] sm:$0xff]   ;;  %v426_v57 = vld [vmem:[#allocation2 + $0x8c] sm:$0x1] }
  0xe8   : > { %4769 = vmatprep.mubr.bf16.mxu0 %v10881_v39  ;;  %v1526_v50 = vor.u32 %v1525_v48, %v1521_v46  ;;  %v837_v28 = vor.u32 %v835_v51, %v834_v43  ;;  %v10898_v15 = vrot.slane %v13629_v26, 9  ;;  %v1938_v13 = vrot.slane %v1806_v40, 5  ;;  %v373_v62 = vld [vmem:[#allocation2 + $0x90] sm:$0x1]  ;;  %v12691_v26 = vld [vmem:[#allocation8 + $0x1e0] sm:$0xff]   ;;  %v12693_v48 = vld [vmem:[#allocation8 + $0x1e8] sm:$0xff]  }
  0xe9   : > { %4770 = vmatmul.mubr.bf16.gmra.mrb[28].mxu0 %v12660_v17  ;;  %v1067_v58 = vsel %vm13318_vm12, %v829_v3, %v1066_v35  ;;  %v1941_v19 = vrot.slane %v1807_v7, 5  ;;  %v1071_v20 = vsel %vm13250_vm3, %v839_v5, %v1070_v36  ;;  %v1522_v21 = vsel %vm13311_vm11, %v1517_v6, %v1521_v46  ;;  %v12692_v33 = vld [vmem:[#allocation8 + $0x1a0] sm:$0xff]   ;;  %11835 = vmatprep.subr.bf16.mxu1 %v12691_v26 }
  0xea   : > { %v1527_v12 = vrot.slane %v1526_v50, 4  ;;  %v838_v22 = vsel %vm13330_vm13, %v830_v0, %v837_v28  ;;  %1068 = vst [vmem:[#allocation2 + $0x6c] sm:$0xf] %v1067_v58  ;;  %1072 = vst [vmem:[#allocation2 + $0x74] sm:$0x1] %v1071_v20  ;;  %v368_v14 = vsel %vm13250_vm3, 0, %v367_v60  ;;  %v511_v2 = vmul.f32 %v13534_v56, %v472_v10  ;;  %11836 = vmatpush3.bf16.msra.mxu1 %v12692_v33 }
  0xeb   : > { %1069 = vst [vmem:[#allocation2 + $0x70] sm:$0xf] %v838_v22  ;;  %v1940_v55 = vrot.slane %v1938_v13, 4  ;;  %369 = vst [vmem:[#allocation2 + $0x78] sm:$0x1] %v368_v14  ;;  %v575_v38 = vmax.f32 %v13570_v11, 0.0  ;;  %v1939_v11 = vsel %vm13342_vm14, %v10898_v15, %v1938_v13  ;;  %v13676_v10 = vadd.f32 %v13553_v16, %v13618_v52  ;;  %11837 = vmatprep.subr.bf16.mxu1 %v12693_v48 }
  0xec   : > { %v576_v53 = vmax.f32 %v13599_v4, 0.0  ;;  %v1532_v29 = vsel %vm13311_vm11, %v1527_v12, %v1531_v63  ;;  %v424_v17 = vsel %vm13255_vm4, 0, %v423_v8  ;;  %v371_v31 = vsel %vm13250_vm3, 0, %v370_v47  ;;  %v429_v33 = vld [vmem:[#allocation2 + $0x98] sm:$0x1] }
  0xed   : > { %v577_v32 = vmax.f32 %v13611_v61, 0.0  ;;  %v10882_v34 = vcombine.low %v1522_v21, %v1532_v29  ;;  %v11444_v4 = vpack.c.bf16 %v575_v38, %v575_v38  ;;  %425 = vst [vmem:[#allocation2 + $0x80] sm:$0x1] %v424_v17  ;;  %372 = vst [vmem:[#allocation2 + $0x84] sm:$0x1] %v371_v31  ;;  %v1942_v36 = vsel %vm13342_vm14, %v1940_v55, %v1941_v19 }
  0xee   : > { %v11445_v35 = vpack.c.bf16 %v576_v53, %v576_v53  ;;  %v578_v39 = vmax.f32 %v13615_v49, 0.0  ;;  %v427_v61 = vsel %vm13255_vm4, 0, %v426_v57  ;;  %v374_v46 = vsel %vm13250_vm3, 0, %v373_v62 }
  0xef   : > { %v13667_v41 = vpack.c.bf16 %v577_v32, %v577_v32  ;;  %4777 = vmatprep.mubr.bf16.mxu0 %v10882_v34  ;;  %v841_v18 = vshrl.u32 %v11444_v4, 16  ;;  %v844_v43 = vshll.u32 %v11444_v4, 16  ;;  %428 = vst [vmem:[#allocation2 + $0x8c] sm:$0x1] %v427_v61  ;;  %v10914_v49 = vcombine.low %v1939_v11, %v1942_v36  ;;  %375 = vst [vmem:[#allocation2 + $0x90] sm:$0x1] %v374_v46 }
  0xf0   : > { %v849_v60 = vshrl.u32 %v11445_v35, 16  ;;  %v852_v42 = vshll.u32 %v11445_v35, 16  ;;  %v13680_v59 = vadd.f32 %v13553_v16, %v13632_v30  ;;  %v13682_v5 = vpack.c.bf16 %v578_v39, %v578_v39 }
  0xf1   : > { %4778 = vmatmul.mubr.bf16.gmra.mrb[32].mxu0 %v12662_v23  ;;  %v858_v45 = vshrl.u32 %v13667_v41, 16  ;;  %v1293_v51 = vld [vmem:[#allocation2 + $0x6c] sm:$0xf]  ;;  %v1295_v40 = vld [vmem:[#allocation2 + $0x74] sm:$0x1]  ;;  %v13686_v7 = vadd.f32 %v13553_v16, %v13635_v54  ;;  %v13689_v8 = vadd.f32 %v13553_v16, %v511_v2  ;;  %v843_v28 = vrot.slane %v841_v18, 7 }
  0xf2   : > { %v12661_v63 = vld [vmem:[#allocation2 + $0x6c] sm:$0xff]   ;;  %v1534_v0 = vshrl.u32 %v1293_v51, 16  ;;  %v1537_v47 = vshll.u32 %v1293_v51, 16  ;;  %v1553_v6 = vshll.u32 %v1295_v40, 16  ;;  %v1073_v50 = vld [vmem:[#allocation2 + $0x78] sm:$0xf] }
  0xf3   : > { %v1294_v3 = vld [vmem:[#allocation2 + $0x70] sm:$0xf]  ;;  %4938 = vmatprep.mubr.bf16.mxu1 %v12661_v63  ;;  %v851_v15 = vrot.slane %v849_v60, 7  ;;  %v861_v58 = vshll.u32 %v13667_v41, 16  ;;  %v846_v21 = vor.u32 %v844_v43, %v843_v28  ;;  %v847_v12 = vrot.slane %v843_v28, 4  ;;  %v12695_v51 = vld [vmem:[#allocation8 + $0x1a8] sm:$0xff]  }
  0xf4   : > { %v1543_v52 = vshll.u32 %v1294_v3, 16  ;;  %v1547_v9 = vshrl.u32 %v1294_v3, 16  ;;  %v1536_v30 = vrot.slane %v1534_v0, 4  ;;  %4939 = vmatmul.mubr.bf16.gmra.mrb[32].mxu1 %v10914_v49  ;;  %v1539_v13 = vrot.slane %v1537_v47, 5  ;;  %v1808_v14 = vld [vmem:[#allocation2 + $0x6c] sm:$0xe] }
  0xf5   : > { %v1555_v20 = vrot.slane %v1553_v6, 5  ;;  %v854_v22 = vor.u32 %v852_v42, %v851_v15  ;;  %v856_v23 = vrot.slane %v851_v15, 4  ;;  %v1809_v57 = vld [vmem:[#allocation2 + $0x70] sm:$0xf]  ;;  %v1810_v53 = vld [vmem:[#allocation2 + $0x74] sm:$0x1]  ;;  %v1074_v17 = vsel %vm13318_vm12, %v846_v21, %v1073_v50  ;;  %11838 = vmatpush3.bf16.msra.mxu1 %v12695_v51 }
  0xf6   : > { %v1545_v19 = vrot.slane %v1543_v52, 5  ;;  %v1549_v54 = vrot.slane %v1547_v9, 4  ;;  %v1540_v55 = vor.u32 %v1539_v13, %v1536_v30  ;;  %v10899_v62 = vrot.slane %v1808_v14, 9  ;;  %v1077_v26 = vld [vmem:[#allocation2 + $0x80] sm:$0x1]  ;;  %v12666_v4 = vld [vmem:[#allocation2 + $0x6c] sm:$0xff]  }
  0xf7   : > { %v1945_v2 = vrot.slane %v1809_v57, 5  ;;  %v855_v29 = vsel %vm13330_vm13, %v847_v12, %v854_v22  ;;  %v1948_v31 = vrot.slane %v1810_v53, 5  ;;  %v1078_v32 = vsel %vm13250_vm3, %v856_v23, %v1077_v26  ;;  %1075 = vst [vmem:[#allocation2 + $0x78] sm:$0xf] %v1074_v17  ;;  %v1080_v39 = vld [vmem:[#allocation2 + $0x84] sm:$0xf] }
  0xf8   : > { %v1550_v38 = vor.u32 %v1549_v54, %v1545_v19  ;;  %v1541_v34 = vrot.slane %v1540_v55, 4  ;;  %1076 = vst [vmem:[#allocation2 + $0x7c] sm:$0xf] %v855_v29  ;;  %1079 = vst [vmem:[#allocation2 + $0x80] sm:$0x1] %v1078_v32  ;;  %v860_v61 = vrot.slane %v858_v45, 7 }
  0xf9   : > { %v1946_v35 = vsel %vm13342_vm14, %v10899_v62, %v1945_v2  ;;  %v1947_v36 = vrot.slane %v1945_v2, 4  ;;  %v376_v41 = vld [vmem:[#allocation2 + $0x9c] sm:$0x1]  ;;  %v866_v18 = vshrl.u32 %v13682_v5, 16  ;;  %v869_v43 = vshll.u32 %v13682_v5, 16  ;;  %v12697_v0 = vld [vmem:[#allocation8 + $0x1f0] sm:$0xff]  }
  0xfa   : > { %v1551_v11 = vrot.slane %v1550_v38, 4  ;;  %v579_v60 = vmax.f32 %v13676_v10, 0.0  ;;  %v1546_v42 = vsel %vm13311_vm11, %v1541_v34, %v1545_v19  ;;  %v580_v49 = vmax.f32 %v13680_v59, 0.0  ;;  %v1084_v3 = vld [vmem:[#allocation2 + $0x8c] sm:$0x1]  ;;  %v474_v28 = vld [vmem:[%s13239_s21 + $0xd8] sm:$0xff]  ;;  %11839 = vmatprep.subr.bf16.mxu1 %v12697_v0 }
  0xfb   : > { %v1949_v48 = vsel %vm13342_vm14, %v1947_v36, %v1948_v31  ;;  %v863_v45 = vor.u32 %v861_v58, %v860_v61  ;;  %v864_v63 = vrot.slane %v860_v61, 4  ;;  %v868_v10 = vrot.slane %v866_v18, 7  ;;  %v473_v30 = vld [vmem:[%s13239_s21 + $0xd0] sm:$0xff] }
  0xfc   : > { %v1556_v46 = vsel %vm13311_vm11, %v1551_v11, %v1555_v20  ;;  %v13710_v5 = vpack.c.bf16 %v579_v60, %v579_v60  ;;  %v13712_v47 = vpack.c.bf16 %v580_v49, %v580_v49  ;;  %v430_v52 = vsel %vm13255_vm4, 0, %v429_v33  ;;  %v12698_v15 = vld [vmem:[#allocation8 + $0x1b0] sm:$0xff]   ;;  %v12699_v20 = vld [vmem:[#allocation8 + $0x1f8] sm:$0xff]  }
  0xfd   : > { %v10883_v40 = vcombine.low %v1546_v42, %v1556_v46  ;;  %v10915_v9 = vcombine.low %v1946_v35, %v1949_v48  ;;  %v1081_v59 = vsel %vm13318_vm12, %v863_v45, %v1080_v39  ;;  %431 = vst [vmem:[#allocation2 + $0x98] sm:$0x1] %v430_v52  ;;  %v377_v6 = vsel %vm13250_vm3, 0, %v376_v41  ;;  %11840 = vmatpush3.bf16.msra.mxu1 %v12698_v15  ;;  %v12700_v45 = vld [vmem:[#allocation8 + $0x1b8] sm:$0xff]   ;;  %v13741_v52 = vld [vmem:[#allocation8 + $0x200] sm:$0xff]  }
  0xfe   : > { %v581_v50 = vmax.f32 %v13686_v7, 0.0  ;;  %v871_v58 = vor.u32 %v869_v43, %v868_v10  ;;  %v873_v13 = vrot.slane %v868_v10, 4  ;;  %1082 = vst [vmem:[#allocation2 + $0x84] sm:$0xf] %v1081_v59  ;;  %v875_v19 = vshrl.u32 %v13710_v5, 16  ;;  %11841 = vmatprep.subr.bf16.mxu1 %v12699_v20  ;;  %12435 = vmatprep.subr.bf16.mxu0 %v13741_v52 }
  0xff   : > { %4785 = vmatprep.mubr.bf16.mxu0 %v10883_v40  ;;  %378 = vst [vmem:[#allocation2 + $0x9c] sm:$0x1] %v377_v6  ;;  %v582_v54 = vmax.f32 %v13689_v8, 0.0  ;;  %v12665_v21 = vld [vmem:[#allocation2 + $0x78] sm:$0xff]   ;;  %v883_v12 = vshrl.u32 %v13712_v47, 16  ;;  %v878_v17 = vshll.u32 %v13710_v5, 16  ;;  %v512_v31 = vmul.f32 %v13534_v56, %v473_v30 }
 0x100   : > { %4786 = vmatmul.mubr.bf16.gmra.mrb[36].mxu0 %v12666_v4  ;;  %v1296_v22 = vld [vmem:[#allocation2 + $0x78] sm:$0xf]  ;;  %v1297_v23 = vld [vmem:[#allocation2 + $0x7c] sm:$0xf]  ;;  %v1298_v14 = vld [vmem:[#allocation2 + $0x80] sm:$0x1]  ;;  %v872_v57 = vsel %vm13330_vm13, %v864_v63, %v871_v58  ;;  %v1085_v55 = vsel %vm13250_vm3, %v873_v13, %v1084_v3  ;;  %4946 = vmatprep.mubr.bf16.mxu1 %v12665_v21  ;;  %v13733_v32 = vmul.f32 %v13534_v56, %v474_v28 }
 0x101   : > { %v1558_v38 = vshrl.u32 %v1296_v22, 16  ;;  %v1561_v53 = vshll.u32 %v1296_v22, 16  ;;  %v1567_v62 = vshll.u32 %v1297_v23, 16  ;;  %v1571_v2 = vshrl.u32 %v1297_v23, 16  ;;  %1083 = vst [vmem:[#allocation2 + $0x88] sm:$0xf] %v872_v57  ;;  %4947 = vmatmul.mubr.bf16.gmra.mrb[36].mxu1 %v10915_v9 }
 0x102   : > { %1086 = vst [vmem:[#allocation2 + $0x8c] sm:$0x1] %v1085_v55  ;;  %v1577_v26 = vshll.u32 %v1298_v14, 16  ;;  %v1811_v29 = vld [vmem:[#allocation2 + $0x78] sm:$0xe]  ;;  %v13735_v18 = vrot.slane %v875_v19, 7  ;;  %v11450_v15 = vpack.c.bf16 %v581_v50, %v581_v50  ;;  %v13749_v58 = vadd.f32 %v13553_v16, %v512_v31  ;;  %11842 = vmatpush3.bf16.msra.mxu1 %v12700_v45 }
 0x103   : > { %v1560_v33 = vrot.slane %v1558_v38, 4  ;;  %v1563_v34 = vrot.slane %v1561_v53, 5  ;;  %v1569_v11 = vrot.slane %v1567_v62, 5  ;;  %v1573_v4 = vrot.slane %v1571_v2, 4  ;;  %v1812_v35 = vld [vmem:[#allocation2 + $0x7c] sm:$0xf] }
 0x104   : > { %v1579_v36 = vrot.slane %v1577_v26, 5  ;;  %v1813_v39 = vld [vmem:[#allocation2 + $0x80] sm:$0x1]  ;;  %v10900_v41 = vrot.slane %v1811_v29, 9  ;;  %v1952_v61 = vrot.slane %v1812_v35, 5  ;;  %v885_v48 = vrot.slane %v883_v12, 7 }
 0x105   : > { %v1564_v43 = vor.u32 %v1563_v34, %v1560_v33  ;;  %v1574_v60 = vor.u32 %v1573_v4, %v1569_v11  ;;  %v1955_v42 = vrot.slane %v1813_v39, 5  ;;  %v1299_v46 = vld [vmem:[#allocation2 + $0x84] sm:$0xf]  ;;  %v880_v0 = vor.u32 %v878_v17, %v13735_v18  ;;  %v1087_v5 = vld [vmem:[#allocation2 + $0x90] sm:$0xf]  ;;  %v12668_v20 = vld [vmem:[#allocation2 + $0x78] sm:$0xff]  }
 0x106   : > { %v1953_v56 = vsel %vm13342_vm14, %v10900_v41, %v1952_v61  ;;  %v1954_v49 = vrot.slane %v1952_v61, 4  ;;  %v1582_v51 = vshrl.u32 %v1299_v46, 16  ;;  %v1585_v40 = vshll.u32 %v1299_v46, 16  ;;  %v1814_v28 = vld [vmem:[#allocation2 + $0x84] sm:$0xe] }
 0x107   : > { %v1565_v63 = vrot.slane %v1564_v43, 4  ;;  %v1575_v3 = vrot.slane %v1574_v60, 4  ;;  %v881_v10 = vrot.slane %v13735_v18, 4  ;;  %v886_v38 = vshll.u32 %v13712_v47, 16  ;;  %v1091_v2 = vld [vmem:[#allocation2 + $0x98] sm:$0x1] }
 0x108   : > { %v12667_v9 = vld [vmem:[#allocation2 + $0x84] sm:$0xff]   ;;  %v1956_v59 = vsel %vm13342_vm14, %v1954_v49, %v1955_v42  ;;  %v1584_v30 = vrot.slane %v1582_v51, 4  ;;  %v1587_v22 = vrot.slane %v1585_v40, 5  ;;  %v890_v53 = vrot.slane %v885_v48, 4  ;;  %v1094_v51 = vld [vmem:[#allocation2 + $0x9c] sm:$0xf] }
 0x109   : > { %v1300_v6 = vld [vmem:[#allocation2 + $0x88] sm:$0xf]  ;;  %v1570_v13 = vsel %vm13311_vm11, %v1565_v63, %v1569_v11  ;;  %v1580_v19 = vsel %vm13311_vm11, %v1575_v3, %v1579_v36  ;;  %v10916_v21 = vcombine.low %v1953_v56, %v1956_v59  ;;  %v1301_v12 = vld [vmem:[#allocation2 + $0x8c] sm:$0x1]  ;;  %4954 = vmatprep.mubr.bf16.mxu1 %v12667_v9  ;;  %v1088_v62 = vsel %vm13318_vm12, %v880_v0, %v1087_v5  ;;  %v432_v34 = vld [vmem:[#allocation2 + $0xa4] sm:$0x1] }
 0x10a   : > { %v10884_v23 = vcombine.low %v1570_v13, %v1580_v19  ;;  %v1591_v7 = vshll.u32 %v1300_v6, 16  ;;  %v1595_v50 = vshrl.u32 %v1300_v6, 16  ;;  %v1601_v14 = vshll.u32 %v1301_v12, 16  ;;  %v1815_v57 = vld [vmem:[#allocation2 + $0x88] sm:$0xf] }
 0x10b   : > { %4955 = vmatmul.mubr.bf16.gmra.mrb[40].mxu1 %v10916_v21  ;;  %v1588_v55 = vor.u32 %v1587_v22, %v1584_v30  ;;  %1089 = vst [vmem:[#allocation2 + $0x90] sm:$0xf] %v1088_v62  ;;  %v1816_v31 = vld [vmem:[#allocation2 + $0x8c] sm:$0x1]  ;;  %v11451_v33 = vpack.c.bf16 %v582_v54, %v582_v54  ;;  %v379_v11 = vld [vmem:[#allocation2 + $0xa8] sm:$0x1]  ;;  %v888_v47 = vor.u32 %v886_v38, %v885_v48 }
 0x10c   : > { %4793 = vmatprep.mubr.bf16.mxu0 %v10884_v23  ;;  %v1593_v26 = vrot.slane %v1591_v7, 5  ;;  %v1597_v29 = vrot.slane %v1595_v50, 4  ;;  %v1603_v17 = vrot.slane %v1601_v14, 5  ;;  %v10901_v35 = vrot.slane %v1814_v28, 9  ;;  %v475_v22 = vld [vmem:[%s13239_s21 + $0xe0] sm:$0xff]  ;;  %v476_v23 = vld [vmem:[%s13239_s21 + $0xe8] sm:$0xff] }
 0x10d   : > { %4794 = vmatmul.mubr.bf16.gmra.mrb[40].mxu0 %v12668_v20  ;;  %v1589_v4 = vrot.slane %v1588_v55, 4  ;;  %v1959_v36 = vrot.slane %v1815_v57, 5  ;;  %v1092_v41 = vsel %vm13250_vm3, %v890_v53, %v1091_v2  ;;  %v892_v61 = vshrl.u32 %v11450_v15, 16 }
 0x10e   : > { %v1598_v39 = vor.u32 %v1597_v29, %v1593_v26  ;;  %v895_v18 = vshll.u32 %v11450_v15, 16  ;;  %v889_v43 = vsel %vm13330_vm13, %v881_v10, %v888_v47  ;;  %v1962_v8 = vrot.slane %v1816_v31, 5  ;;  %1093 = vst [vmem:[#allocation2 + $0x98] sm:$0x1] %v1092_v41 }
 0x10f   : > { %v1961_v60 = vrot.slane %v1959_v36, 4  ;;  %v552_v54 = vadd.f32 %v13553_v16, %v13733_v32  ;;  %v1594_v42 = vsel %vm13311_vm11, %v1589_v4, %v1593_v26  ;;  %1090 = vst [vmem:[#allocation2 + $0x94] sm:$0xf] %v889_v43  ;;  %v894_v48 = vrot.slane %v892_v61, 7  ;;  %v12672_v32 = vld [vmem:[#allocation2 + $0x84] sm:$0xff]  }
 0x110   : > { %v1599_v46 = vrot.slane %v1598_v39, 4  ;;  %v900_v56 = vshrl.u32 %v11451_v33, 16  ;;  %v903_v49 = vshll.u32 %v11451_v33, 16  ;;  %v433_v40 = vsel %vm13255_vm4, 0, %v432_v34 }
 0x111   : > { %v380_v45 = vsel %vm13250_vm3, 0, %v379_v11  ;;  %v583_v63 = vmax.f32 %v13749_v58, 0.0  ;;  %v1960_v3 = vsel %vm13342_vm14, %v10901_v35, %v1959_v36  ;;  %v897_v0 = vor.u32 %v895_v18, %v894_v48  ;;  %434 = vst [vmem:[#allocation2 + $0xa4] sm:$0x1] %v433_v40  ;;  %v13790_v35 = vld [vmem:[%s16189_s1] ss:$0 sm:$0xff] }
 0x112   : > { %v1604_v16 = vsel %vm13311_vm11, %v1599_v46, %v1603_v17  ;;  %v898_v10 = vrot.slane %v894_v48, 4  ;;  %381 = vst [vmem:[#allocation2 + $0xa8] sm:$0x1] %v380_v45  ;;  %v1963_v9 = vsel %vm13342_vm14, %v1961_v60, %v1962_v8  ;;  %v1302_v59 = vld [vmem:[#allocation2 + $0x90] sm:$0xf]  ;;  %v902_v6 = vrot.slane %v900_v56, 7 }
 0x113   : > { %v10885_v5 = vcombine.low %v1594_v42, %v1604_v16  ;;  %v584_v30 = vmax.f32 %v552_v54, 0.0  ;;  %v1606_v28 = vshrl.u32 %v1302_v59, 16  ;;  %v1609_v15 = vshll.u32 %v1302_v59, 16  ;;  %v1817_v13 = vld [vmem:[#allocation2 + $0x90] sm:$0xe] }
 0x114   : > { %v1095_v58 = vsel %vm13318_vm12, %v897_v0, %v1094_v51  ;;  %v905_v19 = vor.u32 %v903_v49, %v902_v6  ;;  %v907_v20 = vrot.slane %v902_v6, 4  ;;  %v10902_v21 = vrot.slane %v1817_v13, 9  ;;  %v435_v59 = vld [vmem:[#allocation2 + $0xb0] sm:$0x1]  ;;  %v382_v6 = vld [vmem:[#allocation2 + $0xb4] sm:$0x1] }
 0x115   : > { %4801 = vmatprep.mubr.bf16.mxu0 %v10885_v5  ;;  %1096 = vst [vmem:[#allocation2 + $0x9c] sm:$0xf] %v1095_v58  ;;  %v11452_v12 = vpack.c.bf16 %v583_v63, %v583_v63  ;;  %v10917_v7 = vcombine.low %v1960_v3, %v1963_v9  ;;  %v1304_v50 = vld [vmem:[#allocation2 + $0x98] sm:$0x1]  ;;  %v1608_v14 = vrot.slane %v1606_v28, 4  ;;  %v1611_v57 = vrot.slane %v1609_v15, 5 }
 0x116   : > { %4802 = vmatmul.mubr.bf16.gmra.mrb[44].mxu0 %v12672_v32  ;;  %v1819_v55 = vld [vmem:[#allocation2 + $0x98] sm:$0x1]  ;;  %v12671_v38 = vld [vmem:[#allocation2 + $0x90] sm:$0xff]   ;;  %v1625_v62 = vshll.u32 %v1304_v50, 16  ;;  %v906_v2 = vsel %vm13330_vm13, %v898_v10, %v905_v19  ;;  %v11453_v26 = vpack.c.bf16 %v584_v30, %v584_v30  ;;  %v514_v36 = vmul.f32 %v13790_v35, %v475_v22  ;;  %v477_v30 = vld [vmem:[%s13239_s21 + $0xf0] sm:$0xff] }
 0x117   : > { %v1303_v53 = vld [vmem:[#allocation2 + $0x94] sm:$0xf]  ;;  %v1612_v29 = vor.u32 %v1611_v57, %v1608_v14  ;;  %1097 = vst [vmem:[#allocation2 + $0xa0] sm:$0xf] %v906_v2  ;;  %v1969_v33 = vrot.slane %v1819_v55, 5  ;;  %4962 = vmatprep.mubr.bf16.mxu1 %v12671_v38  ;;  %v909_v47 = vshrl.u32 %v11452_v12, 16  ;;  %v515_v39 = vmul.f32 %v13790_v35, %v476_v23 }
 0x118   : > { %v1615_v17 = vshll.u32 %v1303_v53, 16  ;;  %v1619_v31 = vshrl.u32 %v1303_v53, 16  ;;  %v1627_v34 = vrot.slane %v1625_v62, 5  ;;  %v1818_v11 = vld [vmem:[#allocation2 + $0x94] sm:$0xf]  ;;  %4963 = vmatmul.mubr.bf16.gmra.mrb[44].mxu1 %v10917_v7  ;;  %v912_v54 = vshll.u32 %v11452_v12, 16 }
 0x119   : > { %v1098_v4 = vld [vmem:[#allocation2 + $0xa4] sm:$0x1]  ;;  %v1613_v41 = vrot.slane %v1612_v29, 4  ;;  %v1966_v43 = vrot.slane %v1818_v11, 5  ;;  %v911_v8 = vrot.slane %v909_v47, 7  ;;  %v917_v42 = vshrl.u32 %v11453_v26, 16 }
 0x11a   : > { %v1617_v61 = vrot.slane %v1615_v17, 5  ;;  %v1621_v18 = vrot.slane %v1619_v31, 4  ;;  %v1099_v60 = vsel %vm13250_vm3, %v907_v20, %v1098_v4  ;;  %v1101_v46 = vld [vmem:[#allocation2 + $0xa8] sm:$0xf]  ;;  %v920_v5 = vshll.u32 %v11453_v26, 16  ;;  %v12674_v22 = vld [vmem:[#allocation2 + $0x90] sm:$0xff]  }
 0x11b   : > { %v1967_v49 = vsel %vm13342_vm14, %v10902_v21, %v1966_v43  ;;  %v1968_v51 = vrot.slane %v1966_v43, 4  ;;  %1100 = vst [vmem:[#allocation2 + $0xa4] sm:$0x1] %v1099_v60  ;;  %v914_v16 = vor.u32 %v912_v54, %v911_v8  ;;  %v915_v32 = vrot.slane %v911_v8, 4  ;;  %v13810_v20 = vld [vmem:[%s16190_s2] ss:$0 sm:$0xff] }
 0x11c   : > { %v1618_v48 = vsel %vm13311_vm11, %v1613_v41, %v1617_v61  ;;  %v1622_v56 = vor.u32 %v1621_v18, %v1617_v61  ;;  %v1305_v40 = vld [vmem:[#allocation2 + $0x9c] sm:$0xf]  ;;  %v13802_v10 = vrot.slane %v917_v42, 7  ;;  %v553_v21 = vadd.f32 %v13810_v20, %v514_v36  ;;  %v478_v2 = vld [vmem:[%s13239_s21 + $0xf8] sm:$0xff] }
 0x11d   : > { %v1630_v45 = vshrl.u32 %v1305_v40, 16  ;;  %v1633_v63 = vshll.u32 %v1305_v40, 16  ;;  %v1970_v0 = vsel %vm13342_vm14, %v1968_v51, %v1969_v33  ;;  %v1820_v9 = vld [vmem:[#allocation2 + $0x9c] sm:$0xe]  ;;  %v1102_v19 = vsel %vm13318_vm12, %v914_v16, %v1101_v46  ;;  %v438_v62 = vld [vmem:[#allocation2 + $0xbc] sm:$0x1] }
 0x11e   : > { %v1623_v3 = vrot.slane %v1622_v56, 4  ;;  %v12673_v28 = vld [vmem:[#allocation2 + $0x9c] sm:$0xff]   ;;  %v10918_v15 = vcombine.low %v1967_v49, %v1970_v0  ;;  %1103 = vst [vmem:[#allocation2 + $0xa8] sm:$0xf] %v1102_v19  ;;  %v922_v57 = vor.u32 %v920_v5, %v13802_v10  ;;  %v10903_v38 = vrot.slane %v1820_v9, 9 }
 0x11f   : > { %v1306_v58 = vld [vmem:[#allocation2 + $0xa0] sm:$0xf]  ;;  %v1632_v13 = vrot.slane %v1630_v45, 4  ;;  %v1635_v23 = vrot.slane %v1633_v63, 5  ;;  %4970 = vmatprep.mubr.bf16.mxu1 %v12673_v28  ;;  %v554_v53 = vadd.f32 %v13810_v20, %v515_v39  ;;  %v436_v4 = vsel %vm13255_vm4, 0, %v435_v59 }
 0x120   : > { %v1628_v12 = vsel %vm13311_vm11, %v1623_v3, %v1627_v34  ;;  %v1639_v7 = vshll.u32 %v1306_v58, 16  ;;  %v1643_v50 = vshrl.u32 %v1306_v58, 16  ;;  %v1821_v55 = vld [vmem:[#allocation2 + $0xa0] sm:$0xf]  ;;  %4971 = vmatmul.mubr.bf16.gmra.mrb[48].mxu1 %v10918_v15  ;;  %v923_v34 = vsel %vm13330_vm13, %v915_v32, %v922_v57  ;;  %437 = vst [vmem:[#allocation2 + $0xb0] sm:$0x1] %v436_v4 }
 0x121   : > { %v10886_v14 = vcombine.low %v1618_v48, %v1628_v12  ;;  %v1636_v26 = vor.u32 %v1635_v23, %v1632_v13  ;;  %v1973_v31 = vrot.slane %v1821_v55, 5  ;;  %v383_v47 = vsel %vm13250_vm3, 0, %v382_v6  ;;  %1104 = vst [vmem:[#allocation2 + $0xac] sm:$0xf] %v923_v34  ;;  %v12682_v32 = vld [vmem:[#allocation2 + $0x9c] sm:$0xff]  }
 0x122   : > { %v1641_v29 = vrot.slane %v1639_v7, 5  ;;  %v1645_v17 = vrot.slane %v1643_v50, 4  ;;  %v1307_v33 = vld [vmem:[#allocation2 + $0xa4] sm:$0x1]  ;;  %v516_v36 = vmul.f32 %v13790_v35, %v477_v30  ;;  %384 = vst [vmem:[#allocation2 + $0xb4] sm:$0x1] %v383_v47  ;;  %v517_v18 = vmul.f32 %v13790_v35, %v478_v2 }
 0x123   : > { %4809 = vmatprep.mubr.bf16.mxu0 %v10886_v14  ;;  %v1822_v11 = vld [vmem:[#allocation2 + $0xa4] sm:$0x1]  ;;  %v1637_v39 = vrot.slane %v1636_v26, 4  ;;  %v1649_v61 = vshll.u32 %v1307_v33, 16  ;;  %v1975_v43 = vrot.slane %v1973_v31, 4  ;;  %v585_v8 = vmax.f32 %v553_v21, 0.0 }
 0x124   : > { %4810 = vmatmul.mubr.bf16.gmra.mrb[48].mxu0 %v12674_v22  ;;  %v1646_v41 = vor.u32 %v1645_v17, %v1641_v29  ;;  %v1976_v60 = vrot.slane %v1822_v11, 5  ;;  %v586_v54 = vmax.f32 %v554_v53, 0.0  ;;  %v439_v56 = vsel %vm13255_vm4, 0, %v438_v62  ;;  %v385_v22 = vld [vmem:[#allocation2 + $0xc0] sm:$0x1] }
 0x125   : > { %v1642_v42 = vsel %vm13311_vm11, %v1637_v39, %v1641_v29  ;;  %v1651_v48 = vrot.slane %v1649_v61, 5  ;;  %v1974_v49 = vsel %vm13342_vm14, %v10903_v38, %v1973_v31  ;;  %v1308_v40 = vld [vmem:[#allocation2 + $0xa8] sm:$0xf]  ;;  %v11454_v35 = vpack.c.bf16 %v585_v8, %v585_v8  ;;  %440 = vst [vmem:[#allocation2 + $0xbc] sm:$0x1] %v439_v56 }
 0x126   : > { %v1647_v46 = vrot.slane %v1646_v41, 4  ;;  %v1977_v51 = vsel %vm13342_vm14, %v1975_v43, %v1976_v60  ;;  %v11455_v45 = vpack.c.bf16 %v586_v54, %v586_v54  ;;  %v924_v16 = vrot.slane %v13802_v10, 4  ;;  %v13837_v30 = vld [vmem:[#allocation2 + $0xa8] sm:$0xe]  ;;  %v2728_v26 = vld [vmem:[#allocation2 + $0xc] sm:$0xe] }
 0x127   : > { %v1654_v3 = vshrl.u32 %v1308_v40, 16  ;;  %v1657_v0 = vshll.u32 %v1308_v40, 16  ;;  %v926_v9 = vshrl.u32 %v11454_v35, 16  ;;  %v929_v59 = vshll.u32 %v11454_v35, 16  ;;  %v1105_v21 = vld [vmem:[#allocation2 + $0xb0] sm:$0x1] }
 0x128   : > { %v1652_v63 = vsel %vm13311_vm11, %v1647_v46, %v1651_v48  ;;  %v934_v6 = vshrl.u32 %v11455_v45, 16  ;;  %v10919_v28 = vcombine.low %v1974_v49, %v1977_v51  ;;  %v937_v13 = vshll.u32 %v11455_v45, 16  ;;  %v12680_v19 = vld [vmem:[#allocation2 + $0xa8] sm:$0xff]   ;;  %v2729_v41 = vld [vmem:[#allocation2 + $0x10] sm:$0xf] }
 0x129   : > { %v10887_v5 = vcombine.low %v1642_v42, %v1652_v63  ;;  %v1656_v15 = vrot.slane %v1654_v3, 4  ;;  %v1659_v58 = vrot.slane %v1657_v0, 5  ;;  %v928_v12 = vrot.slane %v926_v9, 7  ;;  %v1309_v7 = vld [vmem:[#allocation2 + $0xac] sm:$0xf]  ;;  %4978 = vmatprep.mubr.bf16.mxu1 %v12680_v19 }
 0x12a   : > { %v555_v10 = vadd.f32 %v13810_v20, %v516_v36  ;;  %v1106_v23 = vsel %vm13250_vm3, %v924_v16, %v1105_v21  ;;  %v936_v14 = vrot.slane %v934_v6, 7  ;;  %v1108_v57 = vld [vmem:[#allocation2 + $0xb4] sm:$0xf]  ;;  %v10904_v55 = vrot.slane %v13837_v30, 9  ;;  %4979 = vmatmul.mubr.bf16.gmra.mrb[52].mxu1 %v10919_v28  ;;  %v1824_v33 = vld [vmem:[#allocation2 + $0xac] sm:$0xf] }
 0x12b   : > { %4817 = vmatprep.mubr.bf16.mxu0 %v10887_v5  ;;  %v1660_v50 = vor.u32 %v1659_v58, %v1656_v15  ;;  %1107 = vst [vmem:[#allocation2 + $0xb0] sm:$0x1] %v1106_v23  ;;  %v1663_v38 = vshll.u32 %v1309_v7, 16  ;;  %v1667_v53 = vshrl.u32 %v1309_v7, 16  ;;  %v931_v62 = vor.u32 %v929_v59, %v928_v12  ;;  %v2730_v54 = vld [vmem:[#allocation2 + $0x14] sm:$0x1] }
 0x12c   : > { %4818 = vmatmul.mubr.bf16.gmra.mrb[52].mxu0 %v12682_v32  ;;  %v932_v2 = vrot.slane %v928_v12, 4  ;;  %v939_v17 = vor.u32 %v937_v13, %v936_v14  ;;  %v941_v31 = vrot.slane %v936_v14, 4  ;;  %v1112_v34 = vld [vmem:[#allocation2 + $0xbc] sm:$0x1]  ;;  %v556_v11 = vadd.f32 %v13810_v20, %v517_v18  ;;  %v2216_v20 = vld [vmem:[#allocation2 + $0xc] sm:$0xf] }
 0x12d   : > { %v13843_v29 = vrot.slane %v1660_v50, 4  ;;  %v1665_v4 = vrot.slane %v1663_v38, 5  ;;  %v1669_v47 = vrot.slane %v1667_v53, 4  ;;  %v1109_v36 = vsel %vm13318_vm12, %v931_v62, %v1108_v57  ;;  %v13857_v45 = vld [vmem:[#allocation2 + $0x10] sm:$0xf] }
 0x12e   : > { %v1980_v39 = vrot.slane %v1824_v33, 5  ;;  %v940_v61 = vsel %vm13330_vm13, %v932_v2, %v939_v17  ;;  %1110 = vst [vmem:[#allocation2 + $0xb4] sm:$0xf] %v1109_v36  ;;  %v1113_v43 = vsel %vm13250_vm3, %v941_v31, %v1112_v34  ;;  %v386_v60 = vsel %vm13250_vm3, 0, %v385_v22  ;;  %v12688_v2 = vld [vmem:[#allocation2 + $0xa8] sm:$0xff]  }
 0x12f   : > { %v587_v8 = vmax.f32 %v555_v10, 0.0  ;;  %v1666_v18 = vsel %vm13311_vm11, %v13843_v29, %v1665_v4  ;;  %v1670_v42 = vor.u32 %v1669_v47, %v1665_v4  ;;  %1111 = vst [vmem:[#allocation2 + $0xb8] sm:$0xf] %v940_v61  ;;  %1114 = vst [vmem:[#allocation2 + $0xbc] sm:$0x1] %v1113_v43  ;;  %v588_v48 = vmax.f32 %v556_v11, 0.0 }
 0x130   : > { %v1982_v46 = vrot.slane %v1980_v39, 4  ;;  %387 = vst [vmem:[#allocation2 + $0xc0] sm:$0x1] %v386_v60  ;;  %v10954_v49 = vrot.slane %v2728_v26, 9  ;;  %v2826_v51 = vrot.slane %v2729_v41, 5  ;;  %v2829_v35 = vrot.slane %v2730_v54, 5 }
 0x131   : > { %v11456_v56 = vpack.c.bf16 %v587_v8, %v587_v8  ;;  %v1671_v40 = vrot.slane %v1670_v42, 4  ;;  %v2265_v63 = vshrl.u32 %v2216_v20, 16  ;;  %v2268_v16 = vshll.u32 %v2216_v20, 16  ;;  %v2218_v43 = vld [vmem:[#allocation2 + $0x14] sm:$0x1] }
 0x132   : > { %v1310_v32 = vld [vmem:[#allocation2 + $0xb0] sm:$0x1]  ;;  %v1981_v0 = vsel %vm13342_vm14, %v10904_v55, %v1980_v39  ;;  %v11457_v5 = vpack.c.bf16 %v588_v48, %v588_v48  ;;  %v2828_v28 = vrot.slane %v2826_v51, 4  ;;  %v13865_v23 = vsel %vm13342_vm14, %v10954_v49, %v2826_v51  ;;  %v3161_v42 = vld [vmem:[#allocation2 + $0x18] sm:$0xf] }
 0x133   : > { %v1825_v3 = vld [vmem:[#allocation2 + $0xb0] sm:$0x1]  ;;  %v943_v9 = vshrl.u32 %v11456_v56, 16  ;;  %v946_v59 = vshll.u32 %v11456_v56, 16  ;;  %v1673_v6 = vshll.u32 %v1310_v32, 16  ;;  %v2267_v15 = vrot.slane %v2265_v63, 4 }
 0x134   : > { %v1983_v30 = vrot.slane %v1825_v3, 5  ;;  %v951_v13 = vshrl.u32 %v11457_v5, 16  ;;  %v954_v19 = vshll.u32 %v11457_v5, 16  ;;  %v2270_v21 = vrot.slane %v2268_v16, 5  ;;  %v3162_v3 = vld [vmem:[#allocation2 + $0x1c] sm:$0xf] }
 0x135   : > { %v945_v58 = vrot.slane %v943_v9, 7  ;;  %v1675_v12 = vrot.slane %v1673_v6, 5  ;;  %v1311_v10 = vld [vmem:[#allocation2 + $0xb4] sm:$0xf]  ;;  %v2274_v7 = vshll.u32 %v13857_v45, 16  ;;  %v13870_v53 = vsel %vm13342_vm14, %v2828_v28, %v2829_v35 }
 0x136   : > { %v1984_v22 = vsel %vm13342_vm14, %v1982_v46, %v1983_v30  ;;  %v12686_v50 = vld [vmem:[#allocation2 + $0xb4] sm:$0xff]   ;;  %v1678_v55 = vshrl.u32 %v1311_v10, 16  ;;  %v1313_v26 = vld [vmem:[#allocation2 + $0xbc] sm:$0x1]  ;;  %v1681_v29 = vshll.u32 %v1311_v10, 16  ;;  %v13874_v61 = vrot.slane %v951_v13, 7 }
 0x137   : > { %v10920_v14 = vcombine.low %v1981_v0, %v1984_v22  ;;  %v1312_v57 = vld [vmem:[#allocation2 + $0xb8] sm:$0xf]  ;;  %v948_v38 = vor.u32 %v946_v59, %v945_v58  ;;  %v1676_v62 = vsel %vm13311_vm11, %v1671_v40, %v1675_v12  ;;  %4986 = vmatprep.mubr.bf16.mxu1 %v12686_v50  ;;  %v1697_v11 = vshll.u32 %v1313_v26, 16  ;;  %v1115_v47 = vld [vmem:[#allocation2 + $0xc0] sm:$0xf] }
 0x138   : > { %v1687_v17 = vshll.u32 %v1312_v57, 16  ;;  %v1691_v31 = vshrl.u32 %v1312_v57, 16  ;;  %v10888_v33 = vcombine.low %v1666_v18, %v1676_v62  ;;  %v1680_v34 = vrot.slane %v1678_v55, 4  ;;  %16236 = vst [vmem:[#allocation19_spill] sm:$0xff] %v13874_v61  ;;  %v1826_v54 = vld [vmem:[#allocation2 + $0xb4] sm:$0xe] }
 0x139   : > { %v949_v4 = vrot.slane %v945_v58, 4  ;;  %4987 = vmatmul.mubr.bf16.gmra.mrb[56].mxu1 %v10920_v14  ;;  %v1683_v36 = vrot.slane %v1681_v29, 5  ;;  %v1699_v60 = vrot.slane %v1697_v11, 5  ;;  %v1116_v8 = vsel %vm13318_vm12, %v948_v38, %v1115_v47  ;;  %v1827_v49 = vld [vmem:[#allocation2 + $0xb8] sm:$0xf] }
 0x13a   : > { %v1689_v39 = vrot.slane %v1687_v17, 5  ;;  %v1693_v41 = vrot.slane %v1691_v31, 4  ;;  %4825 = vmatprep.mubr.bf16.mxu0 %v10888_v33  ;;  %v10970_v20 = vcombine.low %v13865_v23, %v13870_v53  ;;  %v2271_v18 = vor.u32 %v2270_v21, %v2267_v15  ;;  %1117 = vst [vmem:[#allocation2 + $0xc0] sm:$0xf] %v1116_v8  ;;  %v1828_v51 = vld [vmem:[#allocation2 + $0xbc] sm:$0x1] }
 0x13b   : > { %4826 = vmatmul.mubr.bf16.gmra.mrb[56].mxu0 %v12688_v2  ;;  %v1684_v46 = vor.u32 %v1683_v36, %v1680_v34  ;;  %v956_v56 = vor.u32 %v954_v19, %v13874_v61  ;;  %v2276_v40 = vrot.slane %v2274_v7, 5  ;;  %v10905_v35 = vrot.slane %v1826_v54, 9  ;;  %v3163_v6 = vld [vmem:[#allocation2 + $0x20] sm:$0x1]  ;;  %v2731_v13 = vld [vmem:[#allocation2 + $0x18] sm:$0xe] }
 0x13c   : > { %v1694_v48 = vor.u32 %v1693_v41, %v1689_v39  ;;  %v1987_v63 = vrot.slane %v1827_v49, 5  ;;  %v1990_v16 = vrot.slane %v1828_v51, 5  ;;  %v2272_v32 = vrot.slane %v2271_v18, 4  ;;  %v2732_v19 = vld [vmem:[#allocation2 + $0x1c] sm:$0xf]  ;;  %v12696_v22 = vld [vmem:[#allocation2 + $0xb4] sm:$0xff]  }
 0x13d   : > { %v1685_v0 = vrot.slane %v1684_v46, 4  ;;  %v957_v9 = vsel %vm13330_vm13, %v949_v4, %v956_v56  ;;  %v2278_v59 = vshrl.u32 %v13857_v45, 16  ;;  %v2284_v58 = vshll.u32 %v2218_v43, 16  ;;  %v2733_v23 = vld [vmem:[#allocation2 + $0x20] sm:$0x1] }
 0x13e   : > { %v1695_v5 = vrot.slane %v1694_v48, 4  ;;  %1118 = vst [vmem:[#allocation2 + $0xc4] sm:$0xf] %v957_v9  ;;  %v1988_v30 = vsel %vm13342_vm14, %v10905_v35, %v1987_v63  ;;  %v1989_v28 = vrot.slane %v1987_v63, 4  ;;  %v2277_v15 = vsel %vm13311_vm11, %v2272_v32, %v2276_v40  ;;  %v2219_v2 = vld [vmem:[#allocation2 + $0x18] sm:$0xf] }
 0x13f   : > { %v1690_v21 = vsel %vm13311_vm11, %v1685_v0, %v1689_v39  ;;  %v2280_v45 = vrot.slane %v2278_v59, 4  ;;  %v3210_v10 = vshrl.u32 %v3161_v42, 16  ;;  %v2286_v14 = vrot.slane %v2284_v58, 5  ;;  %v2220_v33 = vld [vmem:[#allocation2 + $0x1c] sm:$0xf] }
 0x140   : > { %v1700_v12 = vsel %vm13311_vm11, %v1695_v5, %v1699_v60  ;;  %v1991_v50 = vsel %vm13342_vm14, %v1989_v28, %v1990_v16  ;;  %v3213_v57 = vshll.u32 %v3161_v42, 16  ;;  %v3219_v62 = vshll.u32 %v3162_v3, 16  ;;  %v2221_v36 = vld [vmem:[#allocation2 + $0x20] sm:$0x1]  ;;  %v3165_v32 = vld [vmem:[#allocation2 + $0x28] sm:$0xf] }
 0x141   : > { %v10889_v7 = vcombine.low %v1690_v21, %v1700_v12  ;;  %v10921_v55 = vcombine.low %v1988_v30, %v1991_v50  ;;  %v2281_v38 = vor.u32 %v2280_v45, %v2276_v40  ;;  %v3212_v53 = vrot.slane %v3210_v10, 4  ;;  %v3164_v40 = vld [vmem:[#allocation2 + $0x24] sm:$0xf]  ;;  %v3166_v59 = vld [vmem:[#allocation2 + $0x2c] sm:$0x1]  ;;  %v12702_v21 = vld [vmem:[#allocation2 + $0x18] sm:$0xff]  }
 0x142   : > { %v3215_v26 = vrot.slane %v3213_v57, 5  ;;  %v3223_v29 = vshrl.u32 %v3162_v3, 16  ;;  %v3229_v17 = vshll.u32 %v3163_v6, 16  ;;  %v10955_v31 = vrot.slane %v2731_v13, 9  ;;  %v2734_v58 = vld [vmem:[#allocation2 + $0x24] sm:$0xe] }
 0x143   : > { %4833 = vmatprep.mubr.bf16.mxu0 %v10889_v7  ;;  %v2282_v34 = vrot.slane %v2281_v38, 4  ;;  %v3221_v11 = vrot.slane %v3219_v62, 5  ;;  %v2833_v4 = vrot.slane %v2732_v19, 5  ;;  %v2836_v47 = vrot.slane %v2733_v23, 5  ;;  %v12704_v13 = vld [vmem:[#allocation8 + $0x208] sm:$0xff]  }
 0x144   : > { %4834 = vmatmul.mubr.bf16.gmra.mrb[60].mxu0 %v12696_v22  ;;  %v3216_v39 = vor.u32 %v3215_v26, %v3212_v53  ;;  %v3225_v41 = vrot.slane %v3223_v29, 4  ;;  %v3231_v43 = vrot.slane %v3229_v17, 5  ;;  %v2289_v60 = vshrl.u32 %v2219_v2, 16  ;;  %v2735_v10 = vld [vmem:[#allocation2 + $0x28] sm:$0xf] }
 0x145   : > { %5035 = vmatprep.mubr.bf16.mxu0 %v10970_v20  ;;  %v12694_v8 = vld [vmem:[#allocation2 + $0xc0] sm:$0xff]   ;;  %v2287_v54 = vsel %vm13311_vm11, %v2282_v34, %v2286_v14  ;;  %v2834_v18 = vsel %vm13342_vm14, %v10955_v31, %v2833_v4  ;;  %v2835_v42 = vrot.slane %v2833_v4, 4  ;;  %v2292_v46 = vshll.u32 %v2219_v2, 16  ;;  %v2736_v57 = vld [vmem:[#allocation2 + $0x2c] sm:$0x1] }
 0x146   : > { %v10938_v48 = vcombine.low %v2277_v15, %v2287_v54  ;;  %v3217_v56 = vrot.slane %v3216_v39, 4  ;;  %v3226_v49 = vor.u32 %v3225_v41, %v3221_v11  ;;  %v2291_v51 = vrot.slane %v2289_v60, 4  ;;  %4994 = vmatprep.mubr.bf16.mxu1 %v12694_v8  ;;  %v2223_v26 = vld [vmem:[#allocation2 + $0x28] sm:$0xf]  ;;  %v2761_v25 = vld [vmem:[#allocation2 + $0x90] sm:$0xe] }
 0x147   : > { %v2837_v20 = vsel %vm13342_vm14, %v2835_v42, %v2836_v47  ;;  %v2294_v35 = vrot.slane %v2292_v46, 5  ;;  %v2298_v63 = vshll.u32 %v2220_v33, 16  ;;  %v2302_v16 = vshrl.u32 %v2220_v33, 16  ;;  %4995 = vmatmul.mubr.bf16.gmra.mrb[60].mxu1 %v10921_v55  ;;  %v2222_v55 = vld [vmem:[#allocation2 + $0x24] sm:$0xf]  ;;  %v12707_v34 = vld [vmem:[#allocation8 + $0x210] sm:$0xff]  }
 0x148   : > { %v3222_v3 = vsel %vm13311_vm11, %v3217_v56, %v3221_v11  ;;  %v3227_v0 = vrot.slane %v3226_v49, 4  ;;  %v10971_v5 = vcombine.low %v2834_v18, %v2837_v20  ;;  %v2308_v9 = vshll.u32 %v2221_v36, 16  ;;  %v2224_v18 = vld [vmem:[#allocation2 + $0x2c] sm:$0x1]  ;;  %v3167_v46 = vld [vmem:[#allocation2 + $0x30] sm:$0xf] }
 0x149   : > { %v2295_v6 = vor.u32 %v2294_v35, %v2291_v51  ;;  %v2300_v30 = vrot.slane %v2298_v63, 5  ;;  %v2304_v28 = vrot.slane %v2302_v16, 4  ;;  %v3234_v15 = vshrl.u32 %v3164_v40, 16  ;;  %v12710_v20 = vld [vmem:[#allocation8 + $0x218] sm:$0xff]   ;;  %v12703_v16 = vld [vmem:[#allocation2 + $0x24] sm:$0xff]  }
 0x14a   : > { %v3232_v19 = vsel %vm13311_vm11, %v3227_v0, %v3231_v43  ;;  %v2310_v12 = vrot.slane %v2308_v9, 5  ;;  %v3237_v22 = vshll.u32 %v3164_v40, 16  ;;  %v3243_v45 = vshll.u32 %v3165_v32, 16  ;;  %v3168_v40 = vld [vmem:[#allocation2 + $0x34] sm:$0xf] }
 0x14b   : > { %v11002_v23 = vcombine.low %v3222_v3, %v3232_v19  ;;  %v2296_v7 = vrot.slane %v2295_v6, 4  ;;  %v2305_v50 = vor.u32 %v2304_v28, %v2300_v30  ;;  %v3236_v14 = vrot.slane %v3234_v15, 4  ;;  %v3169_v0 = vld [vmem:[#allocation2 + $0x38] sm:$0x1]  ;;  %v2737_v19 = vld [vmem:[#allocation2 + $0x30] sm:$0xe] }
 0x14c   : > { %5036 = vmatmul.mubr.bf16.vlgmr.msra.gmra.mrb[64].mxu0 %v10938_v48  ;;  %v3239_v38 = vrot.slane %v3237_v22, 5  ;;  %v3245_v53 = vrot.slane %v3243_v45, 5  ;;  %v3247_v62 = vshrl.u32 %v3165_v32, 16  ;;  %v3253_v2 = vshll.u32 %v3166_v59, 16 }
 0x14d   : > { %12436 = vmatpush3.bf16.msra.mxu0 %v13741_v52  ;;  %5043 = vmatprep.mubr.bf16.mxu0 %v10971_v5  ;;  %v2301_v29 = vsel %vm13311_vm11, %v2296_v7, %v2300_v30  ;;  %v2306_v17 = vrot.slane %v2305_v50, 4  ;;  %v10956_v31 = vrot.slane %v2734_v58, 9  ;;  %v2840_v33 = vrot.slane %v2735_v10, 5  ;;  %v12713_v30 = vld [vmem:[#allocation8 + $0x220] sm:$0xff]  }
 0x14e   : > { %5196 = vmatprep.mubr.bf16.mxu1 %v11002_v23  ;;  %12437 = vmatprep.subr.bf16.mxu0 %v12704_v13  ;;  %v3240_v11 = vor.u32 %v3239_v38, %v3236_v14  ;;  %v3249_v4 = vrot.slane %v3247_v62, 4  ;;  %v3255_v47 = vrot.slane %v3253_v2, 5  ;;  %v2843_v36 = vrot.slane %v2736_v57, 5  ;;  %v2739_v23 = vld [vmem:[#allocation2 + $0x38] sm:$0x1] }
 0x14f   : > { %v2311_v52 = vsel %vm13311_vm11, %v2306_v17, %v2310_v12  ;;  %v2841_v39 = vsel %vm13342_vm14, %v10956_v31, %v2840_v33  ;;  %v2842_v41 = vrot.slane %v2840_v33, 4  ;;  %v2313_v43 = vshrl.u32 %v2222_v55, 16  ;;  %5197 = vmatmul.mubr.bf16.vlgmr.msra.gmra.mrb[64].mxu1 %v12702_v21  ;;  %v2738_v21 = vld [vmem:[#allocation2 + $0x34] sm:$0xf]  ;;  %v2225_v2 = vld [vmem:[#allocation2 + $0x30] sm:$0xf] }
 0x150   : > { %v10939_v60 = vcombine.low %v2301_v29, %v2311_v52  ;;  %v3241_v8 = vrot.slane %v3240_v11, 4  ;;  %v3250_v54 = vor.u32 %v3249_v4, %v3245_v53  ;;  %v2316_v42 = vshll.u32 %v2222_v55, 16  ;;  %v2226_v33 = vld [vmem:[#allocation2 + $0x34] sm:$0xf] }
 0x151   : > { %12438 = vmatpush3.bf16.msra.mxu0 %v12704_v13  ;;  %v2844_v48 = vsel %vm13342_vm14, %v2842_v41, %v2843_v36  ;;  %v2315_v56 = vrot.slane %v2313_v43, 4  ;;  %v2322_v49 = vshll.u32 %v2223_v26, 16  ;;  %v2326_v51 = vshrl.u32 %v2223_v26, 16  ;;  %v12716_v36 = vld [vmem:[#allocation8 + $0x228] sm:$0xff]   ;;  %v2227_v43 = vld [vmem:[#allocation2 + $0x38] sm:$0x1] }
 0x152   : > { %12439 = vmatprep.subr.bf16.mxu0 %v12707_v34  ;;  %v3246_v35 = vsel %vm13311_vm11, %v3241_v8, %v3245_v53  ;;  %v3251_v63 = vrot.slane %v3250_v54, 4  ;;  %v10972_v32 = vcombine.low %v2841_v39, %v2844_v48  ;;  %v2318_v3 = vrot.slane %v2316_v42, 5  ;;  %v3170_v8 = vld [vmem:[#allocation2 + $0x3c] sm:$0xf]  ;;  %v3171_v48 = vld [vmem:[#allocation2 + $0x40] sm:$0xf] }
 0x153   : > { %v2324_v5 = vrot.slane %v2322_v49, 5  ;;  %v2328_v9 = vrot.slane %v2326_v51, 4  ;;  %v2332_v59 = vshll.u32 %v2224_v18, 16  ;;  %v3258_v6 = vshrl.u32 %v3167_v46, 16  ;;  %v12705_v51 = vld [vmem:[#allocation2 + $0x30] sm:$0xff]  }
 0x154   : > { %5044 = vmatmul.mubr.bf16.gmra.mrb[68].mxu0 %v10939_v60  ;;  %v3256_v28 = vsel %vm13311_vm11, %v3251_v63, %v3255_v47  ;;  %v2319_v15 = vor.u32 %v2318_v3, %v2315_v56  ;;  %v3261_v58 = vshll.u32 %v3167_v46, 16  ;;  %v3267_v13 = vshll.u32 %v3168_v40, 16  ;;  %v12719_v63 = vld [vmem:[#allocation8 + $0x230] sm:$0xff]  }
 0x155   : > { %5051 = vmatprep.mubr.bf16.mxu0 %v10972_v32  ;;  %12440 = vmatpush3.bf16.msra.mxu0 %v12707_v34  ;;  %v11003_v12 = vcombine.low %v3246_v35, %v3256_v28  ;;  %v2329_v22 = vor.u32 %v2328_v9, %v2324_v5  ;;  %v2334_v45 = vrot.slane %v2332_v59, 5  ;;  %v3260_v10 = vrot.slane %v3258_v6, 4  ;;  %v3172_v35 = vld [vmem:[#allocation2 + $0x44] sm:$0x1]  ;;  %v2740_v28 = vld [vmem:[#allocation2 + $0x3c] sm:$0xe] }
 0x156   : > { %12441 = vmatprep.subr.bf16.mxu0 %v12710_v20  ;;  %v2320_v7 = vrot.slane %v2319_v15, 4  ;;  %v3263_v50 = vrot.slane %v3261_v58, 5  ;;  %v3269_v14 = vrot.slane %v3267_v13, 5  ;;  %v3271_v57 = vshrl.u32 %v3168_v40, 16 }
 0x157   : > { %5204 = vmatprep.mubr.bf16.mxu1 %v11003_v12  ;;  %v2330_v55 = vrot.slane %v2329_v22, 4  ;;  %v3277_v38 = vshll.u32 %v3169_v0, 16  ;;  %v10957_v53 = vrot.slane %v2737_v19, 9  ;;  %v2847_v62 = vrot.slane %v2738_v21, 5  ;;  %v2741_v12 = vld [vmem:[#allocation2 + $0x40] sm:$0xf] }
 0x158   : > { %5205 = vmatmul.mubr.bf16.gmra.mrb[68].mxu1 %v12703_v16  ;;  %v2325_v26 = vsel %vm13311_vm11, %v2320_v7, %v2324_v5  ;;  %v3264_v29 = vor.u32 %v3263_v50, %v3260_v10  ;;  %v3273_v17 = vrot.slane %v3271_v57, 4  ;;  %v2850_v31 = vrot.slane %v2739_v23, 5  ;;  %v2742_v22 = vld [vmem:[#allocation2 + $0x44] sm:$0x1]  ;;  %v2228_v50 = vld [vmem:[#allocation2 + $0x3c] sm:$0xf] }
 0x159   : > { %12442 = vmatpush3.bf16.msra.mxu0 %v12710_v20  ;;  %v2335_v34 = vsel %vm13311_vm11, %v2330_v55, %v2334_v45  ;;  %v3279_v11 = vrot.slane %v3277_v38, 5  ;;  %v2848_v4 = vsel %vm13342_vm14, %v10957_v53, %v2847_v62  ;;  %v2849_v47 = vrot.slane %v2847_v62, 4  ;;  %v2229_v53 = vld [vmem:[#allocation2 + $0x40] sm:$0xf] }
 0x15a   : > { %12443 = vmatprep.subr.bf16.mxu0 %v12713_v30  ;;  %v10940_v52 = vcombine.low %v2325_v26, %v2335_v34  ;;  %v3265_v39 = vrot.slane %v3264_v29, 4  ;;  %v3274_v41 = vor.u32 %v3273_v17, %v3269_v14  ;;  %v2337_v60 = vshrl.u32 %v2225_v2, 16  ;;  %v2230_v17 = vld [vmem:[#allocation2 + $0x44] sm:$0x1] }
 0x15b   : > { %v2851_v54 = vsel %vm13342_vm14, %v2849_v47, %v2850_v31  ;;  %v2340_v18 = vshll.u32 %v2225_v2, 16  ;;  %v2346_v42 = vshll.u32 %v2226_v33, 16  ;;  %v2350_v46 = vshrl.u32 %v2226_v33, 16 }
 0x15c   : > { %5052 = vmatmul.mubr.bf16.gmra.mrb[72].mxu0 %v10940_v52  ;;  %v3270_v56 = vsel %vm13311_vm11, %v3265_v39, %v3269_v14  ;;  %v3275_v49 = vrot.slane %v3274_v41, 4  ;;  %v10973_v40 = vcombine.low %v2848_v4, %v2851_v54  ;;  %v2339_v20 = vrot.slane %v2337_v60, 4  ;;  %v3173_v41 = vld [vmem:[#allocation2 + $0x48] sm:$0xf] }
 0x15d   : > { %v2342_v16 = vrot.slane %v2340_v18, 5  ;;  %v2348_v32 = vrot.slane %v2346_v42, 5  ;;  %v2352_v3 = vrot.slane %v2350_v46, 4  ;;  %v2356_v0 = vshll.u32 %v2227_v43, 16  ;;  %12444 = vmatpush3.bf16.msra.mxu0 %v12713_v30  ;;  %v3174_v42 = vld [vmem:[#allocation2 + $0x4c] sm:$0xf] }
 0x15e   : > { %v3280_v5 = vsel %vm13311_vm11, %v3275_v49, %v3279_v11  ;;  %5059 = vmatprep.mubr.bf16.mxu0 %v10973_v40  ;;  %v3282_v9 = vshrl.u32 %v3170_v8, 16  ;;  %v3285_v59 = vshll.u32 %v3170_v8, 16  ;;  %v3291_v6 = vshll.u32 %v3171_v48, 16  ;;  %12445 = vmatprep.subr.bf16.mxu0 %v12716_v36  ;;  %v3175_v46 = vld [vmem:[#allocation2 + $0x50] sm:$0x1]  ;;  %v12706_v49 = vld [vmem:[#allocation2 + $0x3c] sm:$0xff]  }
 0x15f   : > { %v11004_v58 = vcombine.low %v3270_v56, %v3280_v5  ;;  %v2343_v13 = vor.u32 %v2342_v16, %v2339_v20  ;;  %v2353_v19 = vor.u32 %v2352_v3, %v2348_v32  ;;  %v2358_v21 = vrot.slane %v2356_v0, 5 }
 0x160   : > { %v3284_v30 = vrot.slane %v3282_v9, 4  ;;  %v3287_v10 = vrot.slane %v3285_v59, 5  ;;  %v3293_v23 = vrot.slane %v3291_v6, 5  ;;  %v3295_v7 = vshrl.u32 %v3171_v48, 16  ;;  %v2743_v6 = vld [vmem:[#allocation2 + $0x48] sm:$0xe] }
 0x161   : > { %5212 = vmatprep.mubr.bf16.mxu1 %v11004_v58  ;;  %v2344_v14 = vrot.slane %v2343_v13, 4  ;;  %v2354_v57 = vrot.slane %v2353_v19, 4  ;;  %v3301_v55 = vshll.u32 %v3172_v35, 16  ;;  %v10958_v38 = vrot.slane %v2740_v28, 9  ;;  %12446 = vmatpush3.bf16.msra.mxu0 %v12716_v36  ;;  %v2744_v28 = vld [vmem:[#allocation2 + $0x4c] sm:$0xf] }
 0x162   : > { %5213 = vmatmul.mubr.bf16.gmra.mrb[72].mxu1 %v12705_v51  ;;  %v3288_v62 = vor.u32 %v3287_v10, %v3284_v30  ;;  %v3297_v2 = vrot.slane %v3295_v7, 4  ;;  %v2854_v26 = vrot.slane %v2741_v12, 5  ;;  %v2857_v29 = vrot.slane %v2742_v22, 5  ;;  %12447 = vmatprep.subr.bf16.mxu0 %v12719_v63 }
 0x163   : > { %v2349_v33 = vsel %vm13311_vm11, %v2344_v14, %v2348_v32  ;;  %v2359_v34 = vsel %vm13311_vm11, %v2354_v57, %v2358_v21  ;;  %v3303_v11 = vrot.slane %v3301_v55, 5  ;;  %v2361_v4 = vshrl.u32 %v2228_v50, 16 }
 0x164   : > { %v10941_v47 = vcombine.low %v2349_v33, %v2359_v34  ;;  %v3289_v52 = vrot.slane %v3288_v62, 4  ;;  %v3298_v36 = vor.u32 %v3297_v2, %v3293_v23  ;;  %v2855_v39 = vsel %vm13342_vm14, %v10958_v38, %v2854_v26  ;;  %v2231_v38 = vld [vmem:[#allocation2 + $0x48] sm:$0xf] }
 0x165   : > { %v2856_v60 = vrot.slane %v2854_v26, 4  ;;  %v2363_v8 = vrot.slane %v2361_v4, 4  ;;  %v2364_v54 = vshll.u32 %v2228_v50, 16  ;;  %v2370_v18 = vshll.u32 %v2229_v53, 16  ;;  %12448 = vmatpush3.bf16.msra.mxu0 %v12719_v63  ;;  %v2233_v4 = vld [vmem:[#allocation2 + $0x50] sm:$0x1] }
 0x166   : > { %5060 = vmatmul.mubr.bf16.gmra.mrb[76].mxu0 %v10941_v47  ;;  %v3294_v48 = vsel %vm13311_vm11, %v3289_v52, %v3293_v23  ;;  %v3299_v56 = vrot.slane %v3298_v36, 4  ;;  %v2374_v51 = vshrl.u32 %v2229_v53, 16  ;;  %v2380_v40 = vshll.u32 %v2230_v17, 16  ;;  %v2745_v23 = vld [vmem:[#allocation2 + $0x50] sm:$0x1] }
 0x167   : > { %v2858_v35 = vsel %vm13342_vm14, %v2856_v60, %v2857_v29  ;;  %v2366_v16 = vrot.slane %v2364_v54, 5  ;;  %v2372_v32 = vrot.slane %v2370_v18, 5  ;;  %v3306_v3 = vshrl.u32 %v3173_v41, 16  ;;  %v2232_v29 = vld [vmem:[#allocation2 + $0x4c] sm:$0xf] }
 0x168   : > { %v13929_v15 = vpop.f32.mrb[0].mxu0  ;;  %v3304_v63 = vsel %vm13311_vm11, %v3299_v56, %v3303_v11  ;;  %v10974_v5 = vcombine.low %v2855_v39, %v2858_v35  ;;  %v2376_v9 = vrot.slane %v2374_v51, 4  ;;  %v2382_v59 = vrot.slane %v2380_v40, 5  ;;  %v12708_v56 = vld [vmem:[#allocation2 + $0x48] sm:$0xff]   ;;  %v3177_v35 = vld [vmem:[#allocation2 + $0x58] sm:$0xf] }
 0x169   : > { %v13931_v45 = vpop.f32.mrb[1].mxu0  ;;  %v11005_v58 = vcombine.low %v3294_v48, %v3304_v63  ;;  %v2367_v13 = vor.u32 %v2366_v16, %v2363_v8  ;;  %v3308_v19 = vrot.slane %v3306_v3, 4  ;;  %v3309_v21 = vshll.u32 %v3173_v41, 16 }
 0x16a   : > { %v13933_v31 = vpop.f32.mrb[2].mxu0  ;;  %5067 = vmatprep.mubr.bf16.mxu0 %v10974_v5  ;;  %v2377_v12 = vor.u32 %v2376_v9, %v2372_v32  ;;  %v3315_v22 = vshll.u32 %v3174_v42, 16  ;;  %v3319_v30 = vshrl.u32 %v3174_v42, 16  ;;  %v3325_v10 = vshll.u32 %v3175_v46, 16  ;;  %v3176_v42 = vld [vmem:[#allocation2 + $0x54] sm:$0xf] }
 0x16b   : > { %v13941_v43 = vpop.f32.mrb[3].mxu0  ;;  %v13945_v20 = vpop.f32.mrb[0].mxu1  ;;  %5220 = vmatprep.mubr.bf16.mxu1 %v11005_v58  ;;  %v2368_v50 = vrot.slane %v2367_v13, 4  ;;  %v3311_v14 = vrot.slane %v3309_v21, 5  ;;  %v10959_v57 = vrot.slane %v2743_v6, 9  ;;  %v2861_v55 = vrot.slane %v2744_v28, 5 }
 0x16c   : > { %v13949_v0 = vpop.f32.mrb[1].mxu1  ;;  %5221 = vmatmul.mubr.bf16.gmra.mrb[76].mxu1 %v12706_v49  ;;  %v2378_v53 = vrot.slane %v2377_v12, 4  ;;  %v3317_v62 = vrot.slane %v3315_v22, 5  ;;  %v3321_v2 = vrot.slane %v3319_v30, 4  ;;  %v3327_v26 = vrot.slane %v3325_v10, 5 }
 0x16d   : > { %v13953_v7 = vpop.f32.mrb[2].mxu1  ;;  %v2373_v17 = vsel %vm13311_vm11, %v2368_v50, %v2372_v32  ;;  %v3312_v33 = vor.u32 %v3311_v14, %v3308_v19  ;;  %v2862_v34 = vsel %vm13342_vm14, %v10959_v57, %v2861_v55  ;;  %v2863_v11 = vrot.slane %v2861_v55, 4  ;;  %v3178_v9 = vld [vmem:[#allocation2 + $0x5c] sm:$0x1]  ;;  %v2747_v19 = vld [vmem:[#allocation2 + $0x58] sm:$0xf] }
 0x16e   : > { %v13959_v47 = vpop.f32.mrb[3].mxu1  ;;  %v2383_v52 = vsel %vm13311_vm11, %v2378_v53, %v2382_v59  ;;  %v3322_v36 = vor.u32 %v3321_v2, %v3317_v62  ;;  %v2864_v39 = vrot.slane %v2745_v23, 5  ;;  %v2385_v41 = vshrl.u32 %v2231_v38, 16  ;;  %v2746_v59 = vld [vmem:[#allocation2 + $0x54] sm:$0xe] }
 0x16f   : > { %v10942_v60 = vcombine.low %v2373_v17, %v2383_v52  ;;  %v3313_v8 = vrot.slane %v3312_v33, 4  ;;  %v2388_v54 = vshll.u32 %v2231_v38, 16  ;;  %v2394_v18 = vshll.u32 %v2232_v29, 16  ;;  %v2748_v23 = vld [vmem:[#allocation2 + $0x5c] sm:$0x1] }
 0x170   : > { %v3323_v48 = vrot.slane %v3322_v36, 4  ;;  %v2865_v49 = vsel %vm13342_vm14, %v2863_v11, %v2864_v39  ;;  %v2387_v51 = vrot.slane %v2385_v41, 4  ;;  %v2398_v40 = vshrl.u32 %v2232_v29, 16  ;;  %v2234_v11 = vld [vmem:[#allocation2 + $0x54] sm:$0xf] }
 0x171   : > { %5068 = vmatmul.mubr.bf16.gmra.mrb[80].mxu0 %v10942_v60  ;;  %v3318_v32 = vsel %vm13311_vm11, %v3313_v8, %v3317_v62  ;;  %v10975_v3 = vcombine.low %v2862_v34, %v2865_v49  ;;  %v2390_v63 = vrot.slane %v2388_v54, 5  ;;  %v2396_v5 = vrot.slane %v2394_v18, 5  ;;  %v2235_v41 = vld [vmem:[#allocation2 + $0x58] sm:$0xf]  ;;  %v2236_v49 = vld [vmem:[#allocation2 + $0x5c] sm:$0x1] }
 0x172   : > { %v3328_v6 = vsel %vm13311_vm11, %v3323_v48, %v3327_v26  ;;  %v2400_v28 = vrot.slane %v2398_v40, 4  ;;  %v2404_v58 = vshll.u32 %v2233_v4, 16  ;;  %v3330_v13 = vshrl.u32 %v3176_v42, 16 }
 0x173   : > { %v13963_v46 = vpop.f32.mrb[4].mxu1  ;;  %v11006_v12 = vcombine.low %v3318_v32, %v3328_v6  ;;  %5075 = vmatprep.mubr.bf16.mxu0 %v10975_v3  ;;  %v2391_v22 = vor.u32 %v2390_v63, %v2387_v51  ;;  %v3333_v30 = vshll.u32 %v3176_v42, 16  ;;  %v3339_v10 = vshll.u32 %v3177_v35, 16  ;;  %v12709_v3 = vld [vmem:[#allocation2 + $0x54] sm:$0xff]  }
 0x174   : > { %v2401_v50 = vor.u32 %v2400_v28, %v2396_v5  ;;  %v2406_v14 = vrot.slane %v2404_v58, 5  ;;  %v3332_v57 = vrot.slane %v3330_v13, 4  ;;  %v3343_v55 = vshrl.u32 %v3177_v35, 16  ;;  %v13975_v38 = vpop.f32.mrb[5].mxu1 }
 0x175   : > { %5228 = vmatprep.mubr.bf16.mxu1 %v11006_v12  ;;  %v2392_v53 = vrot.slane %v2391_v22, 4  ;;  %v3335_v62 = vrot.slane %v3333_v30, 5  ;;  %v3341_v2 = vrot.slane %v3339_v10, 5  ;;  %v3349_v26 = vshll.u32 %v3178_v9, 16  ;;  %v13985_v35 = vpop.f32.mrb[6].mxu1 }
 0x176   : > { %5229 = vmatmul.mubr.bf16.gmra.mrb[80].mxu1 %v12708_v56  ;;  %v2402_v29 = vrot.slane %v2401_v50, 4  ;;  %v3345_v17 = vrot.slane %v3343_v55, 4  ;;  %v10960_v33 = vrot.slane %v2746_v59, 9  ;;  %v2868_v34 = vrot.slane %v2747_v19, 5  ;;  %v3179_v59 = vld [vmem:[#allocation2 + $0x60] sm:$0xf] }
 0x177   : > { %v13967_v16 = vpop.f32.mrb[4].mxu0  ;;  %v2397_v4 = vsel %vm13311_vm11, %v2392_v53, %v2396_v5  ;;  %v3336_v52 = vor.u32 %v3335_v62, %v3332_v57  ;;  %v3351_v36 = vrot.slane %v3349_v26, 5  ;;  %v2871_v39 = vrot.slane %v2748_v23, 5  ;;  %v3180_v12 = vld [vmem:[#allocation2 + $0x64] sm:$0xf]  ;;  %v13995_v57 = vpop.f32.mrb[7].mxu1 }
 0x178   : > { %v13973_v21 = vpop.f32.mrb[5].mxu0  ;;  %v2407_v60 = vsel %vm13311_vm11, %v2402_v29, %v2406_v14  ;;  %v3346_v8 = vor.u32 %v3345_v17, %v3341_v2  ;;  %v2869_v54 = vsel %vm13342_vm14, %v10960_v33, %v2868_v34  ;;  %v2870_v18 = vrot.slane %v2868_v34, 4  ;;  %v3181_v22 = vld [vmem:[#allocation2 + $0x68] sm:$0x1]  ;;  %v2749_v14 = vld [vmem:[#allocation2 + $0x60] sm:$0xe] }
 0x179   : > { %v13983_v42 = vpop.f32.mrb[6].mxu0  ;;  %v10943_v48 = vcombine.low %v2397_v4, %v2407_v60  ;;  %v3337_v56 = vrot.slane %v3336_v52, 4  ;;  %v2409_v51 = vshrl.u32 %v2234_v11, 16  ;;  %v2412_v40 = vshll.u32 %v2234_v11, 16  ;;  %v2751_v29 = vld [vmem:[#allocation2 + $0x68] sm:$0x1] }
 0x17a   : > { %v3347_v32 = vrot.slane %v3346_v8, 4  ;;  %v2872_v63 = vsel %vm13342_vm14, %v2870_v18, %v2871_v39  ;;  %v2418_v5 = vshll.u32 %v2235_v41, 16  ;;  %v2422_v9 = vshrl.u32 %v2235_v41, 16  ;;  %v13989_v6 = vpop.f32.mrb[7].mxu0  ;;  %v2237_v4 = vld [vmem:[#allocation2 + $0x60] sm:$0xf] }
 0x17b   : > { %5076 = vmatmul.mubr.bf16.gmra.mrb[84].mxu0 %v10943_v48  ;;  %v3342_v28 = vsel %vm13311_vm11, %v3337_v56, %v3341_v2  ;;  %v10976_v58 = vcombine.low %v2869_v54, %v2872_v63  ;;  %v2411_v13 = vrot.slane %v2409_v51, 4  ;;  %v2414_v19 = vrot.slane %v2412_v40, 5  ;;  %v2750_v2 = vld [vmem:[#allocation2 + $0x64] sm:$0xf] }
 0x17c   : > { %v3352_v30 = vsel %vm13311_vm11, %v3347_v32, %v3351_v36  ;;  %v2420_v10 = vrot.slane %v2418_v5, 5  ;;  %v2424_v23 = vrot.slane %v2422_v9, 4  ;;  %v2428_v50 = vshll.u32 %v2236_v49, 16  ;;  %v2238_v32 = vld [vmem:[#allocation2 + $0x64] sm:$0xf] }
 0x17d   : > { %v11007_v55 = vcombine.low %v3342_v28, %v3352_v30  ;;  %5083 = vmatprep.mubr.bf16.mxu0 %v10976_v58  ;;  %v2415_v53 = vor.u32 %v2414_v19, %v2411_v13  ;;  %v3354_v62 = vshrl.u32 %v3179_v59, 16  ;;  %v3357_v26 = vshll.u32 %v3179_v59, 16  ;;  %v2239_v59 = vld [vmem:[#allocation2 + $0x68] sm:$0x1] }
 0x17e   : > { %v2425_v17 = vor.u32 %v2424_v23, %v2420_v10  ;;  %v2430_v33 = vrot.slane %v2428_v50, 5  ;;  %v3363_v34 = vshll.u32 %v3180_v12, 16  ;;  %v3367_v11 = vshrl.u32 %v3180_v12, 16  ;;  %v3182_v12 = vld [vmem:[#allocation2 + $0x6c] sm:$0xf] }
 0x17f   : > { %v13997_v52 = vpop.f32.mrb[8].mxu0  ;;  %5236 = vmatprep.mubr.bf16.mxu1 %v11007_v55  ;;  %v2416_v36 = vrot.slane %v2415_v53, 4  ;;  %v3356_v39 = vrot.slane %v3354_v62, 4  ;;  %v3359_v41 = vrot.slane %v3357_v26, 5  ;;  %v3373_v60 = vshll.u32 %v3181_v22, 16 }
 0x180   : > { %5237 = vmatmul.mubr.bf16.gmra.mrb[84].mxu1 %v12709_v3  ;;  %v2426_v8 = vrot.slane %v2425_v17, 4  ;;  %v3365_v54 = vrot.slane %v3363_v34, 5  ;;  %v3369_v18 = vrot.slane %v3367_v11, 4  ;;  %v10961_v48 = vrot.slane %v2749_v14, 9  ;;  %v3183_v22 = vld [vmem:[#allocation2 + $0x70] sm:$0xf] }
 0x181   : > { %v2421_v56 = vsel %vm13311_vm11, %v2416_v36, %v2420_v10  ;;  %v3360_v49 = vor.u32 %v3359_v41, %v3356_v39  ;;  %v3375_v51 = vrot.slane %v3373_v60, 5  ;;  %v2875_v40 = vrot.slane %v2750_v2, 5  ;;  %v12711_v10 = vld [vmem:[#allocation2 + $0x60] sm:$0xff]   ;;  %v3184_v55 = vld [vmem:[#allocation2 + $0x74] sm:$0x1] }
 0x182   : > { %v2431_v63 = vsel %vm13311_vm11, %v2426_v8, %v2430_v33  ;;  %v3370_v5 = vor.u32 %v3369_v18, %v3365_v54  ;;  %v2878_v9 = vrot.slane %v2751_v29, 5  ;;  %v2433_v28 = vshrl.u32 %v2237_v4, 16  ;;  %v2752_v29 = vld [vmem:[#allocation2 + $0x6c] sm:$0xe]  ;;  %v2753_v36 = vld [vmem:[#allocation2 + $0x70] sm:$0xf] }
 0x183   : > { %v10944_v58 = vcombine.low %v2421_v56, %v2431_v63  ;;  %v3361_v3 = vrot.slane %v3360_v49, 4  ;;  %v2876_v13 = vsel %vm13342_vm14, %v10961_v48, %v2875_v40  ;;  %v2877_v19 = vrot.slane %v2875_v40, 4  ;;  %v14011_v18 = vpop.f32.mrb[8].mxu1  ;;  %v14013_v40 = vpop.f32.mrb[9].mxu0 }
 0x184   : > { %v3371_v30 = vrot.slane %v3370_v5, 4  ;;  %v2435_v23 = vrot.slane %v2433_v28, 4  ;;  %v2436_v50 = vshll.u32 %v2237_v4, 16  ;;  %v2442_v14 = vshll.u32 %v2238_v32, 16  ;;  %v2754_v4 = vld [vmem:[#allocation2 + $0x74] sm:$0x1] }
 0x185   : > { %5084 = vmatmul.mubr.bf16.gmra.mrb[88].mxu0 %v10944_v58  ;;  %v3366_v53 = vsel %vm13311_vm11, %v3361_v3, %v3365_v54  ;;  %v2879_v62 = vsel %vm13342_vm14, %v2877_v19, %v2878_v9  ;;  %v2446_v26 = vshrl.u32 %v2238_v32, 16  ;;  %v2452_v2 = vshll.u32 %v2239_v59, 16  ;;  %v2240_v9 = vld [vmem:[#allocation2 + $0x6c] sm:$0xf]  ;;  %v14015_v59 = vpop.f32.mrb[9].mxu1 }
 0x186   : > { %v3376_v17 = vsel %vm13311_vm11, %v3371_v30, %v3375_v51  ;;  %v10977_v33 = vcombine.low %v2876_v13, %v2879_v62  ;;  %v2438_v34 = vrot.slane %v2436_v50, 5  ;;  %v2444_v11 = vrot.slane %v2442_v14, 5  ;;  %v14019_v62 = vpop.f32.mrb[10].mxu0 }
 0x187   : > { %v11008_v39 = vcombine.low %v3366_v53, %v3376_v17  ;;  %v2448_v41 = vrot.slane %v2446_v26, 4  ;;  %v2454_v60 = vrot.slane %v2452_v2, 5  ;;  %v3378_v8 = vshrl.u32 %v3182_v12, 16  ;;  %v2241_v53 = vld [vmem:[#allocation2 + $0x70] sm:$0xf] }
 0x188   : > { %5091 = vmatprep.mubr.bf16.mxu0 %v10977_v33  ;;  %v2439_v54 = vor.u32 %v2438_v34, %v2435_v23  ;;  %v3381_v48 = vshll.u32 %v3182_v12, 16  ;;  %v3387_v56 = vshll.u32 %v3183_v22, 16  ;;  %v3391_v49 = vshrl.u32 %v3183_v22, 16  ;;  %v3185_v33 = vld [vmem:[#allocation2 + $0x78] sm:$0xf] }
 0x189   : > { %5244 = vmatprep.mubr.bf16.mxu1 %v11008_v39  ;;  %v2449_v51 = vor.u32 %v2448_v41, %v2444_v11  ;;  %v3380_v32 = vrot.slane %v3378_v8, 4  ;;  %v3397_v63 = vshll.u32 %v3184_v55, 16  ;;  %v10962_v5 = vrot.slane %v2752_v29, 9  ;;  %v2242_v29 = vld [vmem:[#allocation2 + $0x74] sm:$0x1]  ;;  %v14025_v8 = vpop.f32.mrb[10].mxu1 }
 0x18a   : > { %5245 = vmatmul.mubr.bf16.gmra.mrb[88].mxu1 %v12711_v10  ;;  %v2440_v28 = vrot.slane %v2439_v54, 4  ;;  %v3383_v58 = vrot.slane %v3381_v48, 5  ;;  %v3389_v3 = vrot.slane %v3387_v56, 5  ;;  %v3393_v13 = vrot.slane %v3391_v49, 4  ;;  %v3186_v41 = vld [vmem:[#allocation2 + $0x7c] sm:$0xf] }
 0x18b   : > { %v2450_v19 = vrot.slane %v2449_v51, 4  ;;  %v3399_v30 = vrot.slane %v3397_v63, 5  ;;  %v2882_v12 = vrot.slane %v2753_v36, 5  ;;  %v2885_v23 = vrot.slane %v2754_v4, 5  ;;  %v3187_v49 = vld [vmem:[#allocation2 + $0x80] sm:$0x1] }
 0x18c   : > { %v2445_v22 = vsel %vm13311_vm11, %v2440_v28, %v2444_v11  ;;  %v3384_v50 = vor.u32 %v3383_v58, %v3380_v32  ;;  %v3394_v14 = vor.u32 %v3393_v13, %v3389_v3  ;;  %v2457_v55 = vshrl.u32 %v2240_v9, 16  ;;  %v12712_v11 = vld [vmem:[#allocation2 + $0x6c] sm:$0xff]   ;;  %v14029_v51 = vpop.f32.mrb[11].mxu0  ;;  %v14035_v28 = vpop.f32.mrb[11].mxu1 }
 0x18d   : > { %v2455_v10 = vsel %vm13311_vm11, %v2450_v19, %v2454_v60  ;;  %v2883_v26 = vsel %vm13342_vm14, %v10962_v5, %v2882_v12  ;;  %v2884_v2 = vrot.slane %v2882_v12, 4  ;;  %v2460_v17 = vshll.u32 %v2240_v9, 16 }
 0x18e   : > { %v10945_v34 = vcombine.low %v2445_v22, %v2455_v10  ;;  %v3385_v36 = vrot.slane %v3384_v50, 4  ;;  %v3395_v4 = vrot.slane %v3394_v14, 4  ;;  %v2459_v39 = vrot.slane %v2457_v55, 4  ;;  %v2756_v22 = vld [vmem:[#allocation2 + $0x7c] sm:$0xf] }
 0x18f   : > { %v2886_v54 = vsel %vm13342_vm14, %v2884_v2, %v2885_v23  ;;  %v2462_v48 = vrot.slane %v2460_v17, 5  ;;  %v2466_v60 = vshll.u32 %v2241_v53, 16  ;;  %v2470_v56 = vshrl.u32 %v2241_v53, 16  ;;  %v2755_v23 = vld [vmem:[#allocation2 + $0x78] sm:$0xe]  ;;  %v14037_v17 = vpop.f32.mrb[12].mxu0 }
 0x190   : > { %5092 = vmatmul.mubr.bf16.gmra.mrb[92].mxu0 %v10945_v34  ;;  %v3390_v32 = vsel %vm13311_vm11, %v3385_v36, %v3389_v3  ;;  %v3400_v63 = vsel %vm13311_vm11, %v3395_v4, %v3399_v30  ;;  %v10978_v5 = vcombine.low %v2883_v26, %v2886_v54  ;;  %v2476_v9 = vshll.u32 %v2242_v29, 16  ;;  %v2757_v10 = vld [vmem:[#allocation2 + $0x80] sm:$0x1]  ;;  %v2243_v29 = vld [vmem:[#allocation2 + $0x78] sm:$0xf] }
 0x191   : > { %v11009_v58 = vcombine.low %v3390_v32, %v3400_v63  ;;  %v2463_v13 = vor.u32 %v2462_v48, %v2459_v39  ;;  %v2468_v19 = vrot.slane %v2466_v60, 5  ;;  %v2472_v12 = vrot.slane %v2470_v56, 4  ;;  %v2244_v54 = vld [vmem:[#allocation2 + $0x7c] sm:$0xf]  ;;  %v14041_v32 = vpop.f32.mrb[12].mxu1 }
 0x192   : > { %5099 = vmatprep.mubr.bf16.mxu0 %v10978_v5  ;;  %v2478_v50 = vrot.slane %v2476_v9, 5  ;;  %v3402_v14 = vshrl.u32 %v3185_v33, 16  ;;  %v3405_v53 = vshll.u32 %v3185_v33, 16  ;;  %v3411_v55 = vshll.u32 %v3186_v41, 16  ;;  %v14043_v9 = vpop.f32.mrb[13].mxu0 }
 0x193   : > { %5252 = vmatprep.mubr.bf16.mxu1 %v11009_v58  ;;  %v2464_v3 = vrot.slane %v2463_v13, 4  ;;  %v2473_v2 = vor.u32 %v2472_v12, %v2468_v19  ;;  %v3415_v30 = vshrl.u32 %v3186_v41, 16  ;;  %v3421_v26 = vshll.u32 %v3187_v49, 16  ;;  %v2245_v13 = vld [vmem:[#allocation2 + $0x80] sm:$0x1] }
 0x194   : > { %5253 = vmatmul.mubr.bf16.gmra.mrb[92].mxu1 %v12712_v11  ;;  %v3404_v34 = vrot.slane %v3402_v14, 4  ;;  %v3407_v36 = vrot.slane %v3405_v53, 5  ;;  %v3413_v4 = vrot.slane %v3411_v55, 5  ;;  %v10963_v39 = vrot.slane %v2755_v23, 9 }
 0x195   : > { %v2469_v48 = vsel %vm13311_vm11, %v2464_v3, %v2468_v19  ;;  %v2474_v33 = vrot.slane %v2473_v2, 4  ;;  %v3417_v60 = vrot.slane %v3415_v30, 4  ;;  %v3423_v56 = vrot.slane %v3421_v26, 5  ;;  %v3188_v3 = vld [vmem:[#allocation2 + $0x84] sm:$0xf] }
 0x196   : > { %v3408_v63 = vor.u32 %v3407_v36, %v3404_v34  ;;  %v2889_v41 = vrot.slane %v2756_v22, 5  ;;  %v2892_v49 = vrot.slane %v2757_v10, 5  ;;  %v2481_v5 = vshrl.u32 %v2243_v29, 16  ;;  %v12714_v22 = vld [vmem:[#allocation2 + $0x78] sm:$0xff]  }
 0x197   : > { %v2479_v11 = vsel %vm13311_vm11, %v2474_v33, %v2478_v50  ;;  %v3418_v58 = vor.u32 %v3417_v60, %v3413_v4  ;;  %v2484_v12 = vshll.u32 %v2243_v29, 16  ;;  %v2490_v23 = vshll.u32 %v2244_v54, 16 }
 0x198   : > { %v10946_v14 = vcombine.low %v2469_v48, %v2479_v11  ;;  %v3409_v19 = vrot.slane %v3408_v63, 4  ;;  %v2890_v53 = vsel %vm13342_vm14, %v10963_v39, %v2889_v41  ;;  %v2891_v55 = vrot.slane %v2889_v41, 4  ;;  %v3189_v48 = vld [vmem:[#allocation2 + $0x88] sm:$0xf]  ;;  %v3190_v63 = vld [vmem:[#allocation2 + $0x8c] sm:$0x1] }
 0x199   : > { %v3419_v2 = vrot.slane %v3418_v58, 4  ;;  %v2483_v10 = vrot.slane %v2481_v5, 4  ;;  %v2486_v30 = vrot.slane %v2484_v12, 5  ;;  %v2492_v26 = vrot.slane %v2490_v23, 5  ;;  %v2758_v5 = vld [vmem:[#allocation2 + $0x84] sm:$0xe] }
 0x19a   : > { %5100 = vmatmul.mubr.bf16.gmra.mrb[96].mxu0 %v10946_v14  ;;  %v3414_v50 = vsel %vm13311_vm11, %v3409_v19, %v3413_v4  ;;  %v2893_v29 = vsel %vm13342_vm14, %v2891_v55, %v2892_v49  ;;  %v2494_v34 = vshrl.u32 %v2244_v54, 16  ;;  %v2500_v36 = vshll.u32 %v2245_v13, 16  ;;  %v14055_v11 = vpop.f32.mrb[13].mxu1  ;;  %v2759_v14 = vld [vmem:[#allocation2 + $0x88] sm:$0xf]  ;;  %v14057_v19 = vpop.f32.mrb[14].mxu0 }
 0x19b   : > { %v3424_v39 = vsel %vm13311_vm11, %v3419_v2, %v3423_v56  ;;  %v10979_v33 = vcombine.low %v2890_v53, %v2893_v29  ;;  %v2487_v60 = vor.u32 %v2486_v30, %v2483_v10  ;;  %v3426_v41 = vshrl.u32 %v3188_v3, 16  ;;  %v2760_v56 = vld [vmem:[#allocation2 + $0x8c] sm:$0x1]  ;;  %v2246_v29 = vld [vmem:[#allocation2 + $0x84] sm:$0xf]  ;;  %v14059_v44 = vpop.f32.mrb[14].mxu1 }
 0x19c   : > { %v11010_v58 = vcombine.low %v3414_v50, %v3424_v39  ;;  %v2496_v12 = vrot.slane %v2494_v34, 4  ;;  %v2502_v23 = vrot.slane %v2500_v36, 5  ;;  %v3429_v4 = vshll.u32 %v3188_v3, 16  ;;  %v2247_v39 = vld [vmem:[#allocation2 + $0x88] sm:$0xf] }
 0x19d   : > { %5107 = vmatprep.mubr.bf16.mxu0 %v10979_v33  ;;  %v2488_v54 = vrot.slane %v2487_v60, 4  ;;  %v3428_v49 = vrot.slane %v3426_v41, 4  ;;  %v3435_v13 = vshll.u32 %v3189_v48, 16  ;;  %v3439_v55 = vshrl.u32 %v3189_v48, 16  ;;  %v14063_v33 = vpop.f32.mrb[15].mxu0 }
 0x19e   : > { %5260 = vmatprep.mubr.bf16.mxu1 %v11010_v58  ;;  %v2497_v53 = vor.u32 %v2496_v12, %v2492_v26  ;;  %v3431_v2 = vrot.slane %v3429_v4, 5  ;;  %v3445_v10 = vshll.u32 %v3190_v63, 16  ;;  %v10964_v30 = vrot.slane %v2758_v5, 9  ;;  %v2248_v12 = vld [vmem:[#allocation2 + $0x8c] sm:$0x1]  ;;  %v14065_v63 = vpop.f32.mrb[15].mxu1 }
 0x19f   : > { %5261 = vmatmul.mubr.bf16.gmra.mrb[96].mxu1 %v12714_v22  ;;  %v2493_v3 = vsel %vm13311_vm11, %v2488_v54, %v2492_v26  ;;  %v3437_v50 = vrot.slane %v3435_v13, 5  ;;  %v3441_v34 = vrot.slane %v3439_v55, 4  ;;  %v2896_v36 = vrot.slane %v2759_v14, 5  ;;  %v3191_v26 = vld [vmem:[#allocation2 + $0x90] sm:$0xf] }
 0x1a0   : > { %v2498_v48 = vrot.slane %v2497_v53, 4  ;;  %v3432_v60 = vor.u32 %v3431_v2, %v3428_v49  ;;  %v3447_v41 = vrot.slane %v3445_v10, 5  ;;  %v2899_v58 = vrot.slane %v2760_v56, 5  ;;  %v12722_v53 = vld [vmem:[#allocation8 + $0x238] sm:$0xff]  }
 0x1a1   : > { %v3442_v5 = vor.u32 %v3441_v34, %v3437_v50  ;;  %v2897_v22 = vsel %vm13342_vm14, %v10964_v30, %v2896_v36  ;;  %v2898_v4 = vrot.slane %v2896_v36, 4  ;;  %v2505_v37 = vshrl.u32 %v2246_v29, 16  ;;  %v3192_v34 = vld [vmem:[#allocation2 + $0x94] sm:$0xf]  ;;  %12449 = vmatprep.subr.bf16.mxu0 %v12722_v53 }
 0x1a2   : > { %v2503_v14 = vsel %vm13311_vm11, %v2498_v48, %v2502_v23  ;;  %v3433_v54 = vrot.slane %v3432_v60, 4  ;;  %v2508_v13 = vshll.u32 %v2246_v29, 16  ;;  %v2514_v55 = vshll.u32 %v2247_v39, 16  ;;  %v12715_v29 = vld [vmem:[#allocation2 + $0x84] sm:$0xff]   ;;  %v3193_v60 = vld [vmem:[#allocation2 + $0x98] sm:$0x1]  ;;  %12450 = vmatpush3.bf16.msra.mxu0 %v12722_v53 }
 0x1a3   : > { %v10947_v49 = vcombine.low %v2493_v3, %v2503_v14  ;;  %v3443_v2 = vrot.slane %v3442_v5, 4  ;;  %v2900_v56 = vsel %vm13342_vm14, %v2898_v4, %v2899_v58  ;;  %v2507_v10 = vrot.slane %v2505_v37, 4  ;;  %v2249_v53 = vld [vmem:[#allocation2 + $0x90] sm:$0xf] }
 0x1a4   : > { %v3438_v30 = vsel %vm13311_vm11, %v3433_v54, %v3437_v50  ;;  %v10980_v36 = vcombine.low %v2897_v22, %v2900_v56  ;;  %v2510_v24 = vrot.slane %v2508_v13, 5  ;;  %v2516_v61 = vrot.slane %v2514_v55, 5  ;;  %v2762_v55 = vld [vmem:[#allocation2 + $0x94] sm:$0xf] }
 0x1a5   : > { %5108 = vmatmul.mubr.bf16.gmra.mrb[100].mxu0 %v10947_v49  ;;  %v3448_v23 = vsel %vm13311_vm11, %v3443_v2, %v3447_v41  ;;  %v2518_v48 = vshrl.u32 %v2247_v39, 16  ;;  %v2524_v3 = vshll.u32 %v2248_v12, 16  ;;  %v3450_v5 = vshrl.u32 %v3191_v26, 16  ;;  %v2763_v12 = vld [vmem:[#allocation2 + $0x98] sm:$0x1] }
 0x1a6   : > { %v11011_v14 = vcombine.low %v3438_v30, %v3448_v23  ;;  %5115 = vmatprep.mubr.bf16.mxu0 %v10980_v36  ;;  %v2511_v37 = vor.u32 %v2510_v24, %v2507_v10  ;;  %v3453_v58 = vshll.u32 %v3191_v26, 16  ;;  %v3459_v4 = vshll.u32 %v3192_v34, 16  ;;  %v2250_v10 = vld [vmem:[#allocation2 + $0x94] sm:$0xf] }
 0x1a7   : > { %v2520_v50 = vrot.slane %v2518_v48, 4  ;;  %v2526_v22 = vrot.slane %v2524_v3, 5  ;;  %v3452_v54 = vrot.slane %v3450_v5, 4  ;;  %v3463_v13 = vshrl.u32 %v3192_v34, 16  ;;  %v14085_v34 = vpop.f32.mrb[16].mxu0  ;;  %v14093_v3 = vpop.f32.mrb[16].mxu1 }
 0x1a8   : > { %5268 = vmatprep.mubr.bf16.mxu1 %v11011_v14  ;;  %v2512_v49 = vrot.slane %v2511_v37, 4  ;;  %v3455_v41 = vrot.slane %v3453_v58, 5  ;;  %v3461_v2 = vrot.slane %v3459_v4, 5  ;;  %v3469_v39 = vshll.u32 %v3193_v60, 16  ;;  %v2251_v60 = vld [vmem:[#allocation2 + $0x98] sm:$0x1] }
 0x1a9   : > { %5269 = vmatmul.mubr.bf16.gmra.mrb[100].mxu1 %v12715_v29  ;;  %v2521_v56 = vor.u32 %v2520_v50, %v2516_v61  ;;  %v3465_v30 = vrot.slane %v3463_v13, 4  ;;  %v14079_v24 = vadd.f32 %v13931_v45, %v13929_v15  ;;  %v14083_v26 = vadd.f32 %v13949_v0, %v13945_v20  ;;  %v14099_v5 = vpop.f32.mrb[17].mxu0  ;;  %v14101_v14 = vpop.f32.mrb[17].mxu1 }
 0x1aa   : > { %v2517_v36 = vsel %vm13311_vm11, %v2512_v49, %v2516_v61  ;;  %v3456_v23 = vor.u32 %v3455_v41, %v3452_v54  ;;  %v3471_v48 = vrot.slane %v3469_v39, 5  ;;  %v14091_v29 = vadd.f32 %v13941_v43, %v13933_v31  ;;  %v14103_v31 = vpop.f32.mrb[18].mxu0  ;;  %v14105_v43 = vpop.f32.mrb[18].mxu1  ;;  %v12717_v41 = vld [vmem:[#allocation2 + $0x90] sm:$0xff]  }
 0x1ab   : > { %16237 = vst [vmem:[#allocation20_spill] sm:$0xff] %v14079_v24  ;;  %16238 = vst [vmem:[#allocation21_spill] sm:$0xff] %v14083_v26  ;;  %v2522_v15 = vrot.slane %v2521_v56, 4  ;;  %v3466_v45 = vor.u32 %v3465_v30, %v3461_v2  ;;  %v14097_v20 = vadd.f32 %v13959_v47, %v13953_v7  ;;  %v10965_v0 = vrot.slane %v2761_v25, 9  ;;  %v14109_v25 = vpop.f32.mrb[19].mxu0  ;;  %v14111_v13 = vpop.f32.mrb[19].mxu1 }
 0x1ac   : > { %16239 = vst [vmem:[#allocation22_spill] sm:$0xff] %v14091_v29  ;;  %v3457_v61 = vrot.slane %v3456_v23, 4  ;;  %v2903_v37 = vrot.slane %v2762_v55, 5  ;;  %v2906_v58 = vrot.slane %v2763_v12, 5  ;;  %v2529_v4 = vshrl.u32 %v2249_v53, 16  ;;  %v14117_v30 = vpop.f32.mrb[20].mxu0 }
 0x1ad   : > { %16240 = vst [vmem:[#allocation23_spill] sm:$0xff] %v14097_v20  ;;  %v2527_v50 = vsel %vm13311_vm11, %v2522_v15, %v2526_v22  ;;  %v3467_v54 = vrot.slane %v3466_v45, 4  ;;  %v2532_v7 = vshll.u32 %v2249_v53, 16  ;;  %v2538_v47 = vshll.u32 %v2250_v10, 16  ;;  %v3194_v56 = vld [vmem:[#allocation2 + $0x9c] sm:$0xf] }
 0x1ae   : > { %v10948_v49 = vcombine.low %v2517_v36, %v2527_v50  ;;  %v3462_v55 = vsel %vm13311_vm11, %v3457_v61, %v3461_v2  ;;  %v2904_v39 = vsel %vm13342_vm14, %v10965_v0, %v2903_v37  ;;  %v2905_v12 = vrot.slane %v2903_v37, 4  ;;  %16241 = vst [vmem:[#allocation24_spill] sm:$0xff] %v14117_v30  ;;  %v3195_v45 = vld [vmem:[#allocation2 + $0xa0] sm:$0xf]  ;;  %v14121_v20 = vpop.f32.mrb[20].mxu1 }
 0x1af   : > { %v3472_v22 = vsel %vm13311_vm11, %v3467_v54, %v3471_v48  ;;  %v2531_v53 = vrot.slane %v2529_v4, 4  ;;  %v2534_v23 = vrot.slane %v2532_v7, 5  ;;  %v2540_v15 = vrot.slane %v2538_v47, 5  ;;  %16242 = vst [vmem:[#allocation25_spill] sm:$0xff] %v14121_v20  ;;  %v3196_v37 = vld [vmem:[#allocation2 + $0xa4] sm:$0x1] }
 0x1b0   : > { %5116 = vmatmul.mubr.bf16.gmra.mrb[104].mxu0 %v10948_v49  ;;  %v11012_v36 = vcombine.low %v3462_v55, %v3472_v22  ;;  %v2907_v2 = vsel %vm13342_vm14, %v2905_v12, %v2906_v58  ;;  %v2542_v61 = vshrl.u32 %v2250_v10, 16  ;;  %v2548_v0 = vshll.u32 %v2251_v60, 16  ;;  %v2764_v47 = vld [vmem:[#allocation2 + $0x9c] sm:$0xe]  ;;  %v2765_v30 = vld [vmem:[#allocation2 + $0xa0] sm:$0xf] }
 0x1b1   : > { %v10981_v50 = vcombine.low %v2904_v39, %v2907_v2  ;;  %v2535_v29 = vor.u32 %v2534_v23, %v2531_v53  ;;  %v3474_v26 = vshrl.u32 %v3194_v56, 16  ;;  %v3477_v24 = vshll.u32 %v3194_v56, 16  ;;  %v14125_v20 = vpop.f32.mrb[21].mxu0  ;;  %v14127_v49 = vpop.f32.mrb[21].mxu1 }
 0x1b2   : > { %5276 = vmatprep.mubr.bf16.mxu1 %v11012_v36  ;;  %v2544_v48 = vrot.slane %v2542_v61, 4  ;;  %v2550_v4 = vrot.slane %v2548_v0, 5  ;;  %v3483_v54 = vshll.u32 %v3195_v45, 16  ;;  %v3487_v7 = vshrl.u32 %v3195_v45, 16  ;;  %v14129_v39 = vpop.f32.mrb[22].mxu0  ;;  %v14131_v12 = vpop.f32.mrb[22].mxu1 }
 0x1b3   : > { %5277 = vmatmul.mubr.bf16.gmra.mrb[104].mxu1 %v12717_v41  ;;  %5123 = vmatprep.mubr.bf16.mxu0 %v10981_v50  ;;  %v2536_v10 = vrot.slane %v2535_v29, 4  ;;  %v3476_v60 = vrot.slane %v3474_v26, 4  ;;  %v3479_v58 = vrot.slane %v3477_v24, 5  ;;  %v3493_v55 = vshll.u32 %v3196_v37, 16  ;;  %v2766_v45 = vld [vmem:[#allocation2 + $0xa4] sm:$0x1] }
 0x1b4   : > { %v2545_v56 = vor.u32 %v2544_v48, %v2540_v15  ;;  %v3485_v22 = vrot.slane %v3483_v54, 5  ;;  %v3489_v53 = vrot.slane %v3487_v7, 4  ;;  %v14135_v23 = vadd.f32 %v13973_v21, %v13967_v16  ;;  %v14137_v36 = vpop.f32.mrb[23].mxu0  ;;  %v14139_v41 = vpop.f32.mrb[23].mxu1  ;;  %v2252_v61 = vld [vmem:[#allocation2 + $0x9c] sm:$0xf] }
 0x1b5   : > { %v2541_v24 = vsel %vm13311_vm11, %v2536_v10, %v2540_v15  ;;  %v3480_v26 = vor.u32 %v3479_v58, %v3476_v60  ;;  %v3495_v29 = vrot.slane %v3493_v55, 5  ;;  %v14145_v2 = vadd.f32 %v13975_v38, %v13963_v46  ;;  %v14147_v0 = vpop.f32.mrb[24].mxu0  ;;  %v2253_v15 = vld [vmem:[#allocation2 + $0xa0] sm:$0xf]  ;;  %v2254_v48 = vld [vmem:[#allocation2 + $0xa4] sm:$0x1] }
 0x1b6   : > { %16243 = vst [vmem:[#allocation26_spill] sm:$0xff] %v14135_v23  ;;  %v2546_v37 = vrot.slane %v2545_v56, 4  ;;  %v3490_v16 = vor.u32 %v3489_v53, %v3485_v22  ;;  %v14151_v21 = vadd.f32 %v13989_v6, %v13983_v42  ;;  %v14155_v50 = vadd.f32 %v13995_v57, %v13985_v35  ;;  %v14157_v54 = vpop.f32.mrb[24].mxu1  ;;  %v3197_v60 = vld [vmem:[#allocation2 + $0xa8] sm:$0xf]  ;;  %v14161_v6 = vpop.f32.mrb[25].mxu0 }
 0x1b7   : > { %16244 = vst [vmem:[#allocation27_spill] sm:$0xff] %v14145_v2  ;;  %16247 = vst [vmem:[#allocation30_spill] sm:$0xff] %v14157_v54  ;;  %v3481_v7 = vrot.slane %v3480_v26, 4  ;;  %v10966_v46 = vrot.slane %v2764_v47, 9  ;;  %v2910_v38 = vrot.slane %v2765_v30, 5  ;;  %v2913_v10 = vrot.slane %v2766_v45, 5 }
 0x1b8   : > { %16245 = vst [vmem:[#allocation28_spill] sm:$0xff] %v14151_v21  ;;  %16246 = vst [vmem:[#allocation29_spill] sm:$0xff] %v14155_v50  ;;  %v2551_v58 = vsel %vm13311_vm11, %v2546_v37, %v2550_v4  ;;  %v3491_v55 = vrot.slane %v3490_v16, 4  ;;  %v2553_v56 = vshrl.u32 %v2252_v61, 16  ;;  %v2556_v42 = vshll.u32 %v2252_v61, 16  ;;  %v14163_v53 = vpop.f32.mrb[25].mxu1 }
 0x1b9   : > { %16248 = vst [vmem:[#allocation31_spill] sm:$0xff] %v14163_v53  ;;  %v10949_v35 = vcombine.low %v2541_v24, %v2551_v58  ;;  %v3486_v57 = vsel %vm13311_vm11, %v3481_v7, %v3485_v22  ;;  %v2911_v47 = vsel %vm13342_vm14, %v10966_v46, %v2910_v38  ;;  %v2912_v30 = vrot.slane %v2910_v38, 4  ;;  %v3198_v45 = vld [vmem:[#allocation2 + $0xac] sm:$0xf]  ;;  %v14169_v26 = vpop.f32.mrb[26].mxu0  ;;  %v14171_v50 = vpop.f32.mrb[26].mxu1 }
 0x1ba   : > { %16249 = vst [vmem:[#allocation32_spill] sm:$0xff] %v14169_v26  ;;  %16250 = vst [vmem:[#allocation33_spill] sm:$0xff] %v14171_v50  ;;  %v3496_v4 = vsel %vm13311_vm11, %v3491_v55, %v3495_v29  ;;  %v12718_v61 = vld [vmem:[#allocation2 + $0x9c] sm:$0xff]   ;;  %v2555_v37 = vrot.slane %v2553_v56, 4  ;;  %v2558_v16 = vrot.slane %v2556_v42, 5  ;;  %v2562_v21 = vshll.u32 %v2253_v15, 16 }
 0x1bb   : > { %v14175_v24 = vpop.f32.mrb[27].mxu0  ;;  %v14177_v58 = vpop.f32.mrb[27].mxu1  ;;  %5124 = vmatmul.mubr.bf16.gmra.mrb[108].mxu0 %v10949_v35  ;;  %v11013_v22 = vcombine.low %v3486_v57, %v3496_v4  ;;  %v2914_v7 = vsel %vm13342_vm14, %v2912_v30, %v2913_v10  ;;  %v2566_v46 = vshrl.u32 %v2253_v15, 16  ;;  %v2572_v38 = vshll.u32 %v2254_v48, 16  ;;  %v3199_v2 = vld [vmem:[#allocation2 + $0xb0] sm:$0x1] }
 0x1bc   : > { %16251 = vst [vmem:[#allocation34_spill] sm:$0xff] %v14175_v24  ;;  %v10982_v23 = vcombine.low %v2911_v47, %v2914_v7  ;;  %v2559_v50 = vor.u32 %v2558_v16, %v2555_v37  ;;  %v2564_v26 = vrot.slane %v2562_v21, 5  ;;  %v3498_v29 = vshrl.u32 %v3197_v60, 16  ;;  %v2767_v24 = vld [vmem:[#allocation2 + $0xa8] sm:$0xe]  ;;  %v14181_v15 = vpop.f32.mrb[28].mxu0 }
 0x1bd   : > { %5284 = vmatprep.mubr.bf16.mxu1 %v11013_v22  ;;  %v2568_v55 = vrot.slane %v2566_v46, 4  ;;  %v2574_v56 = vrot.slane %v2572_v38, 5  ;;  %v3501_v42 = vshll.u32 %v3197_v60, 16  ;;  %v3507_v53 = vshll.u32 %v3198_v45, 16  ;;  %v2768_v54 = vld [vmem:[#allocation2 + $0xac] sm:$0xf] }
 0x1be   : > { %5285 = vmatmul.mubr.bf16.gmra.mrb[108].mxu1 %v12718_v61  ;;  %5131 = vmatprep.mubr.bf16.mxu0 %v10982_v23  ;;  %v2560_v35 = vrot.slane %v2559_v50, 4  ;;  %v3500_v57 = vrot.slane %v3498_v29, 4  ;;  %v3511_v4 = vshrl.u32 %v3198_v45, 16  ;;  %v3517_v10 = vshll.u32 %v3199_v2, 16  ;;  %v14183_v48 = vpop.f32.mrb[28].mxu1  ;;  %v14189_v16 = vpop.f32.mrb[29].mxu0 }
 0x1bf   : > { %v2569_v47 = vor.u32 %v2568_v55, %v2564_v26  ;;  %v3503_v21 = vrot.slane %v3501_v42, 5  ;;  %v3509_v30 = vrot.slane %v3507_v53, 5  ;;  %v14187_v37 = vadd.f32 %v14013_v40, %v13997_v52  ;;  %v2769_v60 = vld [vmem:[#allocation2 + $0xb0] sm:$0x1]  ;;  %v14191_v61 = vpop.f32.mrb[29].mxu1  ;;  %v14199_v53 = vpop.f32.mrb[30].mxu0 }
 0x1c0   : > { %v2565_v23 = vsel %vm13311_vm11, %v2560_v35, %v2564_v26  ;;  %v3513_v2 = vrot.slane %v3511_v4, 4  ;;  %v3519_v50 = vrot.slane %v3517_v10, 5  ;;  %v14197_v45 = vadd.f32 %v14015_v59, %v14011_v18  ;;  %v2255_v22 = vld [vmem:[#allocation2 + $0xa8] sm:$0xf]  ;;  %v14201_v7 = vpop.f32.mrb[30].mxu1  ;;  %v14211_v29 = vpop.f32.mrb[31].mxu0 }
 0x1c1   : > { %16252 = vst [vmem:[#allocation35_spill] sm:$0xff] %v14187_v37  ;;  %v2570_v52 = vrot.slane %v2569_v47, 4  ;;  %v3504_v40 = vor.u32 %v3503_v21, %v3500_v57  ;;  %v14205_v46 = vadd.f32 %v14029_v51, %v14019_v62  ;;  %v14209_v26 = vadd.f32 %v14035_v28, %v14025_v8  ;;  %v2256_v38 = vld [vmem:[#allocation2 + $0xac] sm:$0xf]  ;;  %v14213_v18 = vpop.f32.mrb[31].mxu1 }
 0x1c2   : > { %16253 = vst [vmem:[#allocation36_spill] sm:$0xff] %v14197_v45  ;;  %v3514_v59 = vor.u32 %v3513_v2, %v3509_v30  ;;  %v10967_v55 = vrot.slane %v2767_v24, 9  ;;  %v2917_v42 = vrot.slane %v2768_v54, 5  ;;  %v2920_v35 = vrot.slane %v2769_v60, 5  ;;  %v2257_v4 = vld [vmem:[#allocation2 + $0xb0] sm:$0x1] }
 0x1c3   : > { %16254 = vst [vmem:[#allocation37_spill] sm:$0xff] %v14205_v46  ;;  %16255 = vst [vmem:[#allocation38_spill] sm:$0xff] %v14209_v26  ;;  %v2575_v62 = vsel %vm13311_vm11, %v2570_v52, %v2574_v56  ;;  %v3505_v51 = vrot.slane %v3504_v40, 4  ;;  %v2577_v57 = vshrl.u32 %v2255_v22, 16  ;;  %v2580_v47 = vshll.u32 %v2255_v22, 16 }
 0x1c4   : > { %v14215_v10 = vpop.f32.mrb[32].mxu0  ;;  %v3200_v8 = vld [vmem:[#allocation2 + $0xb4] sm:$0xf]  ;;  %v10950_v21 = vcombine.low %v2565_v23, %v2575_v62  ;;  %v3515_v26 = vrot.slane %v3514_v59, 4  ;;  %v2918_v2 = vsel %vm13342_vm14, %v10967_v55, %v2917_v42  ;;  %v2919_v24 = vrot.slane %v2917_v42, 4  ;;  %v12720_v59 = vld [vmem:[#allocation2 + $0xa8] sm:$0xff]  }
 0x1c5   : > { %16256 = vst [vmem:[#allocation39_spill] sm:$0xff] %v14215_v10  ;;  %v14219_v28 = vpop.f32.mrb[33].mxu0  ;;  %v3201_v54 = vld [vmem:[#allocation2 + $0xb8] sm:$0xf]  ;;  %v3510_v46 = vsel %vm13311_vm11, %v3505_v51, %v3509_v30  ;;  %v2579_v45 = vrot.slane %v2577_v57, 4  ;;  %v2582_v56 = vrot.slane %v2580_v47, 5 }
 0x1c6   : > { %16257 = vst [vmem:[#allocation40_spill] sm:$0xff] %v14219_v28  ;;  %v14223_v60 = vpop.f32.mrb[34].mxu0  ;;  %v2586_v52 = vshll.u32 %v2256_v38, 16  ;;  %5132 = vmatmul.mubr.bf16.gmra.mrb[112].mxu0 %v10950_v21  ;;  %v3520_v23 = vsel %vm13311_vm11, %v3515_v26, %v3519_v50  ;;  %v2921_v55 = vsel %vm13342_vm14, %v2919_v24, %v2920_v35  ;;  %v2590_v42 = vshrl.u32 %v2256_v38, 16  ;;  %v3202_v37 = vld [vmem:[#allocation2 + $0xbc] sm:$0x1] }
 0x1c7   : > { %16258 = vst [vmem:[#allocation41_spill] sm:$0xff] %v14223_v60  ;;  %v14227_v40 = vpop.f32.mrb[32].mxu1  ;;  %v14229_v22 = vpop.f32.mrb[35].mxu0  ;;  %v2596_v62 = vshll.u32 %v2257_v4, 16  ;;  %v11014_v30 = vcombine.low %v3510_v46, %v3520_v23  ;;  %v10983_v51 = vcombine.low %v2918_v2, %v2921_v55  ;;  %v2583_v57 = vor.u32 %v2582_v56, %v2579_v45  ;;  %v12725_v26 = vld [vmem:[#allocation10 + $0x40] sm:$0xff]  }
 0x1c8   : > { %16259 = vst [vmem:[#allocation42_spill] sm:$0xff] %v14227_v40  ;;  %16260 = vst [vmem:[#allocation43_spill] sm:$0xff] %v14229_v22  ;;  %v14235_v60 = vpop.f32.mrb[33].mxu1  ;;  %v2588_v47 = vrot.slane %v2586_v52, 5  ;;  %v2592_v22 = vrot.slane %v2590_v42, 4  ;;  %v3522_v28 = vshrl.u32 %v3200_v8, 16  ;;  %v14243_v56 = vadd.f32 %v14043_v9, %v14037_v17  ;;  %11963 = vmatprep.subr.bf16.mxu1 %v12725_v26 }
 0x1c9   : > { %16261 = vst [vmem:[#allocation44_spill] sm:$0xff] %v14235_v60  ;;  %v14237_v40 = vpop.f32.mrb[34].mxu1  ;;  %v2598_v21 = vrot.slane %v2596_v62, 5  ;;  %v3525_v10 = vshll.u32 %v3200_v8, 16  ;;  %5292 = vmatprep.mubr.bf16.mxu1 %v11014_v30  ;;  %5139 = vmatprep.mubr.bf16.mxu0 %v10983_v51  ;;  %v2584_v38 = vrot.slane %v2583_v57, 4  ;;  %v3531_v35 = vshll.u32 %v3201_v54, 16 }
 0x1ca   : > { %v14239_v50 = vpop.f32.mrb[35].mxu1  ;;  %v3535_v4 = vshrl.u32 %v3201_v54, 16  ;;  %v3541_v24 = vshll.u32 %v3202_v37, 16  ;;  %v2770_v60 = vld [vmem:[#allocation2 + $0xb4] sm:$0xe]  ;;  %5293 = vmatmul.mubr.bf16.gmra.mrb[112].mxu1 %v12720_v59  ;;  %v2593_v46 = vor.u32 %v2592_v22, %v2588_v47  ;;  %v3524_v45 = vrot.slane %v3522_v28, 4 }
 0x1cb   : > { %v3527_v2 = vrot.slane %v3525_v10, 5  ;;  %v2771_v52 = vld [vmem:[#allocation2 + $0xb8] sm:$0xf]  ;;  %v2772_v8 = vld [vmem:[#allocation2 + $0xbc] sm:$0x1]  ;;  %v2589_v23 = vsel %vm13311_vm11, %v2584_v38, %v2588_v47  ;;  %v3533_v55 = vrot.slane %v3531_v35, 5  ;;  %v14249_v10 = vadd.f32 %v14055_v11, %v14041_v32 }
 0x1cc   : > { %v3537_v42 = vrot.slane %v3535_v4, 4  ;;  %v3543_v62 = vrot.slane %v3541_v24, 5  ;;  %v2258_v54 = vld [vmem:[#allocation2 + $0xb4] sm:$0xf]  ;;  %v12726_v37 = vld [vmem:[#allocation10] sm:$0xff]   ;;  %v2594_v30 = vrot.slane %v2593_v46, 4  ;;  %v14253_v17 = vadd.f32 %v14063_v33, %v14057_v19 }
 0x1cd   : > { %v3528_v59 = vor.u32 %v3527_v2, %v3524_v45  ;;  %16262 = vst [vmem:[#allocation45_spill] sm:$0xff] %v14249_v10  ;;  %v14257_v28 = vadd.f32 %v14065_v63, %v14059_v44  ;;  %v10968_v22 = vrot.slane %v2770_v60, 9  ;;  %v2924_v51 = vrot.slane %v2771_v52, 5  ;;  %v2259_v57 = vld [vmem:[#allocation2 + $0xb8] sm:$0xf]  ;;  %11964 = vmatpush3.bf16.msra.mxu1 %v12726_v37 }
 0x1ce   : > { %16263 = vst [vmem:[#allocation46_spill] sm:$0xff] %v14253_v17  ;;  %v3538_v9 = vor.u32 %v3537_v42, %v3533_v55  ;;  %v2599_v47 = vsel %vm13311_vm11, %v2594_v30, %v2598_v21  ;;  %v2927_v38 = vrot.slane %v2772_v8, 5  ;;  %v2260_v32 = vld [vmem:[#allocation2 + $0xbc] sm:$0x1]  ;;  %v2601_v11 = vshrl.u32 %v2258_v54, 16  ;;  %v12721_v8 = vld [vmem:[#allocation2 + $0xb4] sm:$0xff]  }
 0x1cf   : > { %16264 = vst [vmem:[#allocation47_spill] sm:$0xff] %v14257_v28  ;;  %v3529_v26 = vrot.slane %v3528_v59, 4  ;;  %v10951_v35 = vcombine.low %v2589_v23, %v2599_v47  ;;  %v2925_v19 = vsel %vm13342_vm14, %v10968_v22, %v2924_v51  ;;  %v2926_v33 = vrot.slane %v2924_v51, 4  ;;  %v441_v24 = vld [vmem:[#allocation2 + $0xc8] sm:$0x1] }
 0x1d0   : > { %v3539_v4 = vrot.slane %v3538_v9, 4  ;;  %v2603_v60 = vrot.slane %v2601_v11, 4  ;;  %v2604_v46 = vshll.u32 %v2258_v54, 16  ;;  %v2610_v45 = vshll.u32 %v2259_v57, 16  ;;  %v3203_v21 = vld [vmem:[#allocation2 + $0xc0] sm:$0xf] }
 0x1d1   : > { %v3534_v63 = vsel %vm13311_vm11, %v3529_v26, %v3533_v55  ;;  %5140 = vmatmul.mubr.bf16.gmra.mrb[116].mxu0 %v10951_v35  ;;  %v2928_v23 = vsel %vm13342_vm14, %v2926_v33, %v2927_v38  ;;  %v2614_v42 = vshrl.u32 %v2259_v57, 16  ;;  %v2620_v37 = vshll.u32 %v2260_v32, 16  ;;  %v3204_v30 = vld [vmem:[#allocation2 + $0xc4] sm:$0xf] }
 0x1d2   : > { %v3544_v52 = vsel %vm13311_vm11, %v3539_v4, %v3543_v62  ;;  %v10984_v9 = vcombine.low %v2925_v19, %v2928_v23  ;;  %v2606_v54 = vrot.slane %v2604_v46, 5  ;;  %v2612_v22 = vrot.slane %v2610_v45, 5  ;;  %v2262_v23 = vld [vmem:[#allocation2 + $0xc4] sm:$0xf] }
 0x1d3   : > { %v14263_v44 = vpop.f32.mrb[36].mxu0  ;;  %v11015_v55 = vcombine.low %v3534_v63, %v3544_v52  ;;  %v2616_v47 = vrot.slane %v2614_v42, 4  ;;  %v2622_v26 = vrot.slane %v2620_v37, 5  ;;  %v442_v62 = vsel %vm13255_vm4, 0, %v441_v24  ;;  %v2261_v52 = vld [vmem:[#allocation2 + $0xc0] sm:$0xf] }
 0x1d4   : > { %v14267_v2 = vpop.f32.mrb[37].mxu0  ;;  %v3546_v35 = vshrl.u32 %v3203_v21, 16  ;;  %v14279_v4 = vpop.f32.mrb[36].mxu1  ;;  %5147 = vmatprep.mubr.bf16.mxu0 %v10984_v9  ;;  %v2607_v57 = vor.u32 %v2606_v54, %v2603_v60  ;;  %443 = vst [vmem:[#allocation2 + $0xc8] sm:$0x1] %v442_v62  ;;  %v3549_v38 = vshll.u32 %v3203_v21, 16  ;;  %v14285_v45 = vadd.f32 %v14099_v5, %v14085_v34 }
 0x1d5   : > { %v14273_v59 = vpop.f32.mrb[38].mxu0  ;;  %5300 = vmatprep.mubr.bf16.mxu1 %v11015_v55  ;;  %v3555_v32 = vshll.u32 %v3204_v30, 16  ;;  %v3559_v33 = vshrl.u32 %v3204_v30, 16  ;;  %v14281_v19 = vpop.f32.mrb[37].mxu1  ;;  %v2617_v63 = vor.u32 %v2616_v47, %v2612_v22  ;;  %v14289_v24 = vadd.f32 %v14101_v14, %v14093_v3  ;;  %v2773_v5 = vld [vmem:[#allocation2 + $0xc0] sm:$0xe] }
 0x1d6   : > { %v14275_v51 = vpop.f32.mrb[39].mxu0  ;;  %5301 = vmatmul.mubr.bf16.gmra.mrb[116].mxu1 %v12721_v8  ;;  %v3548_v46 = vrot.slane %v3546_v35, 4  ;;  %16266 = vst [vmem:[#allocation16_spill] sm:$0xff] %v14285_v45  ;;  %v14291_v60 = vpop.f32.mrb[38].mxu1  ;;  %v2608_v21 = vrot.slane %v2607_v57, 4  ;;  %v3551_v42 = vrot.slane %v3549_v38, 5  ;;  %v14299_v34 = vadd.f32 %v14109_v25, %v14103_v31 }
 0x1d7   : > { %16267 = vst [vmem:[#allocation48_spill] sm:$0xff] %v14289_v24  ;;  %v14293_v37 = vrot.slane %v3555_v32, 5  ;;  %v3561_v30 = vrot.slane %v3559_v33, 4  ;;  %v14295_v8 = vpop.f32.mrb[39].mxu1  ;;  %v2618_v55 = vrot.slane %v2617_v63, 4  ;;  %v14303_v3 = vadd.f32 %v14111_v13, %v14105_v43  ;;  %v16270_v9 = vld [vmem:[#allocation19_spill] sm:$0xff] }
 0x1d8   : > { %16268 = vst [vmem:[#allocation49_spill] sm:$0xff] %v14299_v34  ;;  %v2774_v14 = vld [vmem:[#allocation2 + $0xc4] sm:$0xf]  ;;  %v958_v54 = vrot.slane %v16270_v9, 4  ;;  %v2613_v47 = vsel %vm13311_vm11, %v2608_v21, %v2612_v22  ;;  %v3552_v62 = vor.u32 %v3551_v42, %v3548_v46  ;;  %v2625_v38 = vshrl.u32 %v2261_v52, 16 }
 0x1d9   : > { %16269 = vst [vmem:[#allocation50_spill] sm:$0xff] %v14303_v3  ;;  %v3562_v35 = vor.u32 %v3561_v30, %v14293_v37  ;;  %v2623_v57 = vsel %vm13311_vm11, %v2618_v55, %v2622_v26  ;;  %v2628_v31 = vshll.u32 %v2261_v52, 16  ;;  %v2634_v25 = vshll.u32 %v2262_v23, 16  ;;  %v388_v32 = vld [vmem:[#allocation2 + $0xcc] sm:$0x1]  ;;  %v16282_v45 = vld [vmem:[#allocation32_spill] sm:$0xff] }
 0x1da   : > { %v10952_v33 = vcombine.low %v2613_v47, %v2623_v57  ;;  %v10969_v43 = vrot.slane %v2773_v5, 9  ;;  %v2931_v13 = vrot.slane %v2774_v14, 5  ;;  %v444_v63 = vld [vmem:[#allocation2 + $0xd4] sm:$0x1]  ;;  %v3207_v3 = vld [vmem:[#allocation2 + $0xd0] sm:$0xf]  ;;  %v14341_v11 = vadd.f32 %v14137_v36, %v14129_v39 }
 0x1db   : > { %v1119_v34 = vld [vmem:[#allocation2 + $0xc8] sm:$0x1]  ;;  %v14311_v9 = vrot.slane %v3552_v62, 4  ;;  %v14313_v24 = vrot.slane %v3562_v35, 4  ;;  %v2627_v22 = vrot.slane %v2625_v38, 4  ;;  %v2630_v46 = vrot.slane %v2628_v31, 5 }
 0x1dc   : > { %v3673_v21 = vld [vmem:[#allocation2 + $0x18] sm:$0xe]  ;;  %v3674_v42 = vld [vmem:[#allocation2 + $0x1c] sm:$0xf]  ;;  %5148 = vmatmul.mubr.bf16.gmra.mrb[120].mxu0 %v10952_v33  ;;  %v1120_v52 = vsel %vm13250_vm3, %v958_v54, %v1119_v34  ;;  %v14317_v30 = vrot.slane %v2634_v25, 5  ;;  %v2638_v55 = vshrl.u32 %v2262_v23, 16 }
 0x1dd   : > { %v389_v5 = vsel %vm13250_vm3, 0, %v388_v32  ;;  %v3675_v14 = vld [vmem:[#allocation2 + $0x20] sm:$0x1]  ;;  %1121 = vst [vmem:[#allocation2 + $0xc8] sm:$0x1] %v1120_v52  ;;  %v2631_v35 = vor.u32 %v2630_v46, %v2627_v22  ;;  %v445_v57 = vsel %vm13255_vm4, 0, %v444_v63 }
 0x1de   : > { %v14321_v47 = vpop.f32.mrb[40].mxu1  ;;  %v12727_v62 = vld [vmem:[#allocation10 + $0x48] sm:$0xff]   ;;  %390 = vst [vmem:[#allocation2 + $0xcc] sm:$0x1] %v389_v5  ;;  %v3579_v38 = vshll.u32 %v3207_v3, 16  ;;  %v3583_v31 = vshrl.u32 %v3207_v3, 16 }
 0x1df   : > { %v14325_v33 = vld [vmem:[#allocation2 + $0x24] sm:$0xe]  ;;  %v14327_v34 = vld [vmem:[#allocation2 + $0x28] sm:$0xf]  ;;  %v14329_v23 = vpop.f32.mrb[41].mxu1  ;;  %v2640_v54 = vrot.slane %v2638_v55, 4  ;;  %11965 = vmatprep.subr.bf16.mxu1 %v12727_v62  ;;  %v14349_v55 = vsel %vm13342_vm14, %v10969_v43, %v2931_v13 }
 0x1e0   : > { %446 = vst [vmem:[#allocation2 + $0xd4] sm:$0x1] %v445_v57  ;;  %v16272_v25 = vld [vmem:[#allocation24_spill] sm:$0xff]  ;;  %v16274_v52 = vld [vmem:[#allocation25_spill] sm:$0xff]  ;;  %v14343_v3 = vpop.f32.mrb[40].mxu0  ;;  %v14345_v63 = vpop.f32.mrb[42].mxu1 }
 0x1e1   : > { %v14333_v32 = vadd.f32 %v14125_v20, %v16272_v25  ;;  %v14337_v22 = vadd.f32 %v14127_v49, %v16274_v52  ;;  %16276 = vst [vmem:[#allocation25_spill] sm:$0xff] %v14341_v11  ;;  %v12728_v46 = vld [vmem:[#allocation10 + $0x8] sm:$0xff]   ;;  %v14351_v20 = vrot.slane %v3579_v38, 5  ;;  %v3585_v5 = vrot.slane %v3583_v31, 4  ;;  %v14357_v57 = vld [vmem:[#allocation2 + $0x2c] sm:$0x1] }
 0x1e2   : > { %v14355_v49 = vadd.f32 %v14139_v41, %v14131_v12  ;;  %v14359_v39 = vpop.f32.mrb[41].mxu0  ;;  %v14361_v36 = vpop.f32.mrb[43].mxu1  ;;  %v2933_v25 = vrot.slane %v2931_v13, 4  ;;  %v2641_v62 = vor.u32 %v2640_v54, %v14317_v30  ;;  %v11018_v52 = vrot.slane %v3673_v21, 9  ;;  %11966 = vmatpush3.bf16.msra.mxu1 %v12728_v46 }
 0x1e3   : > { %16273 = vst [vmem:[#allocation19_spill] sm:$0xff] %v14333_v32  ;;  %16275 = vst [vmem:[#allocation24_spill] sm:$0xff] %v14337_v22  ;;  %v3771_v26 = vrot.slane %v3674_v42, 5  ;;  %v14364_v43 = vpop.f32.mrb[42].mxu0  ;;  %v2632_v38 = vrot.slane %v2631_v35, 4  ;;  %v3586_v31 = vor.u32 %v3585_v5, %v14351_v20  ;;  %v3774_v11 = vrot.slane %v3675_v14, 5 }
 0x1e4   : > { %16277 = vst [vmem:[#allocation51_spill] sm:$0xff] %v14355_v49  ;;  %v3778_v12 = vrot.slane %v14327_v34, 5  ;;  %v14368_v41 = vpop.f32.mrb[43].mxu0  ;;  %v2642_v49 = vrot.slane %v2641_v62, 4  ;;  %v11019_v32 = vrot.slane %v14325_v33, 9  ;;  %v3558_v21 = vsel %vm13311_vm11, %v14311_v9, %v14293_v37  ;;  %v16279_v5 = vld [vmem:[#allocation30_spill] sm:$0xff] }
 0x1e5   : > { %v3773_v22 = vrot.slane %v3771_v26, 4  ;;  %v14376_v42 = vrot.slane %v3586_v31, 4  ;;  %v14382_v14 = vadd.f32 %v14161_v6, %v14147_v0  ;;  %v3205_v34 = vld [vmem:[#allocation2 + $0xc8] sm:$0x1]  ;;  %v3772_v33 = vsel %vm13342_vm14, %v11018_v52, %v3771_v26  ;;  %v16280_v62 = vld [vmem:[#allocation31_spill] sm:$0xff]  ;;  %v16283_v37 = vld [vmem:[#allocation34_spill] sm:$0xff] }
 0x1e6   : > { %v14378_v35 = vrot.slane %v3778_v12, 4  ;;  %v2775_v54 = vld [vmem:[#allocation2 + $0xc8] sm:$0x1]  ;;  %v14388_v13 = vadd.f32 %v16280_v62, %v16279_v5  ;;  %v14392_v9 = vadd.f32 %v16283_v37, %v16282_v45  ;;  %v3679_v0 = vld [vmem:[#allocation2 + $0x30] sm:$0xe]  ;;  %v3565_v6 = vshll.u32 %v3205_v34, 16 }
 0x1e7   : > { %16278 = vst [vmem:[#allocation52_spill] sm:$0xff] %v14382_v14  ;;  %v2263_v46 = vld [vmem:[#allocation2 + $0xc8] sm:$0x1]  ;;  %v2934_v14 = vrot.slane %v2775_v54, 5  ;;  %v3206_v10 = vld [vmem:[#allocation2 + $0xcc] sm:$0xf]  ;;  %v3775_v26 = vsel %vm13342_vm14, %v3773_v22, %v3774_v11  ;;  %v2637_v5 = vsel %vm13311_vm11, %v2632_v38, %v14317_v30 }
 0x1e8   : > { %16281 = vst [vmem:[#allocation30_spill] sm:$0xff] %v14388_v13  ;;  %16284 = vst [vmem:[#allocation31_spill] sm:$0xff] %v14392_v9  ;;  %v16285_v31 = vld [vmem:[#allocation33_spill] sm:$0xff]  ;;  %v2644_v17 = vshll.u32 %v2263_v46, 16  ;;  %v3680_v52 = vld [vmem:[#allocation2 + $0x34] sm:$0xf]  ;;  %v11034_v38 = vcombine.low %v3772_v33, %v3775_v26 }
 0x1e9   : > { %v14396_v28 = vadd.f32 %v14177_v58, %v16285_v31  ;;  %v3208_v62 = vld [vmem:[#allocation2 + $0xd4] sm:$0x1]  ;;  %v3570_v45 = vshrl.u32 %v3206_v10, 16  ;;  %v3573_v37 = vshll.u32 %v3206_v10, 16  ;;  %v14405_v58 = vadd.f32 %v14189_v16, %v14181_v15  ;;  %v14409_v22 = vpop.f32.mrb[44].mxu0  ;;  %v12723_v16 = vld [vmem:[#allocation2 + $0xc0] sm:$0xff]  }
 0x1ea   : > { %v3567_v31 = vrot.slane %v3565_v6, 5  ;;  %v2935_v34 = vsel %vm13342_vm14, %v2933_v25, %v2934_v14  ;;  %v2646_v54 = vrot.slane %v2644_v17, 5  ;;  %v3589_v46 = vshll.u32 %v3208_v62, 16  ;;  %v14412_v13 = vld [vmem:[#allocation2 + $0x40] sm:$0xf]  ;;  %v14414_v10 = vpop.f32.mrb[45].mxu0 }
 0x1eb   : > { %16286 = vst [vmem:[#allocation32_spill] sm:$0xff] %v14396_v28  ;;  %16287 = vst [vmem:[#allocation34_spill] sm:$0xff] %v14405_v58  ;;  %v3681_v28 = vld [vmem:[#allocation2 + $0x38] sm:$0x1]  ;;  %v10985_v11 = vcombine.low %v14349_v55, %v2935_v34  ;;  %v3572_v9 = vrot.slane %v3570_v45, 4  ;;  %v3575_v30 = vrot.slane %v3573_v37, 5  ;;  %v3779_v37 = vsel %vm13342_vm14, %v11019_v32, %v3778_v12 }
 0x1ec   : > { %v3568_v15 = vsel %vm13311_vm11, %v14313_v24, %v3567_v31  ;;  %v2647_v17 = vsel %vm13311_vm11, %v2642_v49, %v2646_v54  ;;  %v3591_v25 = vrot.slane %v3589_v46, 5  ;;  %v11020_v14 = vrot.slane %v3679_v0, 9  ;;  %v14421_v6 = vpop.f32.mrb[46].mxu0  ;;  %v3682_v24 = vld [vmem:[#allocation2 + $0x3c] sm:$0xe]  ;;  %v14429_v49 = vpop.f32.mrb[44].mxu1 }
 0x1ed   : > { %v11016_v55 = vcombine.low %v3558_v21, %v3568_v15  ;;  %5155 = vmatprep.mubr.bf16.mxu0 %v10985_v11  ;;  %v10953_v62 = vcombine.low %v2637_v5, %v2647_v17  ;;  %v3576_v33 = vor.u32 %v3575_v30, %v3572_v9  ;;  %v3785_v26 = vrot.slane %v3680_v52, 5  ;;  %v14423_v45 = vpop.f32.mrb[47].mxu0  ;;  %v3684_v31 = vld [vmem:[#allocation2 + $0x44] sm:$0x1]  ;;  %v14427_v58 = vld [vmem:[#allocation2 + $0x4c] sm:$0xf] }
 0x1ee   : > { %v3788_v34 = vrot.slane %v3681_v28, 5  ;;  %v3592_v21 = vsel %vm13311_vm11, %v14376_v42, %v3591_v25  ;;  %v3792_v52 = vrot.slane %v14412_v13, 5  ;;  %v3685_v5 = vld [vmem:[#allocation2 + $0x48] sm:$0xe]  ;;  %v3687_v54 = vld [vmem:[#allocation2 + $0x50] sm:$0x1]  ;;  %v14444_v46 = vadd.f32 %v14191_v61, %v14183_v48 }
 0x1ef   : > { %5308 = vmatprep.mubr.bf16.mxu1 %v11016_v55  ;;  %5156 = vmatmul.mubr.bf16.gmra.mrb[124].mxu0 %v10953_v62  ;;  %v3577_v0 = vrot.slane %v3576_v33, 4  ;;  %v3787_v9 = vrot.slane %v3785_v26, 4  ;;  %v14435_v32 = vpop.f32.mrb[45].mxu1  ;;  %v16288_v28 = vrot.slane %v14357_v57, 5  ;;  %v14448_v42 = vadd.f32 %v14211_v29, %v14199_v53  ;;  %v14463_v61 = vld [vmem:[#allocation2 + $0x58] sm:$0xf] }
 0x1f0   : > { %5309 = vmatmul.mubr.bf16.gmra.mrb[120].mxu1 %v12723_v16  ;;  %12451 = vmatprep.mubr.bf16.mxu0 %v11034_v38  ;;  %v14450_v13 = vpop.f32.mrb[46].mxu1  ;;  %v3786_v57 = vsel %vm13342_vm14, %v11020_v14, %v3785_v26  ;;  %v14461_v48 = vadd.f32 %v14213_v18, %v14201_v7  ;;  %v3799_v30 = vrot.slane %v14427_v58, 5  ;;  %v14468_v38 = vld [vmem:[#allocation2 + $0x64] sm:$0xf]  ;;  %v11021_v15 = vrot.slane %v3682_v24, 9  ;;  %v12724_v14 = vld [vmem:[#allocation2 + $0xcc] sm:$0xff]  }
 0x1f1   : > { %v3782_v12 = vsel %vm13342_vm14, %v14378_v35, %v16288_v28  ;;  %v3582_v11 = vsel %vm13311_vm11, %v3577_v0, %v14351_v20  ;;  %v3789_v35 = vsel %vm13342_vm14, %v3787_v9, %v3788_v34  ;;  %v14465_v53 = vpop.f32.mrb[47].mxu1  ;;  %v3794_v16 = vrot.slane %v3792_v52, 4  ;;  %v3688_v25 = vld [vmem:[#allocation2 + $0x54] sm:$0xe]  ;;  %v3690_v18 = vld [vmem:[#allocation2 + $0x5c] sm:$0x1] }
 0x1f2   : > { %v11017_v29 = vcombine.low %v3582_v11, %v3592_v21  ;;  %v11035_v20 = vcombine.low %v3779_v37, %v3782_v12  ;;  %v3795_v17 = vrot.slane %v3684_v31, 5  ;;  %v11036_v55 = vcombine.low %v3786_v57, %v3789_v35  ;;  %v16289_v33 = vld [vmem:[#allocation39_spill] sm:$0xff]  ;;  %v16290_v26 = vld [vmem:[#allocation40_spill] sm:$0xff]  ;;  %v12729_v0 = vld [vmem:[#allocation10 + $0x50] sm:$0xff]  }
 0x1f3   : > { %v11022_v62 = vrot.slane %v3685_v5, 9  ;;  %v3802_v7 = vrot.slane %v3687_v54, 5  ;;  %v11557_v34 = vadd.f32 %v16290_v26, %v16289_v33  ;;  %v3801_v21 = vrot.slane %v3799_v30, 4  ;;  %v16291_v9 = vld [vmem:[#allocation42_spill] sm:$0xff]  ;;  %v16292_v58 = vld [vmem:[#allocation44_spill] sm:$0xff]  ;;  %v16293_v11 = vld [vmem:[#allocation41_spill] sm:$0xff]  ;;  %11967 = vmatprep.subr.bf16.mxu1 %v12729_v0 }
 0x1f4   : > { %5316 = vmatprep.mubr.bf16.mxu1 %v11017_v29  ;;  %v11669_v28 = vadd.f32 %v16292_v58, %v16291_v9  ;;  %v16294_v37 = vld [vmem:[#allocation43_spill] sm:$0xff]  ;;  %v12730_v12 = vld [vmem:[#allocation10 + $0x10] sm:$0xff]   ;;  %v3806_v31 = vrot.slane %v14463_v61, 5  ;;  %v11672_v57 = vadd.f32 %v14239_v50, %v14237_v40  ;;  %v3691_v5 = vld [vmem:[#allocation2 + $0x60] sm:$0xe]  ;;  %v14479_v35 = vpop.f32.mrb[48].mxu1  ;;  %v3793_v61 = vsel %vm13342_vm14, %v11021_v15, %v3792_v52 }
 0x1f5   : > { %v11560_v24 = vadd.f32 %v16294_v37, %v16293_v11  ;;  %v3693_v54 = vld [vmem:[#allocation2 + $0x68] sm:$0x1]  ;;  %v3813_v33 = vrot.slane %v14468_v38, 5  ;;  %v14484_v26 = vpop.f32.mrb[49].mxu1  ;;  %11968 = vmatpush3.bf16.msra.mxu1 %v12730_v12  ;;  %v3796_v40 = vsel %vm13342_vm14, %v3794_v16, %v3795_v17  ;;  %v11023_v50 = vrot.slane %v3688_v25, 9 }
 0x1f6   : > { %v14481_v29 = vadd.f32 %v11669_v28, %v11557_v34  ;;  %v3800_v38 = vsel %vm13342_vm14, %v11022_v62, %v3799_v30  ;;  %v14500_v34 = vld [vmem:[#allocation2 + $0x70] sm:$0xf]  ;;  %v11563_v52 = vadd.f32 %v14267_v2, %v14263_v44  ;;  %v3808_v17 = vrot.slane %v3806_v31, 4  ;;  %v3694_v11 = vld [vmem:[#allocation2 + $0x6c] sm:$0xe] }
 0x1f7   : > { %12452 = vmatmul.mubr.bf16.vlgmr.msra.gmra.mrb[128].mxu0 %v11035_v20  ;;  %v14490_v9 = vadd.f32 %v11672_v57, %v11560_v24  ;;  %v14492_v0 = vpop.f32.mrb[48].mxu0  ;;  %v14494_v20 = vpop.f32.mrb[50].mxu1  ;;  %v11675_v25 = vadd.f32 %v14281_v19, %v14279_v4  ;;  %v11566_v30 = vadd.f32 %v14275_v51, %v14273_v59  ;;  %v11678_v62 = vadd.f32 %v14295_v8, %v14291_v60  ;;  %v3696_v4 = vld [vmem:[#allocation2 + $0x74] sm:$0x1]  ;;  %v3698_v19 = vld [vmem:[#allocation2 + $0x7c] sm:$0xf] }
 0x1f8   : > { %5317 = vmatmul.mubr.bf16.gmra.mrb[124].mxu1 %v12724_v14  ;;  %12455 = vmatprep.mubr.bf16.mxu0 %v11036_v55  ;;  %v3803_v14 = vsel %vm13342_vm14, %v3801_v21, %v3802_v7  ;;  %v3809_v55 = vrot.slane %v3690_v18, 5  ;;  %v14504_v15 = vpop.f32.mrb[49].mxu0  ;;  %v14506_v16 = vpop.f32.mrb[51].mxu1  ;;  %v11037_v18 = vcombine.low %v3793_v61, %v3796_v40  ;;  %v11024_v21 = vrot.slane %v3691_v5, 9  ;;  %v3697_v8 = vld [vmem:[#allocation2 + $0x78] sm:$0xe] }
 0x1f9   : > { %v14514_v7 = vpop.f32.mrb[50].mxu0  ;;  %v3815_v58 = vrot.slane %v3813_v33, 4  ;;  %v3816_v44 = vrot.slane %v3693_v54, 5  ;;  %v11038_v28 = vcombine.low %v3800_v38, %v3803_v14  ;;  %v14518_v37 = vadd.f32 %v11675_v25, %v11563_v52  ;;  %v3699_v12 = vld [vmem:[#allocation2 + $0x80] sm:$0x1] }
 0x1fa   : > { %v14516_v2 = vpop.f32.mrb[51].mxu0  ;;  %v14520_v24 = vadd.f32 %v11678_v62, %v11566_v30  ;;  %v3807_v59 = vsel %vm13342_vm14, %v11023_v50, %v3806_v31  ;;  %v3810_v51 = vsel %vm13342_vm14, %v3808_v17, %v3809_v55  ;;  %v3820_v60 = vrot.slane %v14500_v34, 5  ;;  %v14533_v61 = vld [vmem:[#allocation2 + $0x88] sm:$0xf]  ;;  %v3700_v55 = vld [vmem:[#allocation2 + $0x84] sm:$0xe] }
 0x1fb   : > { %v11569_v57 = vadd.f32 %v14359_v39, %v14343_v3  ;;  %v3814_v5 = vsel %vm13342_vm14, %v11024_v21, %v3813_v33  ;;  %v3817_v54 = vsel %vm13342_vm14, %v3815_v58, %v3816_v44  ;;  %v11681_v31 = vadd.f32 %v14329_v23, %v14321_v47  ;;  %v14541_v39 = vld [vmem:[#allocation2 + $0x94] sm:$0xf]  ;;  %v14553_v25 = vld [vmem:[#allocation2 + $0xa0] sm:$0xf]  ;;  %v14560_v21 = vld [vmem:[#allocation2 + $0x90] sm:$0xe] }
 0x1fc   : > { %v11572_v40 = vadd.f32 %v14368_v41, %v14364_v43  ;;  %v3827_v50 = vrot.slane %v3698_v19, 5  ;;  %v11684_v3 = vadd.f32 %v14361_v36, %v14345_v63  ;;  %v11039_v33 = vcombine.low %v3807_v59, %v3810_v51  ;;  %v14549_v43 = vld [vmem:[#allocation2 + $0x8c] sm:$0x1]  ;;  %v14562_v58 = vld [vmem:[#allocation2 + $0x98] sm:$0x1] }
 0x1fd   : > { %v11025_v14 = vrot.slane %v3694_v11, 9  ;;  %v14545_v34 = vadd.f32 %v11681_v31, %v11569_v57  ;;  %v11040_v47 = vcombine.low %v3814_v5, %v3817_v54  ;;  %v3822_v23 = vrot.slane %v3820_v60, 4  ;;  %v14555_v63 = vpop.f32.mrb[52].mxu1  ;;  %v14575_v5 = vld [vmem:[#allocation2 + $0x9c] sm:$0xe] }
 0x1fe   : > { %v3823_v17 = vrot.slane %v3696_v4, 5  ;;  %v14551_v41 = vadd.f32 %v11684_v3, %v11572_v40  ;;  %v11026_v30 = vrot.slane %v3697_v8, 9  ;;  %v3830_v62 = vrot.slane %v3699_v12, 5  ;;  %v14593_v40 = vld [vmem:[#allocation2 + $0xb0] sm:$0x1] }
 0x1ff   : > { %12456 = vmatmul.mubr.bf16.gmra.mrb[132].mxu0 %v11037_v18  ;;  %v14543_v38 = vpop.f32.mrb[52].mxu0  ;;  %v3834_v18 = vrot.slane %v14533_v61, 5  ;;  %v11575_v44 = vadd.f32 %v14414_v10, %v14409_v22  ;;  %v3829_v4 = vrot.slane %v3827_v50, 4  ;;  %v11687_v19 = vadd.f32 %v14435_v32, %v14429_v49  ;;  %v14577_v22 = vld [vmem:[#allocation2 + $0xa4] sm:$0x1] }
 0x200   : > { %12459 = vmatprep.mubr.bf16.mxu0 %v11038_v28  ;;  %v14547_v52 = vpop.f32.mrb[53].mxu0  ;;  %v11698_v28 = vpop.f32.mrb[53].mxu1  ;;  %v11578_v59 = vadd.f32 %v14423_v45, %v14421_v6  ;;  %v11690_v51 = vadd.f32 %v14465_v53, %v14450_v13  ;;  %v3821_v12 = vsel %vm13342_vm14, %v11025_v14, %v3820_v60  ;;  %v3841_v57 = vrot.slane %v14541_v39, 5  ;;  %v14579_v10 = vld [vmem:[#allocation2 + $0xac] sm:$0xf] }
 0x201   : > { %v14557_v36 = vpop.f32.mrb[54].mxu0  ;;  %v11700_v8 = vpop.f32.mrb[54].mxu1  ;;  %v3824_v49 = vsel %vm13342_vm14, %v3822_v23, %v3823_v17  ;;  %v11027_v6 = vrot.slane %v3700_v55, 9  ;;  %v14583_v45 = vadd.f32 %v11687_v19, %v11575_v44  ;;  %v14587_v13 = vld [vmem:[#allocation2 + $0xa8] sm:$0xe]  ;;  %v3828_v53 = vsel %vm13342_vm14, %v11026_v30, %v3827_v50 }
 0x202   : > { %v11589_v11 = vpop.f32.mrb[55].mxu0  ;;  %v11701_v54 = vpop.f32.mrb[55].mxu1  ;;  %v14585_v32 = vadd.f32 %v11690_v51, %v11578_v59  ;;  %v3836_v60 = vrot.slane %v3834_v18, 4  ;;  %v3837_v61 = vrot.slane %v14549_v43, 5  ;;  %v3848_v31 = vrot.slane %v14553_v25, 5  ;;  %v16313_v51 = vld [vmem:[#allocation50_spill] sm:$0xff] }
 0x203   : > { %v14595_v3 = vld [vmem:[#allocation2 + $0xb4] sm:$0xe]  ;;  %v3831_v39 = vsel %vm13342_vm14, %v3829_v4, %v3830_v62  ;;  %v11028_v14 = vrot.slane %v14560_v21, 9  ;;  %v14601_v55 = vld [vmem:[#allocation2 + $0xb8] sm:$0xf]  ;;  %v11581_v23 = vadd.f32 %v14504_v15, %v14492_v0  ;;  %v3843_v17 = vrot.slane %v3841_v57, 4 }
 0x204   : > { %v14603_v50 = vld [vmem:[#allocation2 + $0xbc] sm:$0x1]  ;;  %v16209_v43 = vrot.slane %v14579_v10, 5  ;;  %v11584_v30 = vadd.f32 %v14516_v2, %v14514_v7  ;;  %v11041_v62 = vcombine.low %v3821_v12, %v3824_v49  ;;  %v11029_v21 = vrot.slane %v14575_v5, 9  ;;  %v14616_v4 = vld [vmem:[#allocation2 + $0xc4] sm:$0xf] }
 0x205   : > { %v11696_v44 = vadd.f32 %v14506_v16, %v14494_v20  ;;  %v12731_v0 = vld [vmem:[#allocation10 + $0x58] sm:$0xff]   ;;  %v3835_v19 = vsel %vm13342_vm14, %v11027_v6, %v3834_v18  ;;  %v11042_v2 = vcombine.low %v3828_v53, %v3831_v39  ;;  %v3858_v59 = vrot.slane %v14593_v40, 5  ;;  %v16315_v18 = vld [vmem:[#allocation24_spill] sm:$0xff] }
 0x206   : > { %v12732_v15 = vld [vmem:[#allocation10 + $0x18] sm:$0xff]   ;;  %11969 = vmatprep.subr.bf16.mxu1 %v12731_v0  ;;  %v3857_v16 = vrot.slane %v16209_v43, 4  ;;  %v11587_v49 = vadd.f32 %v14547_v52, %v14543_v38  ;;  %v3838_v6 = vsel %vm13342_vm14, %v3836_v60, %v3837_v61  ;;  %v11590_v53 = vadd.f32 %v11589_v11, %v14557_v36  ;;  %v16295_v38 = vld [vmem:[#allocation20_spill] sm:$0xff]  ;;  %v16296_v52 = vld [vmem:[#allocation21_spill] sm:$0xff] }
 0x207   : > { %12460 = vmatmul.mubr.bf16.gmra.mrb[136].mxu0 %v11039_v33  ;;  %v3844_v33 = vrot.slane %v14562_v58, 5  ;;  %v14627_v20 = vadd.f32 %v11696_v44, %v11584_v30  ;;  %11970 = vmatpush3.bf16.msra.mxu1 %v12732_v15  ;;  %v11702_v40 = vadd.f32 %v11701_v54, %v11700_v8  ;;  %v3842_v39 = vsel %vm13342_vm14, %v11028_v14, %v3841_v57  ;;  %v16298_v11 = vld [vmem:[#allocation23_spill] sm:$0xff]  ;;  %v16299_v57 = vld [vmem:[#allocation26_spill] sm:$0xff]  ;;  %v16301_v0 = vld [vmem:[#allocation28_spill] sm:$0xff] }
 0x208   : > { %12463 = vmatprep.mubr.bf16.mxu0 %v11040_v47  ;;  %v11693_v47 = vadd.f32 %v14484_v26, %v14479_v35  ;;  %v3850_v35 = vrot.slane %v3848_v31, 4  ;;  %v11030_v26 = vrot.slane %v14587_v13, 9  ;;  %v11699_v13 = vadd.f32 %v11698_v28, %v14555_v63  ;;  %v16297_v28 = vld [vmem:[#allocation22_spill] sm:$0xff]  ;;  %v16300_v54 = vld [vmem:[#allocation27_spill] sm:$0xff]  ;;  %v16302_v15 = vld [vmem:[#allocation29_spill] sm:$0xff] }
 0x209   : > { %v14646_v44 = vadd.f32 %v16296_v52, %v16295_v38  ;;  %v14650_v63 = vadd.f32 %v11702_v40, %v11590_v53  ;;  %v14654_v8 = vadd.f32 %v16298_v11, %v16297_v28  ;;  %v14658_v61 = vadd.f32 %v16300_v54, %v16299_v57  ;;  %v16305_v28 = vld [vmem:[#allocation37_spill] sm:$0xff]  ;;  %v16306_v11 = vld [vmem:[#allocation38_spill] sm:$0xff]  ;;  %v16317_v43 = vld [vmem:[#allocation51_spill] sm:$0xff] }
 0x20a   : > { %v14623_v7 = vadd.f32 %v11693_v47, %v11581_v23  ;;  %v3845_v23 = vsel %vm13342_vm14, %v3843_v17, %v3844_v33  ;;  %v14648_v60 = vadd.f32 %v11699_v13, %v11587_v49  ;;  %v11043_v14 = vcombine.low %v3835_v19, %v3838_v6  ;;  %v16303_v49 = vld [vmem:[#allocation35_spill] sm:$0xff]  ;;  %v16304_v13 = vld [vmem:[#allocation36_spill] sm:$0xff]  ;;  %v16307_v19 = vld [vmem:[#allocation45_spill] sm:$0xff] }
 0x20b   : > { %v14666_v53 = vadd.f32 %v16304_v13, %v16303_v49  ;;  %v11044_v40 = vcombine.low %v3842_v39, %v3845_v23  ;;  %v14670_v12 = vadd.f32 %v16306_v11, %v16305_v28  ;;  %v14674_v6 = vadd.f32 %v16307_v19, %v14243_v56  ;;  %v16310_v49 = vld [vmem:[#allocation16_spill] sm:$0xff]  ;;  %v16312_v23 = vld [vmem:[#allocation49_spill] sm:$0xff]  ;;  %v16314_v11 = vld [vmem:[#allocation19_spill] sm:$0xff] }
 0x20c   : > { %v11703_v30 = vpop.f32.mrb[56].mxu1  ;;  %v16311_v13 = vld [vmem:[#allocation48_spill] sm:$0xff]  ;;  %v14686_v47 = vadd.f32 %v16313_v51, %v16312_v23  ;;  %v14690_v56 = vadd.f32 %v16315_v18, %v16314_v11  ;;  %v16316_v19 = vld [vmem:[#allocation25_spill] sm:$0xff]  ;;  %v16322_v58 = vld [vmem:[#allocation34_spill] sm:$0xff]  ;;  %v16325_v25 = vrot.slane %v14601_v55, 5 }
 0x20d   : > { %v11704_v36 = vpop.f32.mrb[57].mxu1  ;;  %v14682_v39 = vadd.f32 %v16311_v13, %v16310_v49  ;;  %v3715_v13 = vld [vmem:[#allocation2 + $0xc0] sm:$0xe]  ;;  %v14708_v18 = vadd.f32 %v14444_v46, %v16322_v58  ;;  %v3717_v11 = vld [vmem:[#allocation2 + $0xc8] sm:$0x1]  ;;  %v3859_v58 = vsel %vm13342_vm14, %v3857_v16, %v3858_v59 }
 0x20e   : > { %v11591_v33 = vpop.f32.mrb[56].mxu0  ;;  %v11705_v17 = vadd.f32 %v11704_v36, %v11703_v30  ;;  %v16308_v30 = vld [vmem:[#allocation46_spill] sm:$0xff]  ;;  %v16309_v36 = vld [vmem:[#allocation47_spill] sm:$0xff] }
 0x20f   : > { %12464 = vmatmul.mubr.bf16.gmra.mrb[140].mxu0 %v11041_v62  ;;  %v11706_v62 = vpop.f32.mrb[58].mxu1  ;;  %v11592_v38 = vpop.f32.mrb[57].mxu0  ;;  %v14678_v57 = vadd.f32 %v16309_v36, %v16308_v30  ;;  %v14694_v30 = vadd.f32 %v16317_v43, %v16316_v19  ;;  %v16321_v36 = vld [vmem:[#allocation32_spill] sm:$0xff]  ;;  %v14712_v43 = vadd.f32 %v14461_v48, %v14448_v42  ;;  %v16324_v42 = vrot.slane %v14579_v10, 5 }
 0x210   : > { %12467 = vmatprep.mubr.bf16.mxu0 %v11042_v2  ;;  %v14662_v2 = vadd.f32 %v16302_v15, %v16301_v0  ;;  %v11707_v52 = vpop.f32.mrb[59].mxu1  ;;  %v11593_v54 = vadd.f32 %v11592_v38, %v11591_v33  ;;  %v11594_v0 = vpop.f32.mrb[58].mxu0  ;;  %v16318_v33 = vld [vmem:[#allocation52_spill] sm:$0xff]  ;;  %v16319_v38 = vld [vmem:[#allocation30_spill] sm:$0xff]  ;;  %v16326_v10 = vrot.slane %v14616_v4, 5 }
 0x211   : > { %v11708_v15 = vadd.f32 %v11707_v52, %v11706_v62  ;;  %v11595_v28 = vpop.f32.mrb[59].mxu0  ;;  %v14698_v62 = vadd.f32 %v16319_v38, %v16318_v33  ;;  %v16320_v52 = vld [vmem:[#allocation31_spill] sm:$0xff]  ;;  %v3856_v48 = vsel %vm13342_vm14, %v11030_v26, %v16324_v42  ;;  %v3718_v26 = vld [vmem:[#allocation2 + $0xcc] sm:$0xe] }
 0x212   : > { %v14702_v49 = vadd.f32 %v16321_v36, %v16320_v52  ;;  %v14704_v51 = vadd.f32 %v11705_v17, %v11593_v54  ;;  %v11596_v23 = vadd.f32 %v11595_v28, %v11594_v0  ;;  %v3849_v17 = vsel %vm13342_vm14, %v11029_v21, %v3848_v31  ;;  %v3720_v36 = vld [vmem:[#allocation2 + $0xd4] sm:$0x1] }
 0x213   : > { %v16323_v54 = vrot.slane %v14577_v22, 5  ;;  %v3872_v21 = vrot.slane %v3717_v11, 5  ;;  %v3719_v22 = vld [vmem:[#allocation2 + $0xd0] sm:$0xf]  ;;  %v3871_v33 = vrot.slane %v16326_v10, 4 }
 0x214   : > { %v14714_v19 = vadd.f32 %v11708_v15, %v11596_v23  ;;  %v16328_v23 = vrot.slane %v14595_v3, 9 }
 0x215   : > { %v3852_v46 = vsel %vm13342_vm14, %v3850_v35, %v16323_v54  ;;  %v11046_v35 = vcombine.low %v3856_v48, %v3859_v58  ;;  %v12733_v58 = vld [vmem:[#allocation10 + $0x60] sm:$0xff]   ;;  %v3873_v3 = vsel %vm13342_vm14, %v3871_v33, %v3872_v21 }
 0x216   : > { %v11045_v31 = vcombine.low %v3849_v17, %v3852_v46  ;;  %v16329_v17 = vrot.slane %v14603_v50, 5  ;;  %v3876_v46 = vrot.slane %v3719_v22, 5  ;;  %11971 = vmatprep.subr.bf16.mxu1 %v12733_v58 }
 0x217   : > { %12468 = vmatmul.mubr.bf16.gmra.mrb[144].mxu0 %v11043_v14  ;;  %v3864_v14 = vrot.slane %v16325_v25, 4  ;;  %v11597_v5 = vpop.f32.mrb[60].mxu0 }
 0x218   : > { %12471 = vmatprep.mubr.bf16.mxu0 %v11044_v40  ;;  %v11032_v40 = vrot.slane %v3715_v13, 9  ;;  %v11598_v0 = vpop.f32.mrb[61].mxu0  ;;  %v16327_v13 = vmov %v16325_v25  ;;  %v12734_v25 = vld [vmem:[#allocation10 + $0x20] sm:$0xff]  }
 0x219   : > { %v11599_v15 = vadd.f32 %v11598_v0, %v11597_v5  ;;  %v11600_v28 = vpop.f32.mrb[62].mxu0  ;;  %v3863_v11 = vsel %vm13342_vm14, %v16328_v23, %v16327_v13  ;;  %v3866_v54 = vsel %vm13342_vm14, %v3864_v14, %v16329_v17  ;;  %v16330_v5 = vmov %v16326_v10  ;;  %11972 = vmatpush3.bf16.msra.mxu1 %v12734_v25 }
 0x21a   : > { %v11601_v38 = vpop.f32.mrb[63].mxu0  ;;  %v11709_v59 = vpop.f32.mrb[60].mxu1  ;;  %v3870_v55 = vsel %vm13342_vm14, %v11032_v40, %v16330_v5  ;;  %v11047_v22 = vcombine.low %v3863_v11, %v3866_v54  ;;  %v3879_v10 = vrot.slane %v3720_v36, 5 }
 0x21b   : > { %v11602_v52 = vadd.f32 %v11601_v38, %v11600_v28  ;;  %v11710_v16 = vpop.f32.mrb[61].mxu1  ;;  %v11033_v28 = vrot.slane %v3718_v26, 9  ;;  %v11048_v4 = vcombine.low %v3870_v55, %v3873_v3 }
 0x21c   : > { %v11711_v42 = vadd.f32 %v11710_v16, %v11709_v59  ;;  %v11712_v48 = vpop.f32.mrb[62].mxu1  ;;  %v3878_v16 = vrot.slane %v3876_v46, 4 }
 0x21d   : > { %v11713_v0 = vpop.f32.mrb[63].mxu1  ;;  %v3877_v36 = vsel %vm13342_vm14, %v11033_v28, %v3876_v46 }
 0x21e   : > { %v14752_v50 = vadd.f32 %v11711_v42, %v11599_v15  ;;  %v3880_v11 = vsel %vm13342_vm14, %v3878_v16, %v3879_v10 }
 0x21f   : > { %12472 = vmatmul.mubr.bf16.gmra.mrb[148].mxu0 %v11045_v31  ;;  %v11731_v31 = vpop.f32.mrb[64].mxu0  ;;  %v11049_v25 = vcombine.low %v3877_v36, %v3880_v11 }
 0x220   : > { %12475 = vmatprep.mubr.bf16.mxu0 %v11046_v35  ;;  %v11714_v35 = vadd.f32 %v11713_v0, %v11712_v48  ;;  %v11732_v14 = vpop.f32.mrb[65].mxu0 }
 0x221   : > { %v11733_v38 = vadd.f32 %v11732_v14, %v11731_v31  ;;  %v11734_v59 = vpop.f32.mrb[66].mxu0 }
 0x222   : > { %v14754_v13 = vadd.f32 %v11714_v35, %v11602_v52  ;;  %v11735_v40 = vpop.f32.mrb[67].mxu0  ;;  %v11843_v23 = vpop.f32.mrb[64].mxu1 }
 0x223   : > { %v5038_v21 = vadd.f32 %v11733_v38, %v14646_v44  ;;  %v11736_v33 = vadd.f32 %v11735_v40, %v11734_v59  ;;  %v11844_v26 = vpop.f32.mrb[65].mxu1 }
 0x224   : > { %v11845_v17 = vadd.f32 %v11844_v26, %v11843_v23  ;;  %v11846_v54 = vpop.f32.mrb[66].mxu1  ;;  %v12735_v26 = vld [vmem:[#allocation10 + $0x68] sm:$0xff]  }
 0x225   : > { %v5041_v15 = vadd.f32 %v11736_v33, %v14654_v8  ;;  %v11847_v52 = vpop.f32.mrb[67].mxu1  ;;  %11973 = vmatprep.subr.bf16.mxu1 %v12735_v26 }
 0x226   : > { %v11848_v48 = vadd.f32 %v11847_v52, %v11846_v54  ;;  %v14762_v44 = vadd.f32 %v11845_v17, %v5038_v21 }
 0x227   : > { %12476 = vmatmul.mubr.bf16.gmra.mrb[152].mxu0 %v11047_v22  ;;  %v11737_v42 = vpop.f32.mrb[68].mxu0 }
 0x228   : > { %12479 = vmatprep.mubr.bf16.mxu0 %v11048_v4  ;;  %v11738_v58 = vpop.f32.mrb[69].mxu0  ;;  %v14764_v3 = vadd.f32 %v11848_v48, %v5041_v15 }
 0x229   : > { %v11739_v5 = vadd.f32 %v11738_v58, %v11737_v42  ;;  %v11740_v55 = vpop.f32.mrb[70].mxu0 }
 0x22a   : > { %v11741_v8 = vpop.f32.mrb[71].mxu0 }
 0x22b   : > { %v5046_v0 = vadd.f32 %v11739_v5, %v14658_v61  ;;  %v11742_v46 = vadd.f32 %v11741_v8, %v11740_v55  ;;  %v11849_v31 = vpop.f32.mrb[68].mxu1 }
 0x22c   : > { %v11850_v35 = vpop.f32.mrb[69].mxu1 }
 0x22d   : > { %v5049_v28 = vadd.f32 %v11742_v46, %v14662_v2  ;;  %v11851_v14 = vadd.f32 %v11850_v35, %v11849_v31  ;;  %v11852_v22 = vpop.f32.mrb[70].mxu1  ;;  %v12736_v35 = vld [vmem:[#allocation10 + $0x28] sm:$0xff]  }
 0x22e   : > { %v11853_v10 = vpop.f32.mrb[71].mxu1  ;;  %11974 = vmatpush3.bf16.msra.mxu1 %v12736_v35 }
 0x22f   : > { %12480 = vmatmul.mubr.bf16.gmra.mrb[156].mxu0 %v11049_v25  ;;  %v11854_v38 = vadd.f32 %v11853_v10, %v11852_v22  ;;  %v11743_v59 = vpop.f32.mrb[72].mxu0  ;;  %v14768_v4 = vadd.f32 %v11851_v14, %v5046_v0 }
 0x230   : > { %v11744_v16 = vpop.f32.mrb[73].mxu0 }
 0x231   : > { %v11745_v40 = vadd.f32 %v11744_v16, %v11743_v59  ;;  %v11746_v21 = vpop.f32.mrb[74].mxu0  ;;  %v14770_v33 = vadd.f32 %v11854_v38, %v5049_v28 }
 0x232   : > { %v11747_v23 = vpop.f32.mrb[75].mxu0 }
 0x233   : > { %v5054_v61 = vadd.f32 %v11745_v40, %v14666_v53  ;;  %v11748_v15 = vadd.f32 %v11747_v23, %v11746_v21 }
 0x235   : > { %v11855_v36 = vpop.f32.mrb[72].mxu1  ;;  %v5057_v2 = vadd.f32 %v11748_v15, %v14670_v12 }
 0x236   : > { %v11856_v11 = vpop.f32.mrb[73].mxu1 }
 0x237   : > { %v11857_v17 = vadd.f32 %v11856_v11, %v11855_v36  ;;  %v11858_v54 = vpop.f32.mrb[74].mxu1 }
 0x238   : > { %v11859_v52 = vpop.f32.mrb[75].mxu1 }
 0x239   : > { %v11860_v42 = vadd.f32 %v11859_v52, %v11858_v54  ;;  %v11749_v48 = vpop.f32.mrb[76].mxu0  ;;  %v14774_v58 = vadd.f32 %v11857_v17, %v5054_v61 }
 0x23a   : > { %v11750_v25 = vpop.f32.mrb[77].mxu0 }
 0x23b   : > { %v11751_v5 = vadd.f32 %v11750_v25, %v11749_v48  ;;  %v11752_v55 = vpop.f32.mrb[78].mxu0  ;;  %v14776_v8 = vadd.f32 %v11860_v42, %v5057_v2 }
 0x23c   : > { %v11753_v53 = vpop.f32.mrb[79].mxu0 }
 0x23d   : > { %v5062_v0 = vadd.f32 %v11751_v5, %v14674_v6  ;;  %v11754_v46 = vadd.f32 %v11753_v53, %v11752_v55 }
 0x23f   : > { %v11861_v31 = vpop.f32.mrb[76].mxu1  ;;  %v5065_v12 = vadd.f32 %v11754_v46, %v14678_v57 }
 0x240   : > { %v11862_v28 = vpop.f32.mrb[77].mxu1 }
 0x241   : > { %v11863_v14 = vadd.f32 %v11862_v28, %v11861_v31  ;;  %v11864_v22 = vpop.f32.mrb[78].mxu1 }
 0x242   : > { %v11865_v10 = vpop.f32.mrb[79].mxu1 }
 0x243   : > { %v11866_v38 = vadd.f32 %v11865_v10, %v11864_v22  ;;  %v14780_v59 = vadd.f32 %v11863_v14, %v5062_v0 }
 0x244   : > { %v11755_v16 = vpop.f32.mrb[80].mxu0 }
 0x245   : > { %v11756_v40 = vpop.f32.mrb[81].mxu0  ;;  %v14782_v21 = vadd.f32 %v11866_v38, %v5065_v12 }
 0x246   : > { %v11757_v23 = vadd.f32 %v11756_v40, %v11755_v16  ;;  %v11758_v61 = vpop.f32.mrb[82].mxu0  ;;  %v12737_v40 = vld [vmem:[#allocation10 + $0xc0] sm:$0xff]  }
 0x247   : > { %v11759_v6 = vpop.f32.mrb[83].mxu0  ;;  %12075 = vmatprep.subr.bf16.mxu0 %v12737_v40 }
 0x248   : > { %v5070_v15 = vadd.f32 %v11757_v23, %v14682_v39  ;;  %v11760_v26 = vadd.f32 %v11759_v6, %v11758_v61 }
 0x249   : > { %v11867_v57 = vpop.f32.mrb[80].mxu1 }
 0x24a   : > { %v5073_v36 = vadd.f32 %v11760_v26, %v14686_v47  ;;  %v11868_v2 = vpop.f32.mrb[81].mxu1 }
 0x24b   : > { %v11869_v11 = vadd.f32 %v11868_v2, %v11867_v57  ;;  %v11870_v17 = vpop.f32.mrb[82].mxu1  ;;  %v12740_v57 = vld [vmem:[#allocation10 + $0x30] sm:$0xff]   ;;  %v12741_v2 = vld [vmem:[#allocation10 + $0xc8] sm:$0xff]  }
 0x24c   : > { %v11871_v54 = vpop.f32.mrb[83].mxu1 }
 0x24d   : > { %v11872_v52 = vadd.f32 %v11871_v54, %v11870_v17  ;;  %v14786_v42 = vadd.f32 %v11869_v11, %v5070_v15  ;;  %v12738_v15 = vld [vmem:[#allocation10 + $0x70] sm:$0xff]   ;;  %v12742_v11 = vld [vmem:[#allocation10 + $0x88] sm:$0xff]  }
 0x24e   : > { %v11761_v48 = vpop.f32.mrb[84].mxu0  ;;  %11975 = vmatprep.subr.bf16.mxu1 %v12738_v15 }
 0x24f   : > { %v11762_v25 = vpop.f32.mrb[85].mxu0  ;;  %v14788_v5 = vadd.f32 %v11872_v52, %v5073_v36  ;;  %11976 = vmatpush3.bf16.msra.mxu1 %v12740_v57  ;;  %v12745_v57 = vld [vmem:[#allocation10 + $0xd8] sm:$0xff]  }
 0x250   : > { %v11763_v55 = vadd.f32 %v11762_v25, %v11761_v48  ;;  %v11764_v53 = vpop.f32.mrb[86].mxu0 }
 0x251   : > { %v11765_v0 = vpop.f32.mrb[87].mxu0 }
 0x252   : > { %v5078_v39 = vadd.f32 %v11763_v55, %v14690_v56  ;;  %v11766_v46 = vadd.f32 %v11765_v0, %v11764_v53  ;;  %v12739_v56 = vld [vmem:[#allocation10 + $0x80] sm:$0xff]   ;;  %v12743_v0 = vld [vmem:[#allocation10 + $0xd0] sm:$0xff]  }
 0x253   : > { %v11873_v31 = vpop.f32.mrb[84].mxu1  ;;  %12076 = vmatpush3.bf16.msra.mxu0 %v12739_v56 }
 0x254   : > { %v5081_v47 = vadd.f32 %v11766_v46, %v14694_v30  ;;  %v11874_v12 = vpop.f32.mrb[85].mxu1  ;;  %12077 = vmatprep.subr.bf16.mxu0 %v12741_v2 }
 0x255   : > { %v11875_v28 = vadd.f32 %v11874_v12, %v11873_v31  ;;  %v11876_v35 = vpop.f32.mrb[86].mxu1 }
 0x256   : > { %v11877_v14 = vpop.f32.mrb[87].mxu1 }
 0x257   : > { %v11878_v22 = vadd.f32 %v11877_v14, %v11876_v35  ;;  %v14792_v10 = vadd.f32 %v11875_v28, %v5078_v39  ;;  %12078 = vmatpush3.bf16.msra.mxu0 %v12742_v11  ;;  %v12747_v11 = vld [vmem:[#allocation10 + $0xe0] sm:$0xff]  }
 0x258   : > { %v11767_v38 = vpop.f32.mrb[88].mxu0  ;;  %12079 = vmatprep.subr.bf16.mxu0 %v12743_v0 }
 0x259   : > { %v11768_v16 = vpop.f32.mrb[89].mxu0  ;;  %v14794_v23 = vadd.f32 %v11878_v22, %v5081_v47 }
 0x25a   : > { %v11769_v61 = vadd.f32 %v11768_v16, %v11767_v38  ;;  %v11770_v6 = vpop.f32.mrb[90].mxu0 }
 0x25b   : > { %v11771_v26 = vpop.f32.mrb[91].mxu0 }
 0x25c   : > { %v5086_v30 = vadd.f32 %v11769_v61, %v14698_v62  ;;  %v11772_v36 = vadd.f32 %v11771_v26, %v11770_v6  ;;  %v12744_v62 = vld [vmem:[#allocation10 + $0x90] sm:$0xff]  }
 0x25d   : > { %v11879_v17 = vpop.f32.mrb[88].mxu1  ;;  %12080 = vmatpush3.bf16.msra.mxu0 %v12744_v62 }
 0x25e   : > { %v5089_v54 = vadd.f32 %v11772_v36, %v14702_v49  ;;  %v11880_v52 = vpop.f32.mrb[89].mxu1  ;;  %12081 = vmatprep.subr.bf16.mxu0 %v12745_v57 }
 0x25f   : > { %v11881_v48 = vadd.f32 %v11880_v52, %v11879_v17  ;;  %v11882_v25 = vpop.f32.mrb[90].mxu1 }
 0x260   : > { %v11883_v55 = vpop.f32.mrb[91].mxu1 }
 0x261   : > { %v11884_v53 = vadd.f32 %v11883_v55, %v11882_v25  ;;  %v14798_v39 = vadd.f32 %v11881_v48, %v5086_v30  ;;  %v12746_v30 = vld [vmem:[#allocation10 + $0x98] sm:$0xff]  }
 0x262   : > { %12082 = vmatpush3.bf16.msra.mxu0 %v12746_v30 }
 0x263   : > { %v11773_v46 = vpop.f32.mrb[92].mxu0  ;;  %v14800_v31 = vadd.f32 %v11884_v53, %v5089_v54  ;;  %v12748_v54 = vld [vmem:[#allocation10 + $0x78] sm:$0xff]   ;;  %12083 = vmatprep.subr.bf16.mxu0 %v12747_v11 }
 0x264   : > { %v11774_v47 = vpop.f32.mrb[93].mxu0  ;;  %11977 = vmatprep.subr.bf16.mxu1 %v12748_v54 }
 0x265   : > { %v11775_v12 = vadd.f32 %v11774_v47, %v11773_v46  ;;  %v11776_v28 = vpop.f32.mrb[94].mxu0  ;;  %v12750_v47 = vld [vmem:[#allocation10 + $0x38] sm:$0xff]  }
 0x266   : > { %v11777_v49 = vpop.f32.mrb[95].mxu0  ;;  %11978 = vmatpush3.bf16.msra.mxu1 %v12750_v47 }
 0x267   : > { %v5094_v35 = vadd.f32 %v11775_v12, %v14708_v18  ;;  %v11885_v14 = vpop.f32.mrb[92].mxu1  ;;  %v11778_v22 = vadd.f32 %v11777_v49, %v11776_v28  ;;  %v12751_v28 = vld [vmem:[#allocation10 + $0xe8] sm:$0xff]  }
 0x268   : > { %v11886_v38 = vpop.f32.mrb[93].mxu1  ;;  %v12752_v49 = vld [vmem:[#allocation10 + $0xa8] sm:$0xff]  }
 0x269   : > { %v5097_v16 = vadd.f32 %v11778_v22, %v14712_v43  ;;  %v11887_v40 = vadd.f32 %v11886_v38, %v11885_v14  ;;  %v11888_v61 = vpop.f32.mrb[94].mxu1  ;;  %v12749_v43 = vld [vmem:[#allocation10 + $0xa0] sm:$0xff]  }
 0x26a   : > { %v11889_v6 = vpop.f32.mrb[95].mxu1  ;;  %12084 = vmatpush3.bf16.msra.mxu0 %v12749_v43  ;;  %v12755_v43 = vld [vmem:[#allocation10 + $0xf8] sm:$0xff]  }
 0x26b   : > { %v11890_v15 = vadd.f32 %v11889_v6, %v11888_v61  ;;  %v14804_v56 = vadd.f32 %v11887_v40, %v5094_v35  ;;  %12085 = vmatprep.subr.bf16.mxu0 %v12751_v28  ;;  %v12754_v61 = vld [vmem:[#allocation10 + $0xb0] sm:$0xff]  }
 0x26d   : > { %v11779_v26 = vpop.f32.mrb[96].mxu0  ;;  %v14806_v36 = vadd.f32 %v11890_v15, %v5097_v16  ;;  %v12753_v16 = vld [vmem:[#allocation10 + $0xf0] sm:$0xff]  }
 0x26e   : > { %v11780_v2 = vpop.f32.mrb[97].mxu0  ;;  %12086 = vmatpush3.bf16.msra.mxu0 %v12752_v49 }
 0x26f   : > { %v11781_v17 = vadd.f32 %v11780_v2, %v11779_v26  ;;  %v11782_v18 = vpop.f32.mrb[98].mxu0  ;;  %12087 = vmatprep.subr.bf16.mxu0 %v12753_v16 }
 0x270   : > { %v11783_v52 = vpop.f32.mrb[99].mxu0 }
 0x271   : > { %v5102_v48 = vadd.f32 %v11781_v17, %v14481_v29  ;;  %v11784_v25 = vadd.f32 %v11783_v52, %v11782_v18 }
 0x272   : > { %v11891_v55 = vpop.f32.mrb[96].mxu1  ;;  %12088 = vmatpush3.bf16.msra.mxu0 %v12754_v61 }
 0x273   : > { %v5105_v53 = vadd.f32 %v11784_v25, %v14490_v9  ;;  %v11892_v0 = vpop.f32.mrb[97].mxu1  ;;  %v6332_v25 = vld [vmem:[#allocation2] sm:$0xf]  ;;  %12089 = vmatprep.subr.bf16.mxu0 %v12755_v43 }
 0x274   : > { %v11893_v62 = vadd.f32 %v11892_v0, %v11891_v55  ;;  %v11894_v46 = vpop.f32.mrb[98].mxu1  ;;  %v6333_v0 = vld [vmem:[#allocation2 + $0x4] sm:$0xf]  ;;  %v6384_v47 = vshll.u32 %v6332_v25, 16 }
 0x275   : > { %v11895_v12 = vpop.f32.mrb[99].mxu1 }
 0x276   : > { %v11896_v35 = vadd.f32 %v11895_v12, %v11894_v46  ;;  %v14810_v14 = vadd.f32 %v11893_v62, %v5102_v48  ;;  %v12756_v48 = vld [vmem:[#allocation10 + $0xb8] sm:$0xff]   ;;  %v6381_v62 = vshrl.u32 %v6332_v25, 16  ;;  %v6390_v12 = vshll.u32 %v6333_v0, 16 }
 0x277   : > { %12090 = vmatpush3.bf16.msra.mxu0 %v12756_v48 }
 0x278   : > { %v11785_v29 = vpop.f32.mrb[100].mxu0  ;;  %v14812_v22 = vadd.f32 %v11896_v35, %v5105_v53 }
 0x279   : > { %v11786_v38 = vpop.f32.mrb[101].mxu0 }
 0x27a   : > { %v11787_v9 = vadd.f32 %v11786_v38, %v11785_v29  ;;  %v11788_v40 = vpop.f32.mrb[102].mxu0  ;;  %v6383_v29 = vrot.slane %v6381_v62, 4  ;;  %v12757_v62 = vld [vmem:[#allocation2] sm:$0xff]  }
 0x27b   : > { %v11789_v6 = vpop.f32.mrb[103].mxu0 }
 0x27c   : > { %v5110_v15 = vadd.f32 %v11787_v9, %v14518_v37  ;;  %v11897_v26 = vpop.f32.mrb[100].mxu1  ;;  %v11790_v57 = vadd.f32 %v11789_v6, %v11788_v40  ;;  %v6334_v37 = vld [vmem:[#allocation2 + $0x8] sm:$0x1]  ;;  %v6386_v9 = vrot.slane %v6384_v47, 5  ;;  %v6392_v40 = vrot.slane %v6390_v12, 5  ;;  %v12761_v12 = vld [vmem:[#allocation10 + $0x100] sm:$0xff]  }
 0x27d   : > { %v11898_v30 = vpop.f32.mrb[101].mxu1  ;;  %v6400_v28 = vshll.u32 %v6334_v37, 16 }
 0x27e   : > { %v5113_v2 = vadd.f32 %v11790_v57, %v14520_v24  ;;  %v11899_v11 = vadd.f32 %v11898_v30, %v11897_v26  ;;  %v11900_v17 = vpop.f32.mrb[102].mxu1  ;;  %v6394_v24 = vshrl.u32 %v6333_v0, 16 }
 0x27f   : > { %v11901_v18 = vpop.f32.mrb[103].mxu1 }
 0x280   : > { %v11902_v54 = vadd.f32 %v11901_v18, %v11900_v17  ;;  %v14816_v52 = vadd.f32 %v11899_v11, %v5110_v15  ;;  %v6396_v61 = vrot.slane %v6394_v24, 4  ;;  %v6402_v17 = vrot.slane %v6400_v28, 5  ;;  %v12760_v18 = vld [vmem:[#allocation10 + $0x140] sm:$0xff]  }
 0x281   : > { %12187 = vmatprep.subr.bf16.mxu1 %v12760_v18 }
 0x282   : > { %v14818_v55 = vadd.f32 %v11902_v54, %v5113_v2  ;;  %v6387_v2 = vor.u32 %v6386_v9, %v6383_v29  ;;  %v6397_v11 = vor.u32 %v6396_v61, %v6392_v40 }
 0x283   : > { %v11791_v53 = vpop.f32.mrb[104].mxu0 }
 0x284   : > { %v11792_v46 = vpop.f32.mrb[105].mxu0  ;;  %v6388_v25 = vrot.slane %v6387_v2, 4 }
 0x285   : > { %v11793_v49 = vadd.f32 %v11792_v46, %v11791_v53  ;;  %v11794_v35 = vpop.f32.mrb[106].mxu0  ;;  %v6398_v53 = vrot.slane %v6397_v11, 4 }
 0x286   : > { %v11903_v38 = vpop.f32.mrb[104].mxu1  ;;  %v11795_v16 = vpop.f32.mrb[107].mxu0 }
 0x287   : > { %v5118_v6 = vadd.f32 %v11793_v49, %v14545_v34  ;;  %v11796_v15 = vadd.f32 %v11795_v16, %v11794_v35  ;;  %v11904_v26 = vpop.f32.mrb[105].mxu1  ;;  %v6393_v34 = vsel %vm13311_vm11, %v6388_v25, %v6392_v40  ;;  %v6403_v37 = vsel %vm13311_vm11, %v6398_v53, %v6402_v17 }
 0x288   : > { %v11905_v57 = vadd.f32 %v11904_v26, %v11903_v38  ;;  %v11906_v30 = vpop.f32.mrb[106].mxu1  ;;  %v11172_v47 = vcombine.low %v6393_v34, %v6403_v37 }
 0x289   : > { %v5121_v54 = vadd.f32 %v11796_v15, %v14551_v41  ;;  %v11907_v43 = vpop.f32.mrb[107].mxu1 }
 0x28a   : > { %v11908_v48 = vadd.f32 %v11907_v43, %v11906_v30  ;;  %v14822_v0 = vadd.f32 %v11905_v57, %v5118_v6  ;;  %9772 = vmatprep.mubr.bf16.mxu1 %v11172_v47 }
 0x28b   : > { %9773 = vmatmul.mubr.bf16.vlgmr.msra.gmra.mrb[128].mxu1 %v12757_v62 }
 0x28c   : > { %v14828_v46 = vadd.f32 %v11908_v48, %v5121_v54  ;;  %12188 = vmatpush3.bf16.msra.mxu1 %v12761_v12 }
 0x28e   : > { %v11797_v24 = vpop.f32.mrb[108].mxu0 }
 0x28f   : > { %v11798_v41 = vpop.f32.mrb[109].mxu0 }
 0x290   : > { %v11799_v28 = vadd.f32 %v11798_v41, %v11797_v24  ;;  %v11800_v49 = vpop.f32.mrb[110].mxu0 }
 0x291   : > { %v11909_v35 = vpop.f32.mrb[108].mxu1  ;;  %v11801_v29 = vpop.f32.mrb[111].mxu0 }
 0x292   : > { %v5126_v38 = vadd.f32 %v11799_v28, %v14583_v45  ;;  %v11802_v16 = vadd.f32 %v11801_v29, %v11800_v49  ;;  %v11910_v9 = vpop.f32.mrb[109].mxu1 }
 0x293   : > { %v11911_v40 = vadd.f32 %v11910_v9, %v11909_v35  ;;  %v11912_v61 = vpop.f32.mrb[110].mxu1 }
 0x294   : > { %v5129_v6 = vadd.f32 %v11802_v16, %v14585_v32  ;;  %v11913_v15 = vpop.f32.mrb[111].mxu1 }
 0x295   : > { %v11914_v26 = vadd.f32 %v11913_v15, %v11912_v61  ;;  %v14832_v57 = vadd.f32 %v11911_v40, %v5126_v38 }
 0x297   : > { %v14834_v30 = vadd.f32 %v11914_v26, %v5129_v6  ;;  %v12766_v26 = vld [vmem:[#allocation10 + $0x148] sm:$0xff]  }
 0x298   : > { %12189 = vmatprep.subr.bf16.mxu1 %v12766_v26 }
 0x299   : > { %v11803_v2 = vpop.f32.mrb[112].mxu0 }
 0x29a   : > { %v11804_v11 = vpop.f32.mrb[113].mxu0 }
 0x29b   : > { %v11805_v17 = vadd.f32 %v11804_v11, %v11803_v2  ;;  %v11806_v18 = vpop.f32.mrb[114].mxu0  ;;  %v12767_v11 = vld [vmem:[#allocation10 + $0x108] sm:$0xff]  }
 0x29c   : > { %v11807_v54 = vpop.f32.mrb[115].mxu0  ;;  %12190 = vmatpush3.bf16.msra.mxu1 %v12767_v11  ;;  %v14865_v11 = vld [vmem:[%s16193_s5] ss:$0 sm:$0xff] }
 0x29d   : > { %v5134_v43 = vadd.f32 %v11805_v17, %v14623_v7  ;;  %v11915_v45 = vpop.f32.mrb[112].mxu1  ;;  %v11808_v48 = vadd.f32 %v11807_v54, %v11806_v18 }
 0x29e   : > { %v11916_v25 = vpop.f32.mrb[113].mxu1 }
 0x29f   : > { %v5137_v53 = vadd.f32 %v11808_v48, %v14627_v20  ;;  %v11917_v34 = vadd.f32 %v11916_v25, %v11915_v45  ;;  %v11918_v32 = vpop.f32.mrb[114].mxu1 }
 0x2a0   : > { %v11919_v37 = vpop.f32.mrb[115].mxu1 }
 0x2a1   : > { %v11920_v62 = vadd.f32 %v11919_v37, %v11918_v32  ;;  %v14838_v47 = vadd.f32 %v11917_v34, %v5134_v43 }
 0x2a3   : > { %v14840_v12 = vadd.f32 %v11920_v62, %v5137_v53 }
 0x2a4   : > { %v11809_v24 = vpop.f32.mrb[116].mxu0 }
 0x2a5   : > { %v11810_v41 = vpop.f32.mrb[117].mxu0 }
 0x2a6   : > { %v11811_v28 = vadd.f32 %v11810_v41, %v11809_v24  ;;  %v11812_v49 = vpop.f32.mrb[118].mxu0 }
 0x2a7   : > { %v11813_v35 = vpop.f32.mrb[119].mxu0 }
 0x2a8   : > { %v5142_v7 = vadd.f32 %v11811_v28, %v14648_v60  ;;  %v11814_v38 = vadd.f32 %v11813_v35, %v11812_v49 }
 0x2a9   : > { %v11921_v29 = vpop.f32.mrb[116].mxu1 }
 0x2aa   : > { %v11922_v16 = vpop.f32.mrb[117].mxu1  ;;  %v5145_v20 = vadd.f32 %v11814_v38, %v14650_v63 }
 0x2ab   : > { %v11923_v9 = vadd.f32 %v11922_v16, %v11921_v29  ;;  %v11924_v40 = vpop.f32.mrb[118].mxu1  ;;  %v6845_v29 = vld [vmem:[#allocation2 + $0x4] sm:$0xf] }
 0x2ac   : > { %v11925_v61 = vpop.f32.mrb[119].mxu1 }
 0x2ad   : > { %v11926_v6 = vadd.f32 %v11925_v61, %v11924_v40  ;;  %v14844_v15 = vadd.f32 %v11923_v9, %v5142_v7  ;;  %v6942_v9 = vrot.slane %v6845_v29, 5 }
 0x2af   : > { %v14846_v2 = vadd.f32 %v11926_v6, %v5145_v20  ;;  %v11815_v17 = vpop.f32.mrb[120].mxu0  ;;  %v6846_v20 = vld [vmem:[#allocation2 + $0x8] sm:$0x1]  ;;  %v14859_v6 = vld [vmem:[%s16192_s4] ss:$0 sm:$0xff] }
 0x2b0   : > { %v11816_v18 = vpop.f32.mrb[121].mxu0 }
 0x2b1   : > { %v11817_v54 = vadd.f32 %v11816_v18, %v11815_v17  ;;  %v11818_v60 = vpop.f32.mrb[122].mxu0 }
 0x2b2   : > { %v11819_v43 = vpop.f32.mrb[123].mxu0 }
 0x2b3   : > { %v5150_v45 = vadd.f32 %v11817_v54, %v14704_v51  ;;  %v11820_v63 = vadd.f32 %v11819_v43, %v11818_v60  ;;  %v6945_v43 = vrot.slane %v6846_v20, 5 }
 0x2b5   : > { %v5153_v48 = vadd.f32 %v11820_v63, %v14714_v19  ;;  %v6844_v19 = vld [vmem:[#allocation2] sm:$0xe] }
 0x2b6   : > { %v11188_v60 = vrot.slane %v6844_v19, 9 }
 0x2b8   : > { %v14880_v29 = vsel %vm13342_vm14, %v11188_v60, %v6942_v9 }
 0x2c2   : > { %v11821_v25 = vpop.f32.mrb[124].mxu0 }
 0x2c3   : > { %v11927_v53 = vpop.f32.mrb[120].mxu1  ;;  %v11822_v34 = vpop.f32.mrb[125].mxu0 }
 0x2c4   : > { %v11928_v32 = vpop.f32.mrb[121].mxu1  ;;  %v11823_v37 = vadd.f32 %v11822_v34, %v11821_v25  ;;  %v11824_v62 = vpop.f32.mrb[126].mxu0  ;;  %v6944_v34 = vrot.slane %v6942_v9, 4 }
 0x2c5   : > { %v11929_v24 = vadd.f32 %v11928_v32, %v11927_v53  ;;  %v11930_v41 = vpop.f32.mrb[122].mxu1  ;;  %v11825_v28 = vpop.f32.mrb[127].mxu0 }
 0x2c6   : > { %v11931_v49 = vpop.f32.mrb[123].mxu1  ;;  %v5158_v35 = vadd.f32 %v11823_v37, %v14752_v50  ;;  %v11826_v7 = vadd.f32 %v11825_v28, %v11824_v62  ;;  %v14885_v19 = vsel %vm13342_vm14, %v6944_v34, %v6945_v43 }
 0x2c7   : > { %v11932_v38 = vadd.f32 %v11931_v49, %v11930_v41  ;;  %v14851_v16 = vadd.f32 %v11929_v24, %v5150_v45  ;;  %v12772_v45 = vld [vmem:[#allocation10 + $0x150] sm:$0xff]  }
 0x2c8   : > { %v5161_v51 = vadd.f32 %v11826_v7, %v14754_v13  ;;  %12191 = vmatprep.subr.bf16.mxu1 %v12772_v45  ;;  %v12773_v24 = vld [vmem:[#allocation10 + $0x110] sm:$0xff]  }
 0x2c9   : > { %v14854_v40 = vadd.f32 %v11932_v38, %v5153_v48  ;;  %12192 = vmatpush3.bf16.msra.mxu1 %v12773_v24 }
 0x2ca   : > { %v12453_v61 = vpop.f32.mrb[128].mxu0 }
 0x2cb   : > { %16331 = vst [vmem:[#allocation33_spill] sm:$0xff] %v14854_v40  ;;  %v11933_v26 = vpop.f32.mrb[124].mxu1  ;;  %v5368_v50 = vadd.f32 %v12453_v61, %v14768_v4  ;;  %v5359_v13 = vpop.f32.mrb[129].mxu0 }
 0x2cc   : > { %v11934_v17 = vpop.f32.mrb[125].mxu1  ;;  %v5360_v18 = vadd.f32 %v5359_v13, %v14762_v44  ;;  %v12454_v54 = vpop.f32.mrb[130].mxu0 }
 0x2cd   : > { %v11935_v63 = vadd.f32 %v11934_v17, %v11933_v26  ;;  %v11936_v48 = vpop.f32.mrb[126].mxu1  ;;  %v5559_v25 = vmul.f32 %v14859_v6, %v5368_v50  ;;  %v5371_v53 = vadd.f32 %v12454_v54, %v14770_v33  ;;  %v5362_v4 = vpop.f32.mrb[131].mxu0 }
 0x2ce   : > { %v11937_v32 = vpop.f32.mrb[127].mxu1  ;;  %v5557_v37 = vmul.f32 %v14859_v6, %v5360_v18  ;;  %v5363_v62 = vadd.f32 %v5362_v4, %v14764_v3 }
 0x2cf   : > { %v11938_v44 = vadd.f32 %v11937_v32, %v11936_v48  ;;  %v5598_v41 = vadd.f32 %v14865_v11, %v5559_v25  ;;  %v5560_v28 = vmul.f32 %v14859_v6, %v5371_v53  ;;  %v14874_v49 = vadd.f32 %v11935_v63, %v5158_v35 }
 0x2d0   : > { %v5596_v7 = vadd.f32 %v14865_v11, %v5557_v37  ;;  %v5558_v33 = vmul.f32 %v14859_v6, %v5363_v62  ;;  %v6083_v62 = vld [vmem:[#allocation2 + $0x18] sm:$0xf] }
 0x2d1   : > { %v5630_v38 = vmax.f32 %v5598_v41, 0.0  ;;  %v5599_v3 = vadd.f32 %v14865_v11, %v5560_v28  ;;  %v14887_v20 = vadd.f32 %v11938_v44, %v5161_v51  ;;  %v12778_v41 = vld [vmem:[#allocation10 + $0x158] sm:$0xff]  }
 0x2d2   : > { %v5628_v35 = vmax.f32 %v5596_v7, 0.0  ;;  %v5597_v61 = vadd.f32 %v14865_v11, %v5558_v33  ;;  %v12457_v26 = vpop.f32.mrb[132].mxu0  ;;  %v6076_v7 = vld [vmem:[#allocation2 + $0xc] sm:$0xf]  ;;  %12193 = vmatprep.subr.bf16.mxu1 %v12778_v41 }
 0x2d3   : > { %v11460_v50 = vpack.c.bf16 %v5630_v38, %v5630_v38  ;;  %v5631_v13 = vmax.f32 %v5599_v3, 0.0  ;;  %v5384_v17 = vadd.f32 %v12457_v26, %v14780_v59  ;;  %v5375_v9 = vpop.f32.mrb[133].mxu0 }
 0x2d4   : > { %v11458_v18 = vpack.c.bf16 %v5628_v35, %v5628_v35  ;;  %v5629_v54 = vmax.f32 %v5597_v61, 0.0  ;;  %v5376_v60 = vadd.f32 %v5375_v9, %v14774_v58  ;;  %v12458_v45 = vpop.f32.mrb[134].mxu0 }
 0x2d5   : > { %v5774_v63 = vshrl.u32 %v11460_v50, 16  ;;  %v5777_v51 = vshll.u32 %v11460_v50, 16  ;;  %v11461_v48 = vpack.c.bf16 %v5631_v13, %v5631_v13  ;;  %v5563_v25 = vmul.f32 %v14859_v6, %v5384_v17  ;;  %v5378_v53 = vpop.f32.mrb[135].mxu0  ;;  %v6087_v50 = vld [vmem:[#allocation2 + $0x20] sm:$0x1] }
 0x2d6   : > { %v5757_v4 = vshrl.u32 %v11458_v18, 16  ;;  %v5760_v34 = vshll.u32 %v11458_v18, 16  ;;  %v11459_v32 = vpack.c.bf16 %v5629_v54, %v5629_v54  ;;  %v5561_v59 = vmul.f32 %v14859_v6, %v5376_v60 }
 0x2d7   : > { %v5776_v37 = vrot.slane %v5774_v63, 7  ;;  %v5782_v24 = vshrl.u32 %v11461_v48, 16  ;;  %v5785_v44 = vshll.u32 %v11461_v48, 16  ;;  %v5602_v58 = vadd.f32 %v14865_v11, %v5563_v25  ;;  %v12779_v63 = vld [vmem:[#allocation10 + $0x118] sm:$0xff]  }
 0x2d8   : > { %v5759_v28 = vrot.slane %v5757_v4, 7  ;;  %v5765_v33 = vshrl.u32 %v11459_v32, 16  ;;  %v5768_v38 = vshll.u32 %v11459_v32, 16  ;;  %v5600_v3 = vadd.f32 %v14865_v11, %v5561_v59  ;;  %v6080_v32 = vld [vmem:[#allocation2 + $0x14] sm:$0x1]  ;;  %12194 = vmatpush3.bf16.msra.mxu1 %v12779_v63 }
 0x2d9   : > { %v5779_v35 = vor.u32 %v5777_v51, %v5776_v37  ;;  %v5780_v61 = vrot.slane %v5776_v37, 4  ;;  %v5784_v26 = vrot.slane %v5782_v24, 7  ;;  %v5634_v13 = vmax.f32 %v5602_v58, 0.0 }
 0x2da   : > { %v5762_v17 = vor.u32 %v5760_v34, %v5759_v28  ;;  %v5763_v9 = vrot.slane %v5759_v28, 4  ;;  %v5767_v18 = vrot.slane %v5765_v33, 7  ;;  %v5632_v54 = vmax.f32 %v5600_v3, 0.0  ;;  %v12461_v60 = vpop.f32.mrb[136].mxu0 }
 0x2db   : > { %v6084_v25 = vsel %vm13318_vm12, %v5779_v35, %v6083_v62  ;;  %v5787_v4 = vor.u32 %v5785_v44, %v5784_v26  ;;  %v5789_v43 = vrot.slane %v5784_v26, 4  ;;  %v11464_v40 = vpack.c.bf16 %v5634_v13, %v5634_v13  ;;  %v5391_v59 = vpop.f32.mrb[137].mxu0 }
 0x2dc   : > { %6085 = vst [vmem:[#allocation2 + $0x18] sm:$0xf] %v6084_v25  ;;  %v6077_v51 = vsel %vm13318_vm12, %v5762_v17, %v6076_v7  ;;  %v5770_v37 = vor.u32 %v5768_v38, %v5767_v18  ;;  %v5772_v24 = vrot.slane %v5767_v18, 4  ;;  %v11462_v34 = vpack.c.bf16 %v5632_v54, %v5632_v54  ;;  %v12462_v58 = vpop.f32.mrb[138].mxu0  ;;  %v12782_v25 = vld [vmem:[#allocation10 + $0x1c0] sm:$0xff]  }
 0x2dd   : > { %6078 = vst [vmem:[#allocation2 + $0xc] sm:$0xf] %v6077_v51  ;;  %v5788_v28 = vsel %vm13330_vm13, %v5780_v61, %v5787_v4  ;;  %v6088_v62 = vsel %vm13250_vm3, %v5789_v43, %v6087_v50  ;;  %v5808_v44 = vshrl.u32 %v11464_v40, 16  ;;  %v5811_v3 = vshll.u32 %v11464_v40, 16  ;;  %v5394_v35 = vpop.f32.mrb[139].mxu0  ;;  %12299 = vmatprep.subr.bf16.mxu0 %v12782_v25 }
 0x2de   : > { %6086 = vst [vmem:[#allocation2 + $0x1c] sm:$0xf] %v5788_v28  ;;  %6089 = vst [vmem:[#allocation2 + $0x20] sm:$0x1] %v6088_v62  ;;  %v5771_v7 = vsel %vm13330_vm13, %v5763_v9, %v5770_v37  ;;  %v6081_v38 = vsel %vm13250_vm3, %v5772_v24, %v6080_v32  ;;  %v5791_v26 = vshrl.u32 %v11462_v34, 16  ;;  %v5794_v13 = vshll.u32 %v11462_v34, 16 }
 0x2df   : > { %6079 = vst [vmem:[#allocation2 + $0x10] sm:$0xf] %v5771_v7  ;;  %6082 = vst [vmem:[#allocation2 + $0x14] sm:$0x1] %v6081_v38  ;;  %v14910_v17 = vrot.slane %v5808_v44, 7  ;;  %v5387_v61 = vadd.f32 %v12458_v45, %v14782_v21  ;;  %v5379_v43 = vadd.f32 %v5378_v53, %v14776_v8  ;;  %v5400_v40 = vadd.f32 %v12461_v60, %v14792_v10 }
 0x2e0   : > { %v6097_v50 = vld [vmem:[#allocation2 + $0x30] sm:$0xf]  ;;  %v14915_v18 = vrot.slane %v5791_v26, 7  ;;  %v5392_v9 = vadd.f32 %v5391_v59, %v14786_v42  ;;  %v5403_v54 = vadd.f32 %v12462_v58, %v14794_v23  ;;  %v5395_v63 = vadd.f32 %v5394_v35, %v14788_v5  ;;  %v6090_v51 = vld [vmem:[#allocation2 + $0x24] sm:$0xf] }
 0x2e1   : > { %v5813_v4 = vor.u32 %v5811_v3, %v14910_v17  ;;  %v5814_v32 = vrot.slane %v14910_v17, 4  ;;  %v5564_v21 = vmul.f32 %v14859_v6, %v5387_v61  ;;  %v5562_v8 = vmul.f32 %v14859_v6, %v5379_v43 }
 0x2e2   : > { %v5796_v10 = vor.u32 %v5794_v13, %v14915_v18  ;;  %v5797_v45 = vrot.slane %v14915_v18, 4  ;;  %v5567_v42 = vmul.f32 %v14859_v6, %v5400_v40  ;;  %v5565_v23 = vmul.f32 %v14859_v6, %v5392_v9  ;;  %v12465_v53 = vpop.f32.mrb[140].mxu0  ;;  %v12783_v9 = vld [vmem:[#allocation10 + $0x180] sm:$0xff]  }
 0x2e3   : > { %v6098_v5 = vsel %vm13318_vm12, %v5813_v4, %v6097_v50  ;;  %v5603_v60 = vadd.f32 %v14865_v11, %v5564_v21  ;;  %v5601_v59 = vadd.f32 %v14865_v11, %v5562_v8  ;;  %v5568_v37 = vmul.f32 %v14859_v6, %v5403_v54  ;;  %v5407_v24 = vpop.f32.mrb[141].mxu0 }
 0x2e4   : > { %6099 = vst [vmem:[#allocation2 + $0x30] sm:$0xf] %v6098_v5  ;;  %v6091_v34 = vsel %vm13318_vm12, %v5796_v10, %v6090_v51  ;;  %v5606_v58 = vadd.f32 %v14865_v11, %v5567_v42  ;;  %v5604_v28 = vadd.f32 %v14865_v11, %v5565_v23  ;;  %v5566_v62 = vmul.f32 %v14859_v6, %v5395_v63  ;;  %v14938_v44 = vpop.f32.mrb[142].mxu0  ;;  %v12786_v42 = vld [vmem:[#allocation10 + $0x160] sm:$0xff]  }
 0x2e5   : > { %6092 = vst [vmem:[#allocation2 + $0x24] sm:$0xf] %v6091_v34  ;;  %v5635_v3 = vmax.f32 %v5603_v60, 0.0  ;;  %v5633_v35 = vmax.f32 %v5601_v59, 0.0  ;;  %v5607_v7 = vadd.f32 %v14865_v11, %v5568_v37  ;;  %v5416_v38 = vadd.f32 %v12465_v53, %v14804_v56  ;;  %v14942_v26 = vpop.f32.mrb[143].mxu0  ;;  %v12759_v10 = vld [vmem:[#allocation2 + $0x18] sm:$0xff]   ;;  %12195 = vmatprep.subr.bf16.mxu1 %v12786_v42 }
 0x2e6   : > { %v5638_v13 = vmax.f32 %v5606_v58, 0.0  ;;  %v5636_v61 = vmax.f32 %v5604_v28, 0.0  ;;  %v5605_v43 = vadd.f32 %v14865_v11, %v5566_v62  ;;  %v5408_v40 = vadd.f32 %v5407_v24, %v14798_v39  ;;  %v12758_v50 = vld [vmem:[#allocation2 + $0xc] sm:$0xff]   ;;  %v6101_v59 = vld [vmem:[#allocation2 + $0x38] sm:$0x1] }
 0x2e7   : > { %v11465_v54 = vpack.c.bf16 %v5635_v3, %v5635_v3  ;;  %v11463_v63 = vpack.c.bf16 %v5633_v35, %v5633_v35  ;;  %v5639_v25 = vmax.f32 %v5607_v7, 0.0  ;;  %v5571_v4 = vmul.f32 %v14859_v6, %v5416_v38  ;;  %9933 = vmatprep.mubr.bf16.mxu0 %v12758_v50  ;;  %v6094_v37 = vld [vmem:[#allocation2 + $0x2c] sm:$0x1]  ;;  %v12787_v3 = vld [vmem:[#allocation10 + $0x120] sm:$0xff]   ;;  %v6111_v38 = vld [vmem:[#allocation2 + $0x48] sm:$0xf] }
 0x2e8   : > { %v11468_v51 = vpack.c.bf16 %v5638_v13, %v5638_v13  ;;  %v11466_v21 = vpack.c.bf16 %v5636_v61, %v5636_v61  ;;  %v5637_v8 = vmax.f32 %v5605_v43, 0.0  ;;  %v5569_v56 = vmul.f32 %v14859_v6, %v5408_v40  ;;  %v6104_v13 = vld [vmem:[#allocation2 + $0x3c] sm:$0xf]  ;;  %12196 = vmatpush3.bf16.msra.mxu1 %v12787_v3 }
 0x2e9   : > { %v5816_v23 = vshrl.u32 %v11465_v54, 16  ;;  %v5819_v53 = vshll.u32 %v11465_v54, 16  ;;  %v5799_v5 = vshrl.u32 %v11463_v63, 16  ;;  %v5802_v60 = vshll.u32 %v11463_v63, 16 }
 0x2ea   : > { %v16335_v39 = vcombine.low %v14880_v29, %v14885_v19  ;;  %v5842_v24 = vshrl.u32 %v11468_v51, 16  ;;  %v5845_v34 = vshll.u32 %v11468_v51, 16  ;;  %v5825_v58 = vshrl.u32 %v11466_v21, 16  ;;  %v12469_v62 = vpop.f32.mrb[144].mxu0 }
 0x2eb   : > { %v5828_v28 = vshll.u32 %v11466_v21, 16  ;;  %v5818_v35 = vrot.slane %v5816_v23, 7  ;;  %v5801_v7 = vrot.slane %v5799_v5, 7  ;;  %v11469_v61 = vpack.c.bf16 %v5639_v25, %v5639_v25  ;;  %v5423_v40 = vpop.f32.mrb[145].mxu0 }
 0x2ec   : > { %9934 = vmatmul.mubr.bf16.vlgmr.msra.gmra.mrb[160].mxu0 %v16335_v39  ;;  %v11467_v43 = vpack.c.bf16 %v5637_v8, %v5637_v8  ;;  %v5844_v29 = vrot.slane %v5842_v24, 7  ;;  %v14951_v19 = vrot.slane %v5825_v58, 7  ;;  %v5610_v50 = vadd.f32 %v14865_v11, %v5571_v4  ;;  %v14955_v63 = vpop.f32.mrb[146].mxu0 }
 0x2ed   : > { %9941 = vmatprep.mubr.bf16.mxu0 %v12759_v10  ;;  %12300 = vmatpush3.bf16.msra.mxu0 %v12783_v9  ;;  %v5608_v54 = vadd.f32 %v14865_v11, %v5569_v56  ;;  %v5821_v9 = vor.u32 %v5819_v53, %v5818_v35  ;;  %v5823_v51 = vrot.slane %v5818_v35, 4  ;;  %v5804_v21 = vor.u32 %v5802_v60, %v5801_v7  ;;  %v14957_v23 = vpop.f32.mrb[147].mxu0 }
 0x2ee   : > { %v5806_v10 = vrot.slane %v5801_v7, 4  ;;  %v5847_v25 = vor.u32 %v5845_v34, %v5844_v29  ;;  %v5848_v8 = vrot.slane %v5844_v29, 4  ;;  %v5830_v42 = vor.u32 %v5828_v28, %v14951_v19  ;;  %v6115_v7 = vld [vmem:[#allocation2 + $0x50] sm:$0x1] }
 0x2ef   : > { %v5831_v5 = vrot.slane %v14951_v19, 4  ;;  %v5822_v4 = vsel %vm13330_vm13, %v5814_v32, %v5821_v9  ;;  %v6102_v56 = vsel %vm13250_vm3, %v5823_v51, %v6101_v59  ;;  %v5805_v53 = vsel %vm13330_vm13, %v5797_v45, %v5804_v21  ;;  %v12790_v21 = vld [vmem:[#allocation10 + $0x1c8] sm:$0xff]  }
 0x2f0   : > { %v6095_v60 = vsel %vm13250_vm3, %v5806_v10, %v6094_v37  ;;  %6100 = vst [vmem:[#allocation2 + $0x34] sm:$0xf] %v5822_v4  ;;  %6103 = vst [vmem:[#allocation2 + $0x38] sm:$0x1] %v6102_v56  ;;  %v6112_v17 = vsel %vm13318_vm12, %v5847_v25, %v6111_v38  ;;  %v6105_v32 = vsel %vm13318_vm12, %v5830_v42, %v6104_v13  ;;  %v5850_v39 = vshrl.u32 %v11469_v61, 16  ;;  %v12791_v10 = vld [vmem:[#allocation10 + $0x188] sm:$0xff]  }
 0x2f1   : > { %6093 = vst [vmem:[#allocation2 + $0x28] sm:$0xf] %v5805_v53  ;;  %6096 = vst [vmem:[#allocation2 + $0x2c] sm:$0x1] %v6095_v60  ;;  %v5853_v59 = vshll.u32 %v11469_v61, 16  ;;  %v5833_v18 = vshrl.u32 %v11467_v43, 16  ;;  %v5419_v37 = vadd.f32 %v14938_v44, %v14806_v36  ;;  %v5411_v28 = vadd.f32 %v14942_v26, %v14800_v31  ;;  %12301 = vmatprep.subr.bf16.mxu0 %v12790_v21 }
 0x2f2   : > { %6113 = vst [vmem:[#allocation2 + $0x48] sm:$0xf] %v6112_v17  ;;  %6106 = vst [vmem:[#allocation2 + $0x3c] sm:$0xf] %v6105_v32  ;;  %v5836_v24 = vshll.u32 %v11467_v43, 16  ;;  %v5642_v45 = vmax.f32 %v5610_v50, 0.0  ;;  %v5432_v3 = vadd.f32 %v12469_v62, %v14816_v52  ;;  %v5424_v29 = vadd.f32 %v5423_v40, %v14810_v14  ;;  %12302 = vmatpush3.bf16.msra.mxu0 %v12791_v10 }
 0x2f3   : > { %v5640_v34 = vmax.f32 %v5608_v54, 0.0  ;;  %v5852_v58 = vrot.slane %v5850_v39, 7  ;;  %v14982_v35 = vpop.f32.mrb[148].mxu0  ;;  %v5835_v38 = vrot.slane %v5833_v18, 7  ;;  %v6108_v54 = vld [vmem:[#allocation2 + $0x44] sm:$0x1]  ;;  %v5572_v36 = vmul.f32 %v14859_v6, %v5419_v37 }
 0x2f4   : > { %v11472_v13 = vpack.c.bf16 %v5642_v45, %v5642_v45  ;;  %v14985_v43 = vpop.f32.mrb[149].mxu0  ;;  %v5570_v44 = vmul.f32 %v14859_v6, %v5411_v28  ;;  %v5575_v39 = vmul.f32 %v14859_v6, %v5432_v3 }
 0x2f5   : > { %v11470_v61 = vpack.c.bf16 %v5640_v34, %v5640_v34  ;;  %v5855_v19 = vor.u32 %v5853_v59, %v5852_v58  ;;  %v5857_v50 = vrot.slane %v5852_v58, 4  ;;  %v14989_v31 = vpop.f32.mrb[150].mxu0  ;;  %v5838_v52 = vor.u32 %v5836_v24, %v5835_v38  ;;  %v6118_v24 = vld [vmem:[#allocation2 + $0x54] sm:$0xf] }
 0x2f6   : > { %v5840_v26 = vrot.slane %v5835_v38, 4  ;;  %v5876_v62 = vshrl.u32 %v11472_v13, 16  ;;  %v5879_v9 = vshll.u32 %v11472_v13, 16  ;;  %v14991_v51 = vpop.f32.mrb[151].mxu0  ;;  %v5611_v60 = vadd.f32 %v14865_v11, %v5572_v36 }
 0x2f7   : > { %v5856_v14 = vsel %vm13330_vm13, %v5848_v8, %v5855_v19  ;;  %v6116_v40 = vsel %vm13250_vm3, %v5857_v50, %v6115_v7  ;;  %v5859_v25 = vshrl.u32 %v11470_v61, 16  ;;  %v5862_v42 = vshll.u32 %v11470_v61, 16  ;;  %v6125_v8 = vld [vmem:[#allocation2 + $0x60] sm:$0xf] }
 0x2f8   : > { %6114 = vst [vmem:[#allocation2 + $0x4c] sm:$0xf] %v5856_v14  ;;  %6117 = vst [vmem:[#allocation2 + $0x50] sm:$0x1] %v6116_v40  ;;  %v5839_v4 = vsel %vm13330_vm13, %v5831_v5, %v5838_v52  ;;  %v6109_v56 = vsel %vm13250_vm3, %v5840_v26, %v6108_v54  ;;  %v15001_v53 = vrot.slane %v5876_v62, 7  ;;  %v5609_v32 = vadd.f32 %v14865_v11, %v5570_v44 }
 0x2f9   : > { %6107 = vst [vmem:[#allocation2 + $0x40] sm:$0xf] %v5839_v4  ;;  %6110 = vst [vmem:[#allocation2 + $0x44] sm:$0x1] %v6109_v56  ;;  %v15004_v17 = vrot.slane %v5859_v25, 7  ;;  %v5573_v59 = vmul.f32 %v14859_v6, %v5424_v29  ;;  %v5643_v45 = vmax.f32 %v5611_v60, 0.0  ;;  %v5435_v34 = vadd.f32 %v14955_v63, %v14818_v55 }
 0x2fa   : > { %v5881_v5 = vor.u32 %v5879_v9, %v15001_v53  ;;  %v5882_v18 = vrot.slane %v15001_v53, 4  ;;  %v5641_v28 = vmax.f32 %v5609_v32, 0.0  ;;  %v5614_v7 = vadd.f32 %v14865_v11, %v5575_v39  ;;  %v15016_v3 = vpop.f32.mrb[152].mxu0  ;;  %v6122_v39 = vld [vmem:[#allocation2 + $0x5c] sm:$0x1] }
 0x2fb   : > { %v5864_v58 = vor.u32 %v5862_v42, %v15004_v17  ;;  %v5865_v37 = vrot.slane %v15004_v17, 4  ;;  %v11473_v13 = vpack.c.bf16 %v5643_v45, %v5643_v45  ;;  %v5612_v61 = vadd.f32 %v14865_v11, %v5573_v59  ;;  %v15022_v19 = vpop.f32.mrb[153].mxu0  ;;  %v6129_v42 = vld [vmem:[#allocation2 + $0x68] sm:$0x1] }
 0x2fc   : > { %v6126_v38 = vsel %vm13318_vm12, %v5881_v5, %v6125_v8  ;;  %v5576_v29 = vmul.f32 %v14859_v6, %v5435_v34  ;;  %v11471_v63 = vpack.c.bf16 %v5641_v28, %v5641_v28  ;;  %v5646_v50 = vmax.f32 %v5614_v7, 0.0  ;;  %v15028_v36 = vpop.f32.mrb[154].mxu0 }
 0x2fd   : > { %6127 = vst [vmem:[#allocation2 + $0x60] sm:$0xf] %v6126_v38  ;;  %v6119_v55 = vsel %vm13318_vm12, %v5864_v58, %v6118_v24  ;;  %v5427_v54 = vadd.f32 %v14957_v23, %v14812_v22  ;;  %v5884_v44 = vshrl.u32 %v11473_v13, 16  ;;  %v5887_v52 = vshll.u32 %v11473_v13, 16  ;;  %v15031_v9 = vpop.f32.mrb[155].mxu0  ;;  %v12794_v38 = vld [vmem:[#allocation10 + $0x168] sm:$0xff]  }
 0x2fe   : > { %6120 = vst [vmem:[#allocation2 + $0x54] sm:$0xf] %v6119_v55  ;;  %v5644_v26 = vmax.f32 %v5612_v61, 0.0  ;;  %v5615_v62 = vadd.f32 %v14865_v11, %v5576_v29  ;;  %v5867_v21 = vshrl.u32 %v11471_v63, 16  ;;  %v5870_v10 = vshll.u32 %v11471_v63, 16  ;;  %v12795_v63 = vld [vmem:[#allocation10 + $0x128] sm:$0xff]   ;;  %12197 = vmatprep.subr.bf16.mxu1 %v12794_v38 }
 0x2ff   : > { %v11476_v14 = vpack.c.bf16 %v5646_v50, %v5646_v50  ;;  %v5574_v40 = vmul.f32 %v14859_v6, %v5427_v54  ;;  %v5886_v25 = vrot.slane %v5884_v44, 7  ;;  %v5448_v22 = vadd.f32 %v14982_v35, %v14832_v57  ;;  %v6139_v58 = vld [vmem:[#allocation2 + $0x78] sm:$0xf]  ;;  %v6335_v29 = vld [vmem:[#allocation2 + $0xc] sm:$0xf]  ;;  %12198 = vmatpush3.bf16.msra.mxu1 %v12795_v63 }
 0x300   : > { %v11474_v4 = vpack.c.bf16 %v5644_v26, %v5644_v26  ;;  %v5647_v56 = vmax.f32 %v5615_v62, 0.0  ;;  %v5869_v23 = vrot.slane %v5867_v21, 7  ;;  %v6336_v26 = vld [vmem:[#allocation2 + $0x10] sm:$0xf] }
 0x301   : > { %v5910_v53 = vshrl.u32 %v11476_v14, 16  ;;  %v5913_v60 = vshll.u32 %v11476_v14, 16  ;;  %v5613_v8 = vadd.f32 %v14865_v11, %v5574_v40  ;;  %v5889_v17 = vor.u32 %v5887_v52, %v5886_v25  ;;  %v6132_v52 = vld [vmem:[#allocation2 + $0x6c] sm:$0xf]  ;;  %v6337_v40 = vld [vmem:[#allocation2 + $0x14] sm:$0x1] }
 0x302   : > { %v5891_v32 = vrot.slane %v5886_v25, 4  ;;  %v5893_v59 = vshrl.u32 %v11474_v4, 16  ;;  %v5896_v5 = vshll.u32 %v11474_v4, 16  ;;  %v5872_v24 = vor.u32 %v5870_v10, %v5869_v23  ;;  %v15039_v7 = vpop.f32.mrb[156].mxu0  ;;  %v6143_v4 = vld [vmem:[#allocation2 + $0x80] sm:$0x1] }
 0x303   : > { %v5874_v45 = vrot.slane %v5869_v23, 4  ;;  %v15037_v34 = vrot.slane %v5910_v53, 7  ;;  %v11477_v28 = vpack.c.bf16 %v5647_v56, %v5647_v56  ;;  %v5890_v57 = vsel %vm13330_vm13, %v5882_v18, %v5889_v17  ;;  %v15047_v55 = vpop.f32.mrb[157].mxu0 }
 0x304   : > { %v6130_v35 = vsel %vm13250_vm3, %v5891_v32, %v6129_v42  ;;  %v15045_v13 = vrot.slane %v5893_v59, 7  ;;  %v5645_v61 = vmax.f32 %v5613_v8, 0.0  ;;  %6128 = vst [vmem:[#allocation2 + $0x64] sm:$0xf] %v5890_v57  ;;  %v5873_v50 = vsel %vm13330_vm13, %v5865_v37, %v5872_v24  ;;  %v15055_v62 = vpop.f32.mrb[158].mxu0  ;;  %v12799_v59 = vld [vmem:[#allocation10 + $0x190] sm:$0xff]  }
 0x305   : > { %6131 = vst [vmem:[#allocation2 + $0x68] sm:$0x1] %v6130_v35  ;;  %v6123_v54 = vsel %vm13250_vm3, %v5874_v45, %v6122_v39  ;;  %v5915_v18 = vor.u32 %v5913_v60, %v15037_v34  ;;  %v5916_v44 = vrot.slane %v15037_v34, 4  ;;  %6121 = vst [vmem:[#allocation2 + $0x58] sm:$0xf] %v5873_v50  ;;  %v5918_v14 = vshrl.u32 %v11477_v28, 16 }
 0x306   : > { %6124 = vst [vmem:[#allocation2 + $0x5c] sm:$0x1] %v6123_v54  ;;  %v5898_v21 = vor.u32 %v5896_v5, %v15045_v13  ;;  %v5899_v10 = vrot.slane %v15045_v13, 4  ;;  %v5921_v37 = vshll.u32 %v11477_v28, 16  ;;  %v15059_v25 = vpop.f32.mrb[159].mxu0  ;;  %v11475_v56 = vpack.c.bf16 %v5645_v61, %v5645_v61  ;;  %v12798_v60 = vld [vmem:[#allocation10 + $0x1d0] sm:$0xff]  }
 0x307   : > { %v6140_v42 = vsel %vm13318_vm12, %v5915_v18, %v6139_v58  ;;  %v5579_v23 = vmul.f32 %v14859_v6, %v5448_v22  ;;  %v6405_v53 = vshrl.u32 %v6335_v29, 16  ;;  %v5920_v17 = vrot.slane %v5918_v14, 7  ;;  %v6847_v58 = vld [vmem:[#allocation2 + $0xc] sm:$0xe]  ;;  %12303 = vmatprep.subr.bf16.mxu0 %v12798_v60  ;;  %v6848_v13 = vld [vmem:[#allocation2 + $0x10] sm:$0xf] }
 0x308   : > { %6141 = vst [vmem:[#allocation2 + $0x78] sm:$0xf] %v6140_v42  ;;  %v6133_v8 = vsel %vm13318_vm12, %v5898_v21, %v6132_v52  ;;  %v6408_v32 = vshll.u32 %v6335_v29, 16  ;;  %v6414_v39 = vshll.u32 %v6336_v26, 16  ;;  %v5901_v5 = vshrl.u32 %v11475_v56, 16  ;;  %v12802_v28 = vld [vmem:[#allocation10 + $0x170] sm:$0xff]   ;;  %12304 = vmatpush3.bf16.msra.mxu0 %v12799_v59 }
 0x309   : > { %6134 = vst [vmem:[#allocation2 + $0x6c] sm:$0xf] %v6133_v8  ;;  %v5904_v24 = vshll.u32 %v11475_v56, 16  ;;  %v5618_v45 = vadd.f32 %v14865_v11, %v5579_v23  ;;  %v6407_v34 = vrot.slane %v6405_v53, 4  ;;  %v5923_v22 = vor.u32 %v5921_v37, %v5920_v17  ;;  %v12803_v61 = vld [vmem:[#allocation10 + $0x130] sm:$0xff]   ;;  %12199 = vmatprep.subr.bf16.mxu1 %v12802_v28 }
 0x30a   : > { %v5925_v38 = vrot.slane %v5920_v17, 4  ;;  %v6410_v57 = vrot.slane %v6408_v32, 5  ;;  %v15067_v35 = vrot.slane %v6414_v39, 5  ;;  %v5903_v29 = vrot.slane %v5901_v5, 7  ;;  %v6849_v18 = vld [vmem:[#allocation2 + $0x14] sm:$0x1]  ;;  %12200 = vmatpush3.bf16.msra.mxu1 %v12803_v61 }
 0x30b   : > { %v5650_v63 = vmax.f32 %v5618_v45, 0.0  ;;  %v6418_v50 = vshrl.u32 %v6336_v26, 16  ;;  %v6424_v54 = vshll.u32 %v6337_v40, 16  ;;  %v5924_v52 = vsel %vm13330_vm13, %v5916_v44, %v5923_v22  ;;  %v6136_v14 = vld [vmem:[#allocation2 + $0x74] sm:$0x1] }
 0x30c   : > { %v6144_v21 = vsel %vm13250_vm3, %v5925_v38, %v6143_v4  ;;  %v6411_v37 = vor.u32 %v6410_v57, %v6407_v34  ;;  %v11189_v42 = vrot.slane %v6847_v58, 9  ;;  %6142 = vst [vmem:[#allocation2 + $0x7c] sm:$0xf] %v5924_v52  ;;  %v5906_v56 = vor.u32 %v5904_v24, %v5903_v29  ;;  %v6338_v26 = vld [vmem:[#allocation2 + $0x18] sm:$0xf] }
 0x30d   : > { %6145 = vst [vmem:[#allocation2 + $0x80] sm:$0x1] %v6144_v21  ;;  %v5908_v23 = vrot.slane %v5903_v29, 4  ;;  %v11480_v53 = vpack.c.bf16 %v5650_v63, %v5650_v63  ;;  %v6420_v60 = vrot.slane %v6418_v50, 4  ;;  %v6426_v8 = vrot.slane %v6424_v54, 5  ;;  %v12806_v63 = vld [vmem:[#allocation10 + $0x1d8] sm:$0xff]  }
 0x30e   : > { %v6412_v40 = vrot.slane %v6411_v37, 4  ;;  %v6949_v17 = vrot.slane %v6848_v13, 5  ;;  %v6952_v32 = vrot.slane %v6849_v18, 5  ;;  %v6339_v39 = vld [vmem:[#allocation2 + $0x1c] sm:$0xf]  ;;  %v5907_v44 = vsel %vm13330_vm13, %v5899_v10, %v5906_v56  ;;  %v12807_v21 = vld [vmem:[#allocation10 + $0x198] sm:$0xff]   ;;  %12305 = vmatprep.subr.bf16.mxu0 %v12806_v63 }
 0x30f   : > { %v6137_v4 = vsel %vm13250_vm3, %v5908_v23, %v6136_v14  ;;  %v5944_v59 = vshrl.u32 %v11480_v53, 16  ;;  %v5947_v5 = vshll.u32 %v11480_v53, 16  ;;  %6135 = vst [vmem:[#allocation2 + $0x70] sm:$0xf] %v5907_v44  ;;  %v6421_v45 = vor.u32 %v6420_v60, %v15067_v35  ;;  %v6153_v57 = vld [vmem:[#allocation2 + $0x90] sm:$0xf]  ;;  %12306 = vmatpush3.bf16.msra.mxu0 %v12807_v21 }
 0x310   : > { %6138 = vst [vmem:[#allocation2 + $0x74] sm:$0x1] %v6137_v4  ;;  %v6417_v24 = vsel %vm13311_vm11, %v6412_v40, %v15067_v35  ;;  %v6950_v34 = vsel %vm13342_vm14, %v11189_v42, %v6949_v17  ;;  %v6951_v58 = vrot.slane %v6949_v17, 4  ;;  %v5440_v10 = vadd.f32 %v14985_v43, %v14822_v0  ;;  %v6340_v0 = vld [vmem:[#allocation2 + $0x20] sm:$0x1] }
 0x311   : > { %v15083_v28 = vrot.slane %v5944_v59, 7  ;;  %v5451_v22 = vadd.f32 %v14989_v31, %v14834_v30  ;;  %v6429_v38 = vshrl.u32 %v6338_v26, 16  ;;  %v6422_v13 = vrot.slane %v6421_v45, 4  ;;  %v6850_v43 = vld [vmem:[#allocation2 + $0x18] sm:$0xe]  ;;  %v12763_v31 = vld [vmem:[#allocation2 + $0x24] sm:$0xff]  }
 0x312   : > { %v6953_v61 = vsel %vm13342_vm14, %v6951_v58, %v6952_v32  ;;  %v6432_v29 = vshll.u32 %v6338_v26, 16  ;;  %v6438_v35 = vshll.u32 %v6339_v39, 16  ;;  %v5577_v52 = vmul.f32 %v14859_v6, %v5440_v10  ;;  %v12762_v26 = vld [vmem:[#allocation2 + $0xc] sm:$0xff]   ;;  %v6851_v44 = vld [vmem:[#allocation2 + $0x1c] sm:$0xf] }
 0x313   : > { %v5949_v50 = vor.u32 %v5947_v5, %v15083_v28  ;;  %v5950_v54 = vrot.slane %v15083_v28, 4  ;;  %v11205_v18 = vcombine.low %v6950_v34, %v6953_v61  ;;  %v6427_v30 = vsel %vm13311_vm11, %v6422_v13, %v6426_v8  ;;  %v15136_v28 = vld [vmem:[%s16192_s4] ss:$0 sm:$0xff] }
 0x314   : > { %v5580_v14 = vmul.f32 %v14859_v6, %v5451_v22  ;;  %v6431_v37 = vrot.slane %v6429_v38, 4  ;;  %v6434_v42 = vrot.slane %v6432_v29, 5  ;;  %v11173_v23 = vcombine.low %v6417_v24, %v6427_v30  ;;  %v6852_v24 = vld [vmem:[#allocation2 + $0x20] sm:$0x1] }
 0x315   : > { %v6154_v56 = vsel %vm13318_vm12, %v5949_v50, %v6153_v57  ;;  %9942 = vmatmul.mubr.bf16.gmra.mrb[164].mxu0 %v11205_v18  ;;  %v5616_v53 = vadd.f32 %v14865_v11, %v5577_v52  ;;  %v6440_v60 = vrot.slane %v6438_v35, 5  ;;  %v6442_v17 = vshrl.u32 %v6339_v39, 16 }
 0x316   : > { %6155 = vst [vmem:[#allocation2 + $0x90] sm:$0xf] %v6154_v56  ;;  %9949 = vmatprep.mubr.bf16.mxu0 %v12763_v31  ;;  %v5619_v40 = vadd.f32 %v14865_v11, %v5580_v14  ;;  %v6435_v8 = vor.u32 %v6434_v42, %v6431_v37  ;;  %v6448_v32 = vshll.u32 %v6340_v0, 16  ;;  %9780 = vmatprep.mubr.bf16.mxu1 %v11173_v23  ;;  %v11190_v45 = vrot.slane %v6850_v43, 9  ;;  %v12811_v43 = vld [vmem:[#allocation10 + $0x178] sm:$0xff]  }
 0x317   : > { %v5648_v4 = vmax.f32 %v5616_v53, 0.0  ;;  %v5443_v59 = vadd.f32 %v14991_v51, %v14828_v46  ;;  %v5464_v5 = vadd.f32 %v15016_v3, %v14844_v15  ;;  %9781 = vmatmul.mubr.bf16.gmra.mrb[132].mxu1 %v12762_v26  ;;  %v6444_v10 = vrot.slane %v6442_v17, 4  ;;  %v12808_v15 = vld [vmem:[#allocation10 + $0x1e0] sm:$0xff]   ;;  %v6146_v37 = vld [vmem:[#allocation2 + $0x84] sm:$0xf]  ;;  %12201 = vmatprep.subr.bf16.mxu1 %v12811_v43 }
 0x318   : > { %v5651_v34 = vmax.f32 %v5619_v40, 0.0  ;;  %v6436_v58 = vrot.slane %v6435_v8, 4  ;;  %v6450_v22 = vrot.slane %v6448_v32, 5  ;;  %v6956_v13 = vrot.slane %v6851_v44, 5  ;;  %12307 = vmatprep.subr.bf16.mxu0 %v12808_v15  ;;  %v12812_v53 = vld [vmem:[#allocation10 + $0x1a0] sm:$0xff]   ;;  %v12813_v44 = vld [vmem:[#allocation10 + $0x138] sm:$0xff]  }
 0x319   : > { %v11478_v38 = vpack.c.bf16 %v5648_v4, %v5648_v4  ;;  %v5578_v39 = vmul.f32 %v14859_v6, %v5443_v59  ;;  %v5583_v57 = vmul.f32 %v14859_v6, %v5464_v5  ;;  %v6445_v51 = vor.u32 %v6444_v10, %v6440_v60  ;;  %v6157_v40 = vld [vmem:[#allocation2 + $0x98] sm:$0x1]  ;;  %12308 = vmatpush3.bf16.msra.mxu0 %v12812_v53 }
 0x31a   : > { %v11481_v61 = vpack.c.bf16 %v5651_v34, %v5651_v34  ;;  %v6441_v46 = vsel %vm13311_vm11, %v6436_v58, %v6440_v60  ;;  %v6959_v29 = vrot.slane %v6852_v24, 5  ;;  %v6957_v6 = vsel %vm13342_vm14, %v11190_v45, %v6956_v13  ;;  %v12764_v32 = vld [vmem:[#allocation2 + $0x18] sm:$0xff]   ;;  %v6342_v58 = vld [vmem:[#allocation2 + $0x28] sm:$0xf]  ;;  %12202 = vmatpush3.bf16.msra.mxu1 %v12813_v44 }
 0x31b   : > { %v5927_v3 = vshrl.u32 %v11478_v38, 16  ;;  %v5930_v35 = vshll.u32 %v11478_v38, 16  ;;  %v5617_v63 = vadd.f32 %v14865_v11, %v5578_v39  ;;  %v5622_v50 = vadd.f32 %v14865_v11, %v5583_v57  ;;  %v12765_v57 = vld [vmem:[#allocation2 + $0x30] sm:$0xff]   ;;  %v12818_v44 = vld [vmem:[#allocation10 + $0x1b0] sm:$0xff]  }
 0x31c   : > { %v5952_v18 = vshrl.u32 %v11481_v61, 16  ;;  %v5955_v52 = vshll.u32 %v11481_v61, 16  ;;  %v6446_v0 = vrot.slane %v6445_v51, 4  ;;  %v6958_v14 = vrot.slane %v6956_v13, 4  ;;  %v6150_v61 = vld [vmem:[#allocation2 + $0x8c] sm:$0x1] }
 0x31d   : > { %v15113_v21 = vrot.slane %v5927_v3, 7  ;;  %v5649_v30 = vmax.f32 %v5617_v63, 0.0  ;;  %v5654_v31 = vmax.f32 %v5622_v50, 0.0  ;;  %v5456_v11 = vadd.f32 %v15022_v19, %v14838_v47  ;;  %v6341_v19 = vld [vmem:[#allocation2 + $0x24] sm:$0xf] }
 0x31e   : > { %v5954_v42 = vrot.slane %v5952_v18, 7  ;;  %v6451_v56 = vsel %vm13311_vm11, %v6446_v0, %v6450_v22  ;;  %v5467_v23 = vadd.f32 %v15028_v36, %v14846_v2  ;;  %v6960_v47 = vsel %vm13342_vm14, %v6958_v14, %v6959_v29  ;;  %v12814_v2 = vld [vmem:[#allocation10 + $0x1e8] sm:$0xff]   ;;  %v6343_v3 = vld [vmem:[#allocation2 + $0x2c] sm:$0x1] }
 0x31f   : > { %v5932_v60 = vor.u32 %v5930_v35, %v15113_v21  ;;  %v5933_v26 = vrot.slane %v15113_v21, 4  ;;  %v11174_v8 = vcombine.low %v6441_v46, %v6451_v56  ;;  %v11479_v17 = vpack.c.bf16 %v5649_v30, %v5649_v30  ;;  %12309 = vmatprep.subr.bf16.mxu0 %v12814_v2  ;;  %v6167_v46 = vld [vmem:[#allocation2 + $0xa8] sm:$0xf]  ;;  %v15145_v0 = vld [vmem:[%s16193_s5] ss:$0 sm:$0xff] }
 0x320   : > { %v5957_v4 = vor.u32 %v5955_v52, %v5954_v42  ;;  %v5959_v59 = vrot.slane %v5954_v42, 4  ;;  %v11484_v5 = vpack.c.bf16 %v5654_v31, %v5654_v31  ;;  %v11206_v34 = vcombine.low %v6957_v6, %v6960_v47  ;;  %v12815_v21 = vld [vmem:[#allocation10 + $0x1a8] sm:$0xff]   ;;  %v12816_v42 = vld [vmem:[#allocation10 + $0x1f0] sm:$0xff]  }
 0x321   : > { %v6147_v36 = vsel %vm13318_vm12, %v5932_v60, %v6146_v37  ;;  %9788 = vmatprep.mubr.bf16.mxu1 %v11174_v8  ;;  %v5935_v24 = vshrl.u32 %v11479_v17, 16  ;;  %v5938_v45 = vshll.u32 %v11479_v17, 16  ;;  %v5584_v51 = vmul.f32 %v15136_v28, %v5467_v23  ;;  %v6853_v60 = vld [vmem:[#allocation2 + $0x24] sm:$0xe]  ;;  %12310 = vmatpush3.bf16.msra.mxu0 %v12815_v21 }
 0x322   : > { %6148 = vst [vmem:[#allocation2 + $0x84] sm:$0xf] %v6147_v36  ;;  %v5958_v10 = vsel %vm13330_vm13, %v5950_v54, %v5957_v4  ;;  %v6158_v22 = vsel %vm13250_vm3, %v5959_v59, %v6157_v40  ;;  %v5978_v38 = vshrl.u32 %v11484_v5, 16  ;;  %v5981_v39 = vshll.u32 %v11484_v5, 16  ;;  %9789 = vmatmul.mubr.bf16.gmra.mrb[136].mxu1 %v12764_v32  ;;  %9950 = vmatmul.mubr.bf16.gmra.mrb[168].mxu0 %v11206_v34  ;;  %v12819_v4 = vld [vmem:[#allocation10 + $0x1f8] sm:$0xff]  }
 0x323   : > { %6156 = vst [vmem:[#allocation2 + $0x94] sm:$0xf] %v5958_v10  ;;  %6159 = vst [vmem:[#allocation2 + $0x98] sm:$0x1] %v6158_v22  ;;  %v5937_v13 = vrot.slane %v5935_v24, 7  ;;  %v5581_v54 = vmul.f32 %v15136_v28, %v5456_v11  ;;  %v6453_v29 = vshrl.u32 %v6341_v19, 16  ;;  %9957 = vmatprep.mubr.bf16.mxu0 %v12765_v57  ;;  %v5623_v43 = vadd.f32 %v15145_v0, %v5584_v51 }
 0x324   : > { %v15140_v15 = vrot.slane %v5978_v38, 7  ;;  %v6456_v35 = vshll.u32 %v6341_v19, 16  ;;  %v6462_v63 = vshll.u32 %v6342_v58, 16  ;;  %v6466_v50 = vshrl.u32 %v6342_v58, 16  ;;  %12311 = vmatprep.subr.bf16.mxu0 %v12816_v42  ;;  %v6854_v19 = vld [vmem:[#allocation2 + $0x28] sm:$0xf] }
 0x325   : > { %v5940_v18 = vor.u32 %v5938_v45, %v5937_v13  ;;  %v5942_v52 = vrot.slane %v5937_v13, 4  ;;  %v5620_v6 = vadd.f32 %v15145_v0, %v5581_v54  ;;  %v6455_v14 = vrot.slane %v6453_v29, 4  ;;  %v6855_v45 = vld [vmem:[#allocation2 + $0x2c] sm:$0x1]  ;;  %12312 = vmatpush3.bf16.msra.mxu0 %v12818_v44  ;;  %v6160_v54 = vld [vmem:[#allocation2 + $0x9c] sm:$0xf] }
 0x326   : > { %v5983_v30 = vor.u32 %v5981_v39, %v15140_v15  ;;  %v5984_v31 = vrot.slane %v15140_v15, 4  ;;  %v6458_v37 = vrot.slane %v6456_v35, 5  ;;  %v5655_v53 = vmax.f32 %v5623_v43, 0.0  ;;  %v12820_v39 = vld [vmem:[#allocation10 + $0x1b8] sm:$0xff]   ;;  %12313 = vmatprep.subr.bf16.mxu0 %v12819_v4 }
 0x327   : > { %v5941_v56 = vsel %vm13330_vm13, %v5933_v26, %v5940_v18  ;;  %v6151_v11 = vsel %vm13250_vm3, %v5942_v52, %v6150_v61  ;;  %v5652_v23 = vmax.f32 %v5620_v6, 0.0  ;;  %v6464_v17 = vrot.slane %v6462_v63, 5  ;;  %v6171_v51 = vld [vmem:[#allocation2 + $0xb0] sm:$0x1] }
 0x328   : > { %6149 = vst [vmem:[#allocation2 + $0x88] sm:$0xf] %v5941_v56  ;;  %6152 = vst [vmem:[#allocation2 + $0x8c] sm:$0x1] %v6151_v11  ;;  %v6168_v40 = vsel %vm13318_vm12, %v5983_v30, %v6167_v46  ;;  %v6459_v8 = vor.u32 %v6458_v37, %v6455_v14  ;;  %v6468_v32 = vrot.slane %v6466_v50, 4  ;;  %v11485_v59 = vpack.c.bf16 %v5655_v53, %v5655_v53  ;;  %v12822_v50 = vld [vmem:[#allocation10 + $0x200] sm:$0xff]  }
 0x329   : > { %6169 = vst [vmem:[#allocation2 + $0xa8] sm:$0xf] %v6168_v40  ;;  %v11482_v26 = vpack.c.bf16 %v5652_v23, %v5652_v23  ;;  %v6472_v5 = vshll.u32 %v6343_v3, 16  ;;  %v5459_v47 = vadd.f32 %v15031_v9, %v14840_v12  ;;  %v5480_v24 = vadd.f32 %v15039_v7, %v14874_v49  ;;  %12314 = vmatpush3.bf16.msra.mxu0 %v12820_v39  ;;  %v6344_v42 = vld [vmem:[#allocation2 + $0x30] sm:$0xf]  ;;  %v12768_v53 = vld [vmem:[#allocation2 + $0x24] sm:$0xff]  }
 0x32a   : > { %v6460_v2 = vrot.slane %v6459_v8, 4  ;;  %v6469_v36 = vor.u32 %v6468_v32, %v6464_v17  ;;  %v11191_v34 = vrot.slane %v6853_v60, 9  ;;  %v5986_v22 = vshrl.u32 %v11485_v59, 16  ;;  %v6345_v56 = vld [vmem:[#allocation2 + $0x34] sm:$0xf]  ;;  %12483 = vmatprep.subr.bf16.mxu1 %v12822_v50 }
 0x32b   : > { %v5961_v58 = vshrl.u32 %v11482_v26, 16  ;;  %v5964_v10 = vshll.u32 %v11482_v26, 16  ;;  %v5989_v38 = vshll.u32 %v11485_v59, 16  ;;  %v6474_v61 = vrot.slane %v6472_v5, 5 }
 0x32c   : > { %v6465_v57 = vsel %vm13311_vm11, %v6460_v2, %v6464_v17  ;;  %v6470_v13 = vrot.slane %v6469_v36, 4  ;;  %v5582_v12 = vmul.f32 %v15136_v28, %v5459_v47  ;;  %v5988_v46 = vrot.slane %v5986_v22, 7  ;;  %v6346_v47 = vld [vmem:[#allocation2 + $0x38] sm:$0x1]  ;;  %v12769_v2 = vld [vmem:[#allocation2 + $0x3c] sm:$0xff]  }
 0x32d   : > { %v15164_v9 = vrot.slane %v5961_v58, 7  ;;  %v5587_v49 = vmul.f32 %v15136_v28, %v5480_v24  ;;  %v6963_v7 = vrot.slane %v6854_v19, 5  ;;  %v6966_v35 = vrot.slane %v6855_v45, 5  ;;  %v6181_v22 = vld [vmem:[#allocation2 + $0xc0] sm:$0xf] }
 0x32e   : > { %v6475_v29 = vsel %vm13311_vm11, %v6470_v13, %v6474_v61  ;;  %v5621_v3 = vadd.f32 %v15145_v0, %v5582_v12  ;;  %v5472_v63 = vadd.f32 %v15047_v55, %v14851_v16  ;;  %v5991_v6 = vor.u32 %v5989_v38, %v5988_v46 }
 0x32f   : > { %v5966_v18 = vor.u32 %v5964_v10, %v15164_v9  ;;  %v5967_v52 = vrot.slane %v15164_v9, 4  ;;  %v5993_v43 = vrot.slane %v5988_v46, 4  ;;  %v11175_v21 = vcombine.low %v6465_v57, %v6475_v29  ;;  %v6164_v10 = vld [vmem:[#allocation2 + $0xa4] sm:$0x1] }
 0x330   : > { %v5653_v30 = vmax.f32 %v5621_v3, 0.0  ;;  %v5626_v14 = vadd.f32 %v15145_v0, %v5587_v49  ;;  %v6964_v37 = vsel %vm13342_vm14, %v11191_v34, %v6963_v7  ;;  %v5992_v55 = vsel %vm13330_vm13, %v5984_v31, %v5991_v6  ;;  %v6856_v49 = vld [vmem:[#allocation2 + $0x30] sm:$0xe] }
 0x331   : > { %v6161_v16 = vsel %vm13318_vm12, %v5966_v18, %v6160_v54  ;;  %v6172_v11 = vsel %vm13250_vm3, %v5993_v43, %v6171_v51  ;;  %v6965_v23 = vrot.slane %v6963_v7, 4  ;;  %6170 = vst [vmem:[#allocation2 + $0xac] sm:$0xf] %v5992_v55  ;;  %9796 = vmatprep.mubr.bf16.mxu1 %v11175_v21  ;;  %v5585_v8 = vmul.f32 %v15136_v28, %v5472_v63  ;;  %v6857_v18 = vld [vmem:[#allocation2 + $0x34] sm:$0xf] }
 0x332   : > { %6162 = vst [vmem:[#allocation2 + $0x9c] sm:$0xf] %v6161_v16  ;;  %6173 = vst [vmem:[#allocation2 + $0xb0] sm:$0x1] %v6172_v11  ;;  %v11483_v60 = vpack.c.bf16 %v5653_v30, %v5653_v30  ;;  %v5658_v40 = vmax.f32 %v5626_v14, 0.0  ;;  %v5483_v17 = vadd.f32 %v15055_v62, %v14887_v20  ;;  %9797 = vmatmul.mubr.bf16.gmra.mrb[140].mxu1 %v12768_v53  ;;  %v6477_v31 = vshrl.u32 %v6344_v42, 16 }
 0x333   : > { %v6967_v15 = vsel %vm13342_vm14, %v6965_v23, %v6966_v35  ;;  %v6480_v32 = vshll.u32 %v6344_v42, 16  ;;  %v6486_v44 = vshll.u32 %v6345_v56, 16  ;;  %v5624_v19 = vadd.f32 %v15145_v0, %v5585_v8  ;;  %v6858_v14 = vld [vmem:[#allocation2 + $0x38] sm:$0x1]  ;;  %v6347_v55 = vld [vmem:[#allocation2 + $0x3c] sm:$0xf] }
 0x334   : > { %v5969_v4 = vshrl.u32 %v11483_v60, 16  ;;  %v5972_v26 = vshll.u32 %v11483_v60, 16  ;;  %v11488_v59 = vpack.c.bf16 %v5658_v40, %v5658_v40  ;;  %v11207_v5 = vcombine.low %v6964_v37, %v6967_v15  ;;  %v6174_v23 = vld [vmem:[#allocation2 + $0xb4] sm:$0xf]  ;;  %v6185_v8 = vld [vmem:[#allocation2 + $0xc8] sm:$0x1] }
 0x335   : > { %v5588_v36 = vmul.f32 %v15136_v28, %v5483_v17  ;;  %v6479_v24 = vrot.slane %v6477_v31, 4  ;;  %v6482_v45 = vrot.slane %v6480_v32, 5  ;;  %v6488_v58 = vrot.slane %v6486_v44, 5  ;;  %v6348_v44 = vld [vmem:[#allocation2 + $0x40] sm:$0xf] }
 0x336   : > { %v5971_v20 = vrot.slane %v5969_v4, 7  ;;  %v6012_v62 = vshrl.u32 %v11488_v59, 16  ;;  %v6015_v34 = vshll.u32 %v11488_v59, 16  ;;  %9958 = vmatmul.mubr.bf16.gmra.mrb[172].mxu0 %v11207_v5  ;;  %v5656_v38 = vmax.f32 %v5624_v19, 0.0  ;;  %v6349_v59 = vld [vmem:[#allocation2 + $0x44] sm:$0x1] }
 0x337   : > { %9965 = vmatprep.mubr.bf16.mxu0 %v12769_v2  ;;  %v5627_v39 = vadd.f32 %v15145_v0, %v5588_v36  ;;  %v6483_v57 = vor.u32 %v6482_v45, %v6479_v24  ;;  %v6490_v13 = vshrl.u32 %v6345_v56, 16  ;;  %v6496_v46 = vshll.u32 %v6346_v47, 16  ;;  %v16336_v56 = vld [vmem:[#allocation33_spill] sm:$0xff] }
 0x338   : > { %v5974_v61 = vor.u32 %v5972_v26, %v5971_v20  ;;  %v5976_v12 = vrot.slane %v5971_v20, 4  ;;  %v6014_v9 = vrot.slane %v6012_v62, 7  ;;  %v11486_v7 = vpack.c.bf16 %v5656_v38, %v5656_v38  ;;  %v12770_v38 = vld [vmem:[#allocation2 + $0x30] sm:$0xff]  }
 0x339   : > { %v5659_v54 = vmax.f32 %v5627_v39, 0.0  ;;  %v6484_v51 = vrot.slane %v6483_v57, 4  ;;  %v6492_v29 = vrot.slane %v6490_v13, 4  ;;  %v5475_v16 = vadd.f32 %v15059_v25, %v16336_v56 }
 0x33a   : > { %v5975_v3 = vsel %vm13330_vm13, %v5967_v52, %v5974_v61  ;;  %v6165_v35 = vsel %vm13250_vm3, %v5976_v12, %v6164_v10  ;;  %v6017_v63 = vor.u32 %v6015_v34, %v6014_v9  ;;  %v6018_v50 = vrot.slane %v6014_v9, 4  ;;  %v6860_v34 = vld [vmem:[#allocation2 + $0x40] sm:$0xf]  ;;  %v12771_v9 = vld [vmem:[#allocation2 + $0x48] sm:$0xff]  }
 0x33b   : > { %6163 = vst [vmem:[#allocation2 + $0xa0] sm:$0xf] %v5975_v3  ;;  %6166 = vst [vmem:[#allocation2 + $0xa4] sm:$0x1] %v6165_v35  ;;  %v5995_v6 = vshrl.u32 %v11486_v7, 16  ;;  %v5998_v43 = vshll.u32 %v11486_v7, 16  ;;  %v11489_v21 = vpack.c.bf16 %v5659_v54, %v5659_v54  ;;  %v6489_v30 = vsel %vm13311_vm11, %v6484_v51, %v6488_v58 }
 0x33c   : > { %v6182_v37 = vsel %vm13318_vm12, %v6017_v63, %v6181_v22  ;;  %v6493_v42 = vor.u32 %v6492_v29, %v6488_v58  ;;  %v6498_v52 = vrot.slane %v6496_v46, 5  ;;  %v11192_v40 = vrot.slane %v6856_v49, 9  ;;  %v6861_v58 = vld [vmem:[#allocation2 + $0x44] sm:$0x1]  ;;  %v6350_v54 = vld [vmem:[#allocation2 + $0x48] sm:$0xf] }
 0x33d   : > { %6183 = vst [vmem:[#allocation2 + $0xc0] sm:$0xf] %v6182_v37  ;;  %v15203_v11 = vrot.slane %v5995_v6, 7  ;;  %v6020_v53 = vshrl.u32 %v11489_v21, 16  ;;  %v6023_v60 = vshll.u32 %v11489_v21, 16  ;;  %v5586_v15 = vmul.f32 %v15136_v28, %v5475_v16 }
 0x33e   : > { %v6494_v17 = vrot.slane %v6493_v42, 4  ;;  %v6970_v31 = vrot.slane %v6857_v18, 5  ;;  %v6973_v32 = vrot.slane %v6858_v14, 5  ;;  %v6501_v5 = vshrl.u32 %v6347_v55, 16  ;;  %v6859_v28 = vld [vmem:[#allocation2 + $0x3c] sm:$0xe] }
 0x33f   : > { %v6000_v4 = vor.u32 %v5998_v43, %v15203_v11  ;;  %v6001_v26 = vrot.slane %v15203_v11, 4  ;;  %v6022_v25 = vrot.slane %v6020_v53, 7  ;;  %v5625_v19 = vadd.f32 %v15145_v0, %v5586_v15  ;;  %v6351_v63 = vld [vmem:[#allocation2 + $0x4c] sm:$0xf]  ;;  %v6178_v21 = vld [vmem:[#allocation2 + $0xbc] sm:$0x1] }
 0x340   : > { %v6499_v47 = vsel %vm13311_vm11, %v6494_v17, %v6498_v52  ;;  %v6971_v2 = vsel %vm13342_vm14, %v11192_v40, %v6970_v31  ;;  %v6972_v36 = vrot.slane %v6970_v31, 4  ;;  %v6503_v0 = vrot.slane %v6501_v5, 4  ;;  %v6352_v42 = vld [vmem:[#allocation2 + $0x50] sm:$0x1]  ;;  %v6862_v53 = vld [vmem:[#allocation2 + $0x48] sm:$0xe] }
 0x341   : > { %v6175_v24 = vsel %vm13318_vm12, %v6000_v4, %v6174_v23  ;;  %v6025_v45 = vor.u32 %v6023_v60, %v6022_v25  ;;  %v6027_v20 = vrot.slane %v6022_v25, 4  ;;  %v11176_v62 = vcombine.low %v6489_v30, %v6499_v47  ;;  %v6863_v15 = vld [vmem:[#allocation2 + $0x4c] sm:$0xf]  ;;  %v6864_v25 = vld [vmem:[#allocation2 + $0x50] sm:$0x1] }
 0x342   : > { %6176 = vst [vmem:[#allocation2 + $0xb4] sm:$0xf] %v6175_v24  ;;  %v5657_v10 = vmax.f32 %v5625_v19, 0.0  ;;  %v6974_v22 = vsel %vm13342_vm14, %v6972_v36, %v6973_v32  ;;  %v6504_v39 = vshll.u32 %v6347_v55, 16  ;;  %v6510_v61 = vshll.u32 %v6348_v44, 16 }
 0x343   : > { %v6026_v57 = vsel %vm13330_vm13, %v6018_v50, %v6025_v45  ;;  %v6186_v48 = vsel %vm13250_vm3, %v6027_v20, %v6185_v8  ;;  %9804 = vmatprep.mubr.bf16.mxu1 %v11176_v62  ;;  %v11208_v13 = vcombine.low %v6971_v2, %v6974_v22  ;;  %v6514_v49 = vshrl.u32 %v6348_v44, 16  ;;  %v12775_v45 = vld [vmem:[#allocation2 + $0x54] sm:$0xff]  }
 0x344   : > { %6184 = vst [vmem:[#allocation2 + $0xc4] sm:$0xf] %v6026_v57  ;;  %6187 = vst [vmem:[#allocation2 + $0xc8] sm:$0x1] %v6186_v48  ;;  %v11487_v12 = vpack.c.bf16 %v5657_v10, %v5657_v10  ;;  %9805 = vmatmul.mubr.bf16.gmra.mrb[144].mxu1 %v12770_v38  ;;  %v6506_v46 = vrot.slane %v6504_v39, 5  ;;  %v6520_v7 = vshll.u32 %v6349_v59, 16 }
 0x345   : > { %9966 = vmatmul.mubr.bf16.gmra.mrb[176].mxu0 %v11208_v13  ;;  %v6512_v51 = vrot.slane %v6510_v61, 5  ;;  %v11193_v29 = vrot.slane %v6859_v28, 9  ;;  %v6977_v3 = vrot.slane %v6860_v34, 5  ;;  %v6980_v35 = vrot.slane %v6861_v58, 5  ;;  %v6353_v59 = vld [vmem:[#allocation2 + $0x54] sm:$0xf] }
 0x346   : > { %v6003_v50 = vshrl.u32 %v11487_v12, 16  ;;  %v6006_v18 = vshll.u32 %v11487_v12, 16  ;;  %9973 = vmatprep.mubr.bf16.mxu0 %v12771_v9  ;;  %v6507_v6 = vor.u32 %v6506_v46, %v6503_v0  ;;  %v6516_v43 = vrot.slane %v6514_v49, 4  ;;  %v6354_v62 = vld [vmem:[#allocation2 + $0x58] sm:$0xf]  ;;  %v12774_v58 = vld [vmem:[#allocation2 + $0x3c] sm:$0xff]  }
 0x347   : > { %v6522_v30 = vrot.slane %v6520_v7, 5  ;;  %v6978_v14 = vsel %vm13342_vm14, %v11193_v29, %v6977_v3  ;;  %v6979_v37 = vrot.slane %v6977_v3, 4  ;;  %v6525_v52 = vshrl.u32 %v6350_v54, 16  ;;  %v6355_v38 = vld [vmem:[#allocation2 + $0x5c] sm:$0x1] }
 0x348   : > { %v6005_v56 = vrot.slane %v6003_v50, 7  ;;  %v6508_v16 = vrot.slane %v6507_v6, 4  ;;  %v6517_v55 = vor.u32 %v6516_v43, %v6512_v51  ;;  %v6528_v23 = vshll.u32 %v6350_v54, 16  ;;  %v6865_v39 = vld [vmem:[#allocation2 + $0x54] sm:$0xe] }
 0x349   : > { %v6981_v60 = vsel %vm13342_vm14, %v6979_v37, %v6980_v35  ;;  %v6527_v40 = vrot.slane %v6525_v52, 4  ;;  %v6534_v8 = vshll.u32 %v6351_v63, 16  ;;  %v6538_v17 = vshrl.u32 %v6351_v63, 16  ;;  %v6866_v57 = vld [vmem:[#allocation2 + $0x58] sm:$0xf] }
 0x34a   : > { %v6008_v31 = vor.u32 %v6006_v18, %v6005_v56  ;;  %v6010_v32 = vrot.slane %v6005_v56, 4  ;;  %v6513_v44 = vsel %vm13311_vm11, %v6508_v16, %v6512_v51  ;;  %v6518_v4 = vrot.slane %v6517_v55, 4  ;;  %v6867_v9 = vld [vmem:[#allocation2 + $0x5c] sm:$0x1]  ;;  %v6356_v63 = vld [vmem:[#allocation2 + $0x60] sm:$0xf] }
 0x34b   : > { %v11209_v5 = vcombine.low %v6978_v14, %v6981_v60  ;;  %v6530_v47 = vrot.slane %v6528_v23, 5  ;;  %v6536_v19 = vrot.slane %v6534_v8, 5  ;;  %v6540_v2 = vrot.slane %v6538_v17, 4  ;;  %v6358_v52 = vld [vmem:[#allocation2 + $0x68] sm:$0x1]  ;;  %v12777_v56 = vld [vmem:[#allocation2 + $0x60] sm:$0xff]  }
 0x34c   : > { %v6009_v36 = vsel %vm13330_vm13, %v6001_v26, %v6008_v31  ;;  %v6179_v28 = vsel %vm13250_vm3, %v6010_v32, %v6178_v21  ;;  %v6523_v24 = vsel %vm13311_vm11, %v6518_v4, %v6522_v30  ;;  %v6544_v20 = vshll.u32 %v6352_v42, 16  ;;  %v6357_v42 = vld [vmem:[#allocation2 + $0x64] sm:$0xf]  ;;  %v12776_v60 = vld [vmem:[#allocation2 + $0x48] sm:$0xff]   ;;  %v6868_v31 = vld [vmem:[#allocation2 + $0x60] sm:$0xe] }
 0x34d   : > { %6177 = vst [vmem:[#allocation2 + $0xb8] sm:$0xf] %v6009_v36  ;;  %6180 = vst [vmem:[#allocation2 + $0xbc] sm:$0x1] %v6179_v28  ;;  %v11177_v34 = vcombine.low %v6513_v44, %v6523_v24  ;;  %9974 = vmatmul.mubr.bf16.gmra.mrb[180].mxu0 %v11209_v5  ;;  %v6531_v10 = vor.u32 %v6530_v47, %v6527_v40  ;;  %v6541_v22 = vor.u32 %v6540_v2, %v6536_v19  ;;  %v6870_v36 = vld [vmem:[#allocation2 + $0x68] sm:$0x1] }
 0x34e   : > { %v11194_v11 = vrot.slane %v6862_v53, 9  ;;  %9981 = vmatprep.mubr.bf16.mxu0 %v12775_v45  ;;  %v6546_v41 = vrot.slane %v6544_v20, 5  ;;  %v6984_v26 = vrot.slane %v6863_v15, 5  ;;  %v6987_v33 = vrot.slane %v6864_v25, 5  ;;  %v6359_v28 = vld [vmem:[#allocation2 + $0x6c] sm:$0xf] }
 0x34f   : > { %v6549_v0 = vshrl.u32 %v6353_v59, 16  ;;  %9812 = vmatprep.mubr.bf16.mxu1 %v11177_v34  ;;  %v6532_v48 = vrot.slane %v6531_v10, 4  ;;  %v6542_v13 = vrot.slane %v6541_v22, 4  ;;  %v6552_v61 = vshll.u32 %v6353_v59, 16  ;;  %v6869_v59 = vld [vmem:[#allocation2 + $0x64] sm:$0xf] }
 0x350   : > { %v6558_v12 = vshll.u32 %v6354_v62, 16  ;;  %9813 = vmatmul.mubr.bf16.gmra.mrb[148].mxu1 %v12774_v58  ;;  %v6985_v46 = vsel %vm13342_vm14, %v11194_v11, %v6984_v26  ;;  %v6986_v49 = vrot.slane %v6984_v26, 4  ;;  %v6562_v54 = vshrl.u32 %v6354_v62, 16  ;;  %v6360_v34 = vld [vmem:[#allocation2 + $0x70] sm:$0xf] }
 0x351   : > { %v6551_v7 = vrot.slane %v6549_v0, 4  ;;  %v6537_v51 = vsel %vm13311_vm11, %v6532_v48, %v6536_v19  ;;  %v6547_v29 = vsel %vm13311_vm11, %v6542_v13, %v6546_v41  ;;  %v6554_v3 = vrot.slane %v6552_v61, 5 }
 0x352   : > { %v6560_v35 = vrot.slane %v6558_v12, 5  ;;  %v11178_v50 = vcombine.low %v6537_v51, %v6547_v29  ;;  %v6988_v18 = vsel %vm13342_vm14, %v6986_v49, %v6987_v33  ;;  %v6564_v6 = vrot.slane %v6562_v54, 4  ;;  %v6872_v12 = vld [vmem:[#allocation2 + $0x70] sm:$0xf] }
 0x353   : > { %v6568_v43 = vshll.u32 %v6355_v38, 16  ;;  %v11210_v21 = vcombine.low %v6985_v46, %v6988_v18  ;;  %v6555_v30 = vor.u32 %v6554_v3, %v6551_v7  ;;  %v11195_v14 = vrot.slane %v6865_v39, 9  ;;  %v6361_v38 = vld [vmem:[#allocation2 + $0x74] sm:$0x1]  ;;  %v6871_v39 = vld [vmem:[#allocation2 + $0x6c] sm:$0xe] }
 0x354   : > { %v6991_v37 = vrot.slane %v6866_v57, 5  ;;  %9820 = vmatprep.mubr.bf16.mxu1 %v11178_v50  ;;  %v6565_v16 = vor.u32 %v6564_v6, %v6560_v35  ;;  %v6994_v23 = vrot.slane %v6867_v9, 5  ;;  %v6573_v53 = vshrl.u32 %v6356_v63, 16  ;;  %v6873_v9 = vld [vmem:[#allocation2 + $0x74] sm:$0x1]  ;;  %v12781_v46 = vld [vmem:[#allocation2 + $0x6c] sm:$0xff]  }
 0x355   : > { %v6570_v55 = vrot.slane %v6568_v43, 5  ;;  %9982 = vmatmul.mubr.bf16.gmra.mrb[184].mxu0 %v11210_v21  ;;  %v6556_v40 = vrot.slane %v6555_v30, 4  ;;  %v6576_v15 = vshll.u32 %v6356_v63, 16  ;;  %v6582_v4 = vshll.u32 %v6357_v42, 16  ;;  %v6362_v50 = vld [vmem:[#allocation2 + $0x78] sm:$0xf] }
 0x356   : > { %v6992_v8 = vsel %vm13342_vm14, %v11195_v14, %v6991_v37  ;;  %v6993_v17 = vrot.slane %v6991_v37, 4  ;;  %9989 = vmatprep.mubr.bf16.mxu0 %v12777_v56  ;;  %v6566_v32 = vrot.slane %v6565_v16, 4  ;;  %v6575_v44 = vrot.slane %v6573_v53, 4  ;;  %v12780_v18 = vld [vmem:[#allocation2 + $0x54] sm:$0xff]   ;;  %v6363_v14 = vld [vmem:[#allocation2 + $0x7c] sm:$0xf] }
 0x357   : > { %v6586_v25 = vshrl.u32 %v6357_v42, 16  ;;  %v6561_v5 = vsel %vm13311_vm11, %v6556_v40, %v6560_v35  ;;  %v6578_v19 = vrot.slane %v6576_v15, 5  ;;  %v6592_v2 = vshll.u32 %v6358_v52, 16  ;;  %v6364_v16 = vld [vmem:[#allocation2 + $0x80] sm:$0x1] }
 0x358   : > { %v6995_v47 = vsel %vm13342_vm14, %v6993_v17, %v6994_v23  ;;  %9821 = vmatmul.mubr.bf16.gmra.mrb[152].mxu1 %v12776_v60  ;;  %v6571_v24 = vsel %vm13311_vm11, %v6566_v32, %v6570_v55  ;;  %v6584_v20 = vrot.slane %v6582_v4, 5  ;;  %v11196_v11 = vrot.slane %v6868_v31, 9  ;;  %v6874_v40 = vld [vmem:[#allocation2 + $0x78] sm:$0xe] }
 0x359   : > { %v11211_v45 = vcombine.low %v6992_v8, %v6995_v47  ;;  %v6588_v62 = vrot.slane %v6586_v25, 4  ;;  %v11179_v58 = vcombine.low %v6561_v5, %v6571_v24  ;;  %v6579_v10 = vor.u32 %v6578_v19, %v6575_v44  ;;  %v6875_v8 = vld [vmem:[#allocation2 + $0x7c] sm:$0xf]  ;;  %v6876_v44 = vld [vmem:[#allocation2 + $0x80] sm:$0x1] }
 0x35a   : > { %v6594_v22 = vrot.slane %v6592_v2, 5  ;;  %v6998_v26 = vrot.slane %v6869_v59, 5  ;;  %v7001_v33 = vrot.slane %v6870_v36, 5  ;;  %v6597_v0 = vshrl.u32 %v6359_v28, 16  ;;  %v6365_v47 = vld [vmem:[#allocation2 + $0x84] sm:$0xf] }
 0x35b   : > { %v6589_v41 = vor.u32 %v6588_v62, %v6584_v20  ;;  %9828 = vmatprep.mubr.bf16.mxu1 %v11179_v58  ;;  %v6580_v57 = vrot.slane %v6579_v10, 4  ;;  %v6600_v48 = vshll.u32 %v6359_v28, 16  ;;  %v6606_v13 = vshll.u32 %v6360_v34, 16  ;;  %v12785_v24 = vld [vmem:[#allocation2 + $0x78] sm:$0xff]  }
 0x35c   : > { %v6610_v61 = vshrl.u32 %v6360_v34, 16  ;;  %v6999_v7 = vsel %vm13342_vm14, %v11196_v11, %v6998_v26  ;;  %v7000_v54 = vrot.slane %v6998_v26, 4  ;;  %v6599_v51 = vrot.slane %v6597_v0, 4 }
 0x35d   : > { %v6590_v49 = vrot.slane %v6589_v41, 4  ;;  %9990 = vmatmul.mubr.bf16.gmra.mrb[188].mxu0 %v11211_v45  ;;  %v6585_v29 = vsel %vm13311_vm11, %v6580_v57, %v6584_v20  ;;  %v6602_v3 = vrot.slane %v6600_v48, 5  ;;  %v6608_v35 = vrot.slane %v6606_v13, 5  ;;  %v12784_v41 = vld [vmem:[#allocation2 + $0x60] sm:$0xff]  }
 0x35e   : > { %v6612_v63 = vrot.slane %v6610_v61, 4  ;;  %9997 = vmatprep.mubr.bf16.mxu0 %v12781_v46  ;;  %v7002_v43 = vsel %vm13342_vm14, %v7000_v54, %v7001_v33  ;;  %v6616_v21 = vshll.u32 %v6361_v38, 16  ;;  %v11197_v30 = vrot.slane %v6871_v39, 9  ;;  %v6366_v38 = vld [vmem:[#allocation2 + $0x88] sm:$0xf] }
 0x35f   : > { %v6595_v6 = vsel %vm13311_vm11, %v6590_v49, %v6594_v22  ;;  %v11212_v42 = vcombine.low %v6999_v7, %v7002_v43  ;;  %v6603_v52 = vor.u32 %v6602_v3, %v6599_v51  ;;  %v7005_v23 = vrot.slane %v6872_v12, 5  ;;  %v6367_v39 = vld [vmem:[#allocation2 + $0x8c] sm:$0x1]  ;;  %v6368_v46 = vld [vmem:[#allocation2 + $0x90] sm:$0xf] }
 0x360   : > { %v11180_v37 = vcombine.low %v6585_v29, %v6595_v6  ;;  %v6613_v56 = vor.u32 %v6612_v63, %v6608_v35  ;;  %9829 = vmatmul.mubr.bf16.gmra.mrb[156].mxu1 %v12780_v18  ;;  %v6618_v55 = vrot.slane %v6616_v21, 5  ;;  %v7008_v53 = vrot.slane %v6873_v9, 5  ;;  %v6877_v9 = vld [vmem:[#allocation2 + $0x84] sm:$0xe]  ;;  %v6369_v29 = vld [vmem:[#allocation2 + $0x94] sm:$0xf] }
 0x361   : > { %v6621_v60 = vshrl.u32 %v6362_v50, 16  ;;  %v6604_v17 = vrot.slane %v6603_v52, 4  ;;  %v6624_v31 = vshll.u32 %v6362_v50, 16  ;;  %v6630_v32 = vshll.u32 %v6363_v14, 16  ;;  %v6878_v18 = vld [vmem:[#allocation2 + $0x88] sm:$0xf] }
 0x362   : > { %9836 = vmatprep.mubr.bf16.mxu1 %v11180_v37  ;;  %v6614_v15 = vrot.slane %v6613_v56, 4  ;;  %v7006_v4 = vsel %vm13342_vm14, %v11197_v30, %v7005_v23  ;;  %v7007_v25 = vrot.slane %v7005_v23, 4  ;;  %v6634_v5 = vshrl.u32 %v6363_v14, 16  ;;  %v6879_v6 = vld [vmem:[#allocation2 + $0x8c] sm:$0x1] }
 0x363   : > { %v6623_v59 = vrot.slane %v6621_v60, 4  ;;  %v6609_v19 = vsel %vm13311_vm11, %v6604_v17, %v6608_v35  ;;  %v6626_v36 = vrot.slane %v6624_v31, 5  ;;  %v6632_v28 = vrot.slane %v6630_v32, 5 }
 0x364   : > { %v6619_v2 = vsel %vm13311_vm11, %v6614_v15, %v6618_v55  ;;  %v7009_v20 = vsel %vm13342_vm14, %v7007_v25, %v7008_v53  ;;  %v6636_v62 = vrot.slane %v6634_v5, 4  ;;  %v6640_v34 = vshll.u32 %v6364_v16, 16  ;;  %v6880_v16 = vld [vmem:[#allocation2 + $0x90] sm:$0xe]  ;;  %v12789_v55 = vld [vmem:[#allocation2 + $0x84] sm:$0xff]  }
 0x365   : > { %v11181_v45 = vcombine.low %v6609_v19, %v6619_v2  ;;  %9998 = vmatmul.mubr.bf16.gmra.mrb[192].mxu0 %v11212_v42  ;;  %v11213_v58 = vcombine.low %v7006_v4, %v7009_v20  ;;  %v6627_v10 = vor.u32 %v6626_v36, %v6623_v59  ;;  %v11198_v22 = vrot.slane %v6874_v40, 9  ;;  %v6370_v40 = vld [vmem:[#allocation2 + $0x98] sm:$0x1]  ;;  %v12788_v4 = vld [vmem:[#allocation2 + $0x6c] sm:$0xff]  }
 0x366   : > { %v7012_v11 = vrot.slane %v6875_v8, 5  ;;  %10005 = vmatprep.mubr.bf16.mxu0 %v12785_v24  ;;  %v6637_v26 = vor.u32 %v6636_v62, %v6632_v28  ;;  %v6642_v33 = vrot.slane %v6640_v34, 5  ;;  %v7015_v0 = vrot.slane %v6876_v44, 5  ;;  %v6881_v44 = vld [vmem:[#allocation2 + $0x94] sm:$0xf] }
 0x367   : > { %v6645_v57 = vshrl.u32 %v6365_v47, 16  ;;  %v6628_v48 = vrot.slane %v6627_v10, 4  ;;  %v6648_v12 = vshll.u32 %v6365_v47, 16  ;;  %v6654_v54 = vshll.u32 %v6366_v38, 16  ;;  %v6882_v19 = vld [vmem:[#allocation2 + $0x98] sm:$0x1] }
 0x368   : > { %v15269_v13 = vsel %vm13342_vm14, %v11198_v22, %v7012_v11  ;;  %v7014_v61 = vrot.slane %v7012_v11, 4  ;;  %9837 = vmatmul.mubr.bf16.gmra.mrb[160].mxu1 %v12784_v41  ;;  %v6638_v49 = vrot.slane %v6637_v26, 4  ;;  %v6658_v51 = vshrl.u32 %v6366_v38, 16  ;;  %v6372_v10 = vld [vmem:[#allocation2 + $0xa0] sm:$0xf] }
 0x369   : > { %v6647_v7 = vrot.slane %v6645_v57, 4  ;;  %9844 = vmatprep.mubr.bf16.mxu1 %v11181_v45  ;;  %v6633_v3 = vsel %vm13311_vm11, %v6628_v48, %v6632_v28  ;;  %v6650_v63 = vrot.slane %v6648_v12, 5  ;;  %v6664_v50 = vshll.u32 %v6367_v39, 16  ;;  %v6371_v45 = vld [vmem:[#allocation2 + $0x9c] sm:$0xf] }
 0x36a   : > { %v15275_v35 = vsel %vm13342_vm14, %v7014_v61, %v7015_v0  ;;  %v6643_v43 = vsel %vm13311_vm11, %v6638_v49, %v6642_v33  ;;  %v6656_v30 = vrot.slane %v6654_v54, 5  ;;  %v6660_v14 = vrot.slane %v6658_v51, 4  ;;  %v6883_v57 = vld [vmem:[#allocation2 + $0x9c] sm:$0xe]  ;;  %v6373_v61 = vld [vmem:[#allocation2 + $0xa4] sm:$0x1] }
 0x36b   : > { %v11214_v21 = vcombine.low %v15269_v13, %v15275_v35  ;;  %v11182_v37 = vcombine.low %v6633_v3, %v6643_v43  ;;  %v6651_v42 = vor.u32 %v6650_v63, %v6647_v7  ;;  %v6666_v52 = vrot.slane %v6664_v50, 5  ;;  %v12792_v43 = vld [vmem:[#allocation2 + $0x78] sm:$0xff]  }
 0x36c   : > { %v11199_v56 = vrot.slane %v6877_v9, 9  ;;  %v6661_v23 = vor.u32 %v6660_v14, %v6656_v30  ;;  %v7019_v53 = vrot.slane %v6878_v18, 5  ;;  %v7022_v60 = vrot.slane %v6879_v6, 5  ;;  %v6885_v18 = vld [vmem:[#allocation2 + $0xa4] sm:$0x1] }
 0x36d   : > { %v6669_v8 = vshrl.u32 %v6368_v46, 16  ;;  %10006 = vmatmul.mubr.bf16.gmra.mrb[196].mxu0 %v11213_v58  ;;  %v6652_v17 = vrot.slane %v6651_v42, 4  ;;  %v6672_v15 = vshll.u32 %v6368_v46, 16  ;;  %v6678_v31 = vshll.u32 %v6369_v29, 16  ;;  %v12793_v46 = vld [vmem:[#allocation2 + $0x90] sm:$0xff]  }
 0x36e   : > { %v6682_v32 = vshrl.u32 %v6369_v29, 16  ;;  %10013 = vmatprep.mubr.bf16.mxu0 %v12789_v55  ;;  %v6662_v25 = vrot.slane %v6661_v23, 4  ;;  %v15283_v59 = vsel %vm13342_vm14, %v11199_v56, %v7019_v53  ;;  %v7021_v5 = vrot.slane %v7019_v53, 4  ;;  %v6884_v29 = vld [vmem:[#allocation2 + $0xa0] sm:$0xf] }
 0x36f   : > { %v6671_v47 = vrot.slane %v6669_v8, 4  ;;  %v6657_v2 = vsel %vm13311_vm11, %v6652_v17, %v6656_v30  ;;  %v6674_v36 = vrot.slane %v6672_v15, 5  ;;  %v6680_v28 = vrot.slane %v6678_v31, 5  ;;  %v6374_v6 = vld [vmem:[#allocation2 + $0xa8] sm:$0xf] }
 0x370   : > { %v6684_v24 = vrot.slane %v6682_v32, 4  ;;  %9845 = vmatmul.mubr.bf16.gmra.mrb[164].mxu1 %v12788_v4  ;;  %v6667_v20 = vsel %vm13311_vm11, %v6662_v25, %v6666_v52  ;;  %v15291_v62 = vsel %vm13342_vm14, %v7021_v5, %v7022_v60  ;;  %v6688_v34 = vshll.u32 %v6370_v40, 16  ;;  %v6375_v55 = vld [vmem:[#allocation2 + $0xac] sm:$0xf]  ;;  %v6376_v23 = vld [vmem:[#allocation2 + $0xb0] sm:$0x1] }
 0x371   : > { %v11200_v58 = vrot.slane %v6880_v16, 9  ;;  %9852 = vmatprep.mubr.bf16.mxu1 %v11182_v37  ;;  %v11183_v22 = vcombine.low %v6657_v2, %v6667_v20  ;;  %v11215_v11 = vcombine.low %v15283_v59, %v15291_v62  ;;  %v6675_v38 = vor.u32 %v6674_v36, %v6671_v47  ;;  %v6886_v17 = vld [vmem:[#allocation2 + $0xa8] sm:$0xe]  ;;  %v6377_v20 = vld [vmem:[#allocation2 + $0xb4] sm:$0xf] }
 0x372   : > { %v6685_v41 = vor.u32 %v6684_v24, %v6680_v28  ;;  %v6690_v26 = vrot.slane %v6688_v34, 5  ;;  %v7026_v33 = vrot.slane %v6881_v44, 5  ;;  %v7029_v0 = vrot.slane %v6882_v19, 5  ;;  %v6887_v19 = vld [vmem:[#allocation2 + $0xac] sm:$0xf]  ;;  %v12797_v34 = vld [vmem:[#allocation2 + $0x9c] sm:$0xff]  }
 0x373   : > { %v6693_v39 = vshrl.u32 %v6371_v45, 16  ;;  %v6676_v48 = vrot.slane %v6675_v38, 4  ;;  %v6696_v12 = vshll.u32 %v6371_v45, 16  ;;  %v6702_v9 = vshll.u32 %v6372_v10, 16  ;;  %v6888_v45 = vld [vmem:[#allocation2 + $0xb0] sm:$0x1] }
 0x374   : > { %v6686_v13 = vrot.slane %v6685_v41, 4  ;;  %v15297_v49 = vsel %vm13342_vm14, %v11200_v58, %v7026_v33  ;;  %v7028_v7 = vrot.slane %v7026_v33, 4  ;;  %v6706_v51 = vshrl.u32 %v6372_v10, 16  ;;  %v6378_v41 = vld [vmem:[#allocation2 + $0xb8] sm:$0xf] }
 0x375   : > { %v6695_v54 = vrot.slane %v6693_v39, 4  ;;  %10014 = vmatmul.mubr.bf16.gmra.mrb[200].mxu0 %v11214_v21  ;;  %v6681_v3 = vsel %vm13311_vm11, %v6676_v48, %v6680_v28  ;;  %v6698_v63 = vrot.slane %v6696_v12, 5  ;;  %v6704_v50 = vrot.slane %v6702_v9, 5  ;;  %v12796_v48 = vld [vmem:[#allocation2 + $0x84] sm:$0xff]   ;;  %v6379_v9 = vld [vmem:[#allocation2 + $0xbc] sm:$0x1] }
 0x376   : > { %v6691_v35 = vsel %vm13311_vm11, %v6686_v13, %v6690_v26  ;;  %10021 = vmatprep.mubr.bf16.mxu0 %v12793_v46  ;;  %v15305_v14 = vsel %vm13342_vm14, %v7028_v7, %v7029_v0  ;;  %v6708_v37 = vrot.slane %v6706_v51, 4  ;;  %v6712_v42 = vshll.u32 %v6373_v61, 16  ;;  %v6891_v59 = vld [vmem:[#allocation2 + $0xbc] sm:$0x1]  ;;  %v8220_v62 = vld [vmem:[#allocation2 + $0x18] sm:$0xf] }
 0x377   : > { %v11184_v30 = vcombine.low %v6681_v3, %v6691_v35  ;;  %v11216_v21 = vcombine.low %v15297_v49, %v15305_v14  ;;  %v6699_v52 = vor.u32 %v6698_v63, %v6695_v54  ;;  %v11201_v56 = vrot.slane %v6883_v57, 9  ;;  %v6889_v57 = vld [vmem:[#allocation2 + $0xb4] sm:$0xe]  ;;  %v6890_v3 = vld [vmem:[#allocation2 + $0xb8] sm:$0xf] }
 0x378   : > { %v7033_v16 = vrot.slane %v6884_v29, 5  ;;  %9853 = vmatmul.mubr.bf16.gmra.mrb[168].mxu1 %v12792_v43  ;;  %v6709_v53 = vor.u32 %v6708_v37, %v6704_v50  ;;  %v6714_v60 = vrot.slane %v6712_v42, 5  ;;  %v7036_v40 = vrot.slane %v6885_v18, 5 }
 0x379   : > { %v6717_v8 = vshrl.u32 %v6374_v6, 16  ;;  %9860 = vmatprep.mubr.bf16.mxu1 %v11183_v22  ;;  %v6700_v15 = vrot.slane %v6699_v52, 4  ;;  %v6720_v44 = vshll.u32 %v6374_v6, 16  ;;  %v6726_v5 = vshll.u32 %v6375_v55, 16 }
 0x37a   : > { %v15311_v31 = vsel %vm13342_vm14, %v11201_v56, %v7033_v16  ;;  %v7035_v32 = vrot.slane %v7033_v16, 4  ;;  %v6710_v4 = vrot.slane %v6709_v53, 4  ;;  %v6730_v47 = vshrl.u32 %v6375_v55, 16  ;;  %v8221_v55 = vld [vmem:[#allocation2 + $0x1c] sm:$0xf] }
 0x37b   : > { %v6719_v25 = vrot.slane %v6717_v8, 4  ;;  %v6705_v2 = vsel %vm13311_vm11, %v6700_v15, %v6704_v50  ;;  %v6722_v28 = vrot.slane %v6720_v44, 5  ;;  %v6736_v24 = vshll.u32 %v6376_v23, 16  ;;  %v12801_v8 = vld [vmem:[#allocation2 + $0xa8] sm:$0xff]  }
 0x37c   : > { %v15317_v36 = vsel %vm13342_vm14, %v7035_v32, %v7036_v40  ;;  %v6715_v58 = vsel %vm13311_vm11, %v6710_v4, %v6714_v60  ;;  %v6728_v22 = vrot.slane %v6726_v5, 5  ;;  %v6732_v38 = vrot.slane %v6730_v47, 4  ;;  %v8222_v40 = vld [vmem:[#allocation2 + $0x20] sm:$0x1]  ;;  %v7788_v4 = vld [vmem:[#allocation2 + $0xc] sm:$0xe] }
 0x37d   : > { %v11217_v10 = vcombine.low %v15311_v31, %v15317_v36  ;;  %10022 = vmatmul.mubr.bf16.gmra.mrb[204].mxu0 %v11215_v11  ;;  %v15326_v26 = vcombine.low %v6705_v2, %v6715_v58  ;;  %v6723_v33 = vor.u32 %v6722_v28, %v6719_v25  ;;  %v6738_v0 = vrot.slane %v6736_v24, 5  ;;  %v7789_v2 = vld [vmem:[#allocation2 + $0x10] sm:$0xf]  ;;  %v7790_v58 = vld [vmem:[#allocation2 + $0x14] sm:$0x1] }
 0x37e   : > { %v11202_v39 = vrot.slane %v6886_v17, 9  ;;  %10029 = vmatprep.mubr.bf16.mxu0 %v12797_v34  ;;  %v6733_v13 = vor.u32 %v6732_v38, %v6728_v22  ;;  %v7040_v61 = vrot.slane %v6887_v19, 5  ;;  %v7043_v12 = vrot.slane %v6888_v45, 5  ;;  %v12800_v28 = vld [vmem:[#allocation2 + $0x90] sm:$0xff]   ;;  %v7276_v38 = vld [vmem:[#allocation2 + $0xc] sm:$0xf] }
 0x37f   : > { %v6741_v46 = vshrl.u32 %v6377_v20, 16  ;;  %v6724_v7 = vrot.slane %v6723_v33, 4  ;;  %v6744_v54 = vshll.u32 %v6377_v20, 16  ;;  %v6750_v51 = vshll.u32 %v6378_v41, 16 }
 0x380   : > { %v6754_v29 = vshrl.u32 %v6378_v41, 16  ;;  %9861 = vmatmul.mubr.bf16.gmra.mrb[172].mxu1 %v12796_v48  ;;  %v6734_v11 = vrot.slane %v6733_v13, 4  ;;  %v15330_v35 = vsel %vm13342_vm14, %v11202_v39, %v7040_v61  ;;  %v7042_v63 = vrot.slane %v7040_v61, 4 }
 0x381   : > { %v6743_v50 = vrot.slane %v6741_v46, 4  ;;  %9868 = vmatprep.mubr.bf16.mxu1 %v11184_v30  ;;  %v6729_v18 = vsel %vm13311_vm11, %v6724_v7, %v6728_v22  ;;  %v6746_v6 = vrot.slane %v6744_v54, 5  ;;  %v6752_v43 = vrot.slane %v6750_v51, 5  ;;  %v7278_v54 = vld [vmem:[#allocation2 + $0x14] sm:$0x1] }
 0x382   : > { %v6756_v37 = vrot.slane %v6754_v29, 4  ;;  %v6739_v42 = vsel %vm13311_vm11, %v6734_v11, %v6738_v0  ;;  %v15338_v52 = vsel %vm13342_vm14, %v7042_v63, %v7043_v12  ;;  %v6760_v56 = vshll.u32 %v6379_v9, 16  ;;  %v7277_v12 = vld [vmem:[#allocation2 + $0x10] sm:$0xf]  ;;  %v15364_v29 = vpop.f32.mrb[128].mxu1 }
 0x383   : > { %v11203_v16 = vrot.slane %v6889_v57, 9  ;;  %v15340_v23 = vcombine.low %v6729_v18, %v6739_v42  ;;  %v11218_v30 = vcombine.low %v15330_v35, %v15338_v52  ;;  %v6747_v53 = vor.u32 %v6746_v6, %v6743_v50  ;;  %v8223_v11 = vld [vmem:[#allocation2 + $0x24] sm:$0xf]  ;;  %v15370_v63 = vpop.f32.mrb[129].mxu1  ;;  %v12804_v50 = vld [vmem:[#allocation2 + $0x9c] sm:$0xff]   ;;  %v12805_v18 = vld [vmem:[#allocation2 + $0xb4] sm:$0xff]  }
 0x384   : > { %v6757_v60 = vor.u32 %v6756_v37, %v6752_v43  ;;  %v6762_v17 = vrot.slane %v6760_v56, 5  ;;  %v7047_v15 = vrot.slane %v6890_v3, 5  ;;  %v7050_v32 = vrot.slane %v6891_v59, 5 }
 0x385   : > { %v8269_v44 = vshrl.u32 %v8220_v62, 16  ;;  %10030 = vmatmul.mubr.bf16.gmra.mrb[208].mxu0 %v11216_v21  ;;  %v6748_v25 = vrot.slane %v6747_v53, 4  ;;  %v8272_v47 = vshll.u32 %v8220_v62, 16  ;;  %v8278_v19 = vshll.u32 %v8221_v55, 16 }
 0x386   : > { %v6758_v5 = vrot.slane %v6757_v60, 4  ;;  %10037 = vmatprep.mubr.bf16.mxu0 %v12801_v8  ;;  %v15349_v24 = vsel %vm13342_vm14, %v11203_v16, %v7047_v15  ;;  %v7049_v45 = vrot.slane %v7047_v15, 4  ;;  %v8282_v34 = vshrl.u32 %v8221_v55, 16  ;;  %v8224_v60 = vld [vmem:[#allocation2 + $0x28] sm:$0xf] }
 0x387   : > { %v8271_v20 = vrot.slane %v8269_v44, 4  ;;  %v6753_v22 = vsel %vm13311_vm11, %v6748_v25, %v6752_v43  ;;  %v8274_v14 = vrot.slane %v8272_v47, 5  ;;  %v8280_v21 = vrot.slane %v8278_v19, 5  ;;  %v7792_v25 = vld [vmem:[#allocation2 + $0x1c] sm:$0xf] }
 0x388   : > { %v6763_v49 = vsel %vm13311_vm11, %v6758_v5, %v6762_v17  ;;  %9869 = vmatmul.mubr.bf16.gmra.mrb[176].mxu1 %v12800_v28  ;;  %v15359_v33 = vsel %vm13342_vm14, %v7049_v45, %v7050_v32  ;;  %v8284_v0 = vrot.slane %v8282_v34, 4  ;;  %v8288_v39 = vshll.u32 %v8222_v40, 16  ;;  %v8225_v40 = vld [vmem:[#allocation2 + $0x2c] sm:$0x1]  ;;  %v7793_v28 = vld [vmem:[#allocation2 + $0x20] sm:$0x1] }
 0x389   : > { %v15355_v41 = vcombine.low %v6753_v22, %v6763_v49  ;;  %9876 = vmatprep.mubr.bf16.mxu1 %v15326_v26  ;;  %v11219_v57 = vcombine.low %v15349_v24, %v15359_v33  ;;  %v8275_v48 = vor.u32 %v8274_v14, %v8271_v20  ;;  %v11252_v13 = vrot.slane %v7788_v4, 9  ;;  %v15387_v45 = vpop.f32.mrb[130].mxu1  ;;  %v7279_v49 = vld [vmem:[#allocation2 + $0x18] sm:$0xf] }
 0x38a   : > { %v7886_v61 = vrot.slane %v7789_v2, 5  ;;  %v8285_v9 = vor.u32 %v8284_v0, %v8280_v21  ;;  %v8290_v46 = vrot.slane %v8288_v39, 5  ;;  %v7889_v7 = vrot.slane %v7790_v58, 5 }
 0x38b   : > { %v7325_v51 = vshrl.u32 %v7276_v38, 16  ;;  %v8276_v3 = vrot.slane %v8275_v48, 4  ;;  %v7328_v62 = vshll.u32 %v7276_v38, 16  ;;  %v7334_v37 = vshll.u32 %v7277_v12, 16 }
 0x38c   : > { %v15368_v59 = vsel %vm13342_vm14, %v11252_v13, %v7886_v61  ;;  %v7888_v26 = vrot.slane %v7886_v61, 4  ;;  %v8286_v6 = vrot.slane %v8285_v9, 4  ;;  %v7338_v42 = vshrl.u32 %v7277_v12, 16  ;;  %v7280_v12 = vld [vmem:[#allocation2 + $0x1c] sm:$0xf]  ;;  %v15392_v9 = vpop.f32.mrb[131].mxu1 }
 0x38d   : > { %v7327_v43 = vrot.slane %v7325_v51, 4  ;;  %10038 = vmatmul.mubr.bf16.gmra.mrb[212].mxu0 %v11217_v10  ;;  %v8281_v56 = vsel %vm13311_vm11, %v8276_v3, %v8280_v21  ;;  %v7330_v55 = vrot.slane %v7328_v62, 5  ;;  %v7344_v53 = vshll.u32 %v7278_v54, 16  ;;  %v7791_v10 = vld [vmem:[#allocation2 + $0x18] sm:$0xe] }
 0x38e   : > { %v15379_v16 = vsel %vm13342_vm14, %v7888_v26, %v7889_v7  ;;  %10045 = vmatprep.mubr.bf16.mxu0 %v12805_v18  ;;  %v8291_v8 = vsel %vm13311_vm11, %v8286_v6, %v8290_v46  ;;  %v7336_v31 = vrot.slane %v7334_v37, 5  ;;  %v7340_v36 = vrot.slane %v7338_v42, 4  ;;  %v12809_v46 = vld [vmem:[#allocation2 + $0xa8] sm:$0xff]   ;;  %v7281_v3 = vld [vmem:[#allocation2 + $0x20] sm:$0x1] }
 0x38f   : > { %v11268_v17 = vcombine.low %v15368_v59, %v15379_v16  ;;  %v15385_v15 = vcombine.low %v8281_v56, %v8291_v8  ;;  %v7331_v32 = vor.u32 %v7330_v55, %v7327_v43  ;;  %v7346_v44 = vrot.slane %v7344_v53, 5  ;;  %v8226_v6 = vld [vmem:[#allocation2 + $0x30] sm:$0xf]  ;;  %v8227_v43 = vld [vmem:[#allocation2 + $0x34] sm:$0xf] }
 0x390   : > { %v8293_v4 = vshrl.u32 %v8223_v11, 16  ;;  %9877 = vmatmul.mubr.bf16.gmra.mrb[180].mxu1 %v12804_v50  ;;  %v7341_v5 = vor.u32 %v7340_v36, %v7336_v31  ;;  %v8296_v47 = vshll.u32 %v8223_v11, 16  ;;  %v8302_v19 = vshll.u32 %v8224_v60, 16  ;;  %v8228_v36 = vld [vmem:[#allocation2 + $0x38] sm:$0x1] }
 0x391   : > { %v8306_v2 = vshrl.u32 %v8224_v60, 16  ;;  %9884 = vmatprep.mubr.bf16.mxu1 %v15340_v23  ;;  %v7332_v20 = vrot.slane %v7331_v32, 4  ;;  %v8312_v58 = vshll.u32 %v8225_v40, 16  ;;  %v11253_v22 = vrot.slane %v7791_v10, 9  ;;  %v12810_v23 = vld [vmem:[#allocation2 + $0xc0] sm:$0xff]  }
 0x392   : > { %v8295_v34 = vrot.slane %v8293_v4, 4  ;;  %v7342_v14 = vrot.slane %v7341_v5, 4  ;;  %v8298_v21 = vrot.slane %v8296_v47, 5  ;;  %v8304_v38 = vrot.slane %v8302_v19, 5  ;;  %v7794_v10 = vld [vmem:[#allocation2 + $0x24] sm:$0xe] }
 0x393   : > { %v8308_v0 = vrot.slane %v8306_v2, 4  ;;  %v7337_v39 = vsel %vm13311_vm11, %v7332_v20, %v7336_v31  ;;  %v8314_v48 = vrot.slane %v8312_v58, 5  ;;  %v7893_v13 = vrot.slane %v7792_v25, 5  ;;  %v7795_v5 = vld [vmem:[#allocation2 + $0x28] sm:$0xf] }
 0x394   : > { %v7896_v61 = vrot.slane %v7793_v28, 5  ;;  %v7347_v7 = vsel %vm13311_vm11, %v7342_v14, %v7346_v44  ;;  %v8299_v54 = vor.u32 %v8298_v21, %v8295_v34  ;;  %v7349_v26 = vshrl.u32 %v7279_v49, 16  ;;  %v7796_v20 = vld [vmem:[#allocation2 + $0x2c] sm:$0x1]  ;;  %v7282_v14 = vld [vmem:[#allocation2 + $0x24] sm:$0xf] }
 0x395   : > { %v8309_v51 = vor.u32 %v8308_v0, %v8304_v38  ;;  %10046 = vmatmul.mubr.bf16.gmra.mrb[216].mxu0 %v11218_v30  ;;  %v15399_v62 = vcombine.low %v7337_v39, %v7347_v7  ;;  %v15403_v11 = vsel %vm13342_vm14, %v11253_v22, %v7893_v13  ;;  %v7895_v50 = vrot.slane %v7893_v13, 4  ;;  %v12817_v39 = vld [vmem:[#allocation2 + $0xb4] sm:$0xff]   ;;  %v8231_v16 = vld [vmem:[#allocation2 + $0x44] sm:$0x1] }
 0x396   : > { %v7352_v18 = vshll.u32 %v7279_v49, 16  ;;  %10053 = vmatprep.mubr.bf16.mxu0 %v12810_v23  ;;  %v8300_v37 = vrot.slane %v8299_v54, 4  ;;  %v7351_v56 = vrot.slane %v7349_v26, 4  ;;  %v7358_v55 = vshll.u32 %v7280_v12, 16  ;;  %v7283_v54 = vld [vmem:[#allocation2 + $0x28] sm:$0xf] }
 0x397   : > { %v8310_v42 = vrot.slane %v8309_v51, 4  ;;  %v15407_v53 = vsel %vm13342_vm14, %v7895_v50, %v7896_v61  ;;  %v7362_v52 = vshrl.u32 %v7280_v12, 16  ;;  %v7368_v30 = vshll.u32 %v7281_v3, 16 }
 0x398   : > { %v7354_v35 = vrot.slane %v7352_v18, 5  ;;  %9885 = vmatmul.mubr.bf16.gmra.mrb[184].mxu1 %v12809_v46  ;;  %v8305_v60 = vsel %vm13311_vm11, %v8300_v37, %v8304_v38  ;;  %v11269_v8 = vcombine.low %v15403_v11, %v15407_v53  ;;  %v7360_v31 = vrot.slane %v7358_v55, 5  ;;  %v8232_v53 = vld [vmem:[#allocation2 + $0x48] sm:$0xf] }
 0x399   : > { %v8315_v40 = vsel %vm13311_vm11, %v8310_v42, %v8314_v48  ;;  %9892 = vmatprep.mubr.bf16.mxu1 %v15355_v41  ;;  %v7364_v4 = vrot.slane %v7362_v52, 4  ;;  %v7370_v25 = vrot.slane %v7368_v30, 5  ;;  %v8317_v47 = vshrl.u32 %v8226_v6, 16  ;;  %v12821_v52 = vld [vmem:[#allocation2 + $0x18] sm:$0xff]  }
 0x39a   : > { %v15416_v32 = vcombine.low %v8305_v60, %v8315_v40  ;;  %v7355_v44 = vor.u32 %v7354_v35, %v7351_v56  ;;  %v8320_v19 = vshll.u32 %v8226_v6, 16  ;;  %v8326_v2 = vshll.u32 %v8227_v43, 16  ;;  %v8230_v35 = vld [vmem:[#allocation2 + $0x40] sm:$0xf] }
 0x39b   : > { %v8330_v28 = vshrl.u32 %v8227_v43, 16  ;;  %v7365_v58 = vor.u32 %v7364_v4, %v7360_v31  ;;  %v8336_v22 = vshll.u32 %v8228_v36, 16  ;;  %v11254_v49 = vrot.slane %v7794_v10, 9  ;;  %v8229_v43 = vld [vmem:[#allocation2 + $0x3c] sm:$0xf] }
 0x39c   : > { %v7356_v34 = vrot.slane %v7355_v44, 4  ;;  %v8319_v21 = vrot.slane %v8317_v47, 4  ;;  %v8322_v38 = vrot.slane %v8320_v19, 5  ;;  %v8328_v0 = vrot.slane %v8326_v2, 5  ;;  %v7798_v4 = vld [vmem:[#allocation2 + $0x34] sm:$0xf] }
 0x39d   : > { %v8332_v41 = vrot.slane %v8330_v28, 4  ;;  %10054 = vmatmul.mubr.bf16.gmra.mrb[220].mxu0 %v11219_v57  ;;  %v7366_v13 = vrot.slane %v7365_v58, 4  ;;  %v8338_v61 = vrot.slane %v8336_v22, 5  ;;  %v7900_v12 = vrot.slane %v7795_v5, 5  ;;  %v7284_v57 = vld [vmem:[#allocation2 + $0x2c] sm:$0x1] }
 0x39e   : > { %v7361_v48 = vsel %vm13311_vm11, %v7356_v34, %v7360_v31  ;;  %10255 = vmatprep.mubr.bf16.mxu0 %v15385_v15  ;;  %v8323_v46 = vor.u32 %v8322_v38, %v8319_v21  ;;  %v7903_v7 = vrot.slane %v7796_v20, 5  ;;  %v7373_v51 = vshrl.u32 %v7282_v14, 16  ;;  %v7285_v28 = vld [vmem:[#allocation2 + $0x30] sm:$0xf] }
 0x39f   : > { %v8333_v23 = vor.u32 %v8332_v41, %v8328_v0  ;;  %v7371_v3 = vsel %vm13311_vm11, %v7366_v13, %v7370_v25  ;;  %v15428_v24 = vsel %vm13342_vm14, %v11254_v49, %v7900_v12  ;;  %v7902_v33 = vrot.slane %v7900_v12, 4  ;;  %v7799_v25 = vld [vmem:[#allocation2 + $0x38] sm:$0x1]  ;;  %v12825_v49 = vld [vmem:[#allocation10 + $0x208] sm:$0xff]  }
 0x3a0   : > { %v7376_v26 = vshll.u32 %v7282_v14, 16  ;;  %9893 = vmatmul.mubr.bf16.gmra.mrb[188].mxu1 %v12817_v39  ;;  %v15430_v50 = vcombine.low %v7361_v48, %v7371_v3  ;;  %v8324_v18 = vrot.slane %v8323_v46, 4  ;;  %v7375_v6 = vrot.slane %v7373_v51, 4  ;;  %v7286_v14 = vld [vmem:[#allocation2 + $0x34] sm:$0xf] }
 0x3a1   : > { %v8334_v15 = vrot.slane %v8333_v23, 4  ;;  %10094 = vmatprep.mubr.bf16.mxu1 %v11268_v17  ;;  %v15437_v37 = vsel %vm13342_vm14, %v7902_v33, %v7903_v7  ;;  %v7382_v56 = vshll.u32 %v7283_v54, 16  ;;  %v7386_v55 = vshrl.u32 %v7283_v54, 16  ;;  %v7797_v17 = vld [vmem:[#allocation2 + $0x30] sm:$0xe] }
 0x3a2   : > { %v7378_v42 = vrot.slane %v7376_v26, 5  ;;  %v8329_v30 = vsel %vm13311_vm11, %v8324_v18, %v8328_v0  ;;  %v11270_v40 = vcombine.low %v15428_v24, %v15437_v37  ;;  %v7392_v59 = vshll.u32 %v7284_v57, 16  ;;  %v7287_v3 = vld [vmem:[#allocation2 + $0x38] sm:$0x1]  ;;  %v12823_v26 = vld [vmem:[#allocation2 + $0x24] sm:$0xff]  }
 0x3a3   : > { %v8339_v60 = vsel %vm13311_vm11, %v8334_v15, %v8338_v61  ;;  %v7384_v10 = vrot.slane %v7382_v56, 5  ;;  %v7388_v44 = vrot.slane %v7386_v55, 4  ;;  %v8341_v47 = vshrl.u32 %v8229_v43, 16  ;;  %v8233_v55 = vld [vmem:[#allocation2 + $0x4c] sm:$0xf] }
 0x3a4   : > { %v15445_v31 = vcombine.low %v8329_v30, %v8339_v60  ;;  %v7379_v36 = vor.u32 %v7378_v42, %v7375_v6  ;;  %v7394_v5 = vrot.slane %v7392_v59, 5  ;;  %v8344_v19 = vshll.u32 %v8229_v43, 16  ;;  %v8234_v59 = vld [vmem:[#allocation2 + $0x50] sm:$0x1] }
 0x3a5   : > { %v8350_v2 = vshll.u32 %v8230_v35, 16  ;;  %10256 = vmatmul.mubr.bf16.vlgmr.msra.gmra.mrb[224].mxu0 %v12821_v52  ;;  %v7389_v34 = vor.u32 %v7388_v44, %v7384_v10  ;;  %v8354_v58 = vshrl.u32 %v8230_v35, 16  ;;  %v8360_v22 = vshll.u32 %v8231_v16, 16  ;;  %v7800_v16 = vld [vmem:[#allocation2 + $0x3c] sm:$0xe] }
 0x3a6   : > { %v7380_v20 = vrot.slane %v7379_v36, 4  ;;  %10263 = vmatprep.mubr.bf16.mxu0 %v15416_v32  ;;  %v8343_v21 = vrot.slane %v8341_v47, 4  ;;  %v8346_v38 = vrot.slane %v8344_v19, 5  ;;  %v11255_v41 = vrot.slane %v7797_v17, 9  ;;  %v12851_v32 = vld [vmem:[#allocation10 + $0x200] sm:$0xff]  }
 0x3a7   : > { %v8352_v0 = vrot.slane %v8350_v2, 5  ;;  %v7390_v48 = vrot.slane %v7389_v34, 4  ;;  %v8356_v13 = vrot.slane %v8354_v58, 4  ;;  %v8362_v61 = vrot.slane %v8360_v22, 5  ;;  %v12831_v2 = vld [vmem:[#allocation10 + $0x218] sm:$0xff]  }
 0x3a8   : > { %v7385_v39 = vsel %vm13311_vm11, %v7380_v20, %v7384_v10  ;;  %10095 = vmatmul.mubr.bf16.vlgmr.msra.gmra.mrb[192].mxu1 %v15399_v62  ;;  %v8347_v12 = vor.u32 %v8346_v38, %v8343_v21  ;;  %v7907_v46 = vrot.slane %v7798_v4, 5  ;;  %v7910_v23 = vrot.slane %v7799_v25, 5  ;;  %v7801_v4 = vld [vmem:[#allocation2 + $0x40] sm:$0xf]  ;;  %v7802_v22 = vld [vmem:[#allocation2 + $0x44] sm:$0x1] }
 0x3a9   : > { %v7397_v7 = vshrl.u32 %v7285_v28, 16  ;;  %10102 = vmatprep.mubr.bf16.mxu1 %v11269_v8  ;;  %12484 = vmatpush3.bf16.msra.mxu1 %v12851_v32  ;;  %v7395_v54 = vsel %vm13311_vm11, %v7390_v48, %v7394_v5  ;;  %v8357_v51 = vor.u32 %v8356_v13, %v8352_v0  ;;  %v7400_v33 = vshll.u32 %v7285_v28, 16  ;;  %v12828_v8 = vld [vmem:[#allocation10 + $0x210] sm:$0xff]   ;;  %v7289_v13 = vld [vmem:[#allocation2 + $0x40] sm:$0xf] }
 0x3aa   : > { %v7406_v57 = vshll.u32 %v7286_v14, 16  ;;  %v15456_v18 = vcombine.low %v7385_v39, %v7395_v54  ;;  %v8348_v62 = vrot.slane %v8347_v12, 4  ;;  %12485 = vmatprep.subr.bf16.mxu1 %v12825_v49  ;;  %v15460_v15 = vsel %vm13342_vm14, %v11255_v41, %v7907_v46 }
 0x3ab   : > { %v7909_v11 = vrot.slane %v7907_v46, 4  ;;  %v8358_v6 = vrot.slane %v8357_v51, 4  ;;  %v7399_v43 = vrot.slane %v7397_v7, 4  ;;  %v7402_v42 = vrot.slane %v7400_v33, 5  ;;  %v12834_v7 = vld [vmem:[#allocation10 + $0x220] sm:$0xff]  }
 0x3ac   : > { %v7408_v56 = vrot.slane %v7406_v57, 5  ;;  %v8353_v35 = vsel %vm13311_vm11, %v8348_v62, %v8352_v0  ;;  %v7410_v30 = vshrl.u32 %v7286_v14, 16  ;;  %v7416_v60 = vshll.u32 %v7287_v3, 16  ;;  %v7288_v0 = vld [vmem:[#allocation2 + $0x3c] sm:$0xf] }
 0x3ad   : > { %v15466_v52 = vsel %vm13342_vm14, %v7909_v11, %v7910_v23  ;;  %10264 = vmatmul.mubr.bf16.gmra.mrb[228].mxu0 %v12823_v26  ;;  %v8363_v17 = vsel %vm13311_vm11, %v8358_v6, %v8362_v61  ;;  %12486 = vmatpush3.bf16.msra.mxu1 %v12825_v49  ;;  %v7403_v10 = vor.u32 %v7402_v42, %v7399_v43  ;;  %v8365_v44 = vshrl.u32 %v8232_v53, 16  ;;  %v12824_v61 = vld [vmem:[#allocation2 + $0x30] sm:$0xff]   ;;  %v8236_v62 = vld [vmem:[#allocation2 + $0x58] sm:$0xf]  ;;  %v8237_v43 = vld [vmem:[#allocation2 + $0x5c] sm:$0x1] }
 0x3ae   : > { %v11271_v36 = vcombine.low %v15460_v15, %v15466_v52  ;;  %10271 = vmatprep.mubr.bf16.mxu0 %v15445_v31  ;;  %v11303_v25 = vcombine.low %v8353_v35, %v8363_v17  ;;  %v7412_v5 = vrot.slane %v7410_v30, 4  ;;  %v7418_v47 = vrot.slane %v7416_v60, 5  ;;  %12487 = vmatprep.subr.bf16.mxu1 %v12828_v8  ;;  %v8235_v51 = vld [vmem:[#allocation2 + $0x54] sm:$0xf]  ;;  %v12837_v42 = vld [vmem:[#allocation10 + $0x228] sm:$0xff]  }
 0x3af   : > { %v8368_v19 = vshll.u32 %v8232_v53, 16  ;;  %v7404_v28 = vrot.slane %v7403_v10, 4  ;;  %v8367_v20 = vrot.slane %v8365_v44, 4  ;;  %v8374_v34 = vshll.u32 %v8233_v55, 16  ;;  %v7803_v10 = vld [vmem:[#allocation2 + $0x48] sm:$0xe] }
 0x3b0   : > { %v8378_v58 = vshrl.u32 %v8233_v55, 16  ;;  %10103 = vmatmul.mubr.bf16.gmra.mrb[196].mxu1 %v15430_v50  ;;  %v7413_v14 = vor.u32 %v7412_v5, %v7408_v56  ;;  %v8384_v21 = vshll.u32 %v8234_v59, 16  ;;  %v11256_v38 = vrot.slane %v7800_v16, 9 }
 0x3b1   : > { %v8370_v49 = vrot.slane %v8368_v19, 5  ;;  %10110 = vmatprep.mubr.bf16.mxu1 %v11270_v40  ;;  %v7409_v31 = vsel %vm13311_vm11, %v7404_v28, %v7408_v56  ;;  %v8376_v41 = vrot.slane %v8374_v34, 5  ;;  %v7914_v48 = vrot.slane %v7801_v4, 5  ;;  %12488 = vmatpush3.bf16.msra.mxu1 %v12828_v8  ;;  %v7290_v40 = vld [vmem:[#allocation2 + $0x44] sm:$0x1] }
 0x3b2   : > { %v8380_v39 = vrot.slane %v8378_v58, 4  ;;  %v7414_v12 = vrot.slane %v7413_v14, 4  ;;  %v8386_v46 = vrot.slane %v8384_v21, 5  ;;  %v7917_v23 = vrot.slane %v7802_v22, 5  ;;  %12489 = vmatprep.subr.bf16.mxu1 %v12831_v2  ;;  %v7805_v19 = vld [vmem:[#allocation2 + $0x50] sm:$0x1] }
 0x3b3   : > { %v8371_v50 = vor.u32 %v8370_v49, %v8367_v20  ;;  %v15481_v24 = vsel %vm13342_vm14, %v11256_v38, %v7914_v48  ;;  %v7916_v37 = vrot.slane %v7914_v48, 4  ;;  %v7421_v54 = vshrl.u32 %v7288_v0, 16  ;;  %v7291_v58 = vld [vmem:[#allocation2 + $0x48] sm:$0xf]  ;;  %v12826_v38 = vld [vmem:[#allocation2 + $0x3c] sm:$0xff]  }
 0x3b4   : > { %v8381_v32 = vor.u32 %v8380_v39, %v8376_v41  ;;  %v7419_v3 = vsel %vm13311_vm11, %v7414_v12, %v7418_v47  ;;  %v7424_v57 = vshll.u32 %v7288_v0, 16  ;;  %v7430_v26 = vshll.u32 %v7289_v13, 16  ;;  %v7804_v47 = vld [vmem:[#allocation2 + $0x4c] sm:$0xf] }
 0x3b5   : > { %v8372_v33 = vrot.slane %v8371_v50, 4  ;;  %10272 = vmatmul.mubr.bf16.gmra.mrb[232].mxu0 %v12824_v61  ;;  %v15485_v11 = vcombine.low %v7409_v31, %v7419_v3  ;;  %v15489_v8 = vsel %vm13342_vm14, %v7916_v37, %v7917_v23  ;;  %v7423_v6 = vrot.slane %v7421_v54, 4  ;;  %12490 = vmatpush3.bf16.msra.mxu1 %v12831_v2  ;;  %v12840_v21 = vld [vmem:[#allocation10 + $0x230] sm:$0xff]   ;;  %v7293_v23 = vld [vmem:[#allocation2 + $0x50] sm:$0x1] }
 0x3b6   : > { %v8382_v53 = vrot.slane %v8381_v32, 4  ;;  %10279 = vmatprep.mubr.bf16.mxu0 %v11303_v25  ;;  %v11272_v55 = vcombine.low %v15481_v24, %v15489_v8  ;;  %v7426_v35 = vrot.slane %v7424_v57, 5  ;;  %v7432_v30 = vrot.slane %v7430_v26, 5  ;;  %12491 = vmatprep.subr.bf16.mxu1 %v12834_v7  ;;  %v7292_v48 = vld [vmem:[#allocation2 + $0x4c] sm:$0xf]  ;;  %v12843_v3 = vld [vmem:[#allocation10 + $0x238] sm:$0xff]  }
 0x3b7   : > { %v8377_v56 = vsel %vm13311_vm11, %v8372_v33, %v8376_v41  ;;  %v7434_v59 = vshrl.u32 %v7289_v13, 16  ;;  %v7440_v16 = vshll.u32 %v7290_v40, 16  ;;  %v8389_v17 = vshrl.u32 %v8235_v51, 16  ;;  %v7806_v24 = vld [vmem:[#allocation2 + $0x54] sm:$0xe] }
 0x3b8   : > { %v8387_v60 = vsel %vm13311_vm11, %v8382_v53, %v8386_v46  ;;  %10111 = vmatmul.mubr.bf16.gmra.mrb[200].mxu1 %v15456_v18  ;;  %v7427_v4 = vor.u32 %v7426_v35, %v7423_v6  ;;  %v8392_v25 = vshll.u32 %v8235_v51, 16  ;;  %v8398_v5 = vshll.u32 %v8236_v62, 16  ;;  %v8238_v53 = vld [vmem:[#allocation2 + $0x60] sm:$0xf]  ;;  %v7807_v8 = vld [vmem:[#allocation2 + $0x58] sm:$0xf] }
 0x3b9   : > { %v11304_v44 = vcombine.low %v8377_v56, %v8387_v60  ;;  %10118 = vmatprep.mubr.bf16.mxu1 %v11271_v36  ;;  %v7436_v2 = vrot.slane %v7434_v59, 4  ;;  %v7442_v28 = vrot.slane %v7440_v16, 5  ;;  %v8391_v20 = vrot.slane %v8389_v17, 4  ;;  %12492 = vmatpush3.bf16.msra.mxu1 %v12834_v7 }
 0x3ba   : > { %v8402_v34 = vshrl.u32 %v8236_v62, 16  ;;  %v7428_v22 = vrot.slane %v7427_v4, 4  ;;  %v8394_v14 = vrot.slane %v8392_v25, 5  ;;  %v8400_v49 = vrot.slane %v8398_v5, 5  ;;  %12493 = vmatprep.subr.bf16.mxu1 %v12837_v42 }
 0x3bb   : > { %v8408_v18 = vshll.u32 %v8237_v43, 16  ;;  %v7437_v0 = vor.u32 %v7436_v2, %v7432_v30  ;;  %v11257_v41 = vrot.slane %v7803_v10, 9  ;;  %v7921_v39 = vrot.slane %v7804_v47, 5  ;;  %v8240_v10 = vld [vmem:[#allocation2 + $0x68] sm:$0x1] }
 0x3bc   : > { %v8404_v31 = vrot.slane %v8402_v34, 4  ;;  %v7433_v15 = vsel %vm13311_vm11, %v7428_v22, %v7432_v30  ;;  %v8395_v52 = vor.u32 %v8394_v14, %v8391_v20  ;;  %v7924_v13 = vrot.slane %v7805_v19, 5  ;;  %v8239_v30 = vld [vmem:[#allocation2 + $0x64] sm:$0xf]  ;;  %v7808_v14 = vld [vmem:[#allocation2 + $0x5c] sm:$0x1] }
 0x3bd   : > { %v8410_v36 = vrot.slane %v8408_v18, 5  ;;  %10280 = vmatmul.mubr.bf16.gmra.mrb[236].mxu0 %v12826_v38  ;;  %v7438_v61 = vrot.slane %v7437_v0, 4  ;;  %v15505_v50 = vsel %vm13342_vm14, %v11257_v41, %v7921_v39  ;;  %v7923_v46 = vrot.slane %v7921_v39, 4  ;;  %12494 = vmatpush3.bf16.msra.mxu1 %v12837_v42  ;;  %v7294_v0 = vld [vmem:[#allocation2 + $0x54] sm:$0xf] }
 0x3be   : > { %v8405_v12 = vor.u32 %v8404_v31, %v8400_v49  ;;  %10287 = vmatprep.mubr.bf16.mxu0 %v11304_v44  ;;  %v8396_v32 = vrot.slane %v8395_v52, 4  ;;  %v7445_v37 = vshrl.u32 %v7291_v58, 16  ;;  %v7448_v40 = vshll.u32 %v7291_v58, 16  ;;  %12495 = vmatprep.subr.bf16.mxu1 %v12840_v21  ;;  %v12827_v44 = vld [vmem:[#allocation2 + $0x48] sm:$0xff]  }
 0x3bf   : > { %v15507_v7 = vpop.f32.mrb[160].mxu0  ;;  %v7454_v54 = vshll.u32 %v7292_v48, 16  ;;  %v7443_v33 = vsel %vm13311_vm11, %v7438_v61, %v7442_v28  ;;  %v7925_v26 = vsel %vm13342_vm14, %v7923_v46, %v7924_v13  ;;  %v7458_v62 = vshrl.u32 %v7292_v48, 16 }
 0x3c0   : > { %v15509_v51 = vpop.f32.mrb[161].mxu0  ;;  %v8406_v57 = vrot.slane %v8405_v12, 4  ;;  %10119 = vmatmul.mubr.bf16.gmra.mrb[204].mxu1 %v15485_v11  ;;  %v11240_v43 = vcombine.low %v7433_v15, %v7443_v33  ;;  %v8401_v42 = vsel %vm13311_vm11, %v8396_v32, %v8400_v49  ;;  %v11273_v56 = vcombine.low %v15505_v50, %v7925_v26  ;;  %v7295_v15 = vld [vmem:[#allocation2 + $0x58] sm:$0xf]  ;;  %v7296_v12 = vld [vmem:[#allocation2 + $0x5c] sm:$0x1] }
 0x3c1   : > { %v15515_v6 = vpop.f32.mrb[162].mxu0  ;;  %v7447_v35 = vrot.slane %v7445_v37, 4  ;;  %10126 = vmatprep.mubr.bf16.mxu1 %v11272_v55  ;;  %v7450_v16 = vrot.slane %v7448_v40, 5  ;;  %v7456_v17 = vrot.slane %v7454_v54, 5  ;;  %v7460_v11 = vrot.slane %v7458_v62, 4  ;;  %12496 = vmatpush3.bf16.msra.mxu1 %v12840_v21  ;;  %v12829_v37 = vld [vmem:[#allocation2 + $0x54] sm:$0xff]  }
 0x3c2   : > { %v15521_v60 = vpop.f32.mrb[163].mxu0  ;;  %v8411_v59 = vsel %vm13311_vm11, %v8406_v57, %v8410_v36  ;;  %v7464_v25 = vshll.u32 %v7293_v23, 16  ;;  %v8413_v5 = vshrl.u32 %v8238_v53, 16  ;;  %v8416_v47 = vshll.u32 %v8238_v53, 16  ;;  %12497 = vmatprep.subr.bf16.mxu1 %v12843_v3 }
 0x3c3   : > { %v11305_v4 = vcombine.low %v8401_v42, %v8411_v59  ;;  %v7451_v19 = vor.u32 %v7450_v16, %v7447_v35  ;;  %v7461_v2 = vor.u32 %v7460_v11, %v7456_v17  ;;  %v8422_v28 = vshll.u32 %v8239_v30, 16  ;;  %v8242_v42 = vld [vmem:[#allocation2 + $0x70] sm:$0xf]  ;;  %v8243_v16 = vld [vmem:[#allocation2 + $0x74] sm:$0x1] }
 0x3c4   : > { %v8426_v20 = vshrl.u32 %v8239_v30, 16  ;;  %v7466_v55 = vrot.slane %v7464_v25, 5  ;;  %v8415_v34 = vrot.slane %v8413_v5, 4  ;;  %v8418_v58 = vrot.slane %v8416_v47, 5  ;;  %v7810_v25 = vld [vmem:[#allocation2 + $0x64] sm:$0xf] }
 0x3c5   : > { %v8432_v22 = vshll.u32 %v8240_v10, 16  ;;  %10288 = vmatmul.mubr.bf16.gmra.mrb[240].mxu0 %v12827_v44  ;;  %v7452_v49 = vrot.slane %v7451_v19, 4  ;;  %v7462_v18 = vrot.slane %v7461_v2, 4  ;;  %v8424_v21 = vrot.slane %v8422_v28, 5  ;;  %12498 = vmatpush3.bf16.msra.mxu1 %v12843_v3  ;;  %v7811_v28 = vld [vmem:[#allocation2 + $0x68] sm:$0x1] }
 0x3c6   : > { %v8428_v38 = vrot.slane %v8426_v20, 4  ;;  %10295 = vmatprep.mubr.bf16.mxu0 %v11305_v4  ;;  %v8419_v31 = vor.u32 %v8418_v58, %v8415_v34  ;;  %v11258_v39 = vrot.slane %v7806_v24, 9  ;;  %v7928_v48 = vrot.slane %v7807_v8, 5  ;;  %v7297_v34 = vld [vmem:[#allocation2 + $0x60] sm:$0xf] }
 0x3c7   : > { %v8434_v41 = vrot.slane %v8432_v22, 5  ;;  %v7457_v52 = vsel %vm13311_vm11, %v7452_v49, %v7456_v17  ;;  %v7467_v36 = vsel %vm13311_vm11, %v7462_v18, %v7466_v55  ;;  %v7931_v61 = vrot.slane %v7808_v14, 5  ;;  %v7809_v17 = vld [vmem:[#allocation2 + $0x60] sm:$0xe] }
 0x3c8   : > { %v8429_v13 = vor.u32 %v8428_v38, %v8424_v21  ;;  %10127 = vmatmul.mubr.bf16.gmra.mrb[208].mxu1 %v11240_v43  ;;  %v11241_v50 = vcombine.low %v7457_v52, %v7467_v36  ;;  %v8420_v46 = vrot.slane %v8419_v31, 4  ;;  %v7929_v23 = vsel %vm13342_vm14, %v11258_v39, %v7928_v48  ;;  %v8241_v43 = vld [vmem:[#allocation2 + $0x6c] sm:$0xf] }
 0x3c9   : > { %v7930_v32 = vrot.slane %v7928_v48, 4  ;;  %10134 = vmatprep.mubr.bf16.mxu1 %v11273_v56  ;;  %v7469_v54 = vshrl.u32 %v7294_v0, 16  ;;  %v7472_v3 = vshll.u32 %v7294_v0, 16  ;;  %v7478_v33 = vshll.u32 %v7295_v15, 16  ;;  %v7298_v48 = vld [vmem:[#allocation2 + $0x64] sm:$0xf] }
 0x3ca   : > { %v8430_v40 = vrot.slane %v8429_v13, 4  ;;  %v8425_v57 = vsel %vm13311_vm11, %v8420_v46, %v8424_v21  ;;  %v7482_v62 = vshrl.u32 %v7295_v15, 16  ;;  %v7488_v53 = vshll.u32 %v7296_v12, 16  ;;  %v7299_v12 = vld [vmem:[#allocation2 + $0x68] sm:$0x1] }
 0x3cb   : > { %v7932_v26 = vsel %vm13342_vm14, %v7930_v32, %v7931_v61  ;;  %v7471_v56 = vrot.slane %v7469_v54, 4  ;;  %v7474_v59 = vrot.slane %v7472_v3, 5  ;;  %v7480_v10 = vrot.slane %v7478_v33, 5 }
 0x3cc   : > { %v8435_v35 = vsel %vm13311_vm11, %v8430_v40, %v8434_v41  ;;  %v11274_v30 = vcombine.low %v7929_v23, %v7932_v26  ;;  %v7484_v44 = vrot.slane %v7482_v62, 4  ;;  %v7490_v4 = vrot.slane %v7488_v53, 5  ;;  %v8244_v40 = vld [vmem:[#allocation2 + $0x78] sm:$0xf] }
 0x3cd   : > { %v11306_v11 = vcombine.low %v8425_v57, %v8435_v35  ;;  %10296 = vmatmul.mubr.bf16.gmra.mrb[244].mxu0 %v12829_v37  ;;  %v7475_v5 = vor.u32 %v7474_v59, %v7471_v56  ;;  %v8437_v47 = vshrl.u32 %v8241_v43, 16  ;;  %v8440_v19 = vshll.u32 %v8241_v43, 16  ;;  %v8246_v35 = vld [vmem:[#allocation2 + $0x80] sm:$0x1] }
 0x3ce   : > { %v8446_v2 = vshll.u32 %v8242_v42, 16  ;;  %v7485_v20 = vor.u32 %v7484_v44, %v7480_v10  ;;  %v8450_v24 = vshrl.u32 %v8242_v42, 16  ;;  %v8456_v8 = vshll.u32 %v8243_v16, 16  ;;  %v8245_v42 = vld [vmem:[#allocation2 + $0x7c] sm:$0xf] }
 0x3cf   : > { %10303 = vmatprep.mubr.bf16.mxu0 %v11306_v11  ;;  %v11259_v55 = vrot.slane %v7809_v17, 9  ;;  %v7476_v58 = vrot.slane %v7475_v5, 4  ;;  %v8439_v22 = vrot.slane %v8437_v47, 4  ;;  %v8442_v14 = vrot.slane %v8440_v19, 5  ;;  %v7812_v17 = vld [vmem:[#allocation2 + $0x6c] sm:$0xe] }
 0x3d0   : > { %v8448_v49 = vrot.slane %v8446_v2, 5  ;;  %10135 = vmatmul.mubr.bf16.gmra.mrb[212].mxu1 %v11241_v50  ;;  %v7486_v18 = vrot.slane %v7485_v20, 4  ;;  %v8452_v21 = vrot.slane %v8450_v24, 4  ;;  %v8458_v38 = vrot.slane %v8456_v8, 5  ;;  %v12830_v50 = vld [vmem:[#allocation2 + $0x60] sm:$0xff]  }
 0x3d1   : > { %v7935_v0 = vrot.slane %v7810_v25, 5  ;;  %10142 = vmatprep.mubr.bf16.mxu1 %v11274_v30  ;;  %v7481_v31 = vsel %vm13311_vm11, %v7476_v58, %v7480_v10  ;;  %v8443_v41 = vor.u32 %v8442_v14, %v8439_v22  ;;  %v7938_v39 = vrot.slane %v7811_v28, 5  ;;  %v7813_v25 = vld [vmem:[#allocation2 + $0x70] sm:$0xf]  ;;  %v7814_v28 = vld [vmem:[#allocation2 + $0x74] sm:$0x1] }
 0x3d2   : > { %v7493_v15 = vshrl.u32 %v7297_v34, 16  ;;  %v7491_v52 = vsel %vm13311_vm11, %v7486_v18, %v7490_v4  ;;  %v8453_v36 = vor.u32 %v8452_v21, %v8448_v49  ;;  %v7496_v37 = vshll.u32 %v7297_v34, 16  ;;  %v12832_v18 = vld [vmem:[#allocation2 + $0x6c] sm:$0xff]  }
 0x3d3   : > { %v7936_v13 = vsel %vm13342_vm14, %v11259_v55, %v7935_v0  ;;  %v7937_v61 = vrot.slane %v7935_v0, 4  ;;  %v11242_v46 = vcombine.low %v7481_v31, %v7491_v52  ;;  %v8444_v23 = vrot.slane %v8443_v41, 4  ;;  %v7301_v41 = vld [vmem:[#allocation2 + $0x70] sm:$0xf] }
 0x3d4   : > { %v7495_v32 = vrot.slane %v7493_v15, 4  ;;  %v8454_v54 = vrot.slane %v8453_v36, 4  ;;  %v7502_v33 = vshll.u32 %v7298_v48, 16  ;;  %v7506_v57 = vshrl.u32 %v7298_v48, 16 }
 0x3d5   : > { %v7939_v3 = vsel %vm13342_vm14, %v7937_v61, %v7938_v39  ;;  %10304 = vmatmul.mubr.bf16.gmra.mrb[248].mxu0 %v12830_v50  ;;  %v8449_v26 = vsel %vm13311_vm11, %v8444_v23, %v8448_v49  ;;  %v7498_v53 = vrot.slane %v7496_v37, 5  ;;  %v7512_v43 = vshll.u32 %v7299_v12, 16  ;;  %v7300_v49 = vld [vmem:[#allocation2 + $0x6c] sm:$0xf]  ;;  %v7302_v61 = vld [vmem:[#allocation2 + $0x74] sm:$0x1] }
 0x3d6   : > { %v11275_v62 = vcombine.low %v7936_v13, %v7939_v3  ;;  %v8459_v30 = vsel %vm13311_vm11, %v8454_v54, %v8458_v38  ;;  %v7504_v56 = vrot.slane %v7502_v33, 5  ;;  %v7508_v59 = vrot.slane %v7506_v57, 4 }
 0x3d7   : > { %v8461_v16 = vshrl.u32 %v8244_v40, 16  ;;  %v11307_v11 = vcombine.low %v8449_v26, %v8459_v30  ;;  %v7499_v10 = vor.u32 %v7498_v53, %v7495_v32  ;;  %v7514_v44 = vrot.slane %v7512_v43, 5  ;;  %v8248_v26 = vld [vmem:[#allocation2 + $0x88] sm:$0xf] }
 0x3d8   : > { %v8464_v4 = vshll.u32 %v8244_v40, 16  ;;  %10143 = vmatmul.mubr.bf16.gmra.mrb[216].mxu1 %v11242_v46  ;;  %v7509_v5 = vor.u32 %v7508_v59, %v7504_v56  ;;  %v8470_v19 = vshll.u32 %v8245_v42, 16  ;;  %v8474_v2 = vshrl.u32 %v8245_v42, 16  ;;  %v8247_v40 = vld [vmem:[#allocation2 + $0x84] sm:$0xf] }
 0x3d9   : > { %v8463_v47 = vrot.slane %v8461_v16, 4  ;;  %10311 = vmatprep.mubr.bf16.mxu0 %v11307_v11  ;;  %10150 = vmatprep.mubr.bf16.mxu1 %v11275_v62  ;;  %v7500_v20 = vrot.slane %v7499_v10, 4  ;;  %v8480_v8 = vshll.u32 %v8246_v35, 16  ;;  %v11260_v55 = vrot.slane %v7812_v17, 9  ;;  %v8249_v35 = vld [vmem:[#allocation2 + $0x8c] sm:$0x1] }
 0x3da   : > { %v8466_v24 = vrot.slane %v8464_v4, 5  ;;  %v7510_v34 = vrot.slane %v7509_v5, 4  ;;  %v8472_v58 = vrot.slane %v8470_v19, 5  ;;  %v8476_v22 = vrot.slane %v8474_v2, 4  ;;  %v7815_v17 = vld [vmem:[#allocation2 + $0x78] sm:$0xe] }
 0x3db   : > { %v7942_v14 = vrot.slane %v7813_v25, 5  ;;  %v7505_v21 = vsel %vm13311_vm11, %v7500_v20, %v7504_v56  ;;  %v8482_v0 = vrot.slane %v8480_v8, 5  ;;  %v7945_v31 = vrot.slane %v7814_v28, 5  ;;  %v7816_v11 = vld [vmem:[#allocation2 + $0x7c] sm:$0xf] }
 0x3dc   : > { %v8467_v38 = vor.u32 %v8466_v24, %v8463_v47  ;;  %v7515_v39 = vsel %vm13311_vm11, %v7510_v34, %v7514_v44  ;;  %v8477_v48 = vor.u32 %v8476_v22, %v8472_v58  ;;  %v7517_v12 = vshrl.u32 %v7300_v49, 16  ;;  %v12833_v10 = vld [vmem:[#allocation2 + $0x78] sm:$0xff]   ;;  %v7817_v47 = vld [vmem:[#allocation2 + $0x80] sm:$0x1] }
 0x3dd   : > { %v7943_v15 = vsel %vm13342_vm14, %v11260_v55, %v7942_v14  ;;  %v7944_v52 = vrot.slane %v7942_v14, 4  ;;  %10312 = vmatmul.mubr.bf16.gmra.mrb[252].mxu0 %v12832_v18  ;;  %v11243_v36 = vcombine.low %v7505_v21, %v7515_v39  ;;  %v7520_v50 = vshll.u32 %v7300_v49, 16  ;;  %v7303_v24 = vld [vmem:[#allocation2 + $0x78] sm:$0xf]  ;;  %v7304_v21 = vld [vmem:[#allocation2 + $0x7c] sm:$0xf] }
 0x3de   : > { %v8468_v13 = vrot.slane %v8467_v38, 4  ;;  %v8478_v46 = vrot.slane %v8477_v48, 4  ;;  %v7526_v32 = vshll.u32 %v7301_v41, 16  ;;  %v7530_v37 = vshrl.u32 %v7301_v41, 16  ;;  %v7305_v41 = vld [vmem:[#allocation2 + $0x80] sm:$0x1] }
 0x3df   : > { %v7946_v23 = vsel %vm13342_vm14, %v7944_v52, %v7945_v31  ;;  %v7519_v33 = vrot.slane %v7517_v12, 4  ;;  %v7522_v57 = vrot.slane %v7520_v50, 5  ;;  %v7536_v42 = vshll.u32 %v7302_v61, 16  ;;  %v8251_v61 = vld [vmem:[#allocation2 + $0x94] sm:$0xf] }
 0x3e0   : > { %v8473_v54 = vsel %vm13311_vm11, %v8468_v13, %v8472_v58  ;;  %v11276_v3 = vcombine.low %v7943_v15, %v7946_v23  ;;  %10151 = vmatmul.mubr.bf16.gmra.mrb[220].mxu1 %v11243_v36  ;;  %v8483_v62 = vsel %vm13311_vm11, %v8478_v46, %v8482_v0  ;;  %v7528_v53 = vrot.slane %v7526_v32, 5  ;;  %v8250_v13 = vld [vmem:[#allocation2 + $0x90] sm:$0xf]  ;;  %v8252_v32 = vld [vmem:[#allocation2 + $0x98] sm:$0x1] }
 0x3e1   : > { %v7532_v43 = vrot.slane %v7530_v37, 4  ;;  %v11308_v30 = vcombine.low %v8473_v54, %v8483_v62  ;;  %v7523_v56 = vor.u32 %v7522_v57, %v7519_v33  ;;  %v8485_v59 = vshrl.u32 %v8247_v40, 16  ;;  %v7818_v57 = vld [vmem:[#allocation2 + $0x84] sm:$0xe] }
 0x3e2   : > { %10158 = vmatprep.mubr.bf16.mxu1 %v11276_v3  ;;  %v8488_v16 = vshll.u32 %v8247_v40, 16  ;;  %v7538_v4 = vrot.slane %v7536_v42, 5  ;;  %v8494_v25 = vshll.u32 %v8248_v26, 16  ;;  %v8498_v5 = vshrl.u32 %v8248_v26, 16 }
 0x3e3   : > { %v7533_v44 = vor.u32 %v7532_v43, %v7528_v53  ;;  %10319 = vmatprep.mubr.bf16.mxu0 %v11308_v30  ;;  %v7524_v19 = vrot.slane %v7523_v56, 4  ;;  %v8487_v2 = vrot.slane %v8485_v59, 4  ;;  %v8504_v20 = vshll.u32 %v8249_v35, 16  ;;  %v7819_v35 = vld [vmem:[#allocation2 + $0x88] sm:$0xf] }
 0x3e4   : > { %v8490_v28 = vrot.slane %v8488_v16, 5  ;;  %v8496_v55 = vrot.slane %v8494_v25, 5  ;;  %v8500_v34 = vrot.slane %v8498_v5, 4  ;;  %v11261_v58 = vrot.slane %v7815_v17, 9  ;;  %v12835_v59 = vld [vmem:[#allocation2 + $0x84] sm:$0xff]  }
 0x3e5   : > { %v7534_v8 = vrot.slane %v7533_v44, 4  ;;  %10320 = vmatmul.mubr.bf16.gmra.mrb[0].mxu0 %v12833_v10  ;;  %v7529_v22 = vsel %vm13311_vm11, %v7524_v19, %v7528_v53  ;;  %v8506_v49 = vrot.slane %v8504_v20, 5  ;;  %v7949_v18 = vrot.slane %v7816_v11, 5  ;;  %v7820_v19 = vld [vmem:[#allocation2 + $0x8c] sm:$0x1] }
 0x3e6   : > { %v8491_v14 = vor.u32 %v8490_v28, %v8487_v2  ;;  %v8501_v0 = vor.u32 %v8500_v34, %v8496_v55  ;;  %v7952_v31 = vrot.slane %v7817_v47, 5  ;;  %v7541_v39 = vshrl.u32 %v7303_v24, 16 }
 0x3e7   : > { %v7539_v38 = vsel %vm13311_vm11, %v7534_v8, %v7538_v4  ;;  %v7950_v52 = vsel %vm13342_vm14, %v11261_v58, %v7949_v18  ;;  %v7951_v36 = vrot.slane %v7949_v18, 4  ;;  %v7544_v46 = vshll.u32 %v7303_v24, 16 }
 0x3e8   : > { %v11244_v48 = vcombine.low %v7529_v22, %v7539_v38  ;;  %v8492_v15 = vrot.slane %v8491_v14, 4  ;;  %v8502_v12 = vrot.slane %v8501_v0, 4  ;;  %v7543_v50 = vrot.slane %v7541_v39, 4  ;;  %v15570_v37 = vpop.f32.mrb[164].mxu0 }
 0x3e9   : > { %v7550_v23 = vshll.u32 %v7304_v21, 16  ;;  %v7953_v54 = vsel %vm13342_vm14, %v7951_v36, %v7952_v31  ;;  %v7554_v3 = vshrl.u32 %v7304_v21, 16  ;;  %v7560_v33 = vshll.u32 %v7305_v41, 16  ;;  %v15576_v26 = vpop.f32.mrb[165].mxu0 }
 0x3ea   : > { %10159 = vmatmul.mubr.bf16.gmra.mrb[224].mxu1 %v11244_v48  ;;  %v8497_v40 = vsel %vm13311_vm11, %v8492_v15, %v8496_v55  ;;  %v8507_v62 = vsel %vm13311_vm11, %v8502_v12, %v8506_v49  ;;  %v11277_v53 = vcombine.low %v7950_v52, %v7953_v54  ;;  %v7546_v43 = vrot.slane %v7544_v46, 5  ;;  %v15580_v30 = vpop.f32.mrb[166].mxu0  ;;  %v15582_v10 = vpop.f32.mrb[132].mxu1  ;;  %v7306_v55 = vld [vmem:[#allocation2 + $0x84] sm:$0xf] }
 0x3eb   : > { %v7552_v42 = vrot.slane %v7550_v23, 5  ;;  %v11309_v56 = vcombine.low %v8497_v40, %v8507_v62  ;;  %v7556_v16 = vrot.slane %v7554_v3, 4  ;;  %v7562_v17 = vrot.slane %v7560_v33, 5  ;;  %v15584_v44 = vpop.f32.mrb[167].mxu0  ;;  %v15586_v2 = vpop.f32.mrb[133].mxu1 }
 0x3ec   : > { %v8509_v11 = vshrl.u32 %v8250_v13, 16  ;;  %10166 = vmatprep.mubr.bf16.mxu1 %v11277_v53  ;;  %v7547_v4 = vor.u32 %v7546_v43, %v7543_v50  ;;  %v8512_v25 = vshll.u32 %v8250_v13, 16  ;;  %v8518_v5 = vshll.u32 %v8251_v61, 16  ;;  %v15588_v34 = vpop.f32.mrb[134].mxu1  ;;  %v7307_v15 = vld [vmem:[#allocation2 + $0x88] sm:$0xf] }
 0x3ed   : > { %v8522_v47 = vshrl.u32 %v8251_v61, 16  ;;  %10327 = vmatprep.mubr.bf16.mxu0 %v11309_v56  ;;  %v7557_v28 = vor.u32 %v7556_v16, %v7552_v42  ;;  %v8528_v24 = vshll.u32 %v8252_v32, 16  ;;  %v11262_v8 = vrot.slane %v7818_v57, 9  ;;  %v15590_v18 = vpop.f32.mrb[135].mxu1  ;;  %v7308_v12 = vld [vmem:[#allocation2 + $0x8c] sm:$0x1] }
 0x3ee   : > { %v8511_v20 = vrot.slane %v8509_v11, 4  ;;  %10328 = vmatmul.mubr.bf16.gmra.mrb[4].mxu0 %v12835_v59  ;;  %v7548_v58 = vrot.slane %v7547_v4, 4  ;;  %v8514_v22 = vrot.slane %v8512_v25, 5  ;;  %v8520_v14 = vrot.slane %v8518_v5, 5  ;;  %v8253_v54 = vld [vmem:[#allocation2 + $0x9c] sm:$0xf] }
 0x3ef   : > { %v8524_v49 = vrot.slane %v8522_v47, 4  ;;  %v7558_v21 = vrot.slane %v7557_v28, 4  ;;  %v8530_v38 = vrot.slane %v8528_v24, 5  ;;  %v7956_v0 = vrot.slane %v7819_v35, 5  ;;  %v8254_v53 = vld [vmem:[#allocation2 + $0xa0] sm:$0xf] }
 0x3f0   : > { %v7959_v31 = vrot.slane %v7820_v19, 5  ;;  %v7553_v41 = vsel %vm13311_vm11, %v7548_v58, %v7552_v42  ;;  %v8515_v39 = vor.u32 %v8514_v22, %v8511_v20  ;;  %v7565_v52 = vshrl.u32 %v7306_v55, 16  ;;  %v8255_v59 = vld [vmem:[#allocation2 + $0xa4] sm:$0x1]  ;;  %v7821_v16 = vld [vmem:[#allocation2 + $0x90] sm:$0xe] }
 0x3f1   : > { %v8525_v48 = vor.u32 %v8524_v49, %v8520_v14  ;;  %v7563_v36 = vsel %vm13311_vm11, %v7558_v21, %v7562_v17  ;;  %v7957_v13 = vsel %vm13342_vm14, %v11262_v8, %v7956_v0  ;;  %v7958_v61 = vrot.slane %v7956_v0, 4  ;;  %v12836_v11 = vld [vmem:[#allocation2 + $0x90] sm:$0xff]   ;;  %v7823_v19 = vld [vmem:[#allocation2 + $0x98] sm:$0x1] }
 0x3f2   : > { %v7568_v50 = vshll.u32 %v7306_v55, 16  ;;  %v11245_v46 = vcombine.low %v7553_v41, %v7563_v36  ;;  %v8516_v23 = vrot.slane %v8515_v39, 4  ;;  %v7567_v40 = vrot.slane %v7565_v52, 4  ;;  %v7822_v47 = vld [vmem:[#allocation2 + $0x94] sm:$0xf] }
 0x3f3   : > { %v8526_v32 = vrot.slane %v8525_v48, 4  ;;  %v7960_v3 = vsel %vm13342_vm14, %v7958_v61, %v7959_v31  ;;  %v7574_v57 = vshll.u32 %v7307_v15, 16  ;;  %v7578_v62 = vshrl.u32 %v7307_v15, 16 }
 0x3f4   : > { %v7570_v33 = vrot.slane %v7568_v50, 5  ;;  %10167 = vmatmul.mubr.bf16.gmra.mrb[228].mxu1 %v11245_v46  ;;  %v8521_v43 = vsel %vm13311_vm11, %v8516_v23, %v8520_v14  ;;  %v11278_v35 = vcombine.low %v7957_v13, %v7960_v3  ;;  %v7584_v56 = vshll.u32 %v7308_v12, 16  ;;  %v7309_v3 = vld [vmem:[#allocation2 + $0x90] sm:$0xf] }
 0x3f5   : > { %v8531_v42 = vsel %vm13311_vm11, %v8526_v32, %v8530_v38  ;;  %v7576_v25 = vrot.slane %v7574_v57, 5  ;;  %v7580_v5 = vrot.slane %v7578_v62, 4  ;;  %v15604_v28 = vpop.f32.mrb[136].mxu1  ;;  %v8533_v24 = vshrl.u32 %v8253_v54, 16  ;;  %v15606_v58 = vpop.f32.mrb[168].mxu0 }
 0x3f6   : > { %v11310_v17 = vcombine.low %v8521_v43, %v8531_v42  ;;  %v7571_v4 = vor.u32 %v7570_v33, %v7567_v40  ;;  %10174 = vmatprep.mubr.bf16.mxu1 %v11278_v35  ;;  %v7586_v20 = vrot.slane %v7584_v56, 5  ;;  %v8536_v8 = vshll.u32 %v8253_v54, 16  ;;  %v15608_v22 = vpop.f32.mrb[137].mxu1  ;;  %v15610_v0 = vpop.f32.mrb[169].mxu0  ;;  %v7310_v43 = vld [vmem:[#allocation2 + $0x94] sm:$0xf] }
 0x3f7   : > { %v8542_v55 = vshll.u32 %v8254_v53, 16  ;;  %v7581_v49 = vor.u32 %v7580_v5, %v7576_v25  ;;  %v8546_v21 = vshrl.u32 %v8254_v53, 16  ;;  %v8552_v38 = vshll.u32 %v8255_v59, 16  ;;  %v15612_v31 = vpop.f32.mrb[138].mxu1  ;;  %v15614_v52 = vpop.f32.mrb[170].mxu0 }
 0x3f8   : > { %10335 = vmatprep.mubr.bf16.mxu0 %v11310_v17  ;;  %v7572_v14 = vrot.slane %v7571_v4, 4  ;;  %v8535_v41 = vrot.slane %v8533_v24, 4  ;;  %v8538_v39 = vrot.slane %v8536_v8, 5  ;;  %v11263_v15 = vrot.slane %v7821_v16, 9  ;;  %v15616_v36 = vpop.f32.mrb[139].mxu1  ;;  %v15620_v46 = vpop.f32.mrb[171].mxu0 }
 0x3f9   : > { %10336 = vmatmul.mubr.bf16.gmra.mrb[8].mxu0 %v12836_v11  ;;  %v8544_v48 = vrot.slane %v8542_v55, 5  ;;  %v7582_v61 = vrot.slane %v7581_v49, 4  ;;  %v8548_v12 = vrot.slane %v8546_v21, 4  ;;  %v8554_v50 = vrot.slane %v8552_v38, 5  ;;  %v7311_v17 = vld [vmem:[#allocation2 + $0x98] sm:$0x1] }
 0x3fa   : > { %v7577_v13 = vsel %vm13311_vm11, %v7572_v14, %v7576_v25  ;;  %v8539_v23 = vor.u32 %v8538_v39, %v8535_v41  ;;  %v7963_v32 = vrot.slane %v7822_v47, 5  ;;  %v7966_v40 = vrot.slane %v7823_v19, 5  ;;  %v8256_v4 = vld [vmem:[#allocation2 + $0xa8] sm:$0xf]  ;;  %v8257_v25 = vld [vmem:[#allocation2 + $0xac] sm:$0xf] }
 0x3fb   : > { %v11981_v54 = vadd.f32 %v15370_v63, %v15364_v29  ;;  %v7587_v33 = vsel %vm13311_vm11, %v7582_v61, %v7586_v20  ;;  %v8549_v57 = vor.u32 %v8548_v12, %v8544_v48  ;;  %v12093_v62 = vadd.f32 %v15509_v51, %v15507_v7  ;;  %v12838_v24 = vld [vmem:[#allocation2 + $0x9c] sm:$0xff]  }
 0x3fc   : > { %v11984_v53 = vadd.f32 %v15392_v9, %v15387_v45  ;;  %v11246_v42 = vcombine.low %v7577_v13, %v7587_v33  ;;  %v8540_v35 = vrot.slane %v8539_v23, 4  ;;  %v7964_v56 = vsel %vm13342_vm14, %v11263_v15, %v7963_v32  ;;  %v7824_v49 = vld [vmem:[#allocation2 + $0x9c] sm:$0xe] }
 0x3fd   : > { %v7965_v59 = vrot.slane %v7963_v32, 4  ;;  %v8550_v16 = vrot.slane %v8549_v57, 4  ;;  %v15632_v29 = vadd.f32 %v12093_v62, %v11981_v54  ;;  %v12096_v63 = vadd.f32 %v15521_v60, %v15515_v6  ;;  %v8258_v60 = vld [vmem:[#allocation2 + $0xb0] sm:$0x1] }
 0x3fe   : > { %v7589_v11 = vshrl.u32 %v7309_v3, 16  ;;  %10175 = vmatmul.mubr.bf16.gmra.mrb[232].mxu1 %v11246_v42  ;;  %v8545_v7 = vsel %vm13311_vm11, %v8540_v35, %v8544_v48  ;;  %v7592_v9 = vshll.u32 %v7309_v3, 16  ;;  %v7598_v51 = vshll.u32 %v7310_v43, 16  ;;  %v7825_v48 = vld [vmem:[#allocation2 + $0xa0] sm:$0xf] }
 0x3ff   : > { %v7967_v45 = vsel %vm13342_vm14, %v7965_v59, %v7966_v40  ;;  %v8555_v5 = vsel %vm13311_vm11, %v8550_v16, %v8554_v50  ;;  %v15642_v19 = vadd.f32 %v12096_v63, %v11984_v53  ;;  %v7602_v14 = vshrl.u32 %v7310_v43, 16  ;;  %v7826_v50 = vld [vmem:[#allocation2 + $0xa4] sm:$0x1] }
 0x400   : > { %v11279_v47 = vcombine.low %v7964_v56, %v7967_v45  ;;  %v7591_v6 = vrot.slane %v7589_v11, 4  ;;  %v11311_v20 = vcombine.low %v8545_v7, %v8555_v5  ;;  %v7594_v8 = vrot.slane %v7592_v9, 5 }
 0x401   : > { %v7600_v55 = vrot.slane %v7598_v51, 5  ;;  %v7608_v21 = vshll.u32 %v7311_v17, 16  ;;  %v8557_v38 = vshrl.u32 %v8256_v4, 16  ;;  %v8560_v41 = vshll.u32 %v8256_v4, 16  ;;  %v7312_v51 = vld [vmem:[#allocation2 + $0x9c] sm:$0xf] }
 0x402   : > { %10182 = vmatprep.mubr.bf16.mxu1 %v11279_v47  ;;  %v8566_v39 = vshll.u32 %v8257_v25, 16  ;;  %10343 = vmatprep.mubr.bf16.mxu0 %v11311_v20  ;;  %v7595_v15 = vor.u32 %v7594_v8, %v7591_v6  ;;  %v7604_v13 = vrot.slane %v7602_v14, 4  ;;  %v8570_v61 = vshrl.u32 %v8257_v25, 16  ;;  %v7313_v47 = vld [vmem:[#allocation2 + $0xa0] sm:$0xf] }
 0x403   : > { %v8576_v12 = vshll.u32 %v8258_v60, 16  ;;  %10344 = vmatmul.mubr.bf16.gmra.mrb[12].mxu0 %v12838_v24  ;;  %v7610_v23 = vrot.slane %v7608_v21, 5  ;;  %v8559_v32 = vrot.slane %v8557_v38, 4  ;;  %v8562_v40 = vrot.slane %v8560_v41, 5  ;;  %v7314_v24 = vld [vmem:[#allocation2 + $0xa4] sm:$0x1] }
 0x404   : > { %v8568_v54 = vrot.slane %v8566_v39, 5  ;;  %v7596_v3 = vrot.slane %v7595_v15, 4  ;;  %v7605_v33 = vor.u32 %v7604_v13, %v7600_v55  ;;  %v8572_v57 = vrot.slane %v8570_v61, 4  ;;  %v8259_v8 = vld [vmem:[#allocation2 + $0xb4] sm:$0xf] }
 0x405   : > { %v8578_v62 = vrot.slane %v8576_v12, 5  ;;  %v8563_v53 = vor.u32 %v8562_v40, %v8559_v32  ;;  %v11264_v43 = vrot.slane %v7824_v49, 9  ;;  %v7970_v42 = vrot.slane %v7825_v48, 5  ;;  %v15648_v17 = vpop.f32.mrb[140].mxu1  ;;  %v8260_v49 = vld [vmem:[#allocation2 + $0xb8] sm:$0xf] }
 0x406   : > { %v7973_v35 = vrot.slane %v7826_v50, 5  ;;  %v7601_v56 = vsel %vm13311_vm11, %v7596_v3, %v7600_v55  ;;  %v7606_v59 = vrot.slane %v7605_v33, 4  ;;  %v8573_v16 = vor.u32 %v8572_v57, %v8568_v54  ;;  %v15654_v4 = vpop.f32.mrb[141].mxu1  ;;  %v8261_v21 = vld [vmem:[#allocation2 + $0xbc] sm:$0x1]  ;;  %v12839_v12 = vld [vmem:[#allocation2 + $0xa8] sm:$0xff]  }
 0x407   : > { %v12099_v63 = vadd.f32 %v15576_v26, %v15570_v37  ;;  %v8564_v11 = vrot.slane %v8563_v53, 4  ;;  %v7971_v7 = vsel %vm13342_vm14, %v11264_v43, %v7970_v42  ;;  %v7972_v45 = vrot.slane %v7970_v42, 4  ;;  %v15662_v6 = vpop.f32.mrb[142].mxu1  ;;  %v7827_v13 = vld [vmem:[#allocation2 + $0xa8] sm:$0xe] }
 0x408   : > { %v11987_v9 = vadd.f32 %v15586_v2, %v15582_v10  ;;  %v7611_v25 = vsel %vm13311_vm11, %v7606_v59, %v7610_v23  ;;  %v8574_v5 = vrot.slane %v8573_v16, 4  ;;  %v12102_v37 = vadd.f32 %v15584_v44, %v15580_v30  ;;  %v15672_v30 = vpop.f32.mrb[143].mxu1  ;;  %v7828_v53 = vld [vmem:[#allocation2 + $0xac] sm:$0xf]  ;;  %v7829_v59 = vld [vmem:[#allocation2 + $0xb0] sm:$0x1] }
 0x409   : > { %v11990_v26 = vadd.f32 %v15590_v18, %v15588_v34  ;;  %v11247_v60 = vcombine.low %v7601_v56, %v7611_v25  ;;  %v8569_v10 = vsel %vm13311_vm11, %v8564_v11, %v8568_v54  ;;  %v7974_v2 = vsel %vm13342_vm14, %v7972_v45, %v7973_v35  ;;  %v15670_v55 = vpop.f32.mrb[172].mxu0 }
 0x40a   : > { %v15668_v20 = vadd.f32 %v12099_v63, %v11987_v9  ;;  %v8579_v44 = vsel %vm13311_vm11, %v8574_v5, %v8578_v62  ;;  %v11280_v34 = vcombine.low %v7971_v7, %v7974_v2  ;;  %v7613_v14 = vshrl.u32 %v7312_v51, 16  ;;  %v15678_v38 = vpop.f32.mrb[173].mxu0 }
 0x40b   : > { %v15676_v18 = vadd.f32 %v12102_v37, %v11990_v26  ;;  %10183 = vmatmul.mubr.bf16.gmra.mrb[236].mxu1 %v11247_v60  ;;  %v11312_v41 = vcombine.low %v8569_v10, %v8579_v44  ;;  %v7616_v39 = vshll.u32 %v7312_v51, 16  ;;  %v7622_v48 = vshll.u32 %v7313_v47, 16  ;;  %v15680_v61 = vpop.f32.mrb[174].mxu0 }
 0x40c   : > { %v7626_v15 = vshrl.u32 %v7313_v47, 16  ;;  %10190 = vmatprep.mubr.bf16.mxu1 %v11280_v34  ;;  %v7615_v50 = vrot.slane %v7613_v14, 4  ;;  %v7632_v23 = vshll.u32 %v7314_v24, 16  ;;  %v8581_v32 = vshrl.u32 %v8259_v8, 16  ;;  %v15682_v54 = vpop.f32.mrb[175].mxu0 }
 0x40d   : > { %v8584_v40 = vshll.u32 %v8259_v8, 16  ;;  %10351 = vmatprep.mubr.bf16.mxu0 %v11312_v41  ;;  %v7618_v3 = vrot.slane %v7616_v39, 5  ;;  %v7624_v33 = vrot.slane %v7622_v48, 5  ;;  %v8590_v62 = vshll.u32 %v8260_v49, 16 }
 0x40e   : > { %v7628_v57 = vrot.slane %v7626_v15, 4  ;;  %10352 = vmatmul.mubr.bf16.gmra.mrb[16].mxu0 %v12839_v12  ;;  %v7634_v43 = vrot.slane %v7632_v23, 5  ;;  %v8583_v42 = vrot.slane %v8581_v32, 4  ;;  %v8594_v56 = vshrl.u32 %v8260_v49, 16  ;;  %v7315_v49 = vld [vmem:[#allocation2 + $0xa8] sm:$0xf] }
 0x40f   : > { %v8586_v35 = vrot.slane %v8584_v40, 5  ;;  %v7619_v16 = vor.u32 %v7618_v3, %v7615_v50  ;;  %v8592_v11 = vrot.slane %v8590_v62, 5  ;;  %v8600_v7 = vshll.u32 %v8261_v21, 16  ;;  %v7316_v21 = vld [vmem:[#allocation2 + $0xac] sm:$0xf] }
 0x410   : > { %v7629_v63 = vor.u32 %v7628_v57, %v7624_v33  ;;  %v8596_v9 = vrot.slane %v8594_v56, 4  ;;  %v11265_v51 = vrot.slane %v7827_v13, 9  ;;  %v7977_v25 = vrot.slane %v7828_v53, 5  ;;  %v7317_v13 = vld [vmem:[#allocation2 + $0xb0] sm:$0x1] }
 0x411   : > { %v8587_v45 = vor.u32 %v8586_v35, %v8583_v42  ;;  %v7620_v5 = vrot.slane %v7619_v16, 4  ;;  %v8602_v26 = vrot.slane %v8600_v7, 5  ;;  %v7980_v47 = vrot.slane %v7829_v59, 5  ;;  %v8264_v23 = vld [vmem:[#allocation2 + $0xc8] sm:$0x1] }
 0x412   : > { %v7630_v37 = vrot.slane %v7629_v63, 4  ;;  %v8597_v10 = vor.u32 %v8596_v9, %v8592_v11  ;;  %v7978_v2 = vsel %vm13342_vm14, %v11265_v51, %v7977_v25  ;;  %v7979_v24 = vrot.slane %v7977_v25, 4  ;;  %v7830_v57 = vld [vmem:[#allocation2 + $0xb4] sm:$0xe]  ;;  %v7831_v42 = vld [vmem:[#allocation2 + $0xb8] sm:$0xf] }
 0x413   : > { %v8588_v60 = vrot.slane %v8587_v45, 4  ;;  %v7625_v8 = vsel %vm13311_vm11, %v7620_v5, %v7624_v33  ;;  %v12105_v34 = vadd.f32 %v15610_v0, %v15606_v58  ;;  %v11993_v14 = vadd.f32 %v15608_v22, %v15604_v28  ;;  %v8262_v22 = vld [vmem:[#allocation2 + $0xc0] sm:$0xf]  ;;  %v8263_v0 = vld [vmem:[#allocation2 + $0xc4] sm:$0xf] }
 0x414   : > { %v7635_v44 = vsel %vm13311_vm11, %v7630_v37, %v7634_v43  ;;  %v8598_v48 = vrot.slane %v8597_v10, 4  ;;  %v7981_v15 = vsel %vm13342_vm14, %v7979_v24, %v7980_v47  ;;  %v12108_v58 = vadd.f32 %v15620_v46, %v15614_v52  ;;  %v12841_v43 = vld [vmem:[#allocation2 + $0xb4] sm:$0xff]   ;;  %v7832_v16 = vld [vmem:[#allocation2 + $0xbc] sm:$0x1] }
 0x415   : > { %v11248_v41 = vcombine.low %v7625_v8, %v7635_v44  ;;  %v8593_v39 = vsel %vm13311_vm11, %v8588_v60, %v8592_v11  ;;  %v11281_v12 = vcombine.low %v7978_v2, %v7981_v15  ;;  %v15698_v50 = vadd.f32 %v12105_v34, %v11993_v14 }
 0x416   : > { %v11996_v28 = vadd.f32 %v15616_v36, %v15612_v31  ;;  %v8603_v32 = vsel %vm13311_vm11, %v8598_v48, %v8602_v26  ;;  %v7637_v40 = vshrl.u32 %v7315_v49, 16  ;;  %v7640_v3 = vshll.u32 %v7315_v49, 16 }
 0x417   : > { %10191 = vmatmul.mubr.bf16.gmra.mrb[240].mxu1 %v11248_v41  ;;  %v7646_v33 = vshll.u32 %v7316_v21, 16  ;;  %v11313_v62 = vcombine.low %v8593_v39, %v8603_v32  ;;  %v7650_v52 = vshrl.u32 %v7316_v21, 16  ;;  %v7656_v46 = vshll.u32 %v7317_v13, 16  ;;  %v15708_v31 = vpop.f32.mrb[144].mxu1 }
 0x418   : > { %10198 = vmatprep.mubr.bf16.mxu1 %v11281_v12  ;;  %v15706_v53 = vadd.f32 %v12108_v58, %v11996_v28  ;;  %v7639_v36 = vrot.slane %v7637_v40, 4  ;;  %v7642_v35 = vrot.slane %v7640_v3, 5  ;;  %v8605_v59 = vshrl.u32 %v8262_v22, 16  ;;  %v15710_v63 = vpop.f32.mrb[176].mxu0  ;;  %v15712_v11 = vpop.f32.mrb[145].mxu1 }
 0x419   : > { %v7648_v56 = vrot.slane %v7646_v33, 5  ;;  %10359 = vmatprep.mubr.bf16.mxu0 %v11313_v62  ;;  %v7652_v7 = vrot.slane %v7650_v52, 4  ;;  %v7658_v45 = vrot.slane %v7656_v46, 5  ;;  %v8608_v9 = vshll.u32 %v8262_v22, 16  ;;  %v15714_v25 = vpop.f32.mrb[177].mxu0  ;;  %v15716_v5 = vpop.f32.mrb[146].mxu1 }
 0x41a   : > { %v8614_v51 = vshll.u32 %v8263_v0, 16  ;;  %10360 = vmatmul.mubr.bf16.gmra.mrb[20].mxu0 %v12841_v43  ;;  %v7643_v37 = vor.u32 %v7642_v35, %v7639_v36  ;;  %v8607_v26 = vrot.slane %v8605_v59, 4  ;;  %v8618_v47 = vshrl.u32 %v8263_v0, 16  ;;  %v15718_v10 = vpop.f32.mrb[178].mxu0  ;;  %v15720_v2 = vpop.f32.mrb[147].mxu1 }
 0x41b   : > { %v8624_v60 = vshll.u32 %v8264_v23, 16  ;;  %v7653_v24 = vor.u32 %v7652_v7, %v7648_v56  ;;  %v8610_v8 = vrot.slane %v8608_v9, 5  ;;  %v11266_v34 = vrot.slane %v7830_v57, 9  ;;  %v15722_v14 = vpop.f32.mrb[179].mxu0  ;;  %v7318_v23 = vld [vmem:[#allocation2 + $0xb4] sm:$0xf] }
 0x41c   : > { %v8616_v44 = vrot.slane %v8614_v51, 5  ;;  %v7644_v49 = vrot.slane %v7643_v37, 4  ;;  %v8620_v21 = vrot.slane %v8618_v47, 4  ;;  %v7984_v39 = vrot.slane %v7831_v42, 5  ;;  %v7320_v52 = vld [vmem:[#allocation2 + $0xbc] sm:$0x1] }
 0x41d   : > { %v8626_v41 = vrot.slane %v8624_v60, 5  ;;  %v7654_v48 = vrot.slane %v7653_v24, 4  ;;  %v8611_v15 = vor.u32 %v8610_v8, %v8607_v26  ;;  %v7987_v13 = vrot.slane %v7832_v16, 5  ;;  %v7835_v16 = vld [vmem:[#allocation2 + $0xc8] sm:$0x1]  ;;  %v12842_v9 = vld [vmem:[#allocation2 + $0xc0] sm:$0xff]  }
 0x41e   : > { %v12111_v12 = vadd.f32 %v15678_v38, %v15670_v55  ;;  %v7649_v58 = vsel %vm13311_vm11, %v7644_v49, %v7648_v56  ;;  %v8621_v28 = vor.u32 %v8620_v21, %v8616_v44  ;;  %v7985_v22 = vsel %vm13342_vm14, %v11266_v34, %v7984_v39  ;;  %v7319_v55 = vld [vmem:[#allocation2 + $0xb8] sm:$0xf]  ;;  %v7321_v34 = vld [vmem:[#allocation2 + $0xc0] sm:$0xf] }
 0x41f   : > { %v7986_v0 = vrot.slane %v7984_v39, 4  ;;  %v7659_v32 = vsel %vm13311_vm11, %v7654_v48, %v7658_v45  ;;  %v8612_v40 = vrot.slane %v8611_v15, 4  ;;  %v11999_v3 = vadd.f32 %v15654_v4, %v15648_v17 }
 0x420   : > { %v12114_v33 = vadd.f32 %v15682_v54, %v15680_v61  ;;  %v11249_v38 = vcombine.low %v7649_v58, %v7659_v32  ;;  %v8622_v57 = vrot.slane %v8621_v28, 4  ;;  %v12002_v43 = vadd.f32 %v15672_v30, %v15662_v6  ;;  %v15740_v46 = vpop.f32.mrb[180].mxu0  ;;  %v7833_v61 = vld [vmem:[#allocation2 + $0xc0] sm:$0xe]  ;;  %v7834_v54 = vld [vmem:[#allocation2 + $0xc4] sm:$0xf] }
 0x421   : > { %v7988_v62 = vsel %vm13342_vm14, %v7986_v0, %v7987_v13  ;;  %v8617_v42 = vsel %vm13311_vm11, %v8612_v40, %v8616_v44  ;;  %v15744_v17 = vadd.f32 %v12111_v12, %v11999_v3  ;;  %v7661_v4 = vshrl.u32 %v7318_v23, 16  ;;  %v15746_v35 = vpop.f32.mrb[181].mxu0  ;;  %v7322_v40 = vld [vmem:[#allocation2 + $0xc4] sm:$0xf] }
 0x422   : > { %v11282_v36 = vcombine.low %v7985_v22, %v7988_v62  ;;  %10199 = vmatmul.mubr.bf16.gmra.mrb[244].mxu1 %v11249_v38  ;;  %v8627_v56 = vsel %vm13311_vm11, %v8622_v57, %v8626_v41  ;;  %v15750_v59 = vadd.f32 %v12114_v33, %v12002_v43  ;;  %v7664_v6 = vshll.u32 %v7318_v23, 16  ;;  %v15752_v7 = vpop.f32.mrb[182].mxu0 }
 0x423   : > { %v7670_v30 = vshll.u32 %v7319_v55, 16  ;;  %v11314_v45 = vcombine.low %v8617_v42, %v8627_v56  ;;  %v7663_v51 = vrot.slane %v7661_v4, 4  ;;  %v7674_v37 = vshrl.u32 %v7319_v55, 16  ;;  %v15754_v47 = vpop.f32.mrb[148].mxu1  ;;  %v15756_v60 = vpop.f32.mrb[183].mxu0 }
 0x424   : > { %10206 = vmatprep.mubr.bf16.mxu1 %v11282_v36  ;;  %v7680_v26 = vshll.u32 %v7320_v52, 16  ;;  %v7666_v24 = vrot.slane %v7664_v6, 5  ;;  %v7991_v44 = vrot.slane %v7834_v54, 5  ;;  %v15758_v49 = vpop.f32.mrb[149].mxu1  ;;  %v11267_v39 = vrot.slane %v7833_v61, 9 }
 0x425   : > { %v7672_v8 = vrot.slane %v7670_v30, 5  ;;  %10367 = vmatprep.mubr.bf16.mxu0 %v11314_v45  ;;  %v7676_v21 = vrot.slane %v7674_v37, 4  ;;  %v12117_v48 = vadd.f32 %v15714_v25, %v15710_v63  ;;  %v15762_v15 = vpop.f32.mrb[150].mxu1  ;;  %v7994_v58 = vrot.slane %v7835_v16, 5  ;;  %v7323_v63 = vld [vmem:[#allocation2 + $0xc8] sm:$0x1] }
 0x426   : > { %v7682_v41 = vrot.slane %v7680_v26, 5  ;;  %10368 = vmatmul.mubr.bf16.gmra.mrb[24].mxu0 %v12842_v9  ;;  %v7667_v13 = vor.u32 %v7666_v24, %v7663_v51  ;;  %v7993_v12 = vrot.slane %v7991_v44, 4  ;;  %v12005_v28 = vadd.f32 %v15712_v11, %v15708_v31  ;;  %v15766_v22 = vpop.f32.mrb[151].mxu1  ;;  %v8265_v31 = vld [vmem:[#allocation2 + $0xcc] sm:$0xf] }
 0x427   : > { %v7677_v0 = vor.u32 %v7676_v21, %v7672_v8  ;;  %v12120_v23 = vadd.f32 %v15722_v14, %v15718_v10  ;;  %v12008_v32 = vadd.f32 %v15720_v2, %v15716_v5  ;;  %v7685_v25 = vshrl.u32 %v7321_v34, 16  ;;  %v8266_v2 = vld [vmem:[#allocation2 + $0xd0] sm:$0xf]  ;;  %v8267_v4 = vld [vmem:[#allocation2 + $0xd4] sm:$0x1] }
 0x428   : > { %v7668_v3 = vrot.slane %v7667_v13, 4  ;;  %v7992_v33 = vsel %vm13342_vm14, %v11267_v39, %v7991_v44  ;;  %v15774_v55 = vadd.f32 %v12117_v48, %v12005_v28  ;;  %v7688_v38 = vshll.u32 %v7321_v34, 16  ;;  %v15776_v11 = vpop.f32.mrb[184].mxu0  ;;  %v8733_v24 = vld [vmem:[#allocation2 + $0x1c] sm:$0xf] }
 0x429   : > { %v7678_v57 = vrot.slane %v7677_v0, 4  ;;  %v7995_v10 = vsel %vm13342_vm14, %v7993_v12, %v7994_v58  ;;  %v15780_v14 = vadd.f32 %v12120_v23, %v12008_v32  ;;  %v7687_v5 = vrot.slane %v7685_v25, 4  ;;  %v15782_v62 = vpop.f32.mrb[185].mxu0  ;;  %v8732_v48 = vld [vmem:[#allocation2 + $0x18] sm:$0xe] }
 0x42a   : > { %v7673_v43 = vsel %vm13311_vm11, %v7668_v3, %v7672_v8  ;;  %v7690_v52 = vrot.slane %v7688_v38, 5  ;;  %v7694_v42 = vshll.u32 %v7322_v40, 16  ;;  %v7698_v36 = vshrl.u32 %v7322_v40, 16  ;;  %v15786_v61 = vpop.f32.mrb[186].mxu0  ;;  %v8734_v0 = vld [vmem:[#allocation2 + $0x20] sm:$0x1] }
 0x42b   : > { %v7683_v54 = vsel %vm13311_vm11, %v7678_v57, %v7682_v41  ;;  %v7704_v56 = vshll.u32 %v7323_v63, 16  ;;  %v8629_v6 = vshrl.u32 %v8265_v31, 16  ;;  %v8632_v30 = vshll.u32 %v8265_v31, 16  ;;  %v15790_v16 = vpop.f32.mrb[152].mxu1  ;;  %v15792_v45 = vpop.f32.mrb[187].mxu0 }
 0x42c   : > { %v11250_v9 = vcombine.low %v7673_v43, %v7683_v54  ;;  %v7691_v51 = vor.u32 %v7690_v52, %v7687_v5  ;;  %v7696_v37 = vrot.slane %v7694_v42, 5  ;;  %v7700_v26 = vrot.slane %v7698_v36, 4  ;;  %v15794_v8 = vpop.f32.mrb[153].mxu1 }
 0x42d   : > { %v11283_v44 = vcombine.low %v7992_v33, %v7995_v10  ;;  %v8631_v34 = vrot.slane %v8629_v6, 4  ;;  %v8634_v21 = vrot.slane %v8632_v30, 5  ;;  %v8638_v39 = vshll.u32 %v8266_v2, 16  ;;  %v15796_v41 = vpop.f32.mrb[154].mxu1 }
 0x42e   : > { %10207 = vmatmul.mubr.bf16.gmra.mrb[248].mxu1 %v11250_v9  ;;  %v7692_v13 = vrot.slane %v7691_v51, 4  ;;  %v7701_v12 = vor.u32 %v7700_v26, %v7696_v37  ;;  %v8642_v58 = vshrl.u32 %v8266_v2, 16  ;;  %v8648_v28 = vshll.u32 %v8267_v4, 16  ;;  %v12019_v23 = vpop.f32.mrb[155].mxu1  ;;  %v8735_v26 = vld [vmem:[#allocation2 + $0x24] sm:$0xe] }
 0x42f   : > { %10214 = vmatprep.mubr.bf16.mxu1 %v11283_v44  ;;  %v7706_v32 = vrot.slane %v7704_v56, 5  ;;  %v8635_v40 = vor.u32 %v8634_v21, %v8631_v34  ;;  %v8640_v63 = vrot.slane %v8638_v39, 5  ;;  %v8830_v25 = vrot.slane %v8733_v24, 5  ;;  %v8736_v56 = vld [vmem:[#allocation2 + $0x28] sm:$0xf] }
 0x430   : > { %v7697_v3 = vsel %vm13311_vm11, %v7692_v13, %v7696_v37  ;;  %v7702_v33 = vrot.slane %v7701_v12, 4  ;;  %v8644_v38 = vrot.slane %v8642_v58, 4  ;;  %v11316_v31 = vrot.slane %v8732_v48, 9  ;;  %v15800_v57 = vpop.f32.mrb[188].mxu0  ;;  %v8739_v24 = vld [vmem:[#allocation2 + $0x34] sm:$0xf] }
 0x431   : > { %v8636_v10 = vrot.slane %v8635_v40, 4  ;;  %v8650_v5 = vrot.slane %v8648_v28, 5  ;;  %v8832_v43 = vrot.slane %v8830_v25, 4  ;;  %v8833_v2 = vrot.slane %v8734_v0, 5  ;;  %v15802_v52 = vpop.f32.mrb[189].mxu0  ;;  %v12844_v28 = vld [vmem:[#allocation2 + $0xcc] sm:$0xff]  }
 0x432   : > { %v7707_v42 = vsel %vm13311_vm11, %v7702_v33, %v7706_v32  ;;  %v8645_v36 = vor.u32 %v8644_v38, %v8640_v63  ;;  %v12123_v4 = vadd.f32 %v15746_v35, %v15740_v46  ;;  %v12011_v54 = vadd.f32 %v15758_v49, %v15754_v47  ;;  %v15810_v6 = vpop.f32.mrb[190].mxu0  ;;  %v8737_v21 = vld [vmem:[#allocation2 + $0x2c] sm:$0x1]  ;;  %v8738_v12 = vld [vmem:[#allocation2 + $0x30] sm:$0xe] }
 0x433   : > { %v11251_v30 = vcombine.low %v7697_v3, %v7707_v42  ;;  %v8831_v9 = vsel %vm13342_vm14, %v11316_v31, %v8830_v25  ;;  %v8834_v51 = vsel %vm13342_vm14, %v8832_v43, %v8833_v2  ;;  %v12126_v37 = vadd.f32 %v15756_v60, %v15752_v7  ;;  %v12021_v44 = vpop.f32.mrb[156].mxu1  ;;  %v12137_v46 = vpop.f32.mrb[191].mxu0  ;;  %v8740_v58 = vld [vmem:[#allocation2 + $0x38] sm:$0x1] }
 0x434   : > { %v8641_v35 = vsel %vm13311_vm11, %v8636_v10, %v8640_v63  ;;  %v8646_v47 = vrot.slane %v8645_v36, 4  ;;  %v15820_v49 = vadd.f32 %v12123_v4, %v12011_v54  ;;  %v12014_v34 = vadd.f32 %v15766_v22, %v15762_v15  ;;  %v12022_v39 = vpop.f32.mrb[157].mxu1  ;;  %v15828_v63 = vld [vmem:[#allocation2 + $0x40] sm:$0xf]  ;;  %v8745_v4 = vld [vmem:[#allocation2 + $0x4c] sm:$0xf] }
 0x435   : > { %v11332_v48 = vcombine.low %v8831_v9, %v8834_v51  ;;  %v8837_v13 = vrot.slane %v8736_v56, 5  ;;  %v12024_v7 = vpop.f32.mrb[158].mxu1  ;;  %v11317_v32 = vrot.slane %v8735_v26, 9  ;;  %v8844_v40 = vrot.slane %v8739_v24, 5  ;;  %v8743_v9 = vld [vmem:[#allocation2 + $0x44] sm:$0x1] }
 0x436   : > { %10215 = vmatmul.mubr.bf16.gmra.mrb[252].mxu1 %v11251_v30  ;;  %v8651_v60 = vsel %vm13311_vm11, %v8646_v47, %v8650_v5  ;;  %v15826_v0 = vadd.f32 %v12126_v37, %v12014_v34  ;;  %v12025_v25 = vpop.f32.mrb[159].mxu1  ;;  %v8840_v3 = vrot.slane %v8737_v21, 5  ;;  %v12129_v33 = vadd.f32 %v15782_v62, %v15776_v11  ;;  %v8741_v24 = vld [vmem:[#allocation2 + $0x3c] sm:$0xe]  ;;  %v8746_v47 = vld [vmem:[#allocation2 + $0x50] sm:$0x1] }
 0x437   : > { %v11315_v15 = vcombine.low %v8641_v35, %v8651_v60  ;;  %12499 = vmatprep.mubr.bf16.mxu1 %v11332_v48  ;;  %v8839_v22 = vrot.slane %v8837_v13, 4  ;;  %v8846_v38 = vrot.slane %v8844_v40, 4  ;;  %v8847_v31 = vrot.slane %v8740_v58, 5  ;;  %v8748_v60 = vld [vmem:[#allocation2 + $0x58] sm:$0xf] }
 0x438   : > { %v12017_v27 = vadd.f32 %v15794_v8, %v15790_v16  ;;  %v12132_v10 = vadd.f32 %v15792_v45, %v15786_v61  ;;  %v12139_v5 = vpop.f32.mrb[192].mxu0  ;;  %v11318_v2 = vrot.slane %v8738_v12, 9  ;;  %v12020_v42 = vadd.f32 %v12019_v23, %v15796_v41  ;;  %v8744_v12 = vld [vmem:[#allocation2 + $0x48] sm:$0xe] }
 0x439   : > { %10375 = vmatprep.mubr.bf16.mxu0 %v11315_v15  ;;  %v8841_v43 = vsel %vm13342_vm14, %v8839_v22, %v8840_v3  ;;  %v8851_v36 = vrot.slane %v15828_v63, 5  ;;  %v12140_v11 = vpop.f32.mrb[193].mxu0  ;;  %v8848_v62 = vsel %vm13342_vm14, %v8846_v38, %v8847_v31  ;;  %v8838_v61 = vsel %vm13342_vm14, %v11317_v32, %v8837_v13 }
 0x43a   : > { %10376 = vmatmul.mubr.bf16.gmra.mrb[28].mxu0 %v12844_v28  ;;  %v15842_v16 = vadd.f32 %v12129_v33, %v12017_v27  ;;  %v12142_v8 = vpop.f32.mrb[194].mxu0  ;;  %v8845_v45 = vsel %vm13342_vm14, %v11318_v2, %v8844_v40  ;;  %v15848_v54 = vadd.f32 %v12132_v10, %v12020_v42  ;;  %v11333_v56 = vcombine.low %v8838_v61, %v8841_v43 }
 0x43b   : > { %v12027_v41 = vpop.f32.mrb[160].mxu1  ;;  %v12143_v23 = vpop.f32.mrb[195].mxu0  ;;  %v11334_v30 = vcombine.low %v8845_v45, %v8848_v62  ;;  %v8858_v51 = vrot.slane %v8745_v4, 5  ;;  %v12135_v37 = vadd.f32 %v15802_v52, %v15800_v57  ;;  %v8853_v35 = vrot.slane %v8851_v36, 4  ;;  %v8751_v57 = vld [vmem:[#allocation2 + $0x64] sm:$0xf] }
 0x43c   : > { %v12028_v26 = vpop.f32.mrb[161].mxu1  ;;  %v12023_v34 = vadd.f32 %v12022_v39, %v12021_v44  ;;  %v12138_v21 = vadd.f32 %v12137_v46, %v15810_v6  ;;  %v12026_v48 = vadd.f32 %v12025_v25, %v12024_v7  ;;  %v8854_v32 = vrot.slane %v8743_v9, 5  ;;  %v8749_v62 = vld [vmem:[#allocation2 + $0x5c] sm:$0x1]  ;;  %v8747_v45 = vld [vmem:[#allocation2 + $0x54] sm:$0xe] }
 0x43d   : > { %v12030_v13 = vpop.f32.mrb[162].mxu1  ;;  %v8860_v58 = vrot.slane %v8858_v51, 4  ;;  %v11319_v52 = vrot.slane %v8741_v24, 9  ;;  %v8861_v15 = vrot.slane %v8746_v47, 5  ;;  %v11320_v44 = vrot.slane %v8744_v12, 9 }
 0x43e   : > { %12500 = vmatmul.mubr.bf16.vlgmr.msra.gmra.mrb[0].mxu1 %v11333_v56  ;;  %v12031_v28 = vpop.f32.mrb[163].mxu1  ;;  %v15853_v40 = vadd.f32 %v12135_v37, %v12023_v34  ;;  %v15855_v63 = vadd.f32 %v12138_v21, %v12026_v48  ;;  %v8855_v6 = vsel %vm13342_vm14, %v8853_v35, %v8854_v32  ;;  %v8865_v46 = vrot.slane %v8748_v60, 5  ;;  %v8750_v24 = vld [vmem:[#allocation2 + $0x60] sm:$0xe] }
 0x43f   : > { %12503 = vmatprep.mubr.bf16.mxu1 %v11334_v30  ;;  %v12141_v39 = vadd.f32 %v12140_v11, %v12139_v5  ;;  %v8862_v25 = vsel %vm13342_vm14, %v8860_v58, %v8861_v15  ;;  %v8872_v3 = vrot.slane %v8751_v57, 5  ;;  %v12029_v33 = vadd.f32 %v12028_v26, %v12027_v41  ;;  %v8752_v41 = vld [vmem:[#allocation2 + $0x68] sm:$0x1]  ;;  %v8754_v30 = vld [vmem:[#allocation2 + $0x70] sm:$0xf] }
 0x440   : > { %v12145_v22 = vpop.f32.mrb[196].mxu0  ;;  %v12144_v38 = vadd.f32 %v12143_v23, %v12142_v8  ;;  %v8852_v27 = vsel %vm13342_vm14, %v11319_v52, %v8851_v36  ;;  %v12032_v10 = vadd.f32 %v12031_v28, %v12030_v13  ;;  %v8859_v4 = vsel %vm13342_vm14, %v11320_v44, %v8858_v51  ;;  %v8757_v51 = vld [vmem:[#allocation2 + $0x7c] sm:$0xf] }
 0x441   : > { %v12146_v7 = vpop.f32.mrb[197].mxu0  ;;  %v11335_v42 = vcombine.low %v8852_v27, %v8855_v6  ;;  %v15865_v5 = vadd.f32 %v12141_v39, %v12029_v33  ;;  %v11336_v61 = vcombine.low %v8859_v4, %v8862_v25  ;;  %v8867_v56 = vrot.slane %v8865_v46, 4 }
 0x442   : > { %v12148_v31 = vpop.f32.mrb[198].mxu0  ;;  %v15867_v8 = vadd.f32 %v12144_v38, %v12032_v10  ;;  %v8874_v36 = vrot.slane %v8872_v3, 4  ;;  %v12147_v9 = vadd.f32 %v12146_v7, %v12145_v22  ;;  %v8868_v26 = vrot.slane %v8749_v62, 5  ;;  %v8755_v38 = vld [vmem:[#allocation2 + $0x74] sm:$0x1] }
 0x443   : > { %v12033_v43 = vpop.f32.mrb[164].mxu1  ;;  %v12149_v2 = vpop.f32.mrb[199].mxu0  ;;  %v11321_v21 = vrot.slane %v8747_v45, 9  ;;  %v8875_v48 = vrot.slane %v8752_v41, 5  ;;  %v8879_v58 = vrot.slane %v8754_v30, 5  ;;  %v11322_v57 = vrot.slane %v8750_v24, 9 }
 0x444   : > { %v12034_v11 = vpop.f32.mrb[165].mxu1  ;;  %v12150_v47 = vadd.f32 %v12149_v2, %v12148_v31  ;;  %v8869_v12 = vsel %vm13342_vm14, %v8867_v56, %v8868_v26  ;;  %v8886_v15 = vrot.slane %v8757_v51, 5  ;;  %v8758_v2 = vld [vmem:[#allocation2 + $0x80] sm:$0x1]  ;;  %v8753_v62 = vld [vmem:[#allocation2 + $0x6c] sm:$0xe] }
 0x445   : > { %v12036_v23 = vpop.f32.mrb[166].mxu1  ;;  %v12035_v35 = vadd.f32 %v12034_v11, %v12033_v43  ;;  %v8876_v52 = vsel %vm13342_vm14, %v8874_v36, %v8875_v48  ;;  %v8866_v6 = vsel %vm13342_vm14, %v11321_v21, %v8865_v46  ;;  %v8873_v33 = vsel %vm13342_vm14, %v11322_v57, %v8872_v3  ;;  %v8756_v56 = vld [vmem:[#allocation2 + $0x78] sm:$0xe]  ;;  %v8763_v41 = vld [vmem:[#allocation2 + $0x94] sm:$0xf] }
 0x446   : > { %12504 = vmatmul.mubr.bf16.gmra.mrb[4].mxu1 %v11335_v42  ;;  %v12037_v37 = vpop.f32.mrb[167].mxu1  ;;  %v11337_v25 = vcombine.low %v8866_v6, %v8869_v12  ;;  %v11338_v10 = vcombine.low %v8873_v33, %v8876_v52  ;;  %v8881_v43 = vrot.slane %v8879_v58, 4  ;;  %v8888_v11 = vrot.slane %v8886_v15, 4 }
 0x447   : > { %12507 = vmatprep.mubr.bf16.mxu1 %v11336_v61  ;;  %v12038_v34 = vadd.f32 %v12037_v37, %v12036_v23  ;;  %v15871_v60 = vadd.f32 %v12147_v9, %v12035_v35  ;;  %v8760_v61 = vld [vmem:[#allocation2 + $0x88] sm:$0xf]  ;;  %v8882_v45 = vrot.slane %v8755_v38, 5  ;;  %v8889_v36 = vrot.slane %v8758_v2, 5  ;;  %v8762_v2 = vld [vmem:[#allocation2 + $0x90] sm:$0xe] }
 0x448   : > { %v12151_v13 = vpop.f32.mrb[200].mxu0  ;;  %v11323_v9 = vrot.slane %v8753_v62, 9  ;;  %v8893_v26 = vrot.slane %v8760_v61, 5  ;;  %v11324_v35 = vrot.slane %v8756_v56, 9 }
 0x449   : > { %v15873_v28 = vadd.f32 %v12150_v47, %v12038_v34  ;;  %v12152_v32 = vpop.f32.mrb[201].mxu0  ;;  %v8883_v37 = vsel %vm13342_vm14, %v8881_v43, %v8882_v45  ;;  %v8890_v47 = vsel %vm13342_vm14, %v8888_v11, %v8889_v36  ;;  %v8900_v34 = vrot.slane %v8763_v41, 5 }
 0x44a   : > { %v12154_v22 = vpop.f32.mrb[202].mxu0  ;;  %v12153_v39 = vadd.f32 %v12152_v32, %v12151_v13  ;;  %v8880_v13 = vsel %vm13342_vm14, %v11323_v9, %v8879_v58  ;;  %v8887_v52 = vsel %vm13342_vm14, %v11324_v35, %v8886_v15 }
 0x44b   : > { %v12039_v44 = vpop.f32.mrb[168].mxu1  ;;  %v12155_v7 = vpop.f32.mrb[203].mxu0  ;;  %v11339_v57 = vcombine.low %v8880_v13, %v8883_v37  ;;  %v8767_v13 = vld [vmem:[#allocation2 + $0xa4] sm:$0x1] }
 0x44c   : > { %v12040_v31 = vpop.f32.mrb[169].mxu1  ;;  %v12156_v27 = vadd.f32 %v12155_v7, %v12154_v22  ;;  %v8761_v22 = vld [vmem:[#allocation2 + $0x8c] sm:$0x1]  ;;  %v8895_v7 = vrot.slane %v8893_v26, 4 }
 0x44d   : > { %v12041_v42 = vadd.f32 %v12040_v31, %v12039_v44  ;;  %v12042_v4 = vpop.f32.mrb[170].mxu1  ;;  %v8759_v31 = vld [vmem:[#allocation2 + $0x84] sm:$0xe]  ;;  %v8896_v58 = vrot.slane %v8761_v22, 5  ;;  %v8770_v22 = vld [vmem:[#allocation2 + $0xb0] sm:$0x1] }
 0x44e   : > { %12508 = vmatmul.mubr.bf16.gmra.mrb[8].mxu1 %v11337_v25  ;;  %v12043_v46 = vpop.f32.mrb[171].mxu1  ;;  %v8764_v25 = vld [vmem:[#allocation2 + $0x98] sm:$0x1]  ;;  %v11325_v61 = vrot.slane %v8759_v31, 9  ;;  %v8775_v31 = vld [vmem:[#allocation2 + $0xc4] sm:$0xf] }
 0x44f   : > { %12511 = vmatprep.mubr.bf16.mxu1 %v11338_v10  ;;  %v15881_v23 = vadd.f32 %v12153_v39, %v12041_v42  ;;  %v12044_v3 = vadd.f32 %v12043_v46, %v12042_v4  ;;  %v11340_v39 = vcombine.low %v8887_v52, %v8890_v47  ;;  %v8766_v10 = vld [vmem:[#allocation2 + $0xa0] sm:$0xf]  ;;  %v8769_v42 = vld [vmem:[#allocation2 + $0xac] sm:$0xf]  ;;  %v8903_v62 = vrot.slane %v8764_v25, 5 }
 0x450   : > { %v12157_v30 = vpop.f32.mrb[204].mxu0  ;;  %v8897_v46 = vsel %vm13342_vm14, %v8895_v7, %v8896_v58  ;;  %v8907_v45 = vrot.slane %v8766_v10, 5  ;;  %v8772_v25 = vld [vmem:[#allocation2 + $0xb8] sm:$0xf]  ;;  %v8917_v10 = vrot.slane %v8770_v22, 5 }
 0x451   : > { %v15885_v24 = vadd.f32 %v12156_v27, %v12044_v3  ;;  %v12158_v51 = vpop.f32.mrb[205].mxu0  ;;  %v8902_v27 = vrot.slane %v8900_v34, 4  ;;  %v11326_v3 = vrot.slane %v8762_v2, 9 }
 0x452   : > { %v12159_v21 = vadd.f32 %v12158_v51, %v12157_v30  ;;  %v12160_v48 = vpop.f32.mrb[206].mxu0  ;;  %v8914_v30 = vrot.slane %v8769_v42, 5  ;;  %v8894_v51 = vsel %vm13342_vm14, %v11325_v61, %v8893_v26  ;;  %v8909_v52 = vrot.slane %v8907_v45, 4 }
 0x453   : > { %v12045_v12 = vpop.f32.mrb[172].mxu1  ;;  %v12161_v32 = vpop.f32.mrb[207].mxu0  ;;  %v8904_v36 = vsel %vm13342_vm14, %v8902_v27, %v8903_v62  ;;  %v8910_v26 = vrot.slane %v8767_v13, 5  ;;  %v8921_v42 = vrot.slane %v8772_v25, 5 }
 0x454   : > { %v12046_v6 = vpop.f32.mrb[173].mxu1  ;;  %v12162_v44 = vadd.f32 %v12161_v32, %v12160_v48  ;;  %v8901_v48 = vsel %vm13342_vm14, %v11326_v3, %v8900_v34  ;;  %v8916_v7 = vrot.slane %v8914_v30, 4 }
 0x455   : > { %v12047_v33 = vadd.f32 %v12046_v6, %v12045_v12  ;;  %v12048_v38 = vpop.f32.mrb[174].mxu1  ;;  %v8911_v2 = vsel %vm13342_vm14, %v8909_v52, %v8910_v26 }
 0x456   : > { %12512 = vmatmul.mubr.bf16.gmra.mrb[12].mxu1 %v11339_v57  ;;  %v12049_v43 = vpop.f32.mrb[175].mxu1  ;;  %v11342_v57 = vcombine.low %v8901_v48, %v8904_v36  ;;  %v8918_v61 = vsel %vm13342_vm14, %v8916_v7, %v8917_v10  ;;  %v8774_v7 = vld [vmem:[#allocation2 + $0xc0] sm:$0xe] }
 0x457   : > { %12515 = vmatprep.mubr.bf16.mxu1 %v11340_v39  ;;  %v15893_v4 = vadd.f32 %v12159_v21, %v12047_v33  ;;  %v12050_v15 = vadd.f32 %v12049_v43, %v12048_v38  ;;  %v11341_v21 = vcombine.low %v8894_v51, %v8897_v46  ;;  %v8765_v39 = vld [vmem:[#allocation2 + $0x9c] sm:$0xe]  ;;  %v8768_v38 = vld [vmem:[#allocation2 + $0xa8] sm:$0xe]  ;;  %v8928_v46 = vrot.slane %v8775_v31, 5 }
 0x458   : > { %v12163_v11 = vpop.f32.mrb[208].mxu0  ;;  %v11327_v58 = vrot.slane %v8765_v39, 9  ;;  %v8779_v31 = vld [vmem:[#allocation2 + $0xd4] sm:$0x1] }
 0x459   : > { %v15897_v56 = vadd.f32 %v12162_v44, %v12050_v15  ;;  %v12164_v41 = vpop.f32.mrb[209].mxu0 }
 0x45a   : > { %v12165_v9 = vadd.f32 %v12164_v41, %v12163_v11  ;;  %v12166_v37 = vpop.f32.mrb[210].mxu0  ;;  %v11328_v11 = vrot.slane %v8768_v38, 9  ;;  %v8908_v36 = vsel %vm13342_vm14, %v11327_v58, %v8907_v45  ;;  %v8777_v38 = vld [vmem:[#allocation2 + $0xcc] sm:$0xe] }
 0x45b   : > { %v12051_v35 = vpop.f32.mrb[176].mxu1  ;;  %v12167_v47 = vpop.f32.mrb[211].mxu0  ;;  %v11343_v51 = vcombine.low %v8908_v36, %v8911_v2  ;;  %v11331_v36 = vrot.slane %v8777_v38, 9 }
 0x45c   : > { %v12052_v12 = vpop.f32.mrb[177].mxu1  ;;  %v12168_v32 = vadd.f32 %v12167_v47, %v12166_v37  ;;  %v8773_v47 = vld [vmem:[#allocation2 + $0xbc] sm:$0x1] }
 0x45d   : > { %v12053_v6 = vadd.f32 %v12052_v12, %v12051_v35  ;;  %v12054_v44 = vpop.f32.mrb[178].mxu1  ;;  %v8915_v35 = vsel %vm13342_vm14, %v11328_v11, %v8914_v30  ;;  %v8924_v45 = vrot.slane %v8773_v47, 5 }
 0x45e   : > { %12516 = vmatmul.mubr.bf16.gmra.mrb[16].mxu1 %v11341_v21  ;;  %v12055_v33 = vpop.f32.mrb[179].mxu1  ;;  %v8778_v21 = vld [vmem:[#allocation2 + $0xd0] sm:$0xf]  ;;  %v11344_v12 = vcombine.low %v8915_v35, %v8918_v61 }
 0x45f   : > { %12519 = vmatprep.mubr.bf16.mxu1 %v11342_v57  ;;  %v15905_v27 = vadd.f32 %v12165_v9, %v12053_v6  ;;  %v12056_v34 = vadd.f32 %v12055_v33, %v12054_v44  ;;  %v8776_v57 = vld [vmem:[#allocation2 + $0xc8] sm:$0x1]  ;;  %v8771_v6 = vld [vmem:[#allocation2 + $0xb4] sm:$0xe]  ;;  %v8930_v44 = vrot.slane %v8928_v46, 4  ;;  %v8935_v25 = vrot.slane %v8778_v21, 5 }
 0x460   : > { %v12169_v43 = vpop.f32.mrb[212].mxu0  ;;  %v8931_v26 = vrot.slane %v8776_v57, 5  ;;  %v11329_v10 = vrot.slane %v8771_v6, 9 }
 0x461   : > { %v15909_v15 = vadd.f32 %v12168_v32, %v12056_v34  ;;  %v12170_v62 = vpop.f32.mrb[213].mxu0  ;;  %v8923_v32 = vrot.slane %v8921_v42, 4 }
 0x462   : > { %v12171_v41 = vadd.f32 %v12170_v62, %v12169_v43  ;;  %v12172_v3 = vpop.f32.mrb[214].mxu0  ;;  %v11330_v62 = vrot.slane %v8774_v7, 9  ;;  %v8932_v11 = vsel %vm13342_vm14, %v8930_v44, %v8931_v26 }
 0x463   : > { %v12057_v9 = vpop.f32.mrb[180].mxu1  ;;  %v12173_v37 = vpop.f32.mrb[215].mxu0  ;;  %v8925_v43 = vsel %vm13342_vm14, %v8923_v32, %v8924_v45 }
 0x464   : > { %v12058_v48 = vpop.f32.mrb[181].mxu1  ;;  %v12174_v13 = vadd.f32 %v12173_v37, %v12172_v3  ;;  %v8938_v37 = vrot.slane %v8779_v31, 5  ;;  %v8929_v21 = vsel %vm13342_vm14, %v11330_v62, %v8928_v46 }
 0x465   : > { %v12059_v52 = vadd.f32 %v12058_v48, %v12057_v9  ;;  %v12060_v22 = vpop.f32.mrb[182].mxu1  ;;  %v8937_v9 = vrot.slane %v8935_v25, 4 }
 0x466   : > { %12520 = vmatmul.mubr.bf16.gmra.mrb[20].mxu1 %v11343_v51  ;;  %v12061_v39 = vpop.f32.mrb[183].mxu1 }
 0x467   : > { %12523 = vmatprep.mubr.bf16.mxu1 %v11344_v12  ;;  %v15917_v33 = vadd.f32 %v12171_v41, %v12059_v52  ;;  %v12062_v30 = vadd.f32 %v12061_v39, %v12060_v22  ;;  %v8922_v41 = vsel %vm13342_vm14, %v11329_v10, %v8921_v42  ;;  %v11346_v12 = vcombine.low %v8929_v21, %v8932_v11 }
 0x468   : > { %v12175_v34 = vpop.f32.mrb[216].mxu0  ;;  %v11345_v47 = vcombine.low %v8922_v41, %v8925_v43  ;;  %v8936_v42 = vsel %vm13342_vm14, %v11331_v36, %v8935_v25  ;;  %v8939_v22 = vsel %vm13342_vm14, %v8937_v9, %v8938_v37 }
 0x469   : > { %v15921_v58 = vadd.f32 %v12174_v13, %v12062_v30  ;;  %v12176_v2 = vpop.f32.mrb[217].mxu0  ;;  %v11347_v7 = vcombine.low %v8936_v42, %v8939_v22 }
 0x46a   : > { %v12177_v61 = vadd.f32 %v12176_v2, %v12175_v34  ;;  %v12178_v3 = vpop.f32.mrb[218].mxu0 }
 0x46b   : > { %v12063_v51 = vpop.f32.mrb[184].mxu1  ;;  %v12179_v35 = vpop.f32.mrb[219].mxu0 }
 0x46c   : > { %v12064_v48 = vpop.f32.mrb[185].mxu1  ;;  %v12180_v13 = vadd.f32 %v12179_v35, %v12178_v3 }
 0x46d   : > { %v12065_v32 = vadd.f32 %v12064_v48, %v12063_v51  ;;  %v12066_v57 = vpop.f32.mrb[186].mxu1 }
 0x46e   : > { %12524 = vmatmul.mubr.bf16.gmra.mrb[24].mxu1 %v11345_v47  ;;  %v12067_v52 = vpop.f32.mrb[187].mxu1 }
 0x46f   : > { %12527 = vmatprep.mubr.bf16.mxu1 %v11346_v12  ;;  %v15933_v6 = vadd.f32 %v12177_v61, %v12065_v32  ;;  %v12068_v44 = vadd.f32 %v12067_v52, %v12066_v57 }
 0x470   : > { %v12181_v39 = vpop.f32.mrb[220].mxu0 }
 0x471   : > { %v15935_v45 = vadd.f32 %v12180_v13, %v12068_v44  ;;  %v12182_v46 = vpop.f32.mrb[221].mxu0 }
 0x472   : > { %v12183_v30 = vadd.f32 %v12182_v46, %v12181_v39  ;;  %v12184_v26 = vpop.f32.mrb[222].mxu0 }
 0x473   : > { %v12069_v38 = vpop.f32.mrb[188].mxu1  ;;  %v12185_v31 = vpop.f32.mrb[223].mxu0 }
 0x474   : > { %v12070_v34 = vpop.f32.mrb[189].mxu1  ;;  %v12186_v10 = vadd.f32 %v12185_v31, %v12184_v26 }
 0x475   : > { %v12071_v43 = vadd.f32 %v12070_v34, %v12069_v38  ;;  %v12072_v2 = vpop.f32.mrb[190].mxu1 }
 0x476   : > { %12528 = vmatmul.mubr.bf16.gmra.mrb[28].mxu1 %v11347_v7  ;;  %v12073_v25 = vpop.f32.mrb[191].mxu1 }
 0x477   : > { %v15937_v1 = vadd.f32 %v12183_v30, %v12071_v43  ;;  %v12074_v62 = vadd.f32 %v12073_v25, %v12072_v2 }
 0x478   : > { %v12315_v11 = vpop.f32.mrb[224].mxu0 }
 0x479   : > { %v15939_v61 = vadd.f32 %v12186_v10, %v12074_v62  ;;  %v12316_v3 = vpop.f32.mrb[225].mxu0 }
 0x47a   : > { %v12317_v41 = vadd.f32 %v12316_v3, %v12315_v11  ;;  %v12318_v36 = vpop.f32.mrb[226].mxu0 }
 0x47b   : > { %v12203_v9 = vpop.f32.mrb[192].mxu1  ;;  %v12319_v37 = vpop.f32.mrb[227].mxu0 }
 0x47c   : > { %v12204_v51 = vpop.f32.mrb[193].mxu1  ;;  %v12320_v35 = vadd.f32 %v12319_v37, %v12318_v36 }
 0x47d   : > { %v12205_v47 = vadd.f32 %v12204_v51, %v12203_v9  ;;  %v12206_v21 = vpop.f32.mrb[194].mxu1 }
 0x47e   : > { %v12207_v48 = vpop.f32.mrb[195].mxu1 }
 0x47f   : > { %v10097_v13 = vadd.f32 %v12205_v47, %v15632_v29  ;;  %v12208_v12 = vadd.f32 %v12207_v48, %v12206_v21 }
 0x480   : > { %v12321_v32 = vpop.f32.mrb[228].mxu0 }
 0x481   : > { %v10100_v57 = vadd.f32 %v12208_v12, %v15642_v19  ;;  %v12322_v52 = vpop.f32.mrb[229].mxu0 }
 0x482   : > { %v12323_v42 = vadd.f32 %v12322_v52, %v12321_v32  ;;  %v12324_v22 = vpop.f32.mrb[230].mxu0 }
 0x483   : > { %v12209_v44 = vpop.f32.mrb[196].mxu1  ;;  %v12325_v39 = vpop.f32.mrb[231].mxu0 }
 0x484   : > { %v12210_v46 = vpop.f32.mrb[197].mxu1  ;;  %v12326_v7 = vadd.f32 %v12325_v39, %v12324_v22 }
 0x485   : > { %v12211_v30 = vadd.f32 %v12210_v46, %v12209_v44  ;;  %v12212_v26 = vpop.f32.mrb[198].mxu1 }
 0x486   : > { %v12213_v38 = vpop.f32.mrb[199].mxu1 }
 0x487   : > { %v10105_v31 = vadd.f32 %v12211_v30, %v15668_v20  ;;  %v12214_v34 = vadd.f32 %v12213_v38, %v12212_v26  ;;  %v15949_v38 = vadd.f32 %v12317_v41, %v10097_v13 }
 0x488   : > { %v12327_v10 = vpop.f32.mrb[232].mxu0 }
 0x489   : > { %v10108_v29 = vadd.f32 %v12214_v34, %v15676_v18  ;;  %v12328_v43 = vpop.f32.mrb[233].mxu0  ;;  %v15947_v12 = vadd.f32 %v12323_v42, %v10105_v31 }
 0x48a   : > { %v12329_v2 = vadd.f32 %v12328_v43, %v12327_v10  ;;  %v12330_v25 = vpop.f32.mrb[234].mxu0  ;;  %v15954_v43 = vadd.f32 %v12320_v35, %v10100_v57 }
 0x48b   : > { %v12215_v19 = vpop.f32.mrb[200].mxu1  ;;  %v12331_v62 = vpop.f32.mrb[235].mxu0  ;;  %v15952_v10 = vadd.f32 %v12326_v7, %v10108_v29 }
 0x48c   : > { %v12216_v11 = vpop.f32.mrb[201].mxu1  ;;  %v12332_v3 = vadd.f32 %v12331_v62, %v12330_v25 }
 0x48d   : > { %v12217_v36 = vadd.f32 %v12216_v11, %v12215_v19  ;;  %v12218_v9 = vpop.f32.mrb[202].mxu1 }
 0x48e   : > { %v12219_v37 = vpop.f32.mrb[203].mxu1 }
 0x48f   : > { %v10113_v51 = vadd.f32 %v12217_v36, %v15698_v50  ;;  %v12220_v47 = vadd.f32 %v12219_v37, %v12218_v9 }
 0x490   : > { %v12333_v21 = vpop.f32.mrb[236].mxu0 }
 0x491   : > { %v10116_v20 = vadd.f32 %v12220_v47, %v15706_v53  ;;  %v12334_v48 = vpop.f32.mrb[237].mxu0  ;;  %v15959_v47 = vadd.f32 %v12329_v2, %v10113_v51 }
 0x492   : > { %v12335_v18 = vadd.f32 %v12334_v48, %v12333_v21  ;;  %v12336_v32 = vpop.f32.mrb[238].mxu0 }
 0x493   : > { %v12221_v52 = vpop.f32.mrb[204].mxu1  ;;  %v12337_v22 = vpop.f32.mrb[239].mxu0  ;;  %v15964_v29 = vadd.f32 %v12332_v3, %v10116_v20 }
 0x494   : > { %v12222_v44 = vpop.f32.mrb[205].mxu1  ;;  %v12338_v39 = vadd.f32 %v12337_v22, %v12336_v32 }
 0x495   : > { %v12223_v46 = vadd.f32 %v12222_v44, %v12221_v52  ;;  %v12224_v30 = vpop.f32.mrb[206].mxu1 }
 0x496   : > { %v12225_v26 = vpop.f32.mrb[207].mxu1 }
 0x497   : > { %v10121_v50 = vadd.f32 %v12223_v46, %v15744_v17  ;;  %v12226_v34 = vadd.f32 %v12225_v26, %v12224_v30 }
 0x498   : > { %v12339_v53 = vpop.f32.mrb[240].mxu0 }
 0x499   : > { %v10124_v42 = vadd.f32 %v12226_v34, %v15750_v59  ;;  %v12340_v31 = vpop.f32.mrb[241].mxu0  ;;  %v15957_v25 = vadd.f32 %v12335_v18, %v10121_v50 }
 0x49a   : > { %v12341_v19 = vadd.f32 %v12340_v31, %v12339_v53  ;;  %v12342_v62 = vpop.f32.mrb[242].mxu0 }
 0x49b   : > { %v12227_v11 = vpop.f32.mrb[208].mxu1  ;;  %v12343_v36 = vpop.f32.mrb[243].mxu0  ;;  %v15962_v57 = vadd.f32 %v12338_v39, %v10124_v42 }
 0x49c   : > { %v12228_v9 = vpop.f32.mrb[209].mxu1  ;;  %v12344_v41 = vadd.f32 %v12343_v36, %v12342_v62 }
 0x49d   : > { %v12229_v13 = vadd.f32 %v12228_v9, %v12227_v11  ;;  %v12230_v37 = vpop.f32.mrb[210].mxu1 }
 0x49e   : > { %v12231_v17 = vpop.f32.mrb[211].mxu1 }
 0x49f   : > { %v10129_v7 = vadd.f32 %v12229_v13, %v15774_v55  ;;  %v12232_v35 = vadd.f32 %v12231_v17, %v12230_v37 }
 0x4a0   : > { %v12345_v59 = vpop.f32.mrb[244].mxu0 }
 0x4a1   : > { %v10132_v21 = vadd.f32 %v12232_v35, %v15780_v14  ;;  %v12346_v48 = vpop.f32.mrb[245].mxu0  ;;  %v15967_v26 = vadd.f32 %v12341_v19, %v10129_v7 }
 0x4a2   : > { %v12347_v18 = vadd.f32 %v12346_v48, %v12345_v59  ;;  %v12348_v32 = vpop.f32.mrb[246].mxu0 }
 0x4a3   : > { %v12233_v52 = vpop.f32.mrb[212].mxu1  ;;  %v12349_v22 = vpop.f32.mrb[247].mxu0  ;;  %v15970_v3 = vadd.f32 %v12344_v41, %v10132_v21 }
 0x4a4   : > { %v12234_v44 = vpop.f32.mrb[213].mxu1  ;;  %v12350_v46 = vadd.f32 %v12349_v22, %v12348_v32 }
 0x4a5   : > { %v12235_v30 = vadd.f32 %v12234_v44, %v12233_v52  ;;  %v12236_v2 = vpop.f32.mrb[214].mxu1 }
 0x4a6   : > { %v12237_v51 = vpop.f32.mrb[215].mxu1 }
 0x4a7   : > { %v10137_v55 = vadd.f32 %v12235_v30, %v15820_v49  ;;  %v12238_v39 = vadd.f32 %v12237_v51, %v12236_v2 }
 0x4a8   : > { %v12351_v50 = vpop.f32.mrb[248].mxu0 }
 0x4a9   : > { %v10140_v14 = vadd.f32 %v12238_v39, %v15826_v0  ;;  %v12352_v20 = vpop.f32.mrb[249].mxu0  ;;  %v15973_v34 = vadd.f32 %v12347_v18, %v10137_v55 }
 0x4aa   : > { %v12353_v53 = vadd.f32 %v12352_v20, %v12351_v50  ;;  %v12354_v42 = vpop.f32.mrb[250].mxu0 }
 0x4ab   : > { %v12239_v31 = vpop.f32.mrb[216].mxu1  ;;  %v12355_v62 = vpop.f32.mrb[251].mxu0  ;;  %v15975_v11 = vadd.f32 %v12350_v46, %v10140_v14 }
 0x4ac   : > { %v12240_v36 = vpop.f32.mrb[217].mxu1  ;;  %v12356_v19 = vadd.f32 %v12355_v62, %v12354_v42 }
 0x4ad   : > { %v12241_v9 = vadd.f32 %v12240_v36, %v12239_v31  ;;  %v12242_v13 = vpop.f32.mrb[218].mxu1 }
 0x4ae   : > { %v12243_v49 = vpop.f32.mrb[219].mxu1 }
 0x4af   : > { %v10145_v37 = vadd.f32 %v12241_v9, %v15842_v16  ;;  %v12244_v41 = vadd.f32 %v12243_v49, %v12242_v13 }
 0x4b0   : > { %v12357_v17 = vpop.f32.mrb[252].mxu0 }
 0x4b1   : > { %v10148_v0 = vadd.f32 %v12244_v41, %v15848_v54  ;;  %v12358_v7 = vpop.f32.mrb[253].mxu0  ;;  %v15979_v35 = vadd.f32 %v12353_v53, %v10145_v37 }
 0x4b2   : > { %v12359_v59 = vadd.f32 %v12358_v7, %v12357_v17  ;;  %v12360_v21 = vpop.f32.mrb[254].mxu0 }
 0x4b3   : > { %v12245_v48 = vpop.f32.mrb[220].mxu1  ;;  %v12361_v18 = vpop.f32.mrb[255].mxu0  ;;  %v15981_v32 = vadd.f32 %v12356_v19, %v10148_v0 }
 0x4b4   : > { %v12246_v52 = vpop.f32.mrb[221].mxu1  ;;  %v12362_v22 = vadd.f32 %v12361_v18, %v12360_v21 }
 0x4b5   : > { %v12247_v44 = vadd.f32 %v12246_v52, %v12245_v48  ;;  %v12248_v46 = vpop.f32.mrb[222].mxu1 }
 0x4b6   : > { %v12249_v30 = vpop.f32.mrb[223].mxu1 }
 0x4b7   : > { %v10153_v16 = vadd.f32 %v12247_v44, %v15853_v40  ;;  %v12250_v2 = vadd.f32 %v12249_v30, %v12248_v46 }
 0x4b8   : > { %v12363_v51 = vpop.f32.mrb[0].mxu0 }
 0x4b9   : > { %v10156_v54 = vadd.f32 %v12250_v2, %v15855_v63  ;;  %v12364_v55 = vpop.f32.mrb[1].mxu0  ;;  %v15985_v39 = vadd.f32 %v12359_v59, %v10153_v16 }
 0x4ba   : > { %v12365_v50 = vadd.f32 %v12364_v55, %v12363_v51  ;;  %v12366_v14 = vpop.f32.mrb[2].mxu0 }
 0x4bb   : > { %v12367_v20 = vpop.f32.mrb[3].mxu0  ;;  %v15987_v53 = vadd.f32 %v12362_v22, %v10156_v54 }
 0x4bc   : > { %v12368_v31 = vadd.f32 %v12367_v20, %v12366_v14 }
 0x4bd   : > { %v12251_v42 = vpop.f32.mrb[224].mxu1 }
 0x4be   : > { %v12252_v62 = vpop.f32.mrb[225].mxu1 }
 0x4bf   : > { %v12253_v36 = vadd.f32 %v12252_v62, %v12251_v42  ;;  %v12254_v19 = vpop.f32.mrb[226].mxu1 }
 0x4c0   : > { %v12255_v9 = vpop.f32.mrb[227].mxu1 }
 0x4c1   : > { %v10161_v40 = vadd.f32 %v12253_v36, %v15865_v5  ;;  %v12256_v13 = vadd.f32 %v12255_v9, %v12254_v19  ;;  %v12369_v49 = vpop.f32.mrb[4].mxu0 }
 0x4c2   : > { %v12370_v37 = vpop.f32.mrb[5].mxu0 }
 0x4c3   : > { %v10164_v63 = vadd.f32 %v12256_v13, %v15867_v8  ;;  %v15991_v41 = vadd.f32 %v12365_v50, %v10161_v40  ;;  %v12371_v17 = vadd.f32 %v12370_v37, %v12369_v49  ;;  %v12372_v0 = vpop.f32.mrb[6].mxu0 }
 0x4c4   : > { %v12373_v7 = vpop.f32.mrb[7].mxu0 }
 0x4c5   : > { %v15993_v59 = vadd.f32 %v12368_v31, %v10164_v63  ;;  %v12374_v21 = vadd.f32 %v12373_v7, %v12372_v0 }
 0x4c7   : > { %v12257_v48 = vpop.f32.mrb[228].mxu1 }
 0x4c8   : > { %v12258_v18 = vpop.f32.mrb[229].mxu1 }
 0x4c9   : > { %v12259_v52 = vadd.f32 %v12258_v18, %v12257_v48  ;;  %v12260_v22 = vpop.f32.mrb[230].mxu1 }
 0x4ca   : > { %v12261_v44 = vpop.f32.mrb[231].mxu1 }
 0x4cb   : > { %v10169_v5 = vadd.f32 %v12259_v52, %v15871_v60  ;;  %v12262_v46 = vadd.f32 %v12261_v44, %v12260_v22 }
 0x4cc   : > { %v12375_v30 = vpop.f32.mrb[8].mxu0 }
 0x4cd   : > { %v12376_v16 = vpop.f32.mrb[9].mxu0  ;;  %v10172_v8 = vadd.f32 %v12262_v46, %v15873_v28  ;;  %v15997_v54 = vadd.f32 %v12371_v17, %v10169_v5 }
 0x4ce   : > { %v12377_v2 = vadd.f32 %v12376_v16, %v12375_v30  ;;  %v12378_v51 = vpop.f32.mrb[10].mxu0 }
 0x4cf   : > { %v12379_v55 = vpop.f32.mrb[11].mxu0  ;;  %v15999_v14 = vadd.f32 %v12374_v21, %v10172_v8 }
 0x4d0   : > { %v12380_v50 = vadd.f32 %v12379_v55, %v12378_v51 }
 0x4d1   : > { %v12263_v20 = vpop.f32.mrb[232].mxu1 }
 0x4d2   : > { %v12264_v42 = vpop.f32.mrb[233].mxu1 }
 0x4d3   : > { %v12265_v31 = vadd.f32 %v12264_v42, %v12263_v20  ;;  %v12266_v62 = vpop.f32.mrb[234].mxu1 }
 0x4d4   : > { %v12267_v36 = vpop.f32.mrb[235].mxu1 }
 0x4d5   : > { %v10177_v60 = vadd.f32 %v12265_v31, %v15881_v23  ;;  %v12268_v19 = vadd.f32 %v12267_v36, %v12266_v62 }
 0x4d6   : > { %v12381_v9 = vpop.f32.mrb[12].mxu0 }
 0x4d7   : > { %v10180_v40 = vadd.f32 %v12268_v19, %v15885_v24  ;;  %v12382_v28 = vpop.f32.mrb[13].mxu0  ;;  %v16003_v13 = vadd.f32 %v12377_v2, %v10177_v60 }
 0x4d8   : > { %v12383_v49 = vadd.f32 %v12382_v28, %v12381_v9  ;;  %v12384_v63 = vpop.f32.mrb[14].mxu0 }
 0x4d9   : > { %v12385_v37 = vpop.f32.mrb[15].mxu0  ;;  %v16005_v17 = vadd.f32 %v12380_v50, %v10180_v40 }
 0x4da   : > { %v12386_v0 = vadd.f32 %v12385_v37, %v12384_v63 }
 0x4de   : > { %v12269_v7 = vpop.f32.mrb[236].mxu1 }
 0x4df   : > { %v12270_v21 = vpop.f32.mrb[237].mxu1 }
 0x4e0   : > { %v12271_v48 = vadd.f32 %v12270_v21, %v12269_v7  ;;  %v12272_v18 = vpop.f32.mrb[238].mxu1 }
 0x4e1   : > { %v12273_v52 = vpop.f32.mrb[239].mxu1  ;;  %v12387_v22 = vpop.f32.mrb[16].mxu0 }
 0x4e2   : > { %v10185_v23 = vadd.f32 %v12271_v48, %v15893_v4  ;;  %v12274_v44 = vadd.f32 %v12273_v52, %v12272_v18  ;;  %v12388_v5 = vpop.f32.mrb[17].mxu0 }
 0x4e3   : > { %v12389_v24 = vadd.f32 %v12388_v5, %v12387_v22  ;;  %v12390_v46 = vpop.f32.mrb[18].mxu0 }
 0x4e4   : > { %v10188_v30 = vadd.f32 %v12274_v44, %v15897_v56  ;;  %v12391_v16 = vpop.f32.mrb[19].mxu0  ;;  %v16009_v8 = vadd.f32 %v12383_v49, %v10185_v23 }
 0x4e5   : > { %v12392_v2 = vadd.f32 %v12391_v16, %v12390_v46 }
 0x4e6   : > { %v16011_v51 = vadd.f32 %v12386_v0, %v10188_v30 }
 0x4ea   : > { %v12275_v55 = vpop.f32.mrb[240].mxu1 }
 0x4eb   : > { %v12276_v50 = vpop.f32.mrb[241].mxu1 }
 0x4ec   : > { %v12277_v20 = vadd.f32 %v12276_v50, %v12275_v55  ;;  %v12278_v42 = vpop.f32.mrb[242].mxu1 }
 0x4ed   : > { %v12279_v31 = vpop.f32.mrb[243].mxu1  ;;  %v12393_v36 = vpop.f32.mrb[20].mxu0 }
 0x4ee   : > { %v10193_v62 = vadd.f32 %v12277_v20, %v15905_v27  ;;  %v12280_v4 = vadd.f32 %v12279_v31, %v12278_v42  ;;  %v12394_v60 = vpop.f32.mrb[21].mxu0 }
 0x4ef   : > { %v12395_v9 = vadd.f32 %v12394_v60, %v12393_v36  ;;  %v12396_v56 = vpop.f32.mrb[22].mxu0 }
 0x4f0   : > { %v10196_v19 = vadd.f32 %v12280_v4, %v15909_v15  ;;  %v16015_v40 = vadd.f32 %v12389_v24, %v10193_v62  ;;  %v12397_v28 = vpop.f32.mrb[23].mxu0 }
 0x4f1   : > { %v12398_v49 = vadd.f32 %v12397_v28, %v12396_v56 }
 0x4f2   : > { %v16017_v63 = vadd.f32 %v12392_v2, %v10196_v19 }
 0x4f5   : > { %v12281_v37 = vpop.f32.mrb[244].mxu1 }
 0x4f6   : > { %v12282_v0 = vpop.f32.mrb[245].mxu1 }
 0x4f7   : > { %v12283_v7 = vadd.f32 %v12282_v0, %v12281_v37  ;;  %v12284_v21 = vpop.f32.mrb[246].mxu1 }
 0x4f8   : > { %v12285_v48 = vpop.f32.mrb[247].mxu1 }
 0x4f9   : > { %v10201_v27 = vadd.f32 %v12283_v7, %v15917_v33  ;;  %v12286_v18 = vadd.f32 %v12285_v48, %v12284_v21  ;;  %v12399_v52 = vpop.f32.mrb[24].mxu0 }
 0x4fa   : > { %v12400_v22 = vpop.f32.mrb[25].mxu0 }
 0x4fb   : > { %v10204_v15 = vadd.f32 %v12286_v18, %v15921_v58  ;;  %v12401_v23 = vadd.f32 %v12400_v22, %v12399_v52  ;;  %v12402_v44 = vpop.f32.mrb[26].mxu0  ;;  %v16021_v5 = vadd.f32 %v12395_v9, %v10201_v27  ;;  %v10611_v27 = vld [vmem:[%s13239_s21 + $0x10] sm:$0xff] }
 0x4fc   : > { %v12403_v24 = vpop.f32.mrb[27].mxu0 }
 0x4fd   : > { %v12404_v46 = vadd.f32 %v12403_v24, %v12402_v44  ;;  %v16023_v30 = vadd.f32 %v12398_v49, %v10204_v15  ;;  %v10612_v44 = vld [vmem:[%s13239_s21 + $0x18] sm:$0xff] }
 0x501   : > { %v12287_v16 = vpop.f32.mrb[248].mxu1 }
 0x502   : > { %v12288_v2 = vpop.f32.mrb[249].mxu1 }
 0x503   : > { %v12289_v55 = vadd.f32 %v12288_v2, %v12287_v16  ;;  %v12290_v50 = vpop.f32.mrb[250].mxu1  ;;  %v10610_v2 = vld [vmem:[%s13239_s21 + $0x8] sm:$0xff] }
 0x504   : > { %v12291_v20 = vpop.f32.mrb[251].mxu1 }
 0x505   : > { %v10209_v33 = vadd.f32 %v12289_v55, %v15933_v6  ;;  %v12292_v42 = vadd.f32 %v12291_v20, %v12290_v50  ;;  %v10615_v20 = vld [vmem:[%s13239_s21 + $0x30] sm:$0xff] }
 0x507   : > { %v10212_v31 = vadd.f32 %v12292_v42, %v15935_v45  ;;  %v16027_v62 = vadd.f32 %v12401_v23, %v10209_v33  ;;  %v10613_v42 = vld [vmem:[%s13239_s21 + $0x20] sm:$0xff] }
 0x509   : > { %v12293_v58 = vpop.f32.mrb[252].mxu1  ;;  %v16029_v4 = vadd.f32 %v12404_v46, %v10212_v31 }
 0x50a   : > { %v12294_v36 = vpop.f32.mrb[253].mxu1 }
 0x50b   : > { %v12295_v60 = vadd.f32 %v12294_v36, %v12293_v58  ;;  %v12296_v19 = vpop.f32.mrb[254].mxu1  ;;  %v10616_v36 = vld [vmem:[%s13239_s21 + $0x38] sm:$0xff] }
 0x50c   : > { %v12297_v9 = vpop.f32.mrb[255].mxu1 }
 0x50d   : > { %v10217_v56 = vadd.f32 %v12295_v60, %v15937_v1  ;;  %v12405_v28 = vpop.f32.mrb[28].mxu0  ;;  %v12298_v49 = vadd.f32 %v12297_v9, %v12296_v19  ;;  %v10609_v1 = vld [vmem:[%s13239_s21] sm:$0xff] }
 0x50e   : > { %v12406_v6 = vpop.f32.mrb[29].mxu0 }
 0x50f   : > { %v10220_v37 = vadd.f32 %v12298_v49, %v15939_v61  ;;  %v12407_v45 = vadd.f32 %v12406_v6, %v12405_v28  ;;  %v12408_v0 = vpop.f32.mrb[30].mxu0 }
 0x510   : > { %v12409_v7 = vpop.f32.mrb[31].mxu0 }
 0x511   : > { %v12410_v21 = vadd.f32 %v12409_v7, %v12408_v0  ;;  %v12501_v48 = vpop.f32.mrb[0].mxu1  ;;  %v16034_v18 = vadd.f32 %v12407_v45, %v10217_v56  ;;  %v10614_v56 = vld [vmem:[%s13239_s21 + $0x28] sm:$0xff]  ;;  %v10617_v0 = vld [vmem:[%s13239_s21 + $0x40] sm:$0xff] }
 0x512   : > { %v10427_v52 = vadd.f32 %v12501_v48, %v15947_v12  ;;  %v10418_v22 = vpop.f32.mrb[1].mxu1 }
 0x513   : > { %v10419_v15 = vadd.f32 %v10418_v22, %v15949_v38  ;;  %v12502_v23 = vpop.f32.mrb[2].mxu1  ;;  %v16040_v61 = vadd.f32 %v12410_v21, %v10220_v37  ;;  %v10619_v37 = vld [vmem:[%s13239_s21 + $0x50] sm:$0xff]  ;;  %v10620_v21 = vld [vmem:[%s13239_s21 + $0x58] sm:$0xff]  ;;  %v10618_v22 = vld [vmem:[%s13239_s21 + $0x48] sm:$0xff] }
 0x514   : > { %v10643_v24 = vadd.f32 %v10611_v27, %v10427_v52  ;;  %v10430_v46 = vadd.f32 %v12502_v23, %v15952_v10  ;;  %v10421_v16 = vpop.f32.mrb[3].mxu1 }
 0x515   : > { %v10641_v55 = vadd.f32 %v10609_v1, %v10419_v15  ;;  %v10422_v50 = vadd.f32 %v10421_v16, %v15954_v43 }
 0x516   : > { %10675 = vst [vmem:[%s16047_s14 + $0x10] sm:$0xff] %v10643_v24  ;;  %v10644_v12 = vadd.f32 %v10612_v44, %v10430_v46  ;;  %v10623_v44 = vld [vmem:[%s13239_s21 + $0x70] sm:$0xff]  ;;  %v10621_v46 = vld [vmem:[%s13239_s21 + $0x60] sm:$0xff] }
 0x517   : > { %10673 = vst [vmem:[%s16047_s14] sm:$0xff] %v10641_v55  ;;  %v10642_v38 = vadd.f32 %v10610_v2, %v10422_v50  ;;  %v10624_v2 = vld [vmem:[%s13239_s21 + $0x78] sm:$0xff] }
 0x518   : > { %10676 = vst [vmem:[%s16047_s14 + $0x18] sm:$0xff] %v10644_v12 }
 0x519   : > { %10674 = vst [vmem:[%s16047_s14 + $0x8] sm:$0xff] %v10642_v38  ;;  %v12505_v10 = vpop.f32.mrb[4].mxu1  ;;  %v10622_v38 = vld [vmem:[%s13239_s21 + $0x68] sm:$0xff] }
 0x51a   : > { %v10443_v43 = vadd.f32 %v12505_v10, %v15957_v25  ;;  %v10434_v33 = vpop.f32.mrb[5].mxu1 }
 0x51b   : > { %v10435_v31 = vadd.f32 %v10434_v33, %v15959_v47  ;;  %v12506_v58 = vpop.f32.mrb[6].mxu1  ;;  %v10627_v33 = vld [vmem:[%s13239_s21 + $0x90] sm:$0xff] }
 0x51c   : > { %v10647_v60 = vadd.f32 %v10615_v20, %v10443_v43  ;;  %v10446_v19 = vadd.f32 %v12506_v58, %v15962_v57  ;;  %v10437_v9 = vpop.f32.mrb[7].mxu1 }
 0x51d   : > { %v10645_v28 = vadd.f32 %v10613_v42, %v10435_v31  ;;  %v10438_v49 = vadd.f32 %v10437_v9, %v15964_v29  ;;  %v10625_v31 = vld [vmem:[%s13239_s21 + $0x80] sm:$0xff] }
 0x51e   : > { %10679 = vst [vmem:[%s16047_s14 + $0x30] sm:$0xff] %v10647_v60  ;;  %v10648_v25 = vadd.f32 %v10616_v36, %v10446_v19  ;;  %v10628_v36 = vld [vmem:[%s13239_s21 + $0x98] sm:$0xff] }
 0x51f   : > { %10677 = vst [vmem:[%s16047_s14 + $0x20] sm:$0xff] %v10645_v28  ;;  %v10646_v6 = vadd.f32 %v10614_v56, %v10438_v49  ;;  %v10626_v56 = vld [vmem:[%s13239_s21 + $0x88] sm:$0xff] }
 0x520   : > { %10680 = vst [vmem:[%s16047_s14 + $0x38] sm:$0xff] %v10648_v25 }
 0x521   : > { %10678 = vst [vmem:[%s16047_s14 + $0x28] sm:$0xff] %v10646_v6  ;;  %v12509_v47 = vpop.f32.mrb[8].mxu1  ;;  %v10631_v6 = vld [vmem:[%s13239_s21 + $0xb0] sm:$0xff] }
 0x522   : > { %v10459_v45 = vadd.f32 %v12509_v47, %v15973_v34  ;;  %v10450_v57 = vpop.f32.mrb[9].mxu1 }
 0x523   : > { %v10451_v7 = vadd.f32 %v10450_v57, %v15967_v26  ;;  %v12510_v29 = vpop.f32.mrb[10].mxu1  ;;  %v10632_v57 = vld [vmem:[%s13239_s21 + $0xb8] sm:$0xff] }
 0x524   : > { %v10651_v48 = vadd.f32 %v10619_v37, %v10459_v45  ;;  %v10462_v27 = vadd.f32 %v12510_v29, %v15975_v11  ;;  %v10453_v52 = vpop.f32.mrb[11].mxu1  ;;  %v10629_v37 = vld [vmem:[%s13239_s21 + $0xa0] sm:$0xff] }
 0x525   : > { %v10649_v1 = vadd.f32 %v10617_v0, %v10451_v7  ;;  %v10454_v15 = vadd.f32 %v10453_v52, %v15970_v3 }
 0x526   : > { %10683 = vst [vmem:[%s16047_s14 + $0x50] sm:$0xff] %v10651_v48  ;;  %v10652_v34 = vadd.f32 %v10620_v21, %v10462_v27  ;;  %v10630_v21 = vld [vmem:[%s13239_s21 + $0xa8] sm:$0xff] }
 0x527   : > { %10681 = vst [vmem:[%s16047_s14 + $0x40] sm:$0xff] %v10649_v1  ;;  %v10650_v23 = vadd.f32 %v10618_v22, %v10454_v15  ;;  %v10635_v22 = vld [vmem:[%s13239_s21 + $0xd0] sm:$0xff]  ;;  %v10633_v15 = vld [vmem:[%s13239_s21 + $0xc0] sm:$0xff] }
 0x528   : > { %10684 = vst [vmem:[%s16047_s14 + $0x58] sm:$0xff] %v10652_v34 }
 0x529   : > { %10682 = vst [vmem:[%s16047_s14 + $0x48] sm:$0xff] %v10650_v23  ;;  %v12513_v26 = vpop.f32.mrb[12].mxu1  ;;  %v10636_v23 = vld [vmem:[%s13239_s21 + $0xd8] sm:$0xff] }
 0x52a   : > { %v10475_v24 = vadd.f32 %v12513_v26, %v15985_v39  ;;  %v10466_v11 = vpop.f32.mrb[13].mxu1 }
 0x52b   : > { %v10467_v16 = vadd.f32 %v10466_v11, %v15979_v35  ;;  %v12514_v3 = vpop.f32.mrb[14].mxu1  ;;  %v10634_v11 = vld [vmem:[%s13239_s21 + $0xc8] sm:$0xff] }
 0x52c   : > { %v10655_v55 = vadd.f32 %v10623_v44, %v10475_v24  ;;  %v10478_v50 = vadd.f32 %v12514_v3, %v15987_v53  ;;  %v10469_v12 = vpop.f32.mrb[15].mxu1 }
 0x52d   : > { %v10653_v10 = vadd.f32 %v10621_v46, %v10467_v16  ;;  %v10470_v20 = vadd.f32 %v10469_v12, %v15981_v32 }
 0x52e   : > { %10687 = vst [vmem:[%s16047_s14 + $0x70] sm:$0xff] %v10655_v55  ;;  %v10656_v39 = vadd.f32 %v10624_v2, %v10478_v50  ;;  %v10639_v2 = vld [vmem:[%s13239_s21 + $0xf0] sm:$0xff]  ;;  %v10637_v50 = vld [vmem:[%s13239_s21 + $0xe0] sm:$0xff] }
 0x52f   : > { %10685 = vst [vmem:[%s16047_s14 + $0x60] sm:$0xff] %v10653_v10  ;;  %v10654_v43 = vadd.f32 %v10622_v38, %v10470_v20 }
 0x530   : > { %10688 = vst [vmem:[%s16047_s14 + $0x78] sm:$0xff] %v10656_v39 }
 0x531   : > { %10686 = vst [vmem:[%s16047_s14 + $0x68] sm:$0xff] %v10654_v43  ;;  %v12517_v35 = vpop.f32.mrb[16].mxu1  ;;  %v10638_v43 = vld [vmem:[%s13239_s21 + $0xe8] sm:$0xff] }
 0x532   : > { %v10491_v42 = vadd.f32 %v12517_v35, %v15997_v54  ;;  %v10482_v53 = vpop.f32.mrb[17].mxu1 }
 0x533   : > { %v10483_v58 = vadd.f32 %v10482_v53, %v15991_v41  ;;  %v12518_v32 = vpop.f32.mrb[18].mxu1 }
 0x534   : > { %v10659_v60 = vadd.f32 %v10627_v33, %v10491_v42  ;;  %v10494_v19 = vadd.f32 %v12518_v32, %v15999_v14  ;;  %v10485_v9 = vpop.f32.mrb[19].mxu1 }
 0x535   : > { %v10657_v28 = vadd.f32 %v10625_v31, %v10483_v58  ;;  %v10486_v49 = vadd.f32 %v10485_v9, %v15993_v59 }
 0x536   : > { %10691 = vst [vmem:[%s16047_s14 + $0x90] sm:$0xff] %v10659_v60  ;;  %v10660_v54 = vadd.f32 %v10628_v36, %v10494_v19 }
 0x537   : > { %10689 = vst [vmem:[%s16047_s14 + $0x80] sm:$0xff] %v10657_v28  ;;  %v10658_v25 = vadd.f32 %v10626_v56, %v10486_v49 }
 0x538   : > { %10692 = vst [vmem:[%s16047_s14 + $0x98] sm:$0xff] %v10660_v54 }
 0x539   : > { %10690 = vst [vmem:[%s16047_s14 + $0x88] sm:$0xff] %v10658_v25  ;;  %v12521_v41 = vpop.f32.mrb[20].mxu1 }
 0x53a   : > { %v10507_v47 = vadd.f32 %v12521_v41, %v16009_v8  ;;  %v10498_v14 = vpop.f32.mrb[21].mxu1 }
 0x53b   : > { %v10499_v45 = vadd.f32 %v10498_v14, %v16003_v13  ;;  %v12522_v59 = vpop.f32.mrb[22].mxu1 }
 0x53c   : > { %v10663_v0 = vadd.f32 %v10631_v6, %v10507_v47  ;;  %v10510_v7 = vadd.f32 %v12522_v59, %v16011_v51  ;;  %v10501_v29 = vpop.f32.mrb[23].mxu1 }
 0x53d   : > { %v10661_v48 = vadd.f32 %v10629_v37, %v10499_v45  ;;  %v10502_v27 = vadd.f32 %v10501_v29, %v16005_v17 }
 0x53e   : > { %10695 = vst [vmem:[%s16047_s14 + $0xb0] sm:$0xff] %v10663_v0  ;;  %v10664_v8 = vadd.f32 %v10632_v57, %v10510_v7 }
 0x53f   : > { %10693 = vst [vmem:[%s16047_s14 + $0xa0] sm:$0xff] %v10661_v48  ;;  %v10662_v52 = vadd.f32 %v10630_v21, %v10502_v27 }
 0x540   : > { %10696 = vst [vmem:[%s16047_s14 + $0xb8] sm:$0xff] %v10664_v8 }
 0x541   : > { %10694 = vst [vmem:[%s16047_s14 + $0xa8] sm:$0xff] %v10662_v52  ;;  %v12525_v13 = vpop.f32.mrb[24].mxu1 }
 0x542   : > { %v10523_v1 = vadd.f32 %v12525_v13, %v16021_v5  ;;  %v10514_v51 = vpop.f32.mrb[25].mxu1 }
 0x543   : > { %v10515_v34 = vadd.f32 %v10514_v51, %v16015_v40  ;;  %v12526_v17 = vpop.f32.mrb[26].mxu1 }
 0x544   : > { %v10667_v26 = vadd.f32 %v10635_v22, %v10523_v1  ;;  %v10526_v44 = vadd.f32 %v12526_v17, %v16023_v30  ;;  %v10517_v24 = vpop.f32.mrb[27].mxu1 }
 0x545   : > { %v10665_v46 = vadd.f32 %v10633_v15, %v10515_v34  ;;  %v10518_v5 = vadd.f32 %v10517_v24, %v16017_v63  ;;  %v10640_v63 = vld [vmem:[%s13239_s21 + $0xf8] sm:$0xff]  ;;  %s12938_s21 = scalar_lea.vmem %s16141_s18, 4096 }
 0x546   : > { %10699 = vst [vmem:[%s16047_s14 + $0xd0] sm:$0xff] %v10667_v26  ;;  %v10668_v16 = vadd.f32 %v10636_v23, %v10526_v44  ;;  %p12939_p11 = scmp.ne.s32.totalorder %s16141_s18, %s12938_s21  ;;  %p12946_p9 = scmp.lt.s32.totalorder %s12944_s10, %s12938_s21 }
 0x547   : > { %10697 = vst [vmem:[%s16047_s14 + $0xc0] sm:$0xff] %v10665_v46  ;;  %v10666_v3 = vadd.f32 %v10634_v11, %v10518_v5 }
 0x548   : > { %10700 = vst [vmem:[%s16047_s14 + $0xd8] sm:$0xff] %v10668_v16  ;;  %p12940_p1 = pnand %p12939_p11, %p16337_p0  ;;  %p12947_p12 = por %p12946_p9, %p12945_p7 }
 0x549   : > { %10698 = vst [vmem:[%s16047_s14 + $0xc8] sm:$0xff] %v10666_v3  ;;  %v12529_v40 = vpop.f32.mrb[28].mxu1 }
 0x54a   : > { %v10539_v30 = vadd.f32 %v12529_v40, %v16034_v18  ;;  %v10530_v55 = vpop.f32.mrb[29].mxu1  ;;  %p12941_p3 = pneg %p12940_p1 }
 0x54b   : > { %v10531_v12 = vadd.f32 %v10530_v55, %v16027_v62  ;;  %v12530_v38 = vpop.f32.mrb[30].mxu1 }
 0x54c   : > { %v10671_v10 = vadd.f32 %v10639_v2, %v10539_v30  ;;  %v10542_v20 = vadd.f32 %v12530_v38, %v16040_v61  ;;  %v10533_v39 = vpop.f32.mrb[31].mxu1  ;;  %p12948_p2 = pnand %p12947_p12, %p12941_p3 }
 0x54d   : > { %v10669_v35 = vadd.f32 %v10637_v50, %v10531_v12  ;;  %v10534_v18 = vadd.f32 %v10533_v39, %v16029_v4 }
 0x54e   : > { %10703 = vst [vmem:[%s16047_s14 + $0xf0] sm:$0xff] %v10671_v10  ;;  %v10672_v33 = vadd.f32 %v10640_v63, %v10542_v20 }
 0x54f   : > { %10701 = vst [vmem:[%s16047_s14 + $0xe0] sm:$0xff] %v10669_v35  ;;  %v10670_v62 = vadd.f32 %v10638_v43, %v10534_v18 }
 0x550   : > { %10704 = vst [vmem:[%s16047_s14 + $0xf8] sm:$0xff] %v10672_v33 }
 0x551   : > { %10702 = vst [vmem:[%s16047_s14 + $0xe8] sm:$0xff] %v10670_v62 }
 0x552   : > { %12951 = shalt.err (!%p12948_p2)
}
 0x553   : > { %s12952_s15 = scalar_lea.hbm %s16139_s20, 4096  ;;  %s12956_s14 = scalar_lea.hbm %s16195_s7, 8192 }
 0x554   : > { %p12953_p13 = scmp.ne.s32.totalorder %s16139_s20, %s12952_s15  ;;  %p12957_p4 = scmp.lt.u32.totalorder %s16139_s20, %s16195_s7 }
 0x555   : > { %p12958_p5 = scmp.lt.u32.totalorder %s12956_s14, %s12952_s15  ;;  %p12960_p11 = scmp.lt.u32.totalorder %s12952_s15, %s16139_s20 }
 0x556   : > { %p12954_p6 = pnand %p12953_p13, %p16337_p0 }
 0x557   : > { %p12959_p8 = por %p12958_p5, %p12957_p4 }
 0x558   : > { %p12955_p10 = pneg %p12954_p6 }
 0x559   : > { %p12961_p1 = por %p12960_p11, %p12959_p8 }
 0x55b   : > { %p12962_p3 = pnand %p12961_p1, %p12955_p10 }
 0x55d   : > { %12965 = shalt.err (!%p12962_p3)
}
 0x55e   : > { %s13019_s9 = smov 128   ;;  %s13020_s21 = smov 8  }
 0x55f   : > { %12541 = dma.vmem_to_hbm [thread:$0]  (%p16337_p0), %s16141_s18, 4096, %s16139_s20, %s10706_s28, %s13019_s9, %s13019_s9, %s13020_s21  }
 0x560 PF: > { %s10734_s11 = sand.u32 1, %s12996_s24   ;;  %p16338_p7 = scmp.ne.s32.totalorder %s16211_s8, 0 }
 0x561   : > { %p16339_p9 = scmp.ge.s32.totalorder %s13008_s27, 2  ;;  %s10735_s22 = scalar_lea.sflag [#allocation7], %s10734_s11 }
 0x563   : > { %p12555_p12 = pnand %p16339_p9, %p16338_p7 }
 0x565   : > { %12991 = dma.done.wait (!%p12555_p12), %s10735_s22, 4096  }
 0x566   : > { %12993 = vsyncadd (!%p12555_p12), %s10735_s22, 4294963200  ;;  %p21_p2 = scmp.ge.s32.totalorder %s13171_s13, 4   ;;  %s16340_s24 = smov %s13000_s25 }
 0x567   : > { %s16341_s25 = smov %s13004_s26  ;;  %s16342_s26 = smov %s13187_s17 }
 0x568   : > { %s16343_s27 = smov %s13171_s13  ;;  %23 = sbr.rel (!%p21_p2) target bundleno = 6 (0x6), region = 104 }
 0x56f   :  { %10740 = vsyncpa [#allocation6], 1 }
 0x570   :  { %10742 = vsyncpa [#allocation6 + $0x1], 1 }
 0x571   :  { %10743 = vsyncpa [#allocation9], 1 }
 0x572   :  { %10744 = vsyncpa [#allocation7], 1 }
 0x573   :  { %10746 = vsyncpa [#allocation7 + $0x1], 1 }

</bundles_post_ra>
